<compile_context>
chip_gen: v6e
topology: v6e:2x2x1
jax: 0.10.0
libtpu: 0.0.40
codegen_flags: <defaults>
</compile_context>

<pallas_src>
import functools

import jax
import jax.numpy as jnp
from jax import lax
from jax.experimental import pallas as pl
from jax.experimental.pallas import tpu as pltpu


# ----------------------------- helpers --------------------------------------


def _round_up(n, m):
    return ((n + m - 1) // m) * m


def _pad_axis(a, axis, new_size):
    pad = new_size - a.shape[axis]
    if pad <= 0:
        return a
    widths = [(0, 0)] * a.ndim
    widths[axis] = (0, pad)
    return jnp.pad(a, widths)


def _pad_gate_rows(w, H, H_pad):
    # w: (..., 4H, K) -> (..., 4*H_pad, K), padding each [i,f,g,o] block.
    lead = w.shape[:-2]
    K = w.shape[-1]
    w4 = w.reshape(lead + (4, H, K))
    w4 = _pad_axis(w4, w4.ndim - 2, H_pad)
    return w4.reshape(lead + (4 * H_pad, K))


def _gate_matmul(a, w):
    # a: (M, D), w: (4H, D) -> (M, 4H); contract last dims (no explicit .T).
    return lax.dot_general(a, w, (((1,), (1,)), ((), ())),
                           preferred_element_type=jnp.float32)


# ------------------------------ kernel --------------------------------------


def d_vector_kernel(x_ref, w_ih0_ref, w_ihr_ref, w_hh_ref, b_ref,
                    emb_w_ref, emb_b_ref, out_ref, gih_ref, seq_ref,
                    *, num_layers, hidden, seq_len, batch_tile, unroll):
    """One batch tile of the full D_VECTOR forward, everything resident in VMEM.

    x_ref:     (T, Bt, D_in)          time-major input tile
    w_ih0_ref: (4H, D_in)             layer-0 input weights (H = padded hidden)
    w_ihr_ref: (max(L-1,1), 4H, H)    layer 1.. input weights
    w_hh_ref:  (L, 4H, H)             recurrent weights
    b_ref:     (L, 1, 4H)             b_ih + b_hh (combined), f32
    emb_w_ref: (E, H), emb_b_ref: (1, E)
    out_ref:   (Bt, E)                L2-normalized speaker embedding tile
    gih_ref:   (T*Bt, 4H) f32 scratch precomputed input projections (+ bias)
    seq_ref:   (T*Bt, H)   scratch    a layer's full output sequence
    """
    T, Bt, H = seq_len, batch_tile, hidden

    def run_layer(src2d, w_ih, w_hh, bias, write_seq):
        # Hoisted out of the recurrence: one big (T*Bt, D) x (D, 4H) matmul,
        # bias added once for all timesteps.
        gih_ref[...] = _gate_matmul(src2d, w_ih) + bias

        def step(t, carry):
            h, c = carry
            row = pl.multiple_of(t * Bt, Bt)
            gates = (gih_ref[pl.ds(row, Bt), :]
                     + _gate_matmul(h.astype(w_hh.dtype), w_hh))
            i = jax.nn.sigmoid(gates[:, 0 * H:1 * H])
            f = jax.nn.sigmoid(gates[:, 1 * H:2 * H])
            g = jnp.tanh(gates[:, 2 * H:3 * H])
            o = jax.nn.sigmoid(gates[:, 3 * H:4 * H])
            c = f * c + i * g
            h = o * jnp.tanh(c)
            if write_seq:  # static flag; last layer skips the seq store
                seq_ref[pl.ds(row, Bt), :] = h.astype(seq_ref.dtype)
            return (h, c)

        h0 = jnp.zeros((Bt, H), jnp.float32)
        c0 = jnp.zeros((Bt, H), jnp.float32)
        h_last, _ = lax.fori_loop(0, T, step, (h0, c0), unroll=unroll)
        return h_last

    # TODO(synk): for very long sequences at production sizes (v7x 64 MiB VMEM),
    # chunk T (stream x / seq via manual double-buffered DMA) instead of holding
    # the full gih/seq scratch resident.

    x2d = x_ref[...].reshape(T * Bt, x_ref.shape[-1])
    h_last = run_layer(x2d, w_ih0_ref[...], w_hh_ref[0], b_ref[0],
                       write_seq=(num_layers > 1))
    for layer in range(1, num_layers):
        h_last = run_layer(seq_ref[...], w_ihr_ref[layer - 1],
                           w_hh_ref[layer], b_ref[layer],
                           write_seq=(layer < num_layers - 1))

    # embedding = Linear(h_T); L2-normalize with rsqrt (+ eps, avoids NaN).
    emb = (_gate_matmul(h_last.astype(emb_w_ref.dtype), emb_w_ref[...])
           + emb_b_ref[...])
    inv_norm = lax.rsqrt(jnp.sum(emb * emb, axis=-1, keepdims=True) + 1e-12)
    out_ref[...] = (emb * inv_norm).astype(out_ref.dtype)


# ------------------------------ wrapper --------------------------------------


def d_vector_forward(x, params, *, param_dtype=jnp.float32, unroll=None):
    """x: (B, T, dim_input) (PyTorch batch_first layout). Returns (B, dim_emb)."""
    B, T, D_in = x.shape
    L = params["num_layers"]
    H = params["dim_cell"]
    E = params["dim_emb"]

    H_pad = _round_up(H, 128)          # lane-aligned gate slices
    E_pad = _round_up(E, 128)          # lane-dense output stores

    # Batch padding / tiling (>= 8 sublanes; grid over batch for megacore).
    if B <= 128:
        B_pad = max(8, _round_up(B, 8))
        B_tile = B_pad
    else:
        B_pad = _round_up(B, 128)
        B_tile = 128
    n_btiles = B_pad // B_tile

    if unroll is None:
        unroll = True if T <= 16 else 8

    # ---- pad & repack parameters (each [i,f,g,o] gate block padded H->H_pad).
    w_ih0 = _pad_gate_rows(params["w_ih0"], H, H_pad)                  # (4Hp, D_in)
    if L > 1:
        w_ihr = _pad_axis(_pad_gate_rows(params["w_ih_rest"], H, H_pad),
                          -1, H_pad)                                   # (L-1,4Hp,Hp)
    else:
        w_ihr = jnp.zeros((1, 4 * H_pad, H_pad), jnp.float32)
    w_hh = _pad_axis(_pad_gate_rows(params["w_hh"], H, H_pad), -1, H_pad)
    b4 = _pad_axis((params["b_ih"] + params["b_hh"]).reshape(L, 4, H),
                   -1, H_pad)
    b = b4.reshape(L, 4 * H_pad)[:, None, :].astype(jnp.float32)       # (L,1,4Hp)
    emb_w = _pad_axis(_pad_axis(params["emb_w"], 0, E_pad), 1, H_pad)  # (Ep, Hp)
    emb_b = _pad_axis(params["emb_b"], 0, E_pad)[None, :].astype(jnp.float32)

    # Weights / activations in param_dtype (bf16 halves VMEM + doubles MXU on
    # v6e/v7x); cell state and gate accumulation stay in f32 inside the kernel.
    cast = lambda a: a.astype(param_dtype)
    w_ih0, w_ihr, w_hh, emb_w = map(cast, (w_ih0, w_ihr, w_hh, emb_w))

    x_tm = jnp.transpose(x, (1, 0, 2)).astype(param_dtype)             # (T,B,D_in)
    x_tm = _pad_axis(x_tm, 1, B_pad)                                   # (T,Bp,D_in)

    # ---- VMEM budget (weights may be double-buffered; + scratch + headroom).
    itemsize = jnp.dtype(param_dtype).itemsize
    weight_bytes = sum(a.size * a.dtype.itemsize
                       for a in (w_ih0, w_ihr, w_hh, b, emb_w, emb_b))
    io_bytes = (2 * T * B_tile * D_in * itemsize) + (2 * B_tile * E_pad * 4)
    scratch_bytes = (T * B_tile * 4 * H_pad * 4) + (T * B_tile * H_pad * itemsize)
    vmem_bytes = int(2 * weight_bytes + io_bytes + scratch_bytes) + (8 << 20)
    vmem_bytes = min(max(vmem_bytes, 32 << 20), 100 << 20)

    kernel = functools.partial(
        d_vector_kernel, num_layers=L, hidden=H_pad, seq_len=T,
        batch_tile=B_tile, unroll=unroll)

    out = pl.pallas_call(
        kernel,
        out_shape=jax.ShapeDtypeStruct((B_pad, E_pad), jnp.float32),
        grid_spec=pltpu.PrefetchScalarGridSpec(
            num_scalar_prefetch=0,
            grid=(n_btiles,),
            in_specs=[
                pl.BlockSpec((T, B_tile, D_in), lambda i: (0, i, 0)),
                pl.BlockSpec(w_ih0.shape, lambda i: (0, 0)),
                pl.BlockSpec(w_ihr.shape, lambda i: (0, 0, 0)),
                pl.BlockSpec(w_hh.shape, lambda i: (0, 0, 0)),
                pl.BlockSpec(b.shape, lambda i: (0, 0, 0)),
                pl.BlockSpec(emb_w.shape, lambda i: (0, 0)),
                pl.BlockSpec(emb_b.shape, lambda i: (0, 0)),
            ],
            out_specs=pl.BlockSpec((B_tile, E_pad), lambda i: (i, 0)),
            scratch_shapes=[
                pltpu.VMEM((T * B_tile, 4 * H_pad), jnp.float32),   # gates_ih
                pltpu.VMEM((T * B_tile, H_pad), param_dtype),       # layer seq
            ],
        ),
        compiler_params=pltpu.CompilerParams(
            dimension_semantics=("parallel",),
            vmem_limit_bytes=vmem_bytes,
        ),
    )(x_tm, w_ih0, w_ihr, w_hh, b, emb_w, emb_b)

    return out[:B, :E]


# --------------------------- reference & init --------------------------------


def d_vector_reference(x, params):
    """Pure-JAX f32 reference of the PyTorch forward (for correctness check)."""
    L, H = params["num_layers"], params["dim_cell"]
    B, T, _ = x.shape
    seq = x.astype(jnp.float32)
    for layer in range(L):
        w_ih = params["w_ih0"] if layer == 0 else params["w_ih_rest"][layer - 1]
        w_hh = params["w_hh"][layer]
        b = params["b_ih"][layer] + params["b_hh"][layer]
        h = jnp.zeros((B, H), jnp.float32)
        c = jnp.zeros((B, H), jnp.float32)
        outs = []
        for t in range(T):
            gates = seq[:, t, :] @ w_ih.T + h @ w_hh.T + b
            i = jax.nn.sigmoid(gates[:, 0 * H:1 * H])
            f = jax.nn.sigmoid(gates[:, 1 * H:2 * H])
            g = jnp.tanh(gates[:, 2 * H:3 * H])
            o = jax.nn.sigmoid(gates[:, 3 * H:4 * H])
            c = f * c + i * g
            h = o * jnp.tanh(c)
            outs.append(h)
        seq = jnp.stack(outs, axis=1)
    embeds = seq[:, -1, :] @ params["emb_w"].T + params["emb_b"]
    norm = jnp.linalg.norm(embeds, axis=-1, keepdims=True)
    return embeds / norm


def init_params(key, num_layers, dim_input, dim_cell, dim_emb, scale=0.1):
    ks = jax.random.split(key, 8)
    H, L = dim_cell, num_layers
    u = lambda k, shp: jax.random.uniform(k, shp, jnp.float32, -scale, scale)
    return {
        "num_layers": L,
        "dim_cell": H,
        "dim_emb": dim_emb,
        "w_ih0": u(ks[0], (4 * H, dim_input)),
        "w_ih_rest": u(ks[1], (max(L - 1, 1), 4 * H, H)),
        "w_hh": u(ks[2], (L, 4 * H, H)),
        "b_ih": u(ks[3], (L, 4 * H)),
        "b_hh": u(ks[4], (L, 4 * H)),
        "emb_w": u(ks[5], (dim_emb, H)),
        "emb_b": u(ks[6], (dim_emb,)),
    }


if __name__ == "__main__":
    # Small shapes consistent with the module's forward (B, T, dim_input).
    B, T = 2, 8
    NUM_LAYERS, DIM_INPUT, DIM_CELL, DIM_EMB = 3, 16, 32, 16

    key = jax.random.PRNGKey(0)
    k_x, k_p = jax.random.split(key)
    x = jax.random.normal(k_x, (B, T, DIM_INPUT), jnp.float32)
    params = init_params(k_p, NUM_LAYERS, DIM_INPUT, DIM_CELL, DIM_EMB)

    # f32 path: tight check against the pure-JAX reference.
    out = jax.block_until_ready(d_vector_forward(x, params))
    ref = d_vector_reference(x, params)
    assert out.shape == (B, DIM_EMB)
    assert jnp.allclose(out, ref, atol=2e-4, rtol=2e-4), "mismatch vs reference"
    assert jnp.allclose(jnp.linalg.norm(out, axis=-1), 1.0, atol=1e-4)

    # bf16 weight/activation path (production option); cell/gate math stays f32.
    out_bf16 = jax.block_until_ready(
        d_vector_forward(x, params, param_dtype=jnp.bfloat16))
    assert out_bf16.shape == (B, DIM_EMB)
    assert bool(jnp.all(jnp.isfinite(out_bf16)))
    assert jnp.allclose(jnp.linalg.norm(out_bf16, axis=-1), 1.0, atol=1e-3)

    print("KERNEL_OK")
</pallas_src>

<mosaic_0001>
module attributes {stable_mosaic.version = 11 : i64} {
  func.func @d_vector_kernel(%arg0: i32, %arg1: memref<8x8x16xf32, #tpu.memory_space<vmem>>, %arg2: memref<512x16xf32, #tpu.memory_space<vmem>>, %arg3: memref<2x512x128xf32, #tpu.memory_space<vmem>>, %arg4: memref<3x512x128xf32, #tpu.memory_space<vmem>>, %arg5: memref<3x1x512xf32, #tpu.memory_space<vmem>>, %arg6: memref<128x128xf32, #tpu.memory_space<vmem>>, %arg7: memref<1x128xf32, #tpu.memory_space<vmem>>, %arg8: memref<8x128xf32, #tpu.memory_space<vmem>>, %arg9: memref<64x512xf32, #tpu.memory_space<vmem>>, %arg10: memref<64x128xf32, #tpu.memory_space<vmem>>) attributes {dimension_semantics = [#tpu.dimension_semantics<parallel>], iteration_bounds = array<i64: 1>, scalar_prefetch = 0 : i64, scratch_operands = 2 : i64, tpu.core_type = #tpu.core_type<tc>, window_params = [{transform_indices = @transform_0, window_bounds = array<i64: 8, 8, 16>}, {pipeline_mode = #tpu.pipeline_mode<synchronous>, transform_indices = @transform_1, window_bounds = array<i64: 512, 16>}, {pipeline_mode = #tpu.pipeline_mode<synchronous>, transform_indices = @transform_2, window_bounds = array<i64: 2, 512, 128>}, {pipeline_mode = #tpu.pipeline_mode<synchronous>, transform_indices = @transform_3, window_bounds = array<i64: 3, 512, 128>}, {pipeline_mode = #tpu.pipeline_mode<synchronous>, transform_indices = @transform_4, window_bounds = array<i64: 3, 1, 512>}, {pipeline_mode = #tpu.pipeline_mode<synchronous>, transform_indices = @transform_5, window_bounds = array<i64: 128, 128>}, {pipeline_mode = #tpu.pipeline_mode<synchronous>, transform_indices = @transform_6, window_bounds = array<i64: 1, 128>}, {transform_indices = @transform_7, window_bounds = array<i64: 8, 128>}]} {
    %c0 = arith.constant 0 : index
    %c0_0 = arith.constant 0 : index
    %c0_1 = arith.constant 0 : index
    %0 = vector.load %arg1[%c0, %c0_0, %c0_1] : memref<8x8x16xf32, #tpu.memory_space<vmem>>, vector<8x8x16xf32>
    %1 = vector.shape_cast %0 : vector<8x8x16xf32> to vector<64x16xf32>
    %c0_2 = arith.constant 0 : index
    %c0_3 = arith.constant 0 : index
    %2 = vector.load %arg2[%c0_2, %c0_3] : memref<512x16xf32, #tpu.memory_space<vmem>>, vector<512x16xf32>
    %c0_4 = arith.constant 0 : index
    %c0_5 = arith.constant 0 : index
    %c0_6 = arith.constant 0 : index
    %3 = vector.load %arg4[%c0_4, %c0_5, %c0_6] : memref<3x512x128xf32, #tpu.memory_space<vmem>>, vector<1x512x128xf32>
    %4 = vector.shape_cast %3 : vector<1x512x128xf32> to vector<512x128xf32>
    %c0_7 = arith.constant 0 : index
    %c0_8 = arith.constant 0 : index
    %c0_9 = arith.constant 0 : index
    %5 = vector.load %arg5[%c0_7, %c0_8, %c0_9] : memref<3x1x512xf32, #tpu.memory_space<vmem>>, vector<1x1x512xf32>
    %6 = vector.shape_cast %5 : vector<1x1x512xf32> to vector<1x512xf32>
    %cst = arith.constant dense<0.000000e+00> : vector<64x512xf32>
    %7 = tpu.matmul %1, %2, %cst {dimension_numbers = #tpu.dot_dimension_numbers<[1], [1], [0], [0], [0, 0, 1, 0], [], []>} : vector<64x16xf32>, vector<512x16xf32>, vector<64x512xf32> -> vector<64x512xf32>
    %8 = vector.broadcast %6 : vector<1x512xf32> to vector<64x512xf32>
    %9 = arith.addf %7, %8 : vector<64x512xf32>
    %c0_10 = arith.constant 0 : index
    %c0_11 = arith.constant 0 : index
    %10 = vector.load %arg9[%c0_10, %c0_11] : memref<64x512xf32, #tpu.memory_space<vmem>>, vector<64x512xf32>
    tpu.vector_store %arg9[%c0_10, %c0_11], %9 {strides = array<i32>} : memref<64x512xf32, #tpu.memory_space<vmem>>, vector<64x512xf32>,
    %cst_12 = arith.constant 0.000000e+00 : f32
    %11 = vector.broadcast %cst_12 : f32 to vector<8x128xf32>
    %cst_13 = arith.constant 0.000000e+00 : f32
    %12 = vector.broadcast %cst_13 : f32 to vector<8x128xf32>
    %c0_i32 = arith.constant 0 : i32
    %c8_i32 = arith.constant 8 : i32
    %13 = arith.muli %c0_i32, %c8_i32 : i32
    %14 = tpu.assume_multiple %13, 8 : i32
    %15 = arith.index_cast %14 : i32 to index
    %c0_14 = arith.constant 0 : index
    %16 = vector.load %arg9[%15, %c0_14] : memref<64x512xf32, #tpu.memory_space<vmem>>, vector<8x512xf32>
    %cst_15 = arith.constant dense<0.000000e+00> : vector<8x512xf32>
    %17 = tpu.matmul %11, %4, %cst_15 {dimension_numbers = #tpu.dot_dimension_numbers<[1], [1], [0], [0], [0, 0, 1, 0], [], []>} : vector<8x128xf32>, vector<512x128xf32>, vector<8x512xf32> -> vector<8x512xf32>
    %18 = arith.addf %16, %17 : vector<8x512xf32>
    %19 = vector.extract_strided_slice %18 {offsets = [0, 0], sizes = [8, 128], strides = [1, 1]} : vector<8x512xf32> to vector<8x128xf32>
    %20 = arith.negf %19 : vector<8x128xf32>
    %21 = math.exp %20 : vector<8x128xf32>
    %cst_16 = arith.constant 1.000000e+00 : f32
    %22 = vector.broadcast %cst_16 : f32 to vector<8x128xf32>
    %23 = arith.addf %22, %21 : vector<8x128xf32>
    %24 = arith.divf %22, %23 : vector<8x128xf32>
    %25 = vector.extract_strided_slice %18 {offsets = [0, 128], sizes = [8, 128], strides = [1, 1]} : vector<8x512xf32> to vector<8x128xf32>
    %26 = arith.negf %25 : vector<8x128xf32>
    %27 = math.exp %26 : vector<8x128xf32>
    %cst_17 = arith.constant 1.000000e+00 : f32
    %28 = vector.broadcast %cst_17 : f32 to vector<8x128xf32>
    %29 = arith.addf %28, %27 : vector<8x128xf32>
    %30 = arith.divf %28, %29 : vector<8x128xf32>
    %31 = vector.extract_strided_slice %18 {offsets = [0, 256], sizes = [8, 128], strides = [1, 1]} : vector<8x512xf32> to vector<8x128xf32>
    %32 = math.tanh %31 : vector<8x128xf32>
    %33 = vector.extract_strided_slice %18 {offsets = [0, 384], sizes = [8, 128], strides = [1, 1]} : vector<8x512xf32> to vector<8x128xf32>
    %34 = arith.negf %33 : vector<8x128xf32>
    %35 = math.exp %34 : vector<8x128xf32>
    %cst_18 = arith.constant 1.000000e+00 : f32
    %36 = vector.broadcast %cst_18 : f32 to vector<8x128xf32>
    %37 = arith.addf %36, %35 : vector<8x128xf32>
    %38 = arith.divf %36, %37 : vector<8x128xf32>
    %39 = arith.mulf %30, %12 : vector<8x128xf32>
    %40 = arith.mulf %24, %32 : vector<8x128xf32>
    %41 = arith.addf %39, %40 : vector<8x128xf32>
    %42 = math.tanh %41 : vector<8x128xf32>
    %43 = arith.mulf %38, %42 : vector<8x128xf32>
    %44 = arith.index_cast %14 : i32 to index
    %c0_19 = arith.constant 0 : index
    %45 = vector.load %arg10[%44, %c0_19] : memref<64x128xf32, #tpu.memory_space<vmem>>, vector<8x128xf32>
    tpu.vector_store %arg10[%44, %c0_19], %43 {strides = array<i32>} : memref<64x128xf32, #tpu.memory_space<vmem>>, vector<8x128xf32>,
    %c1_i32 = arith.constant 1 : i32
    %c8_i32_20 = arith.constant 8 : i32
    %46 = arith.muli %c1_i32, %c8_i32_20 : i32
    %47 = tpu.assume_multiple %46, 8 : i32
    %48 = arith.index_cast %47 : i32 to index
    %c0_21 = arith.constant 0 : index
    %49 = vector.load %arg9[%48, %c0_21] : memref<64x512xf32, #tpu.memory_space<vmem>>, vector<8x512xf32>
    %cst_22 = arith.constant dense<0.000000e+00> : vector<8x512xf32>
    %50 = tpu.matmul %43, %4, %cst_22 {dimension_numbers = #tpu.dot_dimension_numbers<[1], [1], [0], [0], [0, 0, 1, 0], [], []>} : vector<8x128xf32>, vector<512x128xf32>, vector<8x512xf32> -> vector<8x512xf32>
    %51 = arith.addf %49, %50 : vector<8x512xf32>
    %52 = vector.extract_strided_slice %51 {offsets = [0, 0], sizes = [8, 128], strides = [1, 1]} : vector<8x512xf32> to vector<8x128xf32>
    %53 = arith.negf %52 : vector<8x128xf32>
    %54 = math.exp %53 : vector<8x128xf32>
    %cst_23 = arith.constant 1.000000e+00 : f32
    %55 = vector.broadcast %cst_23 : f32 to vector<8x128xf32>
    %56 = arith.addf %55, %54 : vector<8x128xf32>
    %57 = arith.divf %55, %56 : vector<8x128xf32>
    %58 = vector.extract_strided_slice %51 {offsets = [0, 128], sizes = [8, 128], strides = [1, 1]} : vector<8x512xf32> to vector<8x128xf32>
    %59 = arith.negf %58 : vector<8x128xf32>
    %60 = math.exp %59 : vector<8x128xf32>
    %cst_24 = arith.constant 1.000000e+00 : f32
    %61 = vector.broadcast %cst_24 : f32 to vector<8x128xf32>
    %62 = arith.addf %61, %60 : vector<8x128xf32>
    %63 = arith.divf %61, %62 : vector<8x128xf32>
    %64 = vector.extract_strided_slice %51 {offsets = [0, 256], sizes = [8, 128], strides = [1, 1]} : vector<8x512xf32> to vector<8x128xf32>
    %65 = math.tanh %64 : vector<8x128xf32>
    %66 = vector.extract_strided_slice %51 {offsets = [0, 384], sizes = [8, 128], strides = [1, 1]} : vector<8x512xf32> to vector<8x128xf32>
    %67 = arith.negf %66 : vector<8x128xf32>
    %68 = math.exp %67 : vector<8x128xf32>
    %cst_25 = arith.constant 1.000000e+00 : f32
    %69 = vector.broadcast %cst_25 : f32 to vector<8x128xf32>
    %70 = arith.addf %69, %68 : vector<8x128xf32>
    %71 = arith.divf %69, %70 : vector<8x128xf32>
    %72 = arith.mulf %63, %41 : vector<8x128xf32>
    %73 = arith.mulf %57, %65 : vector<8x128xf32>
    %74 = arith.addf %72, %73 : vector<8x128xf32>
    %75 = math.tanh %74 : vector<8x128xf32>
    %76 = arith.mulf %71, %75 : vector<8x128xf32>
    %77 = arith.index_cast %47 : i32 to index
    %c0_26 = arith.constant 0 : index
    %78 = vector.load %arg10[%77, %c0_26] : memref<64x128xf32, #tpu.memory_space<vmem>>, vector<8x128xf32>
    tpu.vector_store %arg10[%77, %c0_26], %76 {strides = array<i32>} : memref<64x128xf32, #tpu.memory_space<vmem>>, vector<8x128xf32>,
    %c2_i32 = arith.constant 2 : i32
    %c8_i32_27 = arith.constant 8 : i32
    %79 = arith.muli %c2_i32, %c8_i32_27 : i32
    %80 = tpu.assume_multiple %79, 8 : i32
    %81 = arith.index_cast %80 : i32 to index
    %c0_28 = arith.constant 0 : index
    %82 = vector.load %arg9[%81, %c0_28] : memref<64x512xf32, #tpu.memory_space<vmem>>, vector<8x512xf32>
    %cst_29 = arith.constant dense<0.000000e+00> : vector<8x512xf32>
    %83 = tpu.matmul %76, %4, %cst_29 {dimension_numbers = #tpu.dot_dimension_numbers<[1], [1], [0], [0], [0, 0, 1, 0], [], []>} : vector<8x128xf32>, vector<512x128xf32>, vector<8x512xf32> -> vector<8x512xf32>
    %84 = arith.addf %82, %83 : vector<8x512xf32>
    %85 = vector.extract_strided_slice %84 {offsets = [0, 0], sizes = [8, 128], strides = [1, 1]} : vector<8x512xf32> to vector<8x128xf32>
    %86 = arith.negf %85 : vector<8x128xf32>
    %87 = math.exp %86 : vector<8x128xf32>
    %cst_30 = arith.constant 1.000000e+00 : f32
    %88 = vector.broadcast %cst_30 : f32 to vector<8x128xf32>
    %89 = arith.addf %88, %87 : vector<8x128xf32>
    %90 = arith.divf %88, %89 : vector<8x128xf32>
    %91 = vector.extract_strided_slice %84 {offsets = [0, 128], sizes = [8, 128], strides = [1, 1]} : vector<8x512xf32> to vector<8x128xf32>
    %92 = arith.negf %91 : vector<8x128xf32>
    %93 = math.exp %92 : vector<8x128xf32>
    %cst_31 = arith.constant 1.000000e+00 : f32
    %94 = vector.broadcast %cst_31 : f32 to vector<8x128xf32>
    %95 = arith.addf %94, %93 : vector<8x128xf32>
    %96 = arith.divf %94, %95 : vector<8x128xf32>
    %97 = vector.extract_strided_slice %84 {offsets = [0, 256], sizes = [8, 128], strides = [1, 1]} : vector<8x512xf32> to vector<8x128xf32>
    %98 = math.tanh %97 : vector<8x128xf32>
    %99 = vector.extract_strided_slice %84 {offsets = [0, 384], sizes = [8, 128], strides = [1, 1]} : vector<8x512xf32> to vector<8x128xf32>
    %100 = arith.negf %99 : vector<8x128xf32>
    %101 = math.exp %100 : vector<8x128xf32>
    %cst_32 = arith.constant 1.000000e+00 : f32
    %102 = vector.broadcast %cst_32 : f32 to vector<8x128xf32>
    %103 = arith.addf %102, %101 : vector<8x128xf32>
    %104 = arith.divf %102, %103 : vector<8x128xf32>
    %105 = arith.mulf %96, %74 : vector<8x128xf32>
    %106 = arith.mulf %90, %98 : vector<8x128xf32>
    %107 = arith.addf %105, %106 : vector<8x128xf32>
    %108 = math.tanh %107 : vector<8x128xf32>
    %109 = arith.mulf %104, %108 : vector<8x128xf32>
    %110 = arith.index_cast %80 : i32 to index
    %c0_33 = arith.constant 0 : index
    %111 = vector.load %arg10[%110, %c0_33] : memref<64x128xf32, #tpu.memory_space<vmem>>, vector<8x128xf32>
    tpu.vector_store %arg10[%110, %c0_33], %109 {strides = array<i32>} : memref<64x128xf32, #tpu.memory_space<vmem>>, vector<8x128xf32>,
    %c3_i32 = arith.constant 3 : i32
    %c8_i32_34 = arith.constant 8 : i32
    %112 = arith.muli %c3_i32, %c8_i32_34 : i32
    %113 = tpu.assume_multiple %112, 8 : i32
    %114 = arith.index_cast %113 : i32 to index
    %c0_35 = arith.constant 0 : index
    %115 = vector.load %arg9[%114, %c0_35] : memref<64x512xf32, #tpu.memory_space<vmem>>, vector<8x512xf32>
    %cst_36 = arith.constant dense<0.000000e+00> : vector<8x512xf32>
    %116 = tpu.matmul %109, %4, %cst_36 {dimension_numbers = #tpu.dot_dimension_numbers<[1], [1], [0], [0], [0, 0, 1, 0], [], []>} : vector<8x128xf32>, vector<512x128xf32>, vector<8x512xf32> -> vector<8x512xf32>
    %117 = arith.addf %115, %116 : vector<8x512xf32>
    %118 = vector.extract_strided_slice %117 {offsets = [0, 0], sizes = [8, 128], strides = [1, 1]} : vector<8x512xf32> to vector<8x128xf32>
    %119 = arith.negf %118 : vector<8x128xf32>
    %120 = math.exp %119 : vector<8x128xf32>
    %cst_37 = arith.constant 1.000000e+00 : f32
    %121 = vector.broadcast %cst_37 : f32 to vector<8x128xf32>
    %122 = arith.addf %121, %120 : vector<8x128xf32>
    %123 = arith.divf %121, %122 : vector<8x128xf32>
    %124 = vector.extract_strided_slice %117 {offsets = [0, 128], sizes = [8, 128], strides = [1, 1]} : vector<8x512xf32> to vector<8x128xf32>
    %125 = arith.negf %124 : vector<8x128xf32>
    %126 = math.exp %125 : vector<8x128xf32>
    %cst_38 = arith.constant 1.000000e+00 : f32
    %127 = vector.broadcast %cst_38 : f32 to vector<8x128xf32>
    %128 = arith.addf %127, %126 : vector<8x128xf32>
    %129 = arith.divf %127, %128 : vector<8x128xf32>
    %130 = vector.extract_strided_slice %117 {offsets = [0, 256], sizes = [8, 128], strides = [1, 1]} : vector<8x512xf32> to vector<8x128xf32>
    %131 = math.tanh %130 : vector<8x128xf32>
    %132 = vector.extract_strided_slice %117 {offsets = [0, 384], sizes = [8, 128], strides = [1, 1]} : vector<8x512xf32> to vector<8x128xf32>
    %133 = arith.negf %132 : vector<8x128xf32>
    %134 = math.exp %133 : vector<8x128xf32>
    %cst_39 = arith.constant 1.000000e+00 : f32
    %135 = vector.broadcast %cst_39 : f32 to vector<8x128xf32>
    %136 = arith.addf %135, %134 : vector<8x128xf32>
    %137 = arith.divf %135, %136 : vector<8x128xf32>
    %138 = arith.mulf %129, %107 : vector<8x128xf32>
    %139 = arith.mulf %123, %131 : vector<8x128xf32>
    %140 = arith.addf %138, %139 : vector<8x128xf32>
    %141 = math.tanh %140 : vector<8x128xf32>
    %142 = arith.mulf %137, %141 : vector<8x128xf32>
    %143 = arith.index_cast %113 : i32 to index
    %c0_40 = arith.constant 0 : index
    %144 = vector.load %arg10[%143, %c0_40] : memref<64x128xf32, #tpu.memory_space<vmem>>, vector<8x128xf32>
    tpu.vector_store %arg10[%143, %c0_40], %142 {strides = array<i32>} : memref<64x128xf32, #tpu.memory_space<vmem>>, vector<8x128xf32>,
    %c4_i32 = arith.constant 4 : i32
    %c8_i32_41 = arith.constant 8 : i32
    %145 = arith.muli %c4_i32, %c8_i32_41 : i32
    %146 = tpu.assume_multiple %145, 8 : i32
    %147 = arith.index_cast %146 : i32 to index
    %c0_42 = arith.constant 0 : index
    %148 = vector.load %arg9[%147, %c0_42] : memref<64x512xf32, #tpu.memory_space<vmem>>, vector<8x512xf32>
    %cst_43 = arith.constant dense<0.000000e+00> : vector<8x512xf32>
    %149 = tpu.matmul %142, %4, %cst_43 {dimension_numbers = #tpu.dot_dimension_numbers<[1], [1], [0], [0], [0, 0, 1, 0], [], []>} : vector<8x128xf32>, vector<512x128xf32>, vector<8x512xf32> -> vector<8x512xf32>
    %150 = arith.addf %148, %149 : vector<8x512xf32>
    %151 = vector.extract_strided_slice %150 {offsets = [0, 0], sizes = [8, 128], strides = [1, 1]} : vector<8x512xf32> to vector<8x128xf32>
    %152 = arith.negf %151 : vector<8x128xf32>
    %153 = math.exp %152 : vector<8x128xf32>
    %cst_44 = arith.constant 1.000000e+00 : f32
    %154 = vector.broadcast %cst_44 : f32 to vector<8x128xf32>
    %155 = arith.addf %154, %153 : vector<8x128xf32>
    %156 = arith.divf %154, %155 : vector<8x128xf32>
    %157 = vector.extract_strided_slice %150 {offsets = [0, 128], sizes = [8, 128], strides = [1, 1]} : vector<8x512xf32> to vector<8x128xf32>
    %158 = arith.negf %157 : vector<8x128xf32>
    %159 = math.exp %158 : vector<8x128xf32>
    %cst_45 = arith.constant 1.000000e+00 : f32
    %160 = vector.broadcast %cst_45 : f32 to vector<8x128xf32>
    %161 = arith.addf %160, %159 : vector<8x128xf32>
    %162 = arith.divf %160, %161 : vector<8x128xf32>
    %163 = vector.extract_strided_slice %150 {offsets = [0, 256], sizes = [8, 128], strides = [1, 1]} : vector<8x512xf32> to vector<8x128xf32>
    %164 = math.tanh %163 : vector<8x128xf32>
    %165 = vector.extract_strided_slice %150 {offsets = [0, 384], sizes = [8, 128], strides = [1, 1]} : vector<8x512xf32> to vector<8x128xf32>
    %166 = arith.negf %165 : vector<8x128xf32>
    %167 = math.exp %166 : vector<8x128xf32>
    %cst_46 = arith.constant 1.000000e+00 : f32
    %168 = vector.broadcast %cst_46 : f32 to vector<8x128xf32>
    %169 = arith.addf %168, %167 : vector<8x128xf32>
    %170 = arith.divf %168, %169 : vector<8x128xf32>
    %171 = arith.mulf %162, %140 : vector<8x128xf32>
    %172 = arith.mulf %156, %164 : vector<8x128xf32>
    %173 = arith.addf %171, %172 : vector<8x128xf32>
    %174 = math.tanh %173 : vector<8x128xf32>
    %175 = arith.mulf %170, %174 : vector<8x128xf32>
    %176 = arith.index_cast %146 : i32 to index
    %c0_47 = arith.constant 0 : index
    %177 = vector.load %arg10[%176, %c0_47] : memref<64x128xf32, #tpu.memory_space<vmem>>, vector<8x128xf32>
    tpu.vector_store %arg10[%176, %c0_47], %175 {strides = array<i32>} : memref<64x128xf32, #tpu.memory_space<vmem>>, vector<8x128xf32>,
    %c5_i32 = arith.constant 5 : i32
    %c8_i32_48 = arith.constant 8 : i32
    %178 = arith.muli %c5_i32, %c8_i32_48 : i32
    %179 = tpu.assume_multiple %178, 8 : i32
    %180 = arith.index_cast %179 : i32 to index
    %c0_49 = arith.constant 0 : index
    %181 = vector.load %arg9[%180, %c0_49] : memref<64x512xf32, #tpu.memory_space<vmem>>, vector<8x512xf32>
    %cst_50 = arith.constant dense<0.000000e+00> : vector<8x512xf32>
    %182 = tpu.matmul %175, %4, %cst_50 {dimension_numbers = #tpu.dot_dimension_numbers<[1], [1], [0], [0], [0, 0, 1, 0], [], []>} : vector<8x128xf32>, vector<512x128xf32>, vector<8x512xf32> -> vector<8x512xf32>
    %183 = arith.addf %181, %182 : vector<8x512xf32>
    %184 = vector.extract_strided_slice %183 {offsets = [0, 0], sizes = [8, 128], strides = [1, 1]} : vector<8x512xf32> to vector<8x128xf32>
    %185 = arith.negf %184 : vector<8x128xf32>
    %186 = math.exp %185 : vector<8x128xf32>
    %cst_51 = arith.constant 1.000000e+00 : f32
    %187 = vector.broadcast %cst_51 : f32 to vector<8x128xf32>
    %188 = arith.addf %187, %186 : vector<8x128xf32>
    %189 = arith.divf %187, %188 : vector<8x128xf32>
    %190 = vector.extract_strided_slice %183 {offsets = [0, 128], sizes = [8, 128], strides = [1, 1]} : vector<8x512xf32> to vector<8x128xf32>
    %191 = arith.negf %190 : vector<8x128xf32>
    %192 = math.exp %191 : vector<8x128xf32>
    %cst_52 = arith.constant 1.000000e+00 : f32
    %193 = vector.broadcast %cst_52 : f32 to vector<8x128xf32>
    %194 = arith.addf %193, %192 : vector<8x128xf32>
    %195 = arith.divf %193, %194 : vector<8x128xf32>
    %196 = vector.extract_strided_slice %183 {offsets = [0, 256], sizes = [8, 128], strides = [1, 1]} : vector<8x512xf32> to vector<8x128xf32>
    %197 = math.tanh %196 : vector<8x128xf32>
    %198 = vector.extract_strided_slice %183 {offsets = [0, 384], sizes = [8, 128], strides = [1, 1]} : vector<8x512xf32> to vector<8x128xf32>
    %199 = arith.negf %198 : vector<8x128xf32>
    %200 = math.exp %199 : vector<8x128xf32>
    %cst_53 = arith.constant 1.000000e+00 : f32
    %201 = vector.broadcast %cst_53 : f32 to vector<8x128xf32>
    %202 = arith.addf %201, %200 : vector<8x128xf32>
    %203 = arith.divf %201, %202 : vector<8x128xf32>
    %204 = arith.mulf %195, %173 : vector<8x128xf32>
    %205 = arith.mulf %189, %197 : vector<8x128xf32>
    %206 = arith.addf %204, %205 : vector<8x128xf32>
    %207 = math.tanh %206 : vector<8x128xf32>
    %208 = arith.mulf %203, %207 : vector<8x128xf32>
    %209 = arith.index_cast %179 : i32 to index
    %c0_54 = arith.constant 0 : index
    %210 = vector.load %arg10[%209, %c0_54] : memref<64x128xf32, #tpu.memory_space<vmem>>, vector<8x128xf32>
    tpu.vector_store %arg10[%209, %c0_54], %208 {strides = array<i32>} : memref<64x128xf32, #tpu.memory_space<vmem>>, vector<8x128xf32>,
    %c6_i32 = arith.constant 6 : i32
    %c8_i32_55 = arith.constant 8 : i32
    %211 = arith.muli %c6_i32, %c8_i32_55 : i32
    %212 = tpu.assume_multiple %211, 8 : i32
    %213 = arith.index_cast %212 : i32 to index
    %c0_56 = arith.constant 0 : index
    %214 = vector.load %arg9[%213, %c0_56] : memref<64x512xf32, #tpu.memory_space<vmem>>, vector<8x512xf32>
    %cst_57 = arith.constant dense<0.000000e+00> : vector<8x512xf32>
    %215 = tpu.matmul %208, %4, %cst_57 {dimension_numbers = #tpu.dot_dimension_numbers<[1], [1], [0], [0], [0, 0, 1, 0], [], []>} : vector<8x128xf32>, vector<512x128xf32>, vector<8x512xf32> -> vector<8x512xf32>
    %216 = arith.addf %214, %215 : vector<8x512xf32>
    %217 = vector.extract_strided_slice %216 {offsets = [0, 0], sizes = [8, 128], strides = [1, 1]} : vector<8x512xf32> to vector<8x128xf32>
    %218 = arith.negf %217 : vector<8x128xf32>
    %219 = math.exp %218 : vector<8x128xf32>
    %cst_58 = arith.constant 1.000000e+00 : f32
    %220 = vector.broadcast %cst_58 : f32 to vector<8x128xf32>
    %221 = arith.addf %220, %219 : vector<8x128xf32>
    %222 = arith.divf %220, %221 : vector<8x128xf32>
    %223 = vector.extract_strided_slice %216 {offsets = [0, 128], sizes = [8, 128], strides = [1, 1]} : vector<8x512xf32> to vector<8x128xf32>
    %224 = arith.negf %223 : vector<8x128xf32>
    %225 = math.exp %224 : vector<8x128xf32>
    %cst_59 = arith.constant 1.000000e+00 : f32
    %226 = vector.broadcast %cst_59 : f32 to vector<8x128xf32>
    %227 = arith.addf %226, %225 : vector<8x128xf32>
    %228 = arith.divf %226, %227 : vector<8x128xf32>
    %229 = vector.extract_strided_slice %216 {offsets = [0, 256], sizes = [8, 128], strides = [1, 1]} : vector<8x512xf32> to vector<8x128xf32>
    %230 = math.tanh %229 : vector<8x128xf32>
    %231 = vector.extract_strided_slice %216 {offsets = [0, 384], sizes = [8, 128], strides = [1, 1]} : vector<8x512xf32> to vector<8x128xf32>
    %232 = arith.negf %231 : vector<8x128xf32>
    %233 = math.exp %232 : vector<8x128xf32>
    %cst_60 = arith.constant 1.000000e+00 : f32
    %234 = vector.broadcast %cst_60 : f32 to vector<8x128xf32>
    %235 = arith.addf %234, %233 : vector<8x128xf32>
    %236 = arith.divf %234, %235 : vector<8x128xf32>
    %237 = arith.mulf %228, %206 : vector<8x128xf32>
    %238 = arith.mulf %222, %230 : vector<8x128xf32>
    %239 = arith.addf %237, %238 : vector<8x128xf32>
    %240 = math.tanh %239 : vector<8x128xf32>
    %241 = arith.mulf %236, %240 : vector<8x128xf32>
    %242 = arith.index_cast %212 : i32 to index
    %c0_61 = arith.constant 0 : index
    %243 = vector.load %arg10[%242, %c0_61] : memref<64x128xf32, #tpu.memory_space<vmem>>, vector<8x128xf32>
    tpu.vector_store %arg10[%242, %c0_61], %241 {strides = array<i32>} : memref<64x128xf32, #tpu.memory_space<vmem>>, vector<8x128xf32>,
    %c7_i32 = arith.constant 7 : i32
    %c8_i32_62 = arith.constant 8 : i32
    %244 = arith.muli %c7_i32, %c8_i32_62 : i32
    %245 = tpu.assume_multiple %244, 8 : i32
    %246 = arith.index_cast %245 : i32 to index
    %c0_63 = arith.constant 0 : index
    %247 = vector.load %arg9[%246, %c0_63] : memref<64x512xf32, #tpu.memory_space<vmem>>, vector<8x512xf32>
    %cst_64 = arith.constant dense<0.000000e+00> : vector<8x512xf32>
    %248 = tpu.matmul %241, %4, %cst_64 {dimension_numbers = #tpu.dot_dimension_numbers<[1], [1], [0], [0], [0, 0, 1, 0], [], []>} : vector<8x128xf32>, vector<512x128xf32>, vector<8x512xf32> -> vector<8x512xf32>
    %249 = arith.addf %247, %248 : vector<8x512xf32>
    %250 = vector.extract_strided_slice %249 {offsets = [0, 0], sizes = [8, 128], strides = [1, 1]} : vector<8x512xf32> to vector<8x128xf32>
    %251 = arith.negf %250 : vector<8x128xf32>
    %252 = math.exp %251 : vector<8x128xf32>
    %cst_65 = arith.constant 1.000000e+00 : f32
    %253 = vector.broadcast %cst_65 : f32 to vector<8x128xf32>
    %254 = arith.addf %253, %252 : vector<8x128xf32>
    %255 = arith.divf %253, %254 : vector<8x128xf32>
    %256 = vector.extract_strided_slice %249 {offsets = [0, 128], sizes = [8, 128], strides = [1, 1]} : vector<8x512xf32> to vector<8x128xf32>
    %257 = arith.negf %256 : vector<8x128xf32>
    %258 = math.exp %257 : vector<8x128xf32>
    %cst_66 = arith.constant 1.000000e+00 : f32
    %259 = vector.broadcast %cst_66 : f32 to vector<8x128xf32>
    %260 = arith.addf %259, %258 : vector<8x128xf32>
    %261 = arith.divf %259, %260 : vector<8x128xf32>
    %262 = vector.extract_strided_slice %249 {offsets = [0, 256], sizes = [8, 128], strides = [1, 1]} : vector<8x512xf32> to vector<8x128xf32>
    %263 = math.tanh %262 : vector<8x128xf32>
    %264 = vector.extract_strided_slice %249 {offsets = [0, 384], sizes = [8, 128], strides = [1, 1]} : vector<8x512xf32> to vector<8x128xf32>
    %265 = arith.negf %264 : vector<8x128xf32>
    %266 = math.exp %265 : vector<8x128xf32>
    %cst_67 = arith.constant 1.000000e+00 : f32
    %267 = vector.broadcast %cst_67 : f32 to vector<8x128xf32>
    %268 = arith.addf %267, %266 : vector<8x128xf32>
    %269 = arith.divf %267, %268 : vector<8x128xf32>
    %270 = arith.mulf %261, %239 : vector<8x128xf32>
    %271 = arith.mulf %255, %263 : vector<8x128xf32>
    %272 = arith.addf %270, %271 : vector<8x128xf32>
    %273 = math.tanh %272 : vector<8x128xf32>
    %274 = arith.mulf %269, %273 : vector<8x128xf32>
    %275 = arith.index_cast %245 : i32 to index
    %c0_68 = arith.constant 0 : index
    %276 = vector.load %arg10[%275, %c0_68] : memref<64x128xf32, #tpu.memory_space<vmem>>, vector<8x128xf32>
    tpu.vector_store %arg10[%275, %c0_68], %274 {strides = array<i32>} : memref<64x128xf32, #tpu.memory_space<vmem>>, vector<8x128xf32>,
    %c8_i32_69 = arith.constant 8 : i32
    %c0_70 = arith.constant 0 : index
    %c0_71 = arith.constant 0 : index
    %277 = vector.load %arg10[%c0_70, %c0_71] : memref<64x128xf32, #tpu.memory_space<vmem>>, vector<64x128xf32>
    %c0_72 = arith.constant 0 : index
    %c0_73 = arith.constant 0 : index
    %c0_74 = arith.constant 0 : index
    %278 = vector.load %arg3[%c0_72, %c0_73, %c0_74] : memref<2x512x128xf32, #tpu.memory_space<vmem>>, vector<1x512x128xf32>
    %279 = vector.shape_cast %278 : vector<1x512x128xf32> to vector<512x128xf32>
    %c1 = arith.constant 1 : index
    %c0_75 = arith.constant 0 : index
    %c0_76 = arith.constant 0 : index
    %280 = vector.load %arg4[%c1, %c0_75, %c0_76] : memref<3x512x128xf32, #tpu.memory_space<vmem>>, vector<1x512x128xf32>
    %281 = vector.shape_cast %280 : vector<1x512x128xf32> to vector<512x128xf32>
    %c1_77 = arith.constant 1 : index
    %c0_78 = arith.constant 0 : index
    %c0_79 = arith.constant 0 : index
    %282 = vector.load %arg5[%c1_77, %c0_78, %c0_79] : memref<3x1x512xf32, #tpu.memory_space<vmem>>, vector<1x1x512xf32>
    %283 = vector.shape_cast %282 : vector<1x1x512xf32> to vector<1x512xf32>
    %cst_80 = arith.constant dense<0.000000e+00> : vector<64x512xf32>
    %284 = tpu.matmul %277, %279, %cst_80 {dimension_numbers = #tpu.dot_dimension_numbers<[1], [1], [0], [0], [0, 0, 1, 0], [], []>} : vector<64x128xf32>, vector<512x128xf32>, vector<64x512xf32> -> vector<64x512xf32>
    %285 = vector.broadcast %283 : vector<1x512xf32> to vector<64x512xf32>
    %286 = arith.addf %284, %285 : vector<64x512xf32>
    %c0_81 = arith.constant 0 : index
    %c0_82 = arith.constant 0 : index
    %287 = vector.load %arg9[%c0_81, %c0_82] : memref<64x512xf32, #tpu.memory_space<vmem>>, vector<64x512xf32>
    tpu.vector_store %arg9[%c0_81, %c0_82], %286 {strides = array<i32>} : memref<64x512xf32, #tpu.memory_space<vmem>>, vector<64x512xf32>,
    %cst_83 = arith.constant 0.000000e+00 : f32
    %288 = vector.broadcast %cst_83 : f32 to vector<8x128xf32>
    %cst_84 = arith.constant 0.000000e+00 : f32
    %289 = vector.broadcast %cst_84 : f32 to vector<8x128xf32>
    %c0_i32_85 = arith.constant 0 : i32
    %c8_i32_86 = arith.constant 8 : i32
    %290 = arith.muli %c0_i32_85, %c8_i32_86 : i32
    %291 = tpu.assume_multiple %290, 8 : i32
    %292 = arith.index_cast %291 : i32 to index
    %c0_87 = arith.constant 0 : index
    %293 = vector.load %arg9[%292, %c0_87] : memref<64x512xf32, #tpu.memory_space<vmem>>, vector<8x512xf32>
    %cst_88 = arith.constant dense<0.000000e+00> : vector<8x512xf32>
    %294 = tpu.matmul %288, %281, %cst_88 {dimension_numbers = #tpu.dot_dimension_numbers<[1], [1], [0], [0], [0, 0, 1, 0], [], []>} : vector<8x128xf32>, vector<512x128xf32>, vector<8x512xf32> -> vector<8x512xf32>
    %295 = arith.addf %293, %294 : vector<8x512xf32>
    %296 = vector.extract_strided_slice %295 {offsets = [0, 0], sizes = [8, 128], strides = [1, 1]} : vector<8x512xf32> to vector<8x128xf32>
    %297 = arith.negf %296 : vector<8x128xf32>
    %298 = math.exp %297 : vector<8x128xf32>
    %cst_89 = arith.constant 1.000000e+00 : f32
    %299 = vector.broadcast %cst_89 : f32 to vector<8x128xf32>
    %300 = arith.addf %299, %298 : vector<8x128xf32>
    %301 = arith.divf %299, %300 : vector<8x128xf32>
    %302 = vector.extract_strided_slice %295 {offsets = [0, 128], sizes = [8, 128], strides = [1, 1]} : vector<8x512xf32> to vector<8x128xf32>
    %303 = arith.negf %302 : vector<8x128xf32>
    %304 = math.exp %303 : vector<8x128xf32>
    %cst_90 = arith.constant 1.000000e+00 : f32
    %305 = vector.broadcast %cst_90 : f32 to vector<8x128xf32>
    %306 = arith.addf %305, %304 : vector<8x128xf32>
    %307 = arith.divf %305, %306 : vector<8x128xf32>
    %308 = vector.extract_strided_slice %295 {offsets = [0, 256], sizes = [8, 128], strides = [1, 1]} : vector<8x512xf32> to vector<8x128xf32>
    %309 = math.tanh %308 : vector<8x128xf32>
    %310 = vector.extract_strided_slice %295 {offsets = [0, 384], sizes = [8, 128], strides = [1, 1]} : vector<8x512xf32> to vector<8x128xf32>
    %311 = arith.negf %310 : vector<8x128xf32>
    %312 = math.exp %311 : vector<8x128xf32>
    %cst_91 = arith.constant 1.000000e+00 : f32
    %313 = vector.broadcast %cst_91 : f32 to vector<8x128xf32>
    %314 = arith.addf %313, %312 : vector<8x128xf32>
    %315 = arith.divf %313, %314 : vector<8x128xf32>
    %316 = arith.mulf %307, %289 : vector<8x128xf32>
    %317 = arith.mulf %301, %309 : vector<8x128xf32>
    %318 = arith.addf %316, %317 : vector<8x128xf32>
    %319 = math.tanh %318 : vector<8x128xf32>
    %320 = arith.mulf %315, %319 : vector<8x128xf32>
    %321 = arith.index_cast %291 : i32 to index
    %c0_92 = arith.constant 0 : index
    %322 = vector.load %arg10[%321, %c0_92] : memref<64x128xf32, #tpu.memory_space<vmem>>, vector<8x128xf32>
    tpu.vector_store %arg10[%321, %c0_92], %320 {strides = array<i32>} : memref<64x128xf32, #tpu.memory_space<vmem>>, vector<8x128xf32>,
    %c1_i32_93 = arith.constant 1 : i32
    %c8_i32_94 = arith.constant 8 : i32
    %323 = arith.muli %c1_i32_93, %c8_i32_94 : i32
    %324 = tpu.assume_multiple %323, 8 : i32
    %325 = arith.index_cast %324 : i32 to index
    %c0_95 = arith.constant 0 : index
    %326 = vector.load %arg9[%325, %c0_95] : memref<64x512xf32, #tpu.memory_space<vmem>>, vector<8x512xf32>
    %cst_96 = arith.constant dense<0.000000e+00> : vector<8x512xf32>
    %327 = tpu.matmul %320, %281, %cst_96 {dimension_numbers = #tpu.dot_dimension_numbers<[1], [1], [0], [0], [0, 0, 1, 0], [], []>} : vector<8x128xf32>, vector<512x128xf32>, vector<8x512xf32> -> vector<8x512xf32>
    %328 = arith.addf %326, %327 : vector<8x512xf32>
    %329 = vector.extract_strided_slice %328 {offsets = [0, 0], sizes = [8, 128], strides = [1, 1]} : vector<8x512xf32> to vector<8x128xf32>
    %330 = arith.negf %329 : vector<8x128xf32>
    %331 = math.exp %330 : vector<8x128xf32>
    %cst_97 = arith.constant 1.000000e+00 : f32
    %332 = vector.broadcast %cst_97 : f32 to vector<8x128xf32>
    %333 = arith.addf %332, %331 : vector<8x128xf32>
    %334 = arith.divf %332, %333 : vector<8x128xf32>
    %335 = vector.extract_strided_slice %328 {offsets = [0, 128], sizes = [8, 128], strides = [1, 1]} : vector<8x512xf32> to vector<8x128xf32>
    %336 = arith.negf %335 : vector<8x128xf32>
    %337 = math.exp %336 : vector<8x128xf32>
    %cst_98 = arith.constant 1.000000e+00 : f32
    %338 = vector.broadcast %cst_98 : f32 to vector<8x128xf32>
    %339 = arith.addf %338, %337 : vector<8x128xf32>
    %340 = arith.divf %338, %339 : vector<8x128xf32>
    %341 = vector.extract_strided_slice %328 {offsets = [0, 256], sizes = [8, 128], strides = [1, 1]} : vector<8x512xf32> to vector<8x128xf32>
    %342 = math.tanh %341 : vector<8x128xf32>
    %343 = vector.extract_strided_slice %328 {offsets = [0, 384], sizes = [8, 128], strides = [1, 1]} : vector<8x512xf32> to vector<8x128xf32>
    %344 = arith.negf %343 : vector<8x128xf32>
    %345 = math.exp %344 : vector<8x128xf32>
    %cst_99 = arith.constant 1.000000e+00 : f32
    %346 = vector.broadcast %cst_99 : f32 to vector<8x128xf32>
    %347 = arith.addf %346, %345 : vector<8x128xf32>
    %348 = arith.divf %346, %347 : vector<8x128xf32>
    %349 = arith.mulf %340, %318 : vector<8x128xf32>
    %350 = arith.mulf %334, %342 : vector<8x128xf32>
    %351 = arith.addf %349, %350 : vector<8x128xf32>
    %352 = math.tanh %351 : vector<8x128xf32>
    %353 = arith.mulf %348, %352 : vector<8x128xf32>
    %354 = arith.index_cast %324 : i32 to index
    %c0_100 = arith.constant 0 : index
    %355 = vector.load %arg10[%354, %c0_100] : memref<64x128xf32, #tpu.memory_space<vmem>>, vector<8x128xf32>
    tpu.vector_store %arg10[%354, %c0_100], %353 {strides = array<i32>} : memref<64x128xf32, #tpu.memory_space<vmem>>, vector<8x128xf32>,
    %c2_i32_101 = arith.constant 2 : i32
    %c8_i32_102 = arith.constant 8 : i32
    %356 = arith.muli %c2_i32_101, %c8_i32_102 : i32
    %357 = tpu.assume_multiple %356, 8 : i32
    %358 = arith.index_cast %357 : i32 to index
    %c0_103 = arith.constant 0 : index
    %359 = vector.load %arg9[%358, %c0_103] : memref<64x512xf32, #tpu.memory_space<vmem>>, vector<8x512xf32>
    %cst_104 = arith.constant dense<0.000000e+00> : vector<8x512xf32>
    %360 = tpu.matmul %353, %281, %cst_104 {dimension_numbers = #tpu.dot_dimension_numbers<[1], [1], [0], [0], [0, 0, 1, 0], [], []>} : vector<8x128xf32>, vector<512x128xf32>, vector<8x512xf32> -> vector<8x512xf32>
    %361 = arith.addf %359, %360 : vector<8x512xf32>
    %362 = vector.extract_strided_slice %361 {offsets = [0, 0], sizes = [8, 128], strides = [1, 1]} : vector<8x512xf32> to vector<8x128xf32>
    %363 = arith.negf %362 : vector<8x128xf32>
    %364 = math.exp %363 : vector<8x128xf32>
    %cst_105 = arith.constant 1.000000e+00 : f32
    %365 = vector.broadcast %cst_105 : f32 to vector<8x128xf32>
    %366 = arith.addf %365, %364 : vector<8x128xf32>
    %367 = arith.divf %365, %366 : vector<8x128xf32>
    %368 = vector.extract_strided_slice %361 {offsets = [0, 128], sizes = [8, 128], strides = [1, 1]} : vector<8x512xf32> to vector<8x128xf32>
    %369 = arith.negf %368 : vector<8x128xf32>
    %370 = math.exp %369 : vector<8x128xf32>
    %cst_106 = arith.constant 1.000000e+00 : f32
    %371 = vector.broadcast %cst_106 : f32 to vector<8x128xf32>
    %372 = arith.addf %371, %370 : vector<8x128xf32>
    %373 = arith.divf %371, %372 : vector<8x128xf32>
    %374 = vector.extract_strided_slice %361 {offsets = [0, 256], sizes = [8, 128], strides = [1, 1]} : vector<8x512xf32> to vector<8x128xf32>
    %375 = math.tanh %374 : vector<8x128xf32>
    %376 = vector.extract_strided_slice %361 {offsets = [0, 384], sizes = [8, 128], strides = [1, 1]} : vector<8x512xf32> to vector<8x128xf32>
    %377 = arith.negf %376 : vector<8x128xf32>
    %378 = math.exp %377 : vector<8x128xf32>
    %cst_107 = arith.constant 1.000000e+00 : f32
    %379 = vector.broadcast %cst_107 : f32 to vector<8x128xf32>
    %380 = arith.addf %379, %378 : vector<8x128xf32>
    %381 = arith.divf %379, %380 : vector<8x128xf32>
    %382 = arith.mulf %373, %351 : vector<8x128xf32>
    %383 = arith.mulf %367, %375 : vector<8x128xf32>
    %384 = arith.addf %382, %383 : vector<8x128xf32>
    %385 = math.tanh %384 : vector<8x128xf32>
    %386 = arith.mulf %381, %385 : vector<8x128xf32>
    %387 = arith.index_cast %357 : i32 to index
    %c0_108 = arith.constant 0 : index
    %388 = vector.load %arg10[%387, %c0_108] : memref<64x128xf32, #tpu.memory_space<vmem>>, vector<8x128xf32>
    tpu.vector_store %arg10[%387, %c0_108], %386 {strides = array<i32>} : memref<64x128xf32, #tpu.memory_space<vmem>>, vector<8x128xf32>,
    %c3_i32_109 = arith.constant 3 : i32
    %c8_i32_110 = arith.constant 8 : i32
    %389 = arith.muli %c3_i32_109, %c8_i32_110 : i32
    %390 = tpu.assume_multiple %389, 8 : i32
    %391 = arith.index_cast %390 : i32 to index
    %c0_111 = arith.constant 0 : index
    %392 = vector.load %arg9[%391, %c0_111] : memref<64x512xf32, #tpu.memory_space<vmem>>, vector<8x512xf32>
    %cst_112 = arith.constant dense<0.000000e+00> : vector<8x512xf32>
    %393 = tpu.matmul %386, %281, %cst_112 {dimension_numbers = #tpu.dot_dimension_numbers<[1], [1], [0], [0], [0, 0, 1, 0], [], []>} : vector<8x128xf32>, vector<512x128xf32>, vector<8x512xf32> -> vector<8x512xf32>
    %394 = arith.addf %392, %393 : vector<8x512xf32>
    %395 = vector.extract_strided_slice %394 {offsets = [0, 0], sizes = [8, 128], strides = [1, 1]} : vector<8x512xf32> to vector<8x128xf32>
    %396 = arith.negf %395 : vector<8x128xf32>
    %397 = math.exp %396 : vector<8x128xf32>
    %cst_113 = arith.constant 1.000000e+00 : f32
    %398 = vector.broadcast %cst_113 : f32 to vector<8x128xf32>
    %399 = arith.addf %398, %397 : vector<8x128xf32>
    %400 = arith.divf %398, %399 : vector<8x128xf32>
    %401 = vector.extract_strided_slice %394 {offsets = [0, 128], sizes = [8, 128], strides = [1, 1]} : vector<8x512xf32> to vector<8x128xf32>
    %402 = arith.negf %401 : vector<8x128xf32>
    %403 = math.exp %402 : vector<8x128xf32>
    %cst_114 = arith.constant 1.000000e+00 : f32
    %404 = vector.broadcast %cst_114 : f32 to vector<8x128xf32>
    %405 = arith.addf %404, %403 : vector<8x128xf32>
    %406 = arith.divf %404, %405 : vector<8x128xf32>
    %407 = vector.extract_strided_slice %394 {offsets = [0, 256], sizes = [8, 128], strides = [1, 1]} : vector<8x512xf32> to vector<8x128xf32>
    %408 = math.tanh %407 : vector<8x128xf32>
    %409 = vector.extract_strided_slice %394 {offsets = [0, 384], sizes = [8, 128], strides = [1, 1]} : vector<8x512xf32> to vector<8x128xf32>
    %410 = arith.negf %409 : vector<8x128xf32>
    %411 = math.exp %410 : vector<8x128xf32>
    %cst_115 = arith.constant 1.000000e+00 : f32
    %412 = vector.broadcast %cst_115 : f32 to vector<8x128xf32>
    %413 = arith.addf %412, %411 : vector<8x128xf32>
    %414 = arith.divf %412, %413 : vector<8x128xf32>
    %415 = arith.mulf %406, %384 : vector<8x128xf32>
    %416 = arith.mulf %400, %408 : vector<8x128xf32>
    %417 = arith.addf %415, %416 : vector<8x128xf32>
    %418 = math.tanh %417 : vector<8x128xf32>
    %419 = arith.mulf %414, %418 : vector<8x128xf32>
    %420 = arith.index_cast %390 : i32 to index
    %c0_116 = arith.constant 0 : index
    %421 = vector.load %arg10[%420, %c0_116] : memref<64x128xf32, #tpu.memory_space<vmem>>, vector<8x128xf32>
    tpu.vector_store %arg10[%420, %c0_116], %419 {strides = array<i32>} : memref<64x128xf32, #tpu.memory_space<vmem>>, vector<8x128xf32>,
    %c4_i32_117 = arith.constant 4 : i32
    %c8_i32_118 = arith.constant 8 : i32
    %422 = arith.muli %c4_i32_117, %c8_i32_118 : i32
    %423 = tpu.assume_multiple %422, 8 : i32
    %424 = arith.index_cast %423 : i32 to index
    %c0_119 = arith.constant 0 : index
    %425 = vector.load %arg9[%424, %c0_119] : memref<64x512xf32, #tpu.memory_space<vmem>>, vector<8x512xf32>
    %cst_120 = arith.constant dense<0.000000e+00> : vector<8x512xf32>
    %426 = tpu.matmul %419, %281, %cst_120 {dimension_numbers = #tpu.dot_dimension_numbers<[1], [1], [0], [0], [0, 0, 1, 0], [], []>} : vector<8x128xf32>, vector<512x128xf32>, vector<8x512xf32> -> vector<8x512xf32>
    %427 = arith.addf %425, %426 : vector<8x512xf32>
    %428 = vector.extract_strided_slice %427 {offsets = [0, 0], sizes = [8, 128], strides = [1, 1]} : vector<8x512xf32> to vector<8x128xf32>
    %429 = arith.negf %428 : vector<8x128xf32>
    %430 = math.exp %429 : vector<8x128xf32>
    %cst_121 = arith.constant 1.000000e+00 : f32
    %431 = vector.broadcast %cst_121 : f32 to vector<8x128xf32>
    %432 = arith.addf %431, %430 : vector<8x128xf32>
    %433 = arith.divf %431, %432 : vector<8x128xf32>
    %434 = vector.extract_strided_slice %427 {offsets = [0, 128], sizes = [8, 128], strides = [1, 1]} : vector<8x512xf32> to vector<8x128xf32>
    %435 = arith.negf %434 : vector<8x128xf32>
    %436 = math.exp %435 : vector<8x128xf32>
    %cst_122 = arith.constant 1.000000e+00 : f32
    %437 = vector.broadcast %cst_122 : f32 to vector<8x128xf32>
    %438 = arith.addf %437, %436 : vector<8x128xf32>
    %439 = arith.divf %437, %438 : vector<8x128xf32>
    %440 = vector.extract_strided_slice %427 {offsets = [0, 256], sizes = [8, 128], strides = [1, 1]} : vector<8x512xf32> to vector<8x128xf32>
    %441 = math.tanh %440 : vector<8x128xf32>
    %442 = vector.extract_strided_slice %427 {offsets = [0, 384], sizes = [8, 128], strides = [1, 1]} : vector<8x512xf32> to vector<8x128xf32>
    %443 = arith.negf %442 : vector<8x128xf32>
    %444 = math.exp %443 : vector<8x128xf32>
    %cst_123 = arith.constant 1.000000e+00 : f32
    %445 = vector.broadcast %cst_123 : f32 to vector<8x128xf32>
    %446 = arith.addf %445, %444 : vector<8x128xf32>
    %447 = arith.divf %445, %446 : vector<8x128xf32>
    %448 = arith.mulf %439, %417 : vector<8x128xf32>
    %449 = arith.mulf %433, %441 : vector<8x128xf32>
    %450 = arith.addf %448, %449 : vector<8x128xf32>
    %451 = math.tanh %450 : vector<8x128xf32>
    %452 = arith.mulf %447, %451 : vector<8x128xf32>
    %453 = arith.index_cast %423 : i32 to index
    %c0_124 = arith.constant 0 : index
    %454 = vector.load %arg10[%453, %c0_124] : memref<64x128xf32, #tpu.memory_space<vmem>>, vector<8x128xf32>
    tpu.vector_store %arg10[%453, %c0_124], %452 {strides = array<i32>} : memref<64x128xf32, #tpu.memory_space<vmem>>, vector<8x128xf32>,
    %c5_i32_125 = arith.constant 5 : i32
    %c8_i32_126 = arith.constant 8 : i32
    %455 = arith.muli %c5_i32_125, %c8_i32_126 : i32
    %456 = tpu.assume_multiple %455, 8 : i32
    %457 = arith.index_cast %456 : i32 to index
    %c0_127 = arith.constant 0 : index
    %458 = vector.load %arg9[%457, %c0_127] : memref<64x512xf32, #tpu.memory_space<vmem>>, vector<8x512xf32>
    %cst_128 = arith.constant dense<0.000000e+00> : vector<8x512xf32>
    %459 = tpu.matmul %452, %281, %cst_128 {dimension_numbers = #tpu.dot_dimension_numbers<[1], [1], [0], [0], [0, 0, 1, 0], [], []>} : vector<8x128xf32>, vector<512x128xf32>, vector<8x512xf32> -> vector<8x512xf32>
    %460 = arith.addf %458, %459 : vector<8x512xf32>
    %461 = vector.extract_strided_slice %460 {offsets = [0, 0], sizes = [8, 128], strides = [1, 1]} : vector<8x512xf32> to vector<8x128xf32>
    %462 = arith.negf %461 : vector<8x128xf32>
    %463 = math.exp %462 : vector<8x128xf32>
    %cst_129 = arith.constant 1.000000e+00 : f32
    %464 = vector.broadcast %cst_129 : f32 to vector<8x128xf32>
    %465 = arith.addf %464, %463 : vector<8x128xf32>
    %466 = arith.divf %464, %465 : vector<8x128xf32>
    %467 = vector.extract_strided_slice %460 {offsets = [0, 128], sizes = [8, 128], strides = [1, 1]} : vector<8x512xf32> to vector<8x128xf32>
    %468 = arith.negf %467 : vector<8x128xf32>
    %469 = math.exp %468 : vector<8x128xf32>
    %cst_130 = arith.constant 1.000000e+00 : f32
    %470 = vector.broadcast %cst_130 : f32 to vector<8x128xf32>
    %471 = arith.addf %470, %469 : vector<8x128xf32>
    %472 = arith.divf %470, %471 : vector<8x128xf32>
    %473 = vector.extract_strided_slice %460 {offsets = [0, 256], sizes = [8, 128], strides = [1, 1]} : vector<8x512xf32> to vector<8x128xf32>
    %474 = math.tanh %473 : vector<8x128xf32>
    %475 = vector.extract_strided_slice %460 {offsets = [0, 384], sizes = [8, 128], strides = [1, 1]} : vector<8x512xf32> to vector<8x128xf32>
    %476 = arith.negf %475 : vector<8x128xf32>
    %477 = math.exp %476 : vector<8x128xf32>
    %cst_131 = arith.constant 1.000000e+00 : f32
    %478 = vector.broadcast %cst_131 : f32 to vector<8x128xf32>
    %479 = arith.addf %478, %477 : vector<8x128xf32>
    %480 = arith.divf %478, %479 : vector<8x128xf32>
    %481 = arith.mulf %472, %450 : vector<8x128xf32>
    %482 = arith.mulf %466, %474 : vector<8x128xf32>
    %483 = arith.addf %481, %482 : vector<8x128xf32>
    %484 = math.tanh %483 : vector<8x128xf32>
    %485 = arith.mulf %480, %484 : vector<8x128xf32>
    %486 = arith.index_cast %456 : i32 to index
    %c0_132 = arith.constant 0 : index
    %487 = vector.load %arg10[%486, %c0_132] : memref<64x128xf32, #tpu.memory_space<vmem>>, vector<8x128xf32>
    tpu.vector_store %arg10[%486, %c0_132], %485 {strides = array<i32>} : memref<64x128xf32, #tpu.memory_space<vmem>>, vector<8x128xf32>,
    %c6_i32_133 = arith.constant 6 : i32
    %c8_i32_134 = arith.constant 8 : i32
    %488 = arith.muli %c6_i32_133, %c8_i32_134 : i32
    %489 = tpu.assume_multiple %488, 8 : i32
    %490 = arith.index_cast %489 : i32 to index
    %c0_135 = arith.constant 0 : index
    %491 = vector.load %arg9[%490, %c0_135] : memref<64x512xf32, #tpu.memory_space<vmem>>, vector<8x512xf32>
    %cst_136 = arith.constant dense<0.000000e+00> : vector<8x512xf32>
    %492 = tpu.matmul %485, %281, %cst_136 {dimension_numbers = #tpu.dot_dimension_numbers<[1], [1], [0], [0], [0, 0, 1, 0], [], []>} : vector<8x128xf32>, vector<512x128xf32>, vector<8x512xf32> -> vector<8x512xf32>
    %493 = arith.addf %491, %492 : vector<8x512xf32>
    %494 = vector.extract_strided_slice %493 {offsets = [0, 0], sizes = [8, 128], strides = [1, 1]} : vector<8x512xf32> to vector<8x128xf32>
    %495 = arith.negf %494 : vector<8x128xf32>
    %496 = math.exp %495 : vector<8x128xf32>
    %cst_137 = arith.constant 1.000000e+00 : f32
    %497 = vector.broadcast %cst_137 : f32 to vector<8x128xf32>
    %498 = arith.addf %497, %496 : vector<8x128xf32>
    %499 = arith.divf %497, %498 : vector<8x128xf32>
    %500 = vector.extract_strided_slice %493 {offsets = [0, 128], sizes = [8, 128], strides = [1, 1]} : vector<8x512xf32> to vector<8x128xf32>
    %501 = arith.negf %500 : vector<8x128xf32>
    %502 = math.exp %501 : vector<8x128xf32>
    %cst_138 = arith.constant 1.000000e+00 : f32
    %503 = vector.broadcast %cst_138 : f32 to vector<8x128xf32>
    %504 = arith.addf %503, %502 : vector<8x128xf32>
    %505 = arith.divf %503, %504 : vector<8x128xf32>
    %506 = vector.extract_strided_slice %493 {offsets = [0, 256], sizes = [8, 128], strides = [1, 1]} : vector<8x512xf32> to vector<8x128xf32>
    %507 = math.tanh %506 : vector<8x128xf32>
    %508 = vector.extract_strided_slice %493 {offsets = [0, 384], sizes = [8, 128], strides = [1, 1]} : vector<8x512xf32> to vector<8x128xf32>
    %509 = arith.negf %508 : vector<8x128xf32>
    %510 = math.exp %509 : vector<8x128xf32>
    %cst_139 = arith.constant 1.000000e+00 : f32
    %511 = vector.broadcast %cst_139 : f32 to vector<8x128xf32>
    %512 = arith.addf %511, %510 : vector<8x128xf32>
    %513 = arith.divf %511, %512 : vector<8x128xf32>
    %514 = arith.mulf %505, %483 : vector<8x128xf32>
    %515 = arith.mulf %499, %507 : vector<8x128xf32>
    %516 = arith.addf %514, %515 : vector<8x128xf32>
    %517 = math.tanh %516 : vector<8x128xf32>
    %518 = arith.mulf %513, %517 : vector<8x128xf32>
    %519 = arith.index_cast %489 : i32 to index
    %c0_140 = arith.constant 0 : index
    %520 = vector.load %arg10[%519, %c0_140] : memref<64x128xf32, #tpu.memory_space<vmem>>, vector<8x128xf32>
    tpu.vector_store %arg10[%519, %c0_140], %518 {strides = array<i32>} : memref<64x128xf32, #tpu.memory_space<vmem>>, vector<8x128xf32>,
    %c7_i32_141 = arith.constant 7 : i32
    %c8_i32_142 = arith.constant 8 : i32
    %521 = arith.muli %c7_i32_141, %c8_i32_142 : i32
    %522 = tpu.assume_multiple %521, 8 : i32
    %523 = arith.index_cast %522 : i32 to index
    %c0_143 = arith.constant 0 : index
    %524 = vector.load %arg9[%523, %c0_143] : memref<64x512xf32, #tpu.memory_space<vmem>>, vector<8x512xf32>
    %cst_144 = arith.constant dense<0.000000e+00> : vector<8x512xf32>
    %525 = tpu.matmul %518, %281, %cst_144 {dimension_numbers = #tpu.dot_dimension_numbers<[1], [1], [0], [0], [0, 0, 1, 0], [], []>} : vector<8x128xf32>, vector<512x128xf32>, vector<8x512xf32> -> vector<8x512xf32>
    %526 = arith.addf %524, %525 : vector<8x512xf32>
    %527 = vector.extract_strided_slice %526 {offsets = [0, 0], sizes = [8, 128], strides = [1, 1]} : vector<8x512xf32> to vector<8x128xf32>
    %528 = arith.negf %527 : vector<8x128xf32>
    %529 = math.exp %528 : vector<8x128xf32>
    %cst_145 = arith.constant 1.000000e+00 : f32
    %530 = vector.broadcast %cst_145 : f32 to vector<8x128xf32>
    %531 = arith.addf %530, %529 : vector<8x128xf32>
    %532 = arith.divf %530, %531 : vector<8x128xf32>
    %533 = vector.extract_strided_slice %526 {offsets = [0, 128], sizes = [8, 128], strides = [1, 1]} : vector<8x512xf32> to vector<8x128xf32>
    %534 = arith.negf %533 : vector<8x128xf32>
    %535 = math.exp %534 : vector<8x128xf32>
    %cst_146 = arith.constant 1.000000e+00 : f32
    %536 = vector.broadcast %cst_146 : f32 to vector<8x128xf32>
    %537 = arith.addf %536, %535 : vector<8x128xf32>
    %538 = arith.divf %536, %537 : vector<8x128xf32>
    %539 = vector.extract_strided_slice %526 {offsets = [0, 256], sizes = [8, 128], strides = [1, 1]} : vector<8x512xf32> to vector<8x128xf32>
    %540 = math.tanh %539 : vector<8x128xf32>
    %541 = vector.extract_strided_slice %526 {offsets = [0, 384], sizes = [8, 128], strides = [1, 1]} : vector<8x512xf32> to vector<8x128xf32>
    %542 = arith.negf %541 : vector<8x128xf32>
    %543 = math.exp %542 : vector<8x128xf32>
    %cst_147 = arith.constant 1.000000e+00 : f32
    %544 = vector.broadcast %cst_147 : f32 to vector<8x128xf32>
    %545 = arith.addf %544, %543 : vector<8x128xf32>
    %546 = arith.divf %544, %545 : vector<8x128xf32>
    %547 = arith.mulf %538, %516 : vector<8x128xf32>
    %548 = arith.mulf %532, %540 : vector<8x128xf32>
    %549 = arith.addf %547, %548 : vector<8x128xf32>
    %550 = math.tanh %549 : vector<8x128xf32>
    %551 = arith.mulf %546, %550 : vector<8x128xf32>
    %552 = arith.index_cast %522 : i32 to index
    %c0_148 = arith.constant 0 : index
    %553 = vector.load %arg10[%552, %c0_148] : memref<64x128xf32, #tpu.memory_space<vmem>>, vector<8x128xf32>
    tpu.vector_store %arg10[%552, %c0_148], %551 {strides = array<i32>} : memref<64x128xf32, #tpu.memory_space<vmem>>, vector<8x128xf32>,
    %c8_i32_149 = arith.constant 8 : i32
    %c0_150 = arith.constant 0 : index
    %c0_151 = arith.constant 0 : index
    %554 = vector.load %arg10[%c0_150, %c0_151] : memref<64x128xf32, #tpu.memory_space<vmem>>, vector<64x128xf32>
    %c1_152 = arith.constant 1 : index
    %c0_153 = arith.constant 0 : index
    %c0_154 = arith.constant 0 : index
    %555 = vector.load %arg3[%c1_152, %c0_153, %c0_154] : memref<2x512x128xf32, #tpu.memory_space<vmem>>, vector<1x512x128xf32>
    %556 = vector.shape_cast %555 : vector<1x512x128xf32> to vector<512x128xf32>
    %c2 = arith.constant 2 : index
    %c0_155 = arith.constant 0 : index
    %c0_156 = arith.constant 0 : index
    %557 = vector.load %arg4[%c2, %c0_155, %c0_156] : memref<3x512x128xf32, #tpu.memory_space<vmem>>, vector<1x512x128xf32>
    %558 = vector.shape_cast %557 : vector<1x512x128xf32> to vector<512x128xf32>
    %c2_157 = arith.constant 2 : index
    %c0_158 = arith.constant 0 : index
    %c0_159 = arith.constant 0 : index
    %559 = vector.load %arg5[%c2_157, %c0_158, %c0_159] : memref<3x1x512xf32, #tpu.memory_space<vmem>>, vector<1x1x512xf32>
    %560 = vector.shape_cast %559 : vector<1x1x512xf32> to vector<1x512xf32>
    %cst_160 = arith.constant dense<0.000000e+00> : vector<64x512xf32>
    %561 = tpu.matmul %554, %556, %cst_160 {dimension_numbers = #tpu.dot_dimension_numbers<[1], [1], [0], [0], [0, 0, 1, 0], [], []>} : vector<64x128xf32>, vector<512x128xf32>, vector<64x512xf32> -> vector<64x512xf32>
    %562 = vector.broadcast %560 : vector<1x512xf32> to vector<64x512xf32>
    %563 = arith.addf %561, %562 : vector<64x512xf32>
    %c0_161 = arith.constant 0 : index
    %c0_162 = arith.constant 0 : index
    %564 = vector.load %arg9[%c0_161, %c0_162] : memref<64x512xf32, #tpu.memory_space<vmem>>, vector<64x512xf32>
    tpu.vector_store %arg9[%c0_161, %c0_162], %563 {strides = array<i32>} : memref<64x512xf32, #tpu.memory_space<vmem>>, vector<64x512xf32>,
    %cst_163 = arith.constant 0.000000e+00 : f32
    %565 = vector.broadcast %cst_163 : f32 to vector<8x128xf32>
    %cst_164 = arith.constant 0.000000e+00 : f32
    %566 = vector.broadcast %cst_164 : f32 to vector<8x128xf32>
    %c0_i32_165 = arith.constant 0 : i32
    %c8_i32_166 = arith.constant 8 : i32
    %567 = arith.muli %c0_i32_165, %c8_i32_166 : i32
    %568 = tpu.assume_multiple %567, 8 : i32
    %569 = arith.index_cast %568 : i32 to index
    %c0_167 = arith.constant 0 : index
    %570 = vector.load %arg9[%569, %c0_167] : memref<64x512xf32, #tpu.memory_space<vmem>>, vector<8x512xf32>
    %cst_168 = arith.constant dense<0.000000e+00> : vector<8x512xf32>
    %571 = tpu.matmul %565, %558, %cst_168 {dimension_numbers = #tpu.dot_dimension_numbers<[1], [1], [0], [0], [0, 0, 1, 0], [], []>} : vector<8x128xf32>, vector<512x128xf32>, vector<8x512xf32> -> vector<8x512xf32>
    %572 = arith.addf %570, %571 : vector<8x512xf32>
    %573 = vector.extract_strided_slice %572 {offsets = [0, 0], sizes = [8, 128], strides = [1, 1]} : vector<8x512xf32> to vector<8x128xf32>
    %574 = arith.negf %573 : vector<8x128xf32>
    %575 = math.exp %574 : vector<8x128xf32>
    %cst_169 = arith.constant 1.000000e+00 : f32
    %576 = vector.broadcast %cst_169 : f32 to vector<8x128xf32>
    %577 = arith.addf %576, %575 : vector<8x128xf32>
    %578 = arith.divf %576, %577 : vector<8x128xf32>
    %579 = vector.extract_strided_slice %572 {offsets = [0, 128], sizes = [8, 128], strides = [1, 1]} : vector<8x512xf32> to vector<8x128xf32>
    %580 = arith.negf %579 : vector<8x128xf32>
    %581 = math.exp %580 : vector<8x128xf32>
    %cst_170 = arith.constant 1.000000e+00 : f32
    %582 = vector.broadcast %cst_170 : f32 to vector<8x128xf32>
    %583 = arith.addf %582, %581 : vector<8x128xf32>
    %584 = arith.divf %582, %583 : vector<8x128xf32>
    %585 = vector.extract_strided_slice %572 {offsets = [0, 256], sizes = [8, 128], strides = [1, 1]} : vector<8x512xf32> to vector<8x128xf32>
    %586 = math.tanh %585 : vector<8x128xf32>
    %587 = vector.extract_strided_slice %572 {offsets = [0, 384], sizes = [8, 128], strides = [1, 1]} : vector<8x512xf32> to vector<8x128xf32>
    %588 = arith.negf %587 : vector<8x128xf32>
    %589 = math.exp %588 : vector<8x128xf32>
    %cst_171 = arith.constant 1.000000e+00 : f32
    %590 = vector.broadcast %cst_171 : f32 to vector<8x128xf32>
    %591 = arith.addf %590, %589 : vector<8x128xf32>
    %592 = arith.divf %590, %591 : vector<8x128xf32>
    %593 = arith.mulf %584, %566 : vector<8x128xf32>
    %594 = arith.mulf %578, %586 : vector<8x128xf32>
    %595 = arith.addf %593, %594 : vector<8x128xf32>
    %596 = math.tanh %595 : vector<8x128xf32>
    %597 = arith.mulf %592, %596 : vector<8x128xf32>
    %c1_i32_172 = arith.constant 1 : i32
    %c8_i32_173 = arith.constant 8 : i32
    %598 = arith.muli %c1_i32_172, %c8_i32_173 : i32
    %599 = tpu.assume_multiple %598, 8 : i32
    %600 = arith.index_cast %599 : i32 to index
    %c0_174 = arith.constant 0 : index
    %601 = vector.load %arg9[%600, %c0_174] : memref<64x512xf32, #tpu.memory_space<vmem>>, vector<8x512xf32>
    %cst_175 = arith.constant dense<0.000000e+00> : vector<8x512xf32>
    %602 = tpu.matmul %597, %558, %cst_175 {dimension_numbers = #tpu.dot_dimension_numbers<[1], [1], [0], [0], [0, 0, 1, 0], [], []>} : vector<8x128xf32>, vector<512x128xf32>, vector<8x512xf32> -> vector<8x512xf32>
    %603 = arith.addf %601, %602 : vector<8x512xf32>
    %604 = vector.extract_strided_slice %603 {offsets = [0, 0], sizes = [8, 128], strides = [1, 1]} : vector<8x512xf32> to vector<8x128xf32>
    %605 = arith.negf %604 : vector<8x128xf32>
    %606 = math.exp %605 : vector<8x128xf32>
    %cst_176 = arith.constant 1.000000e+00 : f32
    %607 = vector.broadcast %cst_176 : f32 to vector<8x128xf32>
    %608 = arith.addf %607, %606 : vector<8x128xf32>
    %609 = arith.divf %607, %608 : vector<8x128xf32>
    %610 = vector.extract_strided_slice %603 {offsets = [0, 128], sizes = [8, 128], strides = [1, 1]} : vector<8x512xf32> to vector<8x128xf32>
    %611 = arith.negf %610 : vector<8x128xf32>
    %612 = math.exp %611 : vector<8x128xf32>
    %cst_177 = arith.constant 1.000000e+00 : f32
    %613 = vector.broadcast %cst_177 : f32 to vector<8x128xf32>
    %614 = arith.addf %613, %612 : vector<8x128xf32>
    %615 = arith.divf %613, %614 : vector<8x128xf32>
    %616 = vector.extract_strided_slice %603 {offsets = [0, 256], sizes = [8, 128], strides = [1, 1]} : vector<8x512xf32> to vector<8x128xf32>
    %617 = math.tanh %616 : vector<8x128xf32>
    %618 = vector.extract_strided_slice %603 {offsets = [0, 384], sizes = [8, 128], strides = [1, 1]} : vector<8x512xf32> to vector<8x128xf32>
    %619 = arith.negf %618 : vector<8x128xf32>
    %620 = math.exp %619 : vector<8x128xf32>
    %cst_178 = arith.constant 1.000000e+00 : f32
    %621 = vector.broadcast %cst_178 : f32 to vector<8x128xf32>
    %622 = arith.addf %621, %620 : vector<8x128xf32>
    %623 = arith.divf %621, %622 : vector<8x128xf32>
    %624 = arith.mulf %615, %595 : vector<8x128xf32>
    %625 = arith.mulf %609, %617 : vector<8x128xf32>
    %626 = arith.addf %624, %625 : vector<8x128xf32>
    %627 = math.tanh %626 : vector<8x128xf32>
    %628 = arith.mulf %623, %627 : vector<8x128xf32>
    %c2_i32_179 = arith.constant 2 : i32
    %c8_i32_180 = arith.constant 8 : i32
    %629 = arith.muli %c2_i32_179, %c8_i32_180 : i32
    %630 = tpu.assume_multiple %629, 8 : i32
    %631 = arith.index_cast %630 : i32 to index
    %c0_181 = arith.constant 0 : index
    %632 = vector.load %arg9[%631, %c0_181] : memref<64x512xf32, #tpu.memory_space<vmem>>, vector<8x512xf32>
    %cst_182 = arith.constant dense<0.000000e+00> : vector<8x512xf32>
    %633 = tpu.matmul %628, %558, %cst_182 {dimension_numbers = #tpu.dot_dimension_numbers<[1], [1], [0], [0], [0, 0, 1, 0], [], []>} : vector<8x128xf32>, vector<512x128xf32>, vector<8x512xf32> -> vector<8x512xf32>
    %634 = arith.addf %632, %633 : vector<8x512xf32>
    %635 = vector.extract_strided_slice %634 {offsets = [0, 0], sizes = [8, 128], strides = [1, 1]} : vector<8x512xf32> to vector<8x128xf32>
    %636 = arith.negf %635 : vector<8x128xf32>
    %637 = math.exp %636 : vector<8x128xf32>
    %cst_183 = arith.constant 1.000000e+00 : f32
    %638 = vector.broadcast %cst_183 : f32 to vector<8x128xf32>
    %639 = arith.addf %638, %637 : vector<8x128xf32>
    %640 = arith.divf %638, %639 : vector<8x128xf32>
    %641 = vector.extract_strided_slice %634 {offsets = [0, 128], sizes = [8, 128], strides = [1, 1]} : vector<8x512xf32> to vector<8x128xf32>
    %642 = arith.negf %641 : vector<8x128xf32>
    %643 = math.exp %642 : vector<8x128xf32>
    %cst_184 = arith.constant 1.000000e+00 : f32
    %644 = vector.broadcast %cst_184 : f32 to vector<8x128xf32>
    %645 = arith.addf %644, %643 : vector<8x128xf32>
    %646 = arith.divf %644, %645 : vector<8x128xf32>
    %647 = vector.extract_strided_slice %634 {offsets = [0, 256], sizes = [8, 128], strides = [1, 1]} : vector<8x512xf32> to vector<8x128xf32>
    %648 = math.tanh %647 : vector<8x128xf32>
    %649 = vector.extract_strided_slice %634 {offsets = [0, 384], sizes = [8, 128], strides = [1, 1]} : vector<8x512xf32> to vector<8x128xf32>
    %650 = arith.negf %649 : vector<8x128xf32>
    %651 = math.exp %650 : vector<8x128xf32>
    %cst_185 = arith.constant 1.000000e+00 : f32
    %652 = vector.broadcast %cst_185 : f32 to vector<8x128xf32>
    %653 = arith.addf %652, %651 : vector<8x128xf32>
    %654 = arith.divf %652, %653 : vector<8x128xf32>
    %655 = arith.mulf %646, %626 : vector<8x128xf32>
    %656 = arith.mulf %640, %648 : vector<8x128xf32>
    %657 = arith.addf %655, %656 : vector<8x128xf32>
    %658 = math.tanh %657 : vector<8x128xf32>
    %659 = arith.mulf %654, %658 : vector<8x128xf32>
    %c3_i32_186 = arith.constant 3 : i32
    %c8_i32_187 = arith.constant 8 : i32
    %660 = arith.muli %c3_i32_186, %c8_i32_187 : i32
    %661 = tpu.assume_multiple %660, 8 : i32
    %662 = arith.index_cast %661 : i32 to index
    %c0_188 = arith.constant 0 : index
    %663 = vector.load %arg9[%662, %c0_188] : memref<64x512xf32, #tpu.memory_space<vmem>>, vector<8x512xf32>
    %cst_189 = arith.constant dense<0.000000e+00> : vector<8x512xf32>
    %664 = tpu.matmul %659, %558, %cst_189 {dimension_numbers = #tpu.dot_dimension_numbers<[1], [1], [0], [0], [0, 0, 1, 0], [], []>} : vector<8x128xf32>, vector<512x128xf32>, vector<8x512xf32> -> vector<8x512xf32>
    %665 = arith.addf %663, %664 : vector<8x512xf32>
    %666 = vector.extract_strided_slice %665 {offsets = [0, 0], sizes = [8, 128], strides = [1, 1]} : vector<8x512xf32> to vector<8x128xf32>
    %667 = arith.negf %666 : vector<8x128xf32>
    %668 = math.exp %667 : vector<8x128xf32>
    %cst_190 = arith.constant 1.000000e+00 : f32
    %669 = vector.broadcast %cst_190 : f32 to vector<8x128xf32>
    %670 = arith.addf %669, %668 : vector<8x128xf32>
    %671 = arith.divf %669, %670 : vector<8x128xf32>
    %672 = vector.extract_strided_slice %665 {offsets = [0, 128], sizes = [8, 128], strides = [1, 1]} : vector<8x512xf32> to vector<8x128xf32>
    %673 = arith.negf %672 : vector<8x128xf32>
    %674 = math.exp %673 : vector<8x128xf32>
    %cst_191 = arith.constant 1.000000e+00 : f32
    %675 = vector.broadcast %cst_191 : f32 to vector<8x128xf32>
    %676 = arith.addf %675, %674 : vector<8x128xf32>
    %677 = arith.divf %675, %676 : vector<8x128xf32>
    %678 = vector.extract_strided_slice %665 {offsets = [0, 256], sizes = [8, 128], strides = [1, 1]} : vector<8x512xf32> to vector<8x128xf32>
    %679 = math.tanh %678 : vector<8x128xf32>
    %680 = vector.extract_strided_slice %665 {offsets = [0, 384], sizes = [8, 128], strides = [1, 1]} : vector<8x512xf32> to vector<8x128xf32>
    %681 = arith.negf %680 : vector<8x128xf32>
    %682 = math.exp %681 : vector<8x128xf32>
    %cst_192 = arith.constant 1.000000e+00 : f32
    %683 = vector.broadcast %cst_192 : f32 to vector<8x128xf32>
    %684 = arith.addf %683, %682 : vector<8x128xf32>
    %685 = arith.divf %683, %684 : vector<8x128xf32>
    %686 = arith.mulf %677, %657 : vector<8x128xf32>
    %687 = arith.mulf %671, %679 : vector<8x128xf32>
    %688 = arith.addf %686, %687 : vector<8x128xf32>
    %689 = math.tanh %688 : vector<8x128xf32>
    %690 = arith.mulf %685, %689 : vector<8x128xf32>
    %c4_i32_193 = arith.constant 4 : i32
    %c8_i32_194 = arith.constant 8 : i32
    %691 = arith.muli %c4_i32_193, %c8_i32_194 : i32
    %692 = tpu.assume_multiple %691, 8 : i32
    %693 = arith.index_cast %692 : i32 to index
    %c0_195 = arith.constant 0 : index
    %694 = vector.load %arg9[%693, %c0_195] : memref<64x512xf32, #tpu.memory_space<vmem>>, vector<8x512xf32>
    %cst_196 = arith.constant dense<0.000000e+00> : vector<8x512xf32>
    %695 = tpu.matmul %690, %558, %cst_196 {dimension_numbers = #tpu.dot_dimension_numbers<[1], [1], [0], [0], [0, 0, 1, 0], [], []>} : vector<8x128xf32>, vector<512x128xf32>, vector<8x512xf32> -> vector<8x512xf32>
    %696 = arith.addf %694, %695 : vector<8x512xf32>
    %697 = vector.extract_strided_slice %696 {offsets = [0, 0], sizes = [8, 128], strides = [1, 1]} : vector<8x512xf32> to vector<8x128xf32>
    %698 = arith.negf %697 : vector<8x128xf32>
    %699 = math.exp %698 : vector<8x128xf32>
    %cst_197 = arith.constant 1.000000e+00 : f32
    %700 = vector.broadcast %cst_197 : f32 to vector<8x128xf32>
    %701 = arith.addf %700, %699 : vector<8x128xf32>
    %702 = arith.divf %700, %701 : vector<8x128xf32>
    %703 = vector.extract_strided_slice %696 {offsets = [0, 128], sizes = [8, 128], strides = [1, 1]} : vector<8x512xf32> to vector<8x128xf32>
    %704 = arith.negf %703 : vector<8x128xf32>
    %705 = math.exp %704 : vector<8x128xf32>
    %cst_198 = arith.constant 1.000000e+00 : f32
    %706 = vector.broadcast %cst_198 : f32 to vector<8x128xf32>
    %707 = arith.addf %706, %705 : vector<8x128xf32>
    %708 = arith.divf %706, %707 : vector<8x128xf32>
    %709 = vector.extract_strided_slice %696 {offsets = [0, 256], sizes = [8, 128], strides = [1, 1]} : vector<8x512xf32> to vector<8x128xf32>
    %710 = math.tanh %709 : vector<8x128xf32>
    %711 = vector.extract_strided_slice %696 {offsets = [0, 384], sizes = [8, 128], strides = [1, 1]} : vector<8x512xf32> to vector<8x128xf32>
    %712 = arith.negf %711 : vector<8x128xf32>
    %713 = math.exp %712 : vector<8x128xf32>
    %cst_199 = arith.constant 1.000000e+00 : f32
    %714 = vector.broadcast %cst_199 : f32 to vector<8x128xf32>
    %715 = arith.addf %714, %713 : vector<8x128xf32>
    %716 = arith.divf %714, %715 : vector<8x128xf32>
    %717 = arith.mulf %708, %688 : vector<8x128xf32>
    %718 = arith.mulf %702, %710 : vector<8x128xf32>
    %719 = arith.addf %717, %718 : vector<8x128xf32>
    %720 = math.tanh %719 : vector<8x128xf32>
    %721 = arith.mulf %716, %720 : vector<8x128xf32>
    %c5_i32_200 = arith.constant 5 : i32
    %c8_i32_201 = arith.constant 8 : i32
    %722 = arith.muli %c5_i32_200, %c8_i32_201 : i32
    %723 = tpu.assume_multiple %722, 8 : i32
    %724 = arith.index_cast %723 : i32 to index
    %c0_202 = arith.constant 0 : index
    %725 = vector.load %arg9[%724, %c0_202] : memref<64x512xf32, #tpu.memory_space<vmem>>, vector<8x512xf32>
    %cst_203 = arith.constant dense<0.000000e+00> : vector<8x512xf32>
    %726 = tpu.matmul %721, %558, %cst_203 {dimension_numbers = #tpu.dot_dimension_numbers<[1], [1], [0], [0], [0, 0, 1, 0], [], []>} : vector<8x128xf32>, vector<512x128xf32>, vector<8x512xf32> -> vector<8x512xf32>
    %727 = arith.addf %725, %726 : vector<8x512xf32>
    %728 = vector.extract_strided_slice %727 {offsets = [0, 0], sizes = [8, 128], strides = [1, 1]} : vector<8x512xf32> to vector<8x128xf32>
    %729 = arith.negf %728 : vector<8x128xf32>
    %730 = math.exp %729 : vector<8x128xf32>
    %cst_204 = arith.constant 1.000000e+00 : f32
    %731 = vector.broadcast %cst_204 : f32 to vector<8x128xf32>
    %732 = arith.addf %731, %730 : vector<8x128xf32>
    %733 = arith.divf %731, %732 : vector<8x128xf32>
    %734 = vector.extract_strided_slice %727 {offsets = [0, 128], sizes = [8, 128], strides = [1, 1]} : vector<8x512xf32> to vector<8x128xf32>
    %735 = arith.negf %734 : vector<8x128xf32>
    %736 = math.exp %735 : vector<8x128xf32>
    %cst_205 = arith.constant 1.000000e+00 : f32
    %737 = vector.broadcast %cst_205 : f32 to vector<8x128xf32>
    %738 = arith.addf %737, %736 : vector<8x128xf32>
    %739 = arith.divf %737, %738 : vector<8x128xf32>
    %740 = vector.extract_strided_slice %727 {offsets = [0, 256], sizes = [8, 128], strides = [1, 1]} : vector<8x512xf32> to vector<8x128xf32>
    %741 = math.tanh %740 : vector<8x128xf32>
    %742 = vector.extract_strided_slice %727 {offsets = [0, 384], sizes = [8, 128], strides = [1, 1]} : vector<8x512xf32> to vector<8x128xf32>
    %743 = arith.negf %742 : vector<8x128xf32>
    %744 = math.exp %743 : vector<8x128xf32>
    %cst_206 = arith.constant 1.000000e+00 : f32
    %745 = vector.broadcast %cst_206 : f32 to vector<8x128xf32>
    %746 = arith.addf %745, %744 : vector<8x128xf32>
    %747 = arith.divf %745, %746 : vector<8x128xf32>
    %748 = arith.mulf %739, %719 : vector<8x128xf32>
    %749 = arith.mulf %733, %741 : vector<8x128xf32>
    %750 = arith.addf %748, %749 : vector<8x128xf32>
    %751 = math.tanh %750 : vector<8x128xf32>
    %752 = arith.mulf %747, %751 : vector<8x128xf32>
    %c6_i32_207 = arith.constant 6 : i32
    %c8_i32_208 = arith.constant 8 : i32
    %753 = arith.muli %c6_i32_207, %c8_i32_208 : i32
    %754 = tpu.assume_multiple %753, 8 : i32
    %755 = arith.index_cast %754 : i32 to index
    %c0_209 = arith.constant 0 : index
    %756 = vector.load %arg9[%755, %c0_209] : memref<64x512xf32, #tpu.memory_space<vmem>>, vector<8x512xf32>
    %cst_210 = arith.constant dense<0.000000e+00> : vector<8x512xf32>
    %757 = tpu.matmul %752, %558, %cst_210 {dimension_numbers = #tpu.dot_dimension_numbers<[1], [1], [0], [0], [0, 0, 1, 0], [], []>} : vector<8x128xf32>, vector<512x128xf32>, vector<8x512xf32> -> vector<8x512xf32>
    %758 = arith.addf %756, %757 : vector<8x512xf32>
    %759 = vector.extract_strided_slice %758 {offsets = [0, 0], sizes = [8, 128], strides = [1, 1]} : vector<8x512xf32> to vector<8x128xf32>
    %760 = arith.negf %759 : vector<8x128xf32>
    %761 = math.exp %760 : vector<8x128xf32>
    %cst_211 = arith.constant 1.000000e+00 : f32
    %762 = vector.broadcast %cst_211 : f32 to vector<8x128xf32>
    %763 = arith.addf %762, %761 : vector<8x128xf32>
    %764 = arith.divf %762, %763 : vector<8x128xf32>
    %765 = vector.extract_strided_slice %758 {offsets = [0, 128], sizes = [8, 128], strides = [1, 1]} : vector<8x512xf32> to vector<8x128xf32>
    %766 = arith.negf %765 : vector<8x128xf32>
    %767 = math.exp %766 : vector<8x128xf32>
    %cst_212 = arith.constant 1.000000e+00 : f32
    %768 = vector.broadcast %cst_212 : f32 to vector<8x128xf32>
    %769 = arith.addf %768, %767 : vector<8x128xf32>
    %770 = arith.divf %768, %769 : vector<8x128xf32>
    %771 = vector.extract_strided_slice %758 {offsets = [0, 256], sizes = [8, 128], strides = [1, 1]} : vector<8x512xf32> to vector<8x128xf32>
    %772 = math.tanh %771 : vector<8x128xf32>
    %773 = vector.extract_strided_slice %758 {offsets = [0, 384], sizes = [8, 128], strides = [1, 1]} : vector<8x512xf32> to vector<8x128xf32>
    %774 = arith.negf %773 : vector<8x128xf32>
    %775 = math.exp %774 : vector<8x128xf32>
    %cst_213 = arith.constant 1.000000e+00 : f32
    %776 = vector.broadcast %cst_213 : f32 to vector<8x128xf32>
    %777 = arith.addf %776, %775 : vector<8x128xf32>
    %778 = arith.divf %776, %777 : vector<8x128xf32>
    %779 = arith.mulf %770, %750 : vector<8x128xf32>
    %780 = arith.mulf %764, %772 : vector<8x128xf32>
    %781 = arith.addf %779, %780 : vector<8x128xf32>
    %782 = math.tanh %781 : vector<8x128xf32>
    %783 = arith.mulf %778, %782 : vector<8x128xf32>
    %c7_i32_214 = arith.constant 7 : i32
    %c8_i32_215 = arith.constant 8 : i32
    %784 = arith.muli %c7_i32_214, %c8_i32_215 : i32
    %785 = tpu.assume_multiple %784, 8 : i32
    %786 = arith.index_cast %785 : i32 to index
    %c0_216 = arith.constant 0 : index
    %787 = vector.load %arg9[%786, %c0_216] : memref<64x512xf32, #tpu.memory_space<vmem>>, vector<8x512xf32>
    %cst_217 = arith.constant dense<0.000000e+00> : vector<8x512xf32>
    %788 = tpu.matmul %783, %558, %cst_217 {dimension_numbers = #tpu.dot_dimension_numbers<[1], [1], [0], [0], [0, 0, 1, 0], [], []>} : vector<8x128xf32>, vector<512x128xf32>, vector<8x512xf32> -> vector<8x512xf32>
    %789 = arith.addf %787, %788 : vector<8x512xf32>
    %790 = vector.extract_strided_slice %789 {offsets = [0, 0], sizes = [8, 128], strides = [1, 1]} : vector<8x512xf32> to vector<8x128xf32>
    %791 = arith.negf %790 : vector<8x128xf32>
    %792 = math.exp %791 : vector<8x128xf32>
    %cst_218 = arith.constant 1.000000e+00 : f32
    %793 = vector.broadcast %cst_218 : f32 to vector<8x128xf32>
    %794 = arith.addf %793, %792 : vector<8x128xf32>
    %795 = arith.divf %793, %794 : vector<8x128xf32>
    %796 = vector.extract_strided_slice %789 {offsets = [0, 128], sizes = [8, 128], strides = [1, 1]} : vector<8x512xf32> to vector<8x128xf32>
    %797 = arith.negf %796 : vector<8x128xf32>
    %798 = math.exp %797 : vector<8x128xf32>
    %cst_219 = arith.constant 1.000000e+00 : f32
    %799 = vector.broadcast %cst_219 : f32 to vector<8x128xf32>
    %800 = arith.addf %799, %798 : vector<8x128xf32>
    %801 = arith.divf %799, %800 : vector<8x128xf32>
    %802 = vector.extract_strided_slice %789 {offsets = [0, 256], sizes = [8, 128], strides = [1, 1]} : vector<8x512xf32> to vector<8x128xf32>
    %803 = math.tanh %802 : vector<8x128xf32>
    %804 = vector.extract_strided_slice %789 {offsets = [0, 384], sizes = [8, 128], strides = [1, 1]} : vector<8x512xf32> to vector<8x128xf32>
    %805 = arith.negf %804 : vector<8x128xf32>
    %806 = math.exp %805 : vector<8x128xf32>
    %cst_220 = arith.constant 1.000000e+00 : f32
    %807 = vector.broadcast %cst_220 : f32 to vector<8x128xf32>
    %808 = arith.addf %807, %806 : vector<8x128xf32>
    %809 = arith.divf %807, %808 : vector<8x128xf32>
    %810 = arith.mulf %801, %781 : vector<8x128xf32>
    %811 = arith.mulf %795, %803 : vector<8x128xf32>
    %812 = arith.addf %810, %811 : vector<8x128xf32>
    %813 = math.tanh %812 : vector<8x128xf32>
    %814 = arith.mulf %809, %813 : vector<8x128xf32>
    %c8_i32_221 = arith.constant 8 : i32
    %c0_222 = arith.constant 0 : index
    %c0_223 = arith.constant 0 : index
    %815 = vector.load %arg6[%c0_222, %c0_223] : memref<128x128xf32, #tpu.memory_space<vmem>>, vector<128x128xf32>
    %cst_224 = arith.constant dense<0.000000e+00> : vector<8x128xf32>
    %816 = tpu.matmul %814, %815, %cst_224 {dimension_numbers = #tpu.dot_dimension_numbers<[1], [1], [0], [0], [0, 0, 1, 0], [], []>} : vector<8x128xf32>, vector<128x128xf32>, vector<8x128xf32> -> vector<8x128xf32>
    %c0_225 = arith.constant 0 : index
    %c0_226 = arith.constant 0 : index
    %817 = vector.load %arg7[%c0_225, %c0_226] : memref<1x128xf32, #tpu.memory_space<vmem>>, vector<1x128xf32>
    %818 = vector.broadcast %817 : vector<1x128xf32> to vector<8x128xf32>
    %819 = arith.addf %816, %818 : vector<8x128xf32>
    %820 = arith.mulf %819, %819 : vector<8x128xf32>
    %cst_227 = arith.constant dense<0.000000e+00> : vector<8xf32>
    %821 = vector.multi_reduction <add>, %820, %cst_227 [1] : vector<8x128xf32> to vector<8xf32>
    %822 = vector.shape_cast %821 : vector<8xf32> to vector<8x1xf32>
    %cst_228 = arith.constant 9.99999996E-13 : f32
    %823 = vector.broadcast %cst_228 : f32 to vector<8x1xf32>
    %824 = arith.addf %822, %823 : vector<8x1xf32>
    %825 = math.rsqrt %824 : vector<8x1xf32>
    %826 = vector.broadcast %825 : vector<8x1xf32> to vector<8x128xf32>
    %827 = arith.mulf %819, %826 : vector<8x128xf32>
    %c0_229 = arith.constant 0 : index
    %c0_230 = arith.constant 0 : index
    %828 = vector.load %arg8[%c0_229, %c0_230] : memref<8x128xf32, #tpu.memory_space<vmem>>, vector<8x128xf32>
    tpu.vector_store %arg8[%c0_229, %c0_230], %827 {strides = array<i32>} : memref<8x128xf32, #tpu.memory_space<vmem>>, vector<8x128xf32>,
    return
  }
  func.func @transform_0(%arg0: i32) -> (i32, i32, i32) {
    %c0_i32 = arith.constant 0 : i32
    %c0_i32_0 = arith.constant 0 : i32
    %c0_i32_1 = arith.constant 0 : i32
    return %c0_i32, %arg0, %c0_i32_0 : i32, i32, i32
  }
  func.func @transform_1(%arg0: i32) -> (i32, i32) {
    %c0_i32 = arith.constant 0 : i32
    %c0_i32_0 = arith.constant 0 : i32
    %c0_i32_1 = arith.constant 0 : i32
    return %c0_i32, %c0_i32_0 : i32, i32
  }
  func.func @transform_2(%arg0: i32) -> (i32, i32, i32) {
    %c0_i32 = arith.constant 0 : i32
    %c0_i32_0 = arith.constant 0 : i32
    %c0_i32_1 = arith.constant 0 : i32
    %c0_i32_2 = arith.constant 0 : i32
    return %c0_i32, %c0_i32_0, %c0_i32_1 : i32, i32, i32
  }
  func.func @transform_3(%arg0: i32) -> (i32, i32, i32) {
    %c0_i32 = arith.constant 0 : i32
    %c0_i32_0 = arith.constant 0 : i32
    %c0_i32_1 = arith.constant 0 : i32
    %c0_i32_2 = arith.constant 0 : i32
    return %c0_i32, %c0_i32_0, %c0_i32_1 : i32, i32, i32
  }
  func.func @transform_4(%arg0: i32) -> (i32, i32, i32) {
    %c0_i32 = arith.constant 0 : i32
    %c0_i32_0 = arith.constant 0 : i32
    %c0_i32_1 = arith.constant 0 : i32
    %c0_i32_2 = arith.constant 0 : i32
    return %c0_i32, %c0_i32_0, %c0_i32_1 : i32, i32, i32
  }
  func.func @transform_5(%arg0: i32) -> (i32, i32) {
    %c0_i32 = arith.constant 0 : i32
    %c0_i32_0 = arith.constant 0 : i32
    %c0_i32_1 = arith.constant 0 : i32
    return %c0_i32, %c0_i32_0 : i32, i32
  }
  func.func @transform_6(%arg0: i32) -> (i32, i32) {
    %c0_i32 = arith.constant 0 : i32
    %c0_i32_0 = arith.constant 0 : i32
    %c0_i32_1 = arith.constant 0 : i32
    return %c0_i32, %c0_i32_0 : i32, i32
  }
  func.func @transform_7(%arg0: i32) -> (i32, i32) {
    %c0_i32 = arith.constant 0 : i32
    %c0_i32_0 = arith.constant 0 : i32
    return %arg0, %c0_i32 : i32, i32
  }
}

</mosaic_0001>

<bundles_post_ra>
// kernel: tpu_custom_call.1
= control target key start
LH: loop header
LB: loop body
LE: loop exit
PB: predicated region body
PF: predicated region fallthrough
CT: control target
= control target key end

     0   :  { %12 = vsyncpa [#allocation5], 0  ;;  %s12024_s0 = inlined_call_operand.vmem [shape: f32[8,8,16], index: 0, kind: input, shape index: {}]   ;;  %s12025_s1 = inlined_call_operand.vmem [shape: f32[512,16], index: 1, kind: input, shape index: {}]   ;;  %s12026_s2 = inlined_call_operand.hbm [shape: f32[2,512,128], index: 2, kind: input, shape index: {}]   ;;  %s12027_s3 = inlined_call_operand.hbm [shape: f32[3,512,128], index: 3, kind: input, shape index: {}]   ;;  %s12028_s4 = inlined_call_operand.vmem [shape: f32[3,1,512], index: 4, kind: input, shape index: {}]   ;;  %s12029_s5 = inlined_call_operand.vmem [shape: f32[128,128], index: 5, kind: input, shape index: {}]   ;;  %s12030_s6 = inlined_call_operand.vmem [shape: f32[1,128], index: 6, kind: input, shape index: {}]   ;;  %s12031_s7 = inlined_call_operand.hbm [shape: f32[8,128], index: 7, kind: output, shape index: {}]  }
   0x1   :  { %13 = vsyncpa [#allocation8], 0 }
   0x2   :  { %14 = vsyncpa [#allocation6], 0  ;;  %s8649_s24 = smov [#allocation4]  }
   0x3   :  { %s24_s25 = sshll.u32 %s8649_s24, 4  ;;  %s25_s25 = int_to_ptr.vmem [resolvable:$true] %s24_s25 }
   0x4   :  { %s8591_s26 = scalar_lea.vmem %s25_s25, 16384  ;;  %p8596_p1 = scmp.lt.s32.totalorder %s25_s25, %s25_s25 }
   0x5   :  { %p8592_p0 = scmp.ne.s32.totalorder %s25_s25, %s8591_s26  ;;  %p8597_p2 = scmp.lt.s32.totalorder %s8591_s26, %s8591_s26 }
   0x7   :  { %p8598_p3 = por %p8597_p2, %p8596_p1 }
   0x9   :  { %p8599_p4 = pnand %p8598_p3, %p8592_p0 }
   0xb   :  { %8602 = shalt.err (!%p8599_p4)
}
   0xc   :  { %s8650_s27 = smov 128   ;;  %s8651_s28 = smov 8  }
   0xd   :  { %30 = dma.hbm_to_vmem [thread:$0]  %s12026_s2, 16384, %s25_s25, [#allocation5], %s8650_s27, %s8650_s27, %s8651_s28  }
   0xe   :  { %s8652_s8 = smov [#allocation7]  }
   0xf   :  { %s36_s9 = sshll.u32 %s8652_s8, 4  ;;  %s37_s9 = int_to_ptr.vmem [resolvable:$true] %s36_s9 }
  0x10   :  { %s8611_s10 = scalar_lea.vmem %s37_s9, 24576  ;;  %p8616_p6 = scmp.lt.s32.totalorder %s37_s9, %s37_s9 }
  0x11   :  { %p8612_p5 = scmp.ne.s32.totalorder %s37_s9, %s8611_s10  ;;  %p8617_p7 = scmp.lt.s32.totalorder %s8611_s10, %s8611_s10 }
  0x13   :  { %p8618_p8 = por %p8617_p7, %p8616_p6 }
  0x15   :  { %p8619_p9 = pnand %p8618_p8, %p8612_p5 }
  0x17   :  { %8622 = shalt.err (!%p8619_p9)
}
  0x18   :  { %42 = dma.hbm_to_vmem [thread:$0]  %s12027_s3, 24576, %s37_s9, [#allocation8], %s8650_s27, %s8650_s27, %s8651_s28  }
  0x19   :  { %8643 = dma.done.wait [#allocation5], 16384  }
  0x1a   :  { %8644 = vsyncadd [#allocation5], 4294950912 }
  0x1b   :  { %8645 = dma.done.wait [#allocation8], 24576  }
  0x1c   :  { %8646 = vsyncadd [#allocation8], 4294942720  ;;  %vm213_vm0 = vcmask 130048   ;;  %v94_v0 = vld [vmem:[%s12025_s1 + $0xf8] sm:$0xff]  ;;  %v93_v4 = vld [vmem:[%s12025_s1 + $0xf0] sm:$0xff]  ;;  %vm8654_vm1 = vmmov 0  }
  0x1d   :  { %v126_v1 = vld [vmem:[%s12025_s1 + $0x1f8] sm:$0xff]  ;;  %6026 = vmatprep.subr.msk.mxu0 %vm213_vm0, %v94_v0  ;;  %v125_v5 = vld [vmem:[%s12025_s1 + $0x1f0] sm:$0xff]  ;;  %v92_v8 = vld [vmem:[%s12025_s1 + $0xe8] sm:$0xff]  ;;  %s8655_s14 = smov [#allocation9]  }
  0x1e   :  { %v78_v2 = vld [vmem:[%s12025_s1 + $0x78] sm:$0xff]  ;;  %6074 = vmatprep.subr.msk.mxu1 %vm213_vm0, %v126_v1  ;;  %v77_v6 = vld [vmem:[%s12025_s1 + $0x70] sm:$0xff]  ;;  %v124_v9 = vld [vmem:[%s12025_s1 + $0x1e8] sm:$0xff]  ;;  %s5854_s15 = sshll.u32 %s8655_s14, 4  ;;  %s5855_s15 = int_to_ptr.vmem [resolvable:$true] %s5854_s15 }
  0x1f   :  { %v110_v3 = vld [vmem:[%s12025_s1 + $0x178] sm:$0xff]  ;;  %6027 = vmatpush3.xpose.msk.msra.mxu0 %vm213_vm0, %v78_v2  ;;  %v109_v7 = vld [vmem:[%s12025_s1 + $0x170] sm:$0xff]  ;;  %v76_v10 = vld [vmem:[%s12025_s1 + $0x68] sm:$0xff]  ;;  %s8623_s16 = scalar_lea.vmem %s5855_s15, 128  ;;  %p8628_p11 = scmp.lt.s32.totalorder %s5855_s15, %s5855_s15 }
  0x20   :  { %6075 = vmatpush3.xpose.msk.msra.mxu1 %vm213_vm0, %v110_v3  ;;  %6028 = vmatprep.subr.msk.mxu0 %vm213_vm0, %v93_v4  ;;  %v108_v11 = vld [vmem:[%s12025_s1 + $0x168] sm:$0xff]  ;;  %v91_v12 = vld [vmem:[%s12025_s1 + $0xe0] sm:$0xff]  ;;  %v90_v16 = vld [vmem:[%s12025_s1 + $0xd8] sm:$0xff]  ;;  %p8624_p10 = scmp.ne.s32.totalorder %s5855_s15, %s8623_s16  ;;  %p8629_p12 = scmp.lt.s32.totalorder %s8623_s16, %s8623_s16 }
  0x21   :  { %6076 = vmatprep.subr.msk.mxu1 %vm213_vm0, %v125_v5  ;;  %v123_v13 = vld [vmem:[%s12025_s1 + $0x1e0] sm:$0xff]  ;;  %v122_v17 = vld [vmem:[%s12025_s1 + $0x1d8] sm:$0xff]  ;;  %v89_v20 = vld [vmem:[%s12025_s1 + $0xd0] sm:$0xff] }
  0x22   :  { %v75_v14 = vld [vmem:[%s12025_s1 + $0x60] sm:$0xff]  ;;  %v74_v18 = vld [vmem:[%s12025_s1 + $0x58] sm:$0xff]  ;;  %v121_v21 = vld [vmem:[%s12025_s1 + $0x1d0] sm:$0xff]  ;;  %p8630_p13 = por %p8629_p12, %p8628_p11 }
  0x23   :  { %6029 = vmatpush3.xpose.msk.msra.mxu0 %vm213_vm0, %v77_v6  ;;  %v107_v15 = vld [vmem:[%s12025_s1 + $0x160] sm:$0xff]  ;;  %v106_v19 = vld [vmem:[%s12025_s1 + $0x158] sm:$0xff]  ;;  %v73_v22 = vld [vmem:[%s12025_s1 + $0x50] sm:$0xff] }
  0x24   :  { %6077 = vmatpush3.xpose.msk.msra.mxu1 %vm213_vm0, %v109_v7  ;;  %6030 = vmatprep.subr.msk.mxu0 %vm213_vm0, %v92_v8  ;;  %v105_v23 = vld [vmem:[%s12025_s1 + $0x150] sm:$0xff]  ;;  %v88_v24 = vld [vmem:[%s12025_s1 + $0xc8] sm:$0xff]  ;;  %v8805_v26 = vld [vmem:[%s12024_s0] sm:$0xff]  ;;  %p8631_p0 = pnand %p8630_p13, %p8624_p10 }
  0x25   :  { %6078 = vmatprep.subr.msk.mxu1 %vm213_vm0, %v124_v9  ;;  %v120_v25 = vld [vmem:[%s12025_s1 + $0x1c8] sm:$0xff]  ;;  %v87_v29 = vld [vmem:[%s12025_s1 + $0xc0] sm:$0xff]  ;;  %6058 = vmatprep.mubr.msk.f32.mxu0 %vm213_vm0, %v8805_v26  ;;  %v86_v33 = vld [vmem:[%s12025_s1 + $0xb8] sm:$0xff] }
  0x26   :  { %v72_v27 = vld [vmem:[%s12025_s1 + $0x48] sm:$0xff]  ;;  %v119_v30 = vld [vmem:[%s12025_s1 + $0x1c0] sm:$0xff]  ;;  %6106 = vmatprep.mubr.msk.f32.mxu1 %vm213_vm0, %v8805_v26  ;;  %v118_v34 = vld [vmem:[%s12025_s1 + $0x1b8] sm:$0xff] }
  0x27   :  { %6031 = vmatpush3.xpose.msk.msra.mxu0 %vm213_vm0, %v76_v10  ;;  %v104_v28 = vld [vmem:[%s12025_s1 + $0x148] sm:$0xff]  ;;  %v71_v31 = vld [vmem:[%s12025_s1 + $0x40] sm:$0xff]  ;;  %v70_v35 = vld [vmem:[%s12025_s1 + $0x38] sm:$0xff] }
  0x28   :  { %6079 = vmatpush3.xpose.msk.msra.mxu1 %vm213_vm0, %v108_v11  ;;  %6032 = vmatprep.subr.msk.mxu0 %vm213_vm0, %v91_v12  ;;  %v103_v32 = vld [vmem:[%s12025_s1 + $0x140] sm:$0xff]  ;;  %v102_v36 = vld [vmem:[%s12025_s1 + $0x138] sm:$0xff]  ;;  %v85_v37 = vld [vmem:[%s12025_s1 + $0xb0] sm:$0xff] }
  0x29   :  { %6080 = vmatprep.subr.msk.mxu1 %vm213_vm0, %v123_v13  ;;  %v117_v38 = vld [vmem:[%s12025_s1 + $0x1b0] sm:$0xff]  ;;  %v84_v41 = vld [vmem:[%s12025_s1 + $0xa8] sm:$0xff]  ;;  %v83_v45 = vld [vmem:[%s12025_s1 + $0xa0] sm:$0xff] }
  0x2a   :  { %v69_v39 = vld [vmem:[%s12025_s1 + $0x30] sm:$0xff]  ;;  %v116_v42 = vld [vmem:[%s12025_s1 + $0x1a8] sm:$0xff]  ;;  %v115_v46 = vld [vmem:[%s12025_s1 + $0x1a0] sm:$0xff] }
  0x2b   :  { %6033 = vmatpush3.xpose.msk.msra.mxu0 %vm213_vm0, %v75_v14  ;;  %v101_v40 = vld [vmem:[%s12025_s1 + $0x130] sm:$0xff]  ;;  %v68_v43 = vld [vmem:[%s12025_s1 + $0x28] sm:$0xff]  ;;  %v67_v47 = vld [vmem:[%s12025_s1 + $0x20] sm:$0xff] }
  0x2c   :  { %6081 = vmatpush3.xpose.msk.msra.mxu1 %vm213_vm0, %v107_v15  ;;  %6034 = vmatprep.subr.msk.mxu0 %vm213_vm0, %v90_v16  ;;  %v100_v44 = vld [vmem:[%s12025_s1 + $0x128] sm:$0xff]  ;;  %v99_v48 = vld [vmem:[%s12025_s1 + $0x120] sm:$0xff]  ;;  %v82_v49 = vld [vmem:[%s12025_s1 + $0x98] sm:$0xff] }
  0x2d   :  { %6082 = vmatprep.subr.msk.mxu1 %vm213_vm0, %v122_v17  ;;  %v114_v50 = vld [vmem:[%s12025_s1 + $0x198] sm:$0xff]  ;;  %v81_v53 = vld [vmem:[%s12025_s1 + $0x90] sm:$0xff]  ;;  %v80_v57 = vld [vmem:[%s12025_s1 + $0x88] sm:$0xff] }
  0x2e   :  { %v66_v51 = vld [vmem:[%s12025_s1 + $0x18] sm:$0xff]  ;;  %v113_v54 = vld [vmem:[%s12025_s1 + $0x190] sm:$0xff]  ;;  %v112_v58 = vld [vmem:[%s12025_s1 + $0x188] sm:$0xff] }
  0x2f   :  { %6035 = vmatpush3.xpose.msk.msra.mxu0 %vm213_vm0, %v74_v18  ;;  %v98_v52 = vld [vmem:[%s12025_s1 + $0x118] sm:$0xff]  ;;  %v65_v55 = vld [vmem:[%s12025_s1 + $0x10] sm:$0xff]  ;;  %v64_v59 = vld [vmem:[%s12025_s1 + $0x8] sm:$0xff] }
  0x30   :  { %6083 = vmatpush3.xpose.msk.msra.mxu1 %vm213_vm0, %v106_v19  ;;  %6036 = vmatprep.subr.msk.mxu0 %vm213_vm0, %v89_v20  ;;  %v97_v56 = vld [vmem:[%s12025_s1 + $0x110] sm:$0xff]  ;;  %v96_v60 = vld [vmem:[%s12025_s1 + $0x108] sm:$0xff]  ;;  %v79_v61 = vld [vmem:[%s12025_s1 + $0x80] sm:$0xff] }
  0x31   :  { %6084 = vmatprep.subr.msk.mxu1 %vm213_vm0, %v121_v21  ;;  %v111_v62 = vld [vmem:[%s12025_s1 + $0x180] sm:$0xff]  ;;  %v8965_v1 = vld [vmem:[#allocation7 + $0xf8] sm:$0xff]  ;;  %v8977_v5 = vld [vmem:[#allocation7 + $0xf0] sm:$0xff] }
  0x32   :  { %v63_v63 = vld [vmem:[%s12025_s1] sm:$0xff]  ;;  %12345 = vst [vmem:[#allocation13_spill] sm:$0xff] %v8965_v1  ;;  %v8967_v2 = vld [vmem:[#allocation7 + $0x1f8] sm:$0xff]  ;;  %v8979_v6 = vld [vmem:[#allocation7 + $0x1f0] sm:$0xff] }
  0x33   :  { %6037 = vmatpush3.xpose.msk.msra.mxu0 %vm213_vm0, %v73_v22  ;;  %v95_v0 = vld [vmem:[%s12025_s1 + $0x100] sm:$0xff]  ;;  %12346 = vst [vmem:[#allocation14_spill] sm:$0xff] %v8967_v2  ;;  %v8973_v3 = vld [vmem:[#allocation7 + $0x78] sm:$0xff]  ;;  %v56_v7 = vld [vmem:[%s12024_s0 + $0x8] sm:$0xff] }
  0x34   :  { %6085 = vmatpush3.xpose.msk.msra.mxu1 %vm213_vm0, %v105_v23  ;;  %6038 = vmatprep.subr.msk.mxu0 %vm213_vm0, %v88_v24  ;;  %v8975_v4 = vld [vmem:[#allocation7 + $0x178] sm:$0xff]  ;;  %v8992_v8 = vld [vmem:[#allocation7 + $0x70] sm:$0xff]  ;;  %v8996_v10 = vld [vmem:[#allocation7 + $0xe8] sm:$0xff] }
  0x35   :  { %6086 = vmatprep.subr.msk.mxu1 %vm213_vm0, %v120_v25  ;;  %v8994_v9 = vld [vmem:[#allocation7 + $0x170] sm:$0xff]  ;;  %v8998_v11 = vld [vmem:[#allocation7 + $0x1e8] sm:$0xff]  ;;  %v9015_v15 = vld [vmem:[#allocation7 + $0xe0] sm:$0xff] }
  0x36   :  { %v57_v12 = vld [vmem:[%s12024_s0 + $0x10] sm:$0xff]  ;;  %v9011_v13 = vld [vmem:[#allocation7 + $0x68] sm:$0xff]  ;;  %v9017_v16 = vld [vmem:[#allocation7 + $0x1e0] sm:$0xff] }
  0x37   :  { %6039 = vmatpush3.xpose.msk.msra.mxu0 %vm213_vm0, %v72_v27  ;;  %v9013_v14 = vld [vmem:[#allocation7 + $0x168] sm:$0xff]  ;;  %v58_v17 = vld [vmem:[%s12024_s0 + $0x18] sm:$0xff]  ;;  %v9030_v18 = vld [vmem:[#allocation7 + $0x60] sm:$0xff] }
  0x38   :  { %6087 = vmatpush3.xpose.msk.msra.mxu1 %vm213_vm0, %v104_v28  ;;  %6040 = vmatprep.subr.msk.mxu0 %vm213_vm0, %v87_v29  ;;  %v9032_v19 = vld [vmem:[#allocation7 + $0x160] sm:$0xff]  ;;  %v9034_v20 = vld [vmem:[#allocation7 + $0xd8] sm:$0xff]  ;;  %v9053_v25 = vld [vmem:[#allocation7 + $0xd0] sm:$0xff] }
  0x39   :  { %6088 = vmatprep.subr.msk.mxu1 %vm213_vm0, %v119_v30  ;;  %v9036_v21 = vld [vmem:[#allocation7 + $0x1d8] sm:$0xff]  ;;  %v59_v22 = vld [vmem:[%s12024_s0 + $0x20] sm:$0xff]  ;;  %v60_v27 = vld [vmem:[%s12024_s0 + $0x28] sm:$0xff] }
  0x3a   :  { %v9049_v23 = vld [vmem:[#allocation7 + $0x58] sm:$0xff]  ;;  %v9068_v28 = vld [vmem:[#allocation7 + $0x50] sm:$0xff]  ;;  %v9072_v30 = vld [vmem:[#allocation7 + $0xc8] sm:$0xff] }
  0x3b   :  { %6041 = vmatpush3.xpose.msk.msra.mxu0 %vm213_vm0, %v71_v31  ;;  %v9051_v24 = vld [vmem:[#allocation7 + $0x158] sm:$0xff]  ;;  %v9070_v29 = vld [vmem:[#allocation7 + $0x150] sm:$0xff]  ;;  %v9074_v31 = vld [vmem:[#allocation7 + $0x1c8] sm:$0xff] }
  0x3c   :  { %6089 = vmatpush3.xpose.msk.msra.mxu1 %vm213_vm0, %v103_v32  ;;  %6042 = vmatprep.subr.msk.mxu0 %vm213_vm0, %v86_v33  ;;  %v61_v32 = vld [vmem:[%s12024_s0 + $0x30] sm:$0xff]  ;;  %v9087_v33 = vld [vmem:[#allocation7 + $0x48] sm:$0xff] }
  0x3d   :  { %6090 = vmatprep.subr.msk.mxu1 %vm213_vm0, %v118_v34  ;;  %v9089_v34 = vld [vmem:[#allocation7 + $0x148] sm:$0xff] }
  0x3f   :  { %6043 = vmatpush3.xpose.msk.msra.mxu0 %vm213_vm0, %v70_v35  ;;  %v9091_v35 = vld [vmem:[#allocation7 + $0xc0] sm:$0xff] }
  0x40   :  { %6091 = vmatpush3.xpose.msk.msra.mxu1 %vm213_vm0, %v102_v36  ;;  %6044 = vmatprep.subr.msk.mxu0 %vm213_vm0, %v85_v37  ;;  %v9093_v36 = vld [vmem:[#allocation7 + $0x1c0] sm:$0xff]  ;;  %v62_v37 = vld [vmem:[%s12024_s0 + $0x38] sm:$0xff] }
  0x41   :  { %6092 = vmatprep.subr.msk.mxu1 %vm213_vm0, %v117_v38  ;;  %v9106_v38 = vld [vmem:[#allocation7 + $0x40] sm:$0xff] }
  0x43   :  { %6045 = vmatpush3.xpose.msk.msra.mxu0 %vm213_vm0, %v69_v39  ;;  %v9108_v39 = vld [vmem:[#allocation7 + $0x140] sm:$0xff] }
  0x44   :  { %6093 = vmatpush3.xpose.msk.msra.mxu1 %vm213_vm0, %v101_v40  ;;  %6046 = vmatprep.subr.msk.mxu0 %vm213_vm0, %v84_v41  ;;  %v9110_v40 = vld [vmem:[#allocation7 + $0xb8] sm:$0xff] }
  0x45   :  { %6094 = vmatprep.subr.msk.mxu1 %vm213_vm0, %v116_v42  ;;  %v9112_v41 = vld [vmem:[#allocation7 + $0x1b8] sm:$0xff] }
  0x46   :  { %v9122_v42 = vld [vmem:[#allocation7 + $0x38] sm:$0xff] }
  0x47   :  { %6047 = vmatpush3.xpose.msk.msra.mxu0 %vm213_vm0, %v68_v43  ;;  %v9124_v43 = vld [vmem:[#allocation7 + $0x138] sm:$0xff] }
  0x48   :  { %6095 = vmatpush3.xpose.msk.msra.mxu1 %vm213_vm0, %v100_v44  ;;  %6048 = vmatprep.subr.msk.mxu0 %vm213_vm0, %v83_v45  ;;  %v9126_v44 = vld [vmem:[#allocation7 + $0xb0] sm:$0xff] }
  0x49   :  { %6096 = vmatprep.subr.msk.mxu1 %vm213_vm0, %v115_v46  ;;  %v9128_v45 = vld [vmem:[#allocation7 + $0x1b0] sm:$0xff]  ;;  %v12032_v46 = vmov 0.0  }
  0x4b   :  { %6049 = vmatpush3.xpose.msk.msra.mxu0 %vm213_vm0, %v67_v47  ;;  %v9136_v47 = vld [vmem:[#allocation7 + $0x30] sm:$0xff] }
  0x4c   :  { %6097 = vmatpush3.xpose.msk.msra.mxu1 %vm213_vm0, %v99_v48  ;;  %6050 = vmatprep.subr.msk.mxu0 %vm213_vm0, %v82_v49  ;;  %v9138_v48 = vld [vmem:[#allocation7 + $0x130] sm:$0xff]  ;;  %v9140_v49 = vld [vmem:[#allocation7 + $0xa8] sm:$0xff] }
  0x4d   :  { %6098 = vmatprep.subr.msk.mxu1 %vm213_vm0, %v114_v50  ;;  %v9142_v50 = vld [vmem:[#allocation7 + $0x1a8] sm:$0xff] }
  0x4f   :  { %6051 = vmatpush3.xpose.msk.msra.mxu0 %vm213_vm0, %v66_v51  ;;  %v9148_v51 = vld [vmem:[#allocation7 + $0x28] sm:$0xff] }
  0x50   :  { %6099 = vmatpush3.xpose.msk.msra.mxu1 %vm213_vm0, %v98_v52  ;;  %6052 = vmatprep.subr.msk.mxu0 %vm213_vm0, %v81_v53  ;;  %v9150_v52 = vld [vmem:[#allocation7 + $0x128] sm:$0xff]  ;;  %v9152_v53 = vld [vmem:[#allocation7 + $0xa0] sm:$0xff] }
  0x51   :  { %6100 = vmatprep.subr.msk.mxu1 %vm213_vm0, %v113_v54  ;;  %12347 = vst [vmem:[#allocation15_spill] sm:$0xff] %v9152_v53  ;;  %v9154_v54 = vld [vmem:[#allocation7 + $0x1a0] sm:$0xff] }
  0x52   :  { %12348 = vst [vmem:[#allocation16_spill] sm:$0xff] %v9154_v54 }
  0x53   :  { %6053 = vmatpush3.xpose.msk.msra.mxu0 %vm213_vm0, %v65_v55  ;;  %v9160_v55 = vld [vmem:[#allocation7 + $0x20] sm:$0xff] }
  0x54   :  { %6101 = vmatpush3.xpose.msk.msra.mxu1 %vm213_vm0, %v97_v56  ;;  %6054 = vmatprep.subr.msk.mxu0 %vm213_vm0, %v80_v57  ;;  %12349 = vst [vmem:[#allocation17_spill] sm:$0xff] %v9160_v55  ;;  %v9162_v56 = vld [vmem:[#allocation7 + $0x120] sm:$0xff]  ;;  %v9164_v57 = vld [vmem:[#allocation7 + $0x98] sm:$0xff] }
  0x55   :  { %6102 = vmatprep.subr.msk.mxu1 %vm213_vm0, %v112_v58  ;;  %12350 = vst [vmem:[#allocation18_spill] sm:$0xff] %v9162_v56  ;;  %12351 = vst [vmem:[#allocation19_spill] sm:$0xff] %v9164_v57  ;;  %v9166_v58 = vld [vmem:[#allocation7 + $0x198] sm:$0xff] }
  0x56   :  { %12352 = vst [vmem:[#allocation20_spill] sm:$0xff] %v9166_v58 }
  0x57   :  { %6055 = vmatpush3.xpose.msk.msra.mxu0 %vm213_vm0, %v64_v59  ;;  %v9172_v59 = vld [vmem:[#allocation7 + $0x18] sm:$0xff] }
  0x58   :  { %6103 = vmatpush3.xpose.msk.msra.mxu1 %vm213_vm0, %v96_v60  ;;  %6056 = vmatprep.subr.msk.mxu0 %vm213_vm0, %v79_v61  ;;  %12353 = vst [vmem:[#allocation21_spill] sm:$0xff] %v9172_v59  ;;  %v9174_v60 = vld [vmem:[#allocation7 + $0x118] sm:$0xff]  ;;  %v9176_v61 = vld [vmem:[#allocation7 + $0x90] sm:$0xff] }
  0x59   :  { %6104 = vmatprep.subr.msk.mxu1 %vm213_vm0, %v111_v62  ;;  %12354 = vst [vmem:[#allocation22_spill] sm:$0xff] %v9174_v60  ;;  %12355 = vst [vmem:[#allocation23_spill] sm:$0xff] %v9176_v61  ;;  %v9178_v62 = vld [vmem:[#allocation7 + $0x190] sm:$0xff] }
  0x5a   :  { %12356 = vst [vmem:[#allocation24_spill] sm:$0xff] %v9178_v62 }
  0x5b   :  { %6057 = vmatpush3.xpose.msk.msra.mxu0 %vm213_vm0, %v63_v63  ;;  %v9184_v63 = vld [vmem:[#allocation7 + $0x10] sm:$0xff] }
  0x5c   :  { %6105 = vmatpush3.xpose.msk.msra.mxu1 %vm213_vm0, %v95_v0  ;;  %6122 = vmatprep.subr.mxu0 %v8965_v1  ;;  %12357 = vst [vmem:[#allocation25_spill] sm:$0xff] %v9184_v63  ;;  %v9186_v0 = vld [vmem:[#allocation7 + $0x110] sm:$0xff] }
  0x5d   :  { %6156 = vmatprep.subr.mxu1 %v8967_v2  ;;  %12358 = vst [vmem:[#allocation26_spill] sm:$0xff] %v9186_v0 }
  0x5e   :  { %6059 = vmatmul.mubr.msk.f32.vlgmr.msra.gmra.mxu0 %vm213_vm0, %v8805_v26 }
  0x5f   :  { %6107 = vmatmul.mubr.msk.f32.vlgmr.msra.gmra.mxu1 %vm213_vm0, %v8805_v26  ;;  %6123 = vmatpush3.xpose.msra.mxu0 %v8973_v3  ;;  %v9055_v26 = vld [vmem:[#allocation7 + $0x1d0] sm:$0xff] }
  0x60   :  { %6157 = vmatpush3.xpose.msra.mxu1 %v8975_v4  ;;  %6124 = vmatprep.subr.mxu0 %v8977_v5 }
  0x61   :  { %6158 = vmatprep.subr.mxu1 %v8979_v6  ;;  %6060 = vmatprep.mubr.msk.f32.mxu0 %vm213_vm0, %v56_v7 }
  0x62   :  { %6108 = vmatprep.mubr.msk.f32.mxu1 %vm213_vm0, %v56_v7  ;;  %6061 = vmatmul.mubr.msk.f32.gmra.mxu0 %vm213_vm0, %v56_v7 }
  0x63   :  { %6109 = vmatmul.mubr.msk.f32.gmra.mxu1 %vm213_vm0, %v56_v7  ;;  %6125 = vmatpush3.xpose.msra.mxu0 %v8992_v8  ;;  %v9188_v7 = vld [vmem:[#allocation7 + $0x88] sm:$0xff] }
  0x64   :  { %6159 = vmatpush3.xpose.msra.mxu1 %v8994_v9  ;;  %6126 = vmatprep.subr.mxu0 %v8996_v10  ;;  %12359 = vst [vmem:[#allocation27_spill] sm:$0xff] %v9188_v7 }
  0x65   :  { %6160 = vmatprep.subr.mxu1 %v8998_v11  ;;  %6062 = vmatprep.mubr.msk.f32.mxu0 %vm213_vm0, %v57_v12 }
  0x66   :  { %6110 = vmatprep.mubr.msk.f32.mxu1 %vm213_vm0, %v57_v12  ;;  %6063 = vmatmul.mubr.msk.f32.gmra.mxu0 %vm213_vm0, %v57_v12 }
  0x67   :  { %6111 = vmatmul.mubr.msk.f32.gmra.mxu1 %vm213_vm0, %v57_v12  ;;  %6127 = vmatpush3.xpose.msra.mxu0 %v9011_v13  ;;  %v9190_v12 = vld [vmem:[#allocation7 + $0x188] sm:$0xff] }
  0x68   :  { %6161 = vmatpush3.xpose.msra.mxu1 %v9013_v14  ;;  %6128 = vmatprep.subr.mxu0 %v9015_v15  ;;  %12360 = vst [vmem:[#allocation28_spill] sm:$0xff] %v9190_v12 }
  0x69   :  { %6162 = vmatprep.subr.mxu1 %v9017_v16  ;;  %6064 = vmatprep.mubr.msk.f32.mxu0 %vm213_vm0, %v58_v17 }
  0x6a   :  { %6112 = vmatprep.mubr.msk.f32.mxu1 %vm213_vm0, %v58_v17  ;;  %6065 = vmatmul.mubr.msk.f32.gmra.mxu0 %vm213_vm0, %v58_v17 }
  0x6b   :  { %6113 = vmatmul.mubr.msk.f32.gmra.mxu1 %vm213_vm0, %v58_v17  ;;  %6129 = vmatpush3.xpose.msra.mxu0 %v9030_v18  ;;  %v9196_v17 = vld [vmem:[#allocation7 + $0x8] sm:$0xff] }
  0x6c   :  { %6163 = vmatpush3.xpose.msra.mxu1 %v9032_v19  ;;  %6130 = vmatprep.subr.mxu0 %v9034_v20  ;;  %12361 = vst [vmem:[#allocation29_spill] sm:$0xff] %v9196_v17 }
  0x6d   :  { %6164 = vmatprep.subr.mxu1 %v9036_v21  ;;  %6066 = vmatprep.mubr.msk.f32.mxu0 %vm213_vm0, %v59_v22 }
  0x6e   :  { %6114 = vmatprep.mubr.msk.f32.mxu1 %vm213_vm0, %v59_v22  ;;  %6067 = vmatmul.mubr.msk.f32.gmra.mxu0 %vm213_vm0, %v59_v22 }
  0x6f   :  { %6115 = vmatmul.mubr.msk.f32.gmra.mxu1 %vm213_vm0, %v59_v22  ;;  %6131 = vmatpush3.xpose.msra.mxu0 %v9049_v23  ;;  %v9198_v22 = vld [vmem:[#allocation7 + $0x108] sm:$0xff] }
  0x70   :  { %6165 = vmatpush3.xpose.msra.mxu1 %v9051_v24  ;;  %6132 = vmatprep.subr.mxu0 %v9053_v25  ;;  %12362 = vst [vmem:[#allocation30_spill] sm:$0xff] %v9198_v22 }
  0x71   :  { %6166 = vmatprep.subr.mxu1 %v9055_v26  ;;  %6068 = vmatprep.mubr.msk.f32.mxu0 %vm213_vm0, %v60_v27 }
  0x72   :  { %6116 = vmatprep.mubr.msk.f32.mxu1 %vm213_vm0, %v60_v27  ;;  %6069 = vmatmul.mubr.msk.f32.gmra.mxu0 %vm213_vm0, %v60_v27 }
  0x73   :  { %6117 = vmatmul.mubr.msk.f32.gmra.mxu1 %vm213_vm0, %v60_v27  ;;  %6133 = vmatpush3.xpose.msra.mxu0 %v9068_v28  ;;  %v9200_v27 = vld [vmem:[#allocation7 + $0x80] sm:$0xff] }
  0x74   :  { %6167 = vmatpush3.xpose.msra.mxu1 %v9070_v29  ;;  %6134 = vmatprep.subr.mxu0 %v9072_v30  ;;  %12363 = vst [vmem:[#allocation31_spill] sm:$0xff] %v9200_v27 }
  0x75   :  { %6168 = vmatprep.subr.mxu1 %v9074_v31  ;;  %6070 = vmatprep.mubr.msk.f32.mxu0 %vm213_vm0, %v61_v32 }
  0x76   :  { %6118 = vmatprep.mubr.msk.f32.mxu1 %vm213_vm0, %v61_v32  ;;  %6071 = vmatmul.mubr.msk.f32.gmra.mxu0 %vm213_vm0, %v61_v32 }
  0x77   :  { %6119 = vmatmul.mubr.msk.f32.gmra.mxu1 %vm213_vm0, %v61_v32  ;;  %6135 = vmatpush3.xpose.msra.mxu0 %v9087_v33  ;;  %v9202_v32 = vld [vmem:[#allocation7 + $0x180] sm:$0xff] }
  0x78   :  { %6169 = vmatpush3.xpose.msra.mxu1 %v9089_v34  ;;  %6136 = vmatprep.subr.mxu0 %v9091_v35  ;;  %12364 = vst [vmem:[#allocation32_spill] sm:$0xff] %v9202_v32 }
  0x79   :  { %6170 = vmatprep.subr.mxu1 %v9093_v36  ;;  %6072 = vmatprep.mubr.msk.f32.mxu0 %vm213_vm0, %v62_v37 }
  0x7a   :  { %6120 = vmatprep.mubr.msk.f32.mxu1 %vm213_vm0, %v62_v37  ;;  %6073 = vmatmul.mubr.msk.f32.gmra.mxu0 %vm213_vm0, %v62_v37 }
  0x7b   :  { %6121 = vmatmul.mubr.msk.f32.gmra.mxu1 %vm213_vm0, %v62_v37  ;;  %6137 = vmatpush3.xpose.msra.mxu0 %v9106_v38  ;;  %v9208_v37 = vld [vmem:[#allocation7] sm:$0xff] }
  0x7c   :  { %6171 = vmatpush3.xpose.msra.mxu1 %v9108_v39  ;;  %6138 = vmatprep.subr.mxu0 %v9110_v40  ;;  %12365 = vst [vmem:[#allocation33_spill] sm:$0xff] %v9208_v37 }
  0x7d   :  { %6172 = vmatprep.subr.mxu1 %v9112_v41  ;;  %6154 = vmatprep.mubr.f32.mxu0 %v12032_v46 }
  0x7e   :  { %6188 = vmatprep.mubr.f32.mxu1 %v12032_v46  ;;  %v9210_v46 = vld [vmem:[#allocation7 + $0x100] sm:$0xff] }
  0x7f   :  { %6139 = vmatpush3.xpose.msra.mxu0 %v9122_v42  ;;  %12366 = vst [vmem:[#allocation34_spill] sm:$0xff] %v9210_v46 }
  0x80   :  { %6173 = vmatpush3.xpose.msra.mxu1 %v9124_v43  ;;  %6140 = vmatprep.subr.mxu0 %v9126_v44 }
  0x81   :  { %6174 = vmatprep.subr.mxu1 %v9128_v45 }
  0x83   :  { %6141 = vmatpush3.xpose.msra.mxu0 %v9136_v47 }
  0x84   :  { %6175 = vmatpush3.xpose.msra.mxu1 %v9138_v48  ;;  %6142 = vmatprep.subr.mxu0 %v9140_v49 }
  0x85   :  { %6176 = vmatprep.subr.mxu1 %v9142_v50 }
  0x87   :  { %6143 = vmatpush3.xpose.msra.mxu0 %v9148_v51 }
  0x88   :  { %6177 = vmatpush3.xpose.msra.mxu1 %v9150_v52  ;;  %6144 = vmatprep.subr.mxu0 %v9152_v53 }
  0x89   :  { %6178 = vmatprep.subr.mxu1 %v9154_v54 }
  0x8b   :  { %6145 = vmatpush3.xpose.msra.mxu0 %v9160_v55 }
  0x8c   :  { %6179 = vmatpush3.xpose.msra.mxu1 %v9162_v56  ;;  %6146 = vmatprep.subr.mxu0 %v9164_v57 }
  0x8d   :  { %6180 = vmatprep.subr.mxu1 %v9166_v58 }
  0x8f   :  { %6147 = vmatpush3.xpose.msra.mxu0 %v9172_v59 }
  0x90   :  { %6181 = vmatpush3.xpose.msra.mxu1 %v9174_v60  ;;  %6148 = vmatprep.subr.mxu0 %v9176_v61 }
  0x91   :  { %6182 = vmatprep.subr.mxu1 %v9178_v62 }
  0x93   :  { %6149 = vmatpush3.xpose.msra.mxu0 %v9184_v63 }
  0x94   :  { %6183 = vmatpush3.xpose.msra.mxu1 %v9186_v0  ;;  %6150 = vmatprep.subr.mxu0 %v9188_v7 }
  0x95   :  { %6184 = vmatprep.subr.mxu1 %v9190_v12  ;;  %v12367_v12 = vmov 0.0  }
  0x97   :  { %6151 = vmatpush3.xpose.msra.mxu0 %v9196_v17 }
  0x98   :  { %6185 = vmatpush3.xpose.msra.mxu1 %v9198_v22  ;;  %6152 = vmatprep.subr.mxu0 %v9200_v27 }
  0x99   :  { %6186 = vmatprep.subr.mxu1 %v9202_v32 }
  0x9b   :  { %6153 = vmatpush3.xpose.msra.mxu0 %v9208_v37 }
  0x9c   :  { %6187 = vmatpush3.xpose.msra.mxu1 %v9210_v46  ;;  %6190 = vmatprep.subr.mxu0 %v8965_v1 }
  0x9d   :  { %6224 = vmatprep.subr.mxu1 %v8967_v2 }
  0x9e   :  { %6155 = vmatmul.mubr.f32.vlgmr.msra.gmra.mxu0 %v12367_v12 }
  0x9f   :  { %6189 = vmatmul.mubr.f32.vlgmr.msra.gmra.mxu1 %v12367_v12  ;;  %6191 = vmatpush3.xpose.msra.mxu0 %v8973_v3  ;;  %v12368_v12 = vld [vmem:[#allocation28_spill] sm:$0xff] }
  0xa0   :  { %6225 = vmatpush3.xpose.msra.mxu1 %v8975_v4  ;;  %6192 = vmatprep.subr.mxu0 %v8977_v5 }
  0xa1   :  { %6226 = vmatprep.subr.mxu1 %v8979_v6 }
  0xa3   :  { %6193 = vmatpush3.xpose.msra.mxu0 %v8992_v8 }
  0xa4   :  { %6227 = vmatpush3.xpose.msra.mxu1 %v8994_v9  ;;  %6194 = vmatprep.subr.mxu0 %v8996_v10 }
  0xa5   :  { %6228 = vmatprep.subr.mxu1 %v8998_v11 }
  0xa7   :  { %6195 = vmatpush3.xpose.msra.mxu0 %v9011_v13 }
  0xa8   :  { %6229 = vmatpush3.xpose.msra.mxu1 %v9013_v14  ;;  %6196 = vmatprep.subr.mxu0 %v9015_v15 }
  0xa9   :  { %6230 = vmatprep.subr.mxu1 %v9017_v16 }
  0xab   :  { %6197 = vmatpush3.xpose.msra.mxu0 %v9030_v18 }
  0xac   :  { %6231 = vmatpush3.xpose.msra.mxu1 %v9032_v19  ;;  %6198 = vmatprep.subr.mxu0 %v9034_v20 }
  0xad   :  { %6232 = vmatprep.subr.mxu1 %v9036_v21 }
  0xaf   :  { %6199 = vmatpush3.xpose.msra.mxu0 %v9049_v23 }
  0xb0   :  { %6233 = vmatpush3.xpose.msra.mxu1 %v9051_v24  ;;  %6200 = vmatprep.subr.mxu0 %v9053_v25 }
  0xb1   :  { %6234 = vmatprep.subr.mxu1 %v9055_v26 }
  0xb3   :  { %6201 = vmatpush3.xpose.msra.mxu0 %v9068_v28 }
  0xb4   :  { %6235 = vmatpush3.xpose.msra.mxu1 %v9070_v29  ;;  %6202 = vmatprep.subr.mxu0 %v9072_v30 }
  0xb5   :  { %6236 = vmatprep.subr.mxu1 %v9074_v31 }
  0xb7   :  { %6203 = vmatpush3.xpose.msra.mxu0 %v9087_v33 }
  0xb8   :  { %6237 = vmatpush3.xpose.msra.mxu1 %v9089_v34  ;;  %6204 = vmatprep.subr.mxu0 %v9091_v35 }
  0xb9   :  { %6238 = vmatprep.subr.mxu1 %v9093_v36 }
  0xbb   :  { %6205 = vmatpush3.xpose.msra.mxu0 %v9106_v38 }
  0xbc   :  { %6239 = vmatpush3.xpose.msra.mxu1 %v9108_v39  ;;  %6206 = vmatprep.subr.mxu0 %v9110_v40 }
  0xbd   :  { %6240 = vmatprep.subr.mxu1 %v9112_v41 }
  0xbf   :  { %6207 = vmatpush3.xpose.msra.mxu0 %v9122_v42 }
  0xc0   :  { %6241 = vmatpush3.xpose.msra.mxu1 %v9124_v43  ;;  %6208 = vmatprep.subr.mxu0 %v9126_v44 }
  0xc1   :  { %6242 = vmatprep.subr.mxu1 %v9128_v45 }
  0xc3   :  { %6209 = vmatpush3.xpose.msra.mxu0 %v9136_v47 }
  0xc4   :  { %6243 = vmatpush3.xpose.msra.mxu1 %v9138_v48  ;;  %6210 = vmatprep.subr.mxu0 %v9140_v49 }
  0xc5   :  { %6244 = vmatprep.subr.mxu1 %v9142_v50 }
  0xc7   :  { %6211 = vmatpush3.xpose.msra.mxu0 %v9148_v51 }
  0xc8   :  { %6245 = vmatpush3.xpose.msra.mxu1 %v9150_v52  ;;  %6212 = vmatprep.subr.mxu0 %v9152_v53 }
  0xc9   :  { %6246 = vmatprep.subr.mxu1 %v9154_v54 }
  0xcb   :  { %6213 = vmatpush3.xpose.msra.mxu0 %v9160_v55 }
  0xcc   :  { %6247 = vmatpush3.xpose.msra.mxu1 %v9162_v56  ;;  %6214 = vmatprep.subr.mxu0 %v9164_v57 }
  0xcd   :  { %6248 = vmatprep.subr.mxu1 %v9166_v58 }
  0xcf   :  { %6215 = vmatpush3.xpose.msra.mxu0 %v9172_v59 }
  0xd0   :  { %6249 = vmatpush3.xpose.msra.mxu1 %v9174_v60  ;;  %6216 = vmatprep.subr.mxu0 %v9176_v61 }
  0xd1   :  { %6250 = vmatprep.subr.mxu1 %v9178_v62 }
  0xd3   :  { %6217 = vmatpush3.xpose.msra.mxu0 %v9184_v63 }
  0xd4   :  { %6251 = vmatpush3.xpose.msra.mxu1 %v9186_v0  ;;  %6218 = vmatprep.subr.mxu0 %v9188_v7  ;;  %v193_v0 = vlaneseq }
  0xd5   :  { %6252 = vmatprep.subr.mxu1 %v12368_v12 }
  0xd6   :  { %v194_v7 = vshrl.u32 %v193_v0, 7 }
  0xd7   :  { %6219 = vmatpush3.xpose.msra.mxu0 %v9196_v17 }
  0xd8   :  { %6253 = vmatpush3.xpose.msra.mxu1 %v9198_v22  ;;  %6220 = vmatprep.subr.mxu0 %v9200_v27  ;;  %v9282_v63 = vsub.s32 0, %v194_v7  ;;  %v9284_v12 = vsub.s32 2, %v194_v7  ;;  %v191_v27 = vld [vmem:[%s12028_s4] sm:$0xf] }
  0xd9   :  { %6254 = vmatprep.subr.mxu1 %v9202_v32 }
  0xda   :  { %12369 = vst [vmem:[#allocation35_spill] sm:$0xff] %v9282_v63  ;;  %12370 = vst [vmem:[#allocation36_spill] sm:$0xff] %v9284_v12  ;;  %v196_v0 = vrot.slane %v191_v27, %v9282_v63  ;;  %v9303_v17 = vrot.slane %v191_v27, %v9284_v12 }
  0xdb   :  { %6221 = vmatpush3.xpose.msra.mxu0 %v9208_v37  ;;  %v9293_v37 = vsub.s32 1, %v194_v7 }
  0xdc   :  { %6255 = vmatpush3.xpose.msra.mxu1 %v9210_v46  ;;  %6258 = vmatprep.subr.mxu0 %v8965_v1  ;;  %v9295_v46 = vsub.s32 3, %v194_v7 }
  0xdd   :  { %6292 = vmatprep.subr.mxu1 %v8967_v2  ;;  %12371 = vst [vmem:[#allocation37_spill] sm:$0xff] %v9293_v37  ;;  %v200_v60 = vrot.slane %v191_v27, %v9293_v37 }
  0xde   :  { %12372 = vst [vmem:[#allocation38_spill] sm:$0xff] %v9295_v46  ;;  %v9307_v59 = vrot.slane %v191_v27, %v9295_v46 }
 0x11e   :  { %v9289_v22 = vpop.f32.mrf.mxu0 }
 0x11f   :  { %v9291_v32 = vpop.f32.mrf.mxu1 }
 0x120   :  { %v9297_v1 = vpop.f32.mrf.mxu0 }
 0x121   :  { %v9299_v2 = vpop.f32.mrf.mxu1 }
 0x122   :  { %v502_v62 = vpop.f32.mrf.mxu0 }
 0x123   :  { %v615_v61 = vpop.f32.mrf.mxu1  ;;  %v9309_v58 = vadd.f32 %v502_v62, %v196_v0 }
 0x124   :  { %v9312_v7 = vadd.f32 %v615_v61, %v9303_v17  ;;  %v504_v57 = vpop.f32.mrf.mxu0 }
 0x125   :  { %12373 = vst [vmem:[#allocation39_spill] sm:$0xff] %v9309_v58  ;;  %v617_v56 = vpop.f32.mrf.mxu1  ;;  %v9314_v55 = vadd.f32 %v504_v57, %v200_v60 }
 0x126   :  { %12374 = vst [vmem:[#allocation40_spill] sm:$0xff] %v9312_v7  ;;  %v9317_v63 = vadd.f32 %v617_v56, %v9307_v59  ;;  %v508_v12 = vpop.f32.mrf.mxu0 }
 0x127   :  { %12375 = vst [vmem:[#allocation41_spill] sm:$0xff] %v9314_v55  ;;  %v621_v54 = vpop.f32.mrf.mxu1  ;;  %v9319_v53 = vadd.f32 %v508_v12, %v196_v0 }
 0x128   :  { %12376 = vst [vmem:[#allocation42_spill] sm:$0xff] %v9317_v63  ;;  %v9322_v37 = vadd.f32 %v621_v54, %v9303_v17  ;;  %v510_v27 = vpop.f32.mrf.mxu0 }
 0x129   :  { %12377 = vst [vmem:[#allocation43_spill] sm:$0xff] %v9319_v53  ;;  %v623_v62 = vpop.f32.mrf.mxu1  ;;  %v9324_v46 = vadd.f32 %v510_v27, %v200_v60 }
 0x12a   :  { %12378 = vst [vmem:[#allocation44_spill] sm:$0xff] %v9322_v37  ;;  %v9327_v61 = vadd.f32 %v623_v62, %v9307_v59  ;;  %v514_v7 = vpop.f32.mrf.mxu0 }
 0x12b   :  { %12379 = vst [vmem:[#allocation45_spill] sm:$0xff] %v9324_v46  ;;  %v627_v57 = vpop.f32.mrf.mxu1  ;;  %v9329_v55 = vadd.f32 %v514_v7, %v196_v0 }
 0x12c   :  { %12380 = vst [vmem:[#allocation46_spill] sm:$0xff] %v9327_v61  ;;  %v9332_v56 = vadd.f32 %v627_v57, %v9303_v17  ;;  %v516_v63 = vpop.f32.mrf.mxu0 }
 0x12d   :  { %12381 = vst [vmem:[#allocation47_spill] sm:$0xff] %v9329_v55  ;;  %v629_v12 = vpop.f32.mrf.mxu1  ;;  %v9334_v53 = vadd.f32 %v516_v63, %v200_v60 }
 0x12e   :  { %12382 = vst [vmem:[#allocation48_spill] sm:$0xff] %v9332_v56  ;;  %v9337_v54 = vadd.f32 %v629_v12, %v9307_v59  ;;  %v520_v37 = vpop.f32.mrf.mxu0 }
 0x12f   :  { %12383 = vst [vmem:[#allocation49_spill] sm:$0xff] %v9334_v53  ;;  %v633_v27 = vpop.f32.mrf.mxu1  ;;  %v9339_v46 = vadd.f32 %v520_v37, %v196_v0 }
 0x130   :  { %12384 = vst [vmem:[#allocation50_spill] sm:$0xff] %v9337_v54  ;;  %v9342_v62 = vadd.f32 %v633_v27, %v9303_v17  ;;  %v522_v61 = vpop.f32.mrf.mxu0 }
 0x131   :  { %12385 = vst [vmem:[#allocation51_spill] sm:$0xff] %v9339_v46  ;;  %v635_v7 = vpop.f32.mrf.mxu1  ;;  %v9344_v55 = vadd.f32 %v522_v61, %v200_v60 }
 0x132   :  { %12386 = vst [vmem:[#allocation52_spill] sm:$0xff] %v9342_v62  ;;  %v9347_v57 = vadd.f32 %v635_v7, %v9307_v59  ;;  %v526_v56 = vpop.f32.mrf.mxu0 }
 0x133   :  { %12387 = vst [vmem:[#allocation53_spill] sm:$0xff] %v9344_v55  ;;  %v639_v63 = vpop.f32.mrf.mxu1  ;;  %v9349_v53 = vadd.f32 %v526_v56, %v196_v0 }
 0x134   :  { %12388 = vst [vmem:[#allocation54_spill] sm:$0xff] %v9347_v57  ;;  %v9352_v12 = vadd.f32 %v639_v63, %v9303_v17  ;;  %v528_v54 = vpop.f32.mrf.mxu0 }
 0x135   :  { %12389 = vst [vmem:[#allocation55_spill] sm:$0xff] %v9349_v53  ;;  %v641_v37 = vpop.f32.mrf.mxu1  ;;  %v9354_v46 = vadd.f32 %v528_v54, %v200_v60 }
 0x136   :  { %12390 = vst [vmem:[#allocation56_spill] sm:$0xff] %v9352_v12  ;;  %v9357_v27 = vadd.f32 %v641_v37, %v9307_v59  ;;  %v532_v62 = vpop.f32.mrf.mxu0 }
 0x137   :  { %12391 = vst [vmem:[#allocation57_spill] sm:$0xff] %v9354_v46  ;;  %v645_v61 = vpop.f32.mrf.mxu1  ;;  %v9359_v55 = vadd.f32 %v532_v62, %v196_v0 }
 0x138   :  { %12392 = vst [vmem:[#allocation58_spill] sm:$0xff] %v9357_v27  ;;  %v9362_v7 = vadd.f32 %v645_v61, %v9303_v17  ;;  %v534_v57 = vpop.f32.mrf.mxu0 }
 0x139   :  { %12393 = vst [vmem:[#allocation59_spill] sm:$0xff] %v9359_v55  ;;  %v647_v56 = vpop.f32.mrf.mxu1  ;;  %v9364_v53 = vadd.f32 %v534_v57, %v200_v60  ;;  %v497_v57 = vadd.f32 %v9289_v22, %v196_v0 }
 0x13a   :  { %12394 = vst [vmem:[#allocation60_spill] sm:$0xff] %v9362_v7  ;;  %v9367_v63 = vadd.f32 %v647_v56, %v9307_v59  ;;  %v538_v12 = vpop.f32.mrf.mxu0  ;;  %v499_v56 = vadd.f32 %v9297_v1, %v200_v60 }
 0x13b   :  { %12395 = vst [vmem:[#allocation61_spill] sm:$0xff] %v9364_v53  ;;  %v651_v54 = vpop.f32.mrf.mxu1  ;;  %v9369_v46 = vadd.f32 %v538_v12, %v196_v0 }
 0x13c   :  { %12396 = vst [vmem:[#allocation62_spill] sm:$0xff] %v9367_v63  ;;  %v9372_v37 = vadd.f32 %v651_v54, %v9303_v17  ;;  %v540_v27 = vpop.f32.mrf.mxu0 }
 0x13d   :  { %12397 = vst [vmem:[#allocation63_spill] sm:$0xff] %v9369_v46  ;;  %v653_v62 = vpop.f32.mrf.mxu1  ;;  %v9374_v55 = vadd.f32 %v540_v27, %v200_v60  ;;  %v612_v27 = vadd.f32 %v9299_v2, %v9307_v59 }
 0x13e   :  { %12398 = vst [vmem:[#allocation64_spill] sm:$0xff] %v9372_v37  ;;  %v9377_v61 = vadd.f32 %v653_v62, %v9307_v59  ;;  %v610_v62 = vadd.f32 %v9291_v32, %v9303_v17  ;;  %v12402_v32 = vld [vmem:[#allocation15_spill] sm:$0xff] }
 0x13f   :  { %12399 = vst [vmem:[#allocation65_spill] sm:$0xff] %v9374_v55 }
 0x140   :  { %12400 = vst [vmem:[#allocation66_spill] sm:$0xff] %v9377_v61 }
 0x15e   :  { %v761_v7 = vpop.f32.mrf.mxu0 }
 0x15f   :  { %v837_v63 = vadd.f32 %v761_v7, %v497_v57  ;;  %v832_v46 = vpop.f32.mrf.mxu1 }
 0x160   :  { %v763_v53 = vpop.f32.mrf.mxu0  ;;  %v839_v61 = vadd.f32 %v832_v46, %v610_v62  ;;  %v12407_v62 = vld [vmem:[#allocation20_spill] sm:$0xff] }
 0x161   :  { %v5951_v58 = vmul.f32 -1.442695, %v837_v63  ;;  %v838_v12 = vadd.f32 %v763_v53, %v499_v56  ;;  %v834_v37 = vpop.f32.mrf.mxu1 }
 0x162   :  { %v840_v55 = vadd.f32 %v834_v37, %v612_v27  ;;  %v12406_v27 = vld [vmem:[#allocation19_spill] sm:$0xff] }
 0x163   :  { %8005 = vpow2.f32 %v5951_v58  ;;  %v5952_v54 = vmul.f32 -1.442695, %v838_v12  ;;  %v12404_v12 = vld [vmem:[#allocation17_spill] sm:$0xff] }
 0x164   :  { %v5953_v22 = vmul.f32 -1.442695, %v840_v55 }
 0x165   :  { %8007 = vpow2.f32 %v5952_v54  ;;  %v12405_v54 = vld [vmem:[#allocation18_spill] sm:$0xff] }
 0x166   :  { %8009 = vpow2.f32 %v5953_v22  ;;  %v12408_v22 = vld [vmem:[#allocation21_spill] sm:$0xff] }
 0x170   :  { %v8006_v0 = vpop.eup %8005 }
 0x171   :  { %v844_v1 = vadd.f32 1.0, %v8006_v0  ;;  %v12409_v0 = vld [vmem:[#allocation22_spill] sm:$0xff] }
 0x172   :  { %v8008_v60 = vpop.eup %8007 }
 0x173   :  { %8011 = vrcp.f32 %v844_v1  ;;  %v850_v53 = vadd.f32 1.0, %v8008_v60  ;;  %v8010_v58 = vpop.eup %8009  ;;  %v12410_v1 = vld [vmem:[#allocation23_spill] sm:$0xff]  ;;  %v12411_v60 = vld [vmem:[#allocation24_spill] sm:$0xff] }
 0x174   :  { %8013 = vtanh.f32 %v839_v61  ;;  %v857_v56 = vadd.f32 1.0, %v8010_v58  ;;  %v12403_v61 = vld [vmem:[#allocation16_spill] sm:$0xff]  ;;  %v12413_v58 = vld [vmem:[#allocation26_spill] sm:$0xff] }
 0x175   :  { %8015 = vrcp.f32 %v850_v53  ;;  %v12412_v53 = vld [vmem:[#allocation25_spill] sm:$0xff] }
 0x176   :  { %8017 = vrcp.f32 %v857_v56  ;;  %v12417_v56 = vld [vmem:[#allocation30_spill] sm:$0xff] }
 0x180   :  { %v8012_v7 = vpop.eup %8011 }
 0x181   :  { %v8014_v63 = vpop.eup %8013 }
 0x182   :  { %v8016_v57 = vpop.eup %8015  ;;  %v861_v59 = vmul.f32 %v8014_v63, %v8012_v7  ;;  %v12414_v7 = vld [vmem:[#allocation27_spill] sm:$0xff]  ;;  %v12415_v63 = vld [vmem:[#allocation28_spill] sm:$0xff] }
 0x183   :  { %v860_v2 = vmul.f32 0.0, %v8016_v57  ;;  %v8018_v46 = vpop.eup %8017  ;;  %v12416_v57 = vld [vmem:[#allocation29_spill] sm:$0xff] }
 0x185   :  { %v9385_v37 = vadd.f32 %v861_v59, %v860_v2  ;;  %v12418_v2 = vld [vmem:[#allocation31_spill] sm:$0xff]  ;;  %v12419_v59 = vld [vmem:[#allocation32_spill] sm:$0xff] }
 0x187   :  { %8019 = vtanh.f32 %v9385_v37 }
 0x194   :  { %v8020_v55 = vpop.eup %8019 }
 0x195   :  { %v9388_v17 = vmul.f32 %v8020_v55, %v8018_v46  ;;  %v12420_v46 = vld [vmem:[#allocation33_spill] sm:$0xff]  ;;  %v12421_v55 = vld [vmem:[#allocation34_spill] sm:$0xff] }
 0x197   :  { %12401 = vst [vmem:[#allocation67_spill] sm:$0xff] %v9388_v17  ;;  %6222 = vmatprep.mubr.f32.mxu0 %v9388_v17  ;;  %6256 = vmatprep.mubr.f32.mxu1 %v9388_v17 }
 0x198   :  { %6223 = vmatmul.mubr.f32.vlgmr.msra.gmra.mxu0 %v9388_v17  ;;  %6257 = vmatmul.mubr.f32.vlgmr.msra.gmra.mxu1 %v9388_v17  ;;  %v12422_v17 = vld [vmem:[#allocation13_spill] sm:$0xff] }
 0x199   :  { %6259 = vmatpush3.xpose.msra.mxu0 %v8973_v3  ;;  %6293 = vmatpush3.xpose.msra.mxu1 %v8975_v4 }
 0x19a   :  { %6260 = vmatprep.subr.mxu0 %v8977_v5  ;;  %6294 = vmatprep.subr.mxu1 %v8979_v6 }
 0x19d   :  { %6261 = vmatpush3.xpose.msra.mxu0 %v8992_v8  ;;  %6295 = vmatpush3.xpose.msra.mxu1 %v8994_v9 }
 0x19e   :  { %6262 = vmatprep.subr.mxu0 %v8996_v10  ;;  %6296 = vmatprep.subr.mxu1 %v8998_v11 }
 0x1a1   :  { %6263 = vmatpush3.xpose.msra.mxu0 %v9011_v13  ;;  %6297 = vmatpush3.xpose.msra.mxu1 %v9013_v14 }
 0x1a2   :  { %6264 = vmatprep.subr.mxu0 %v9015_v15  ;;  %6298 = vmatprep.subr.mxu1 %v9017_v16 }
 0x1a5   :  { %6265 = vmatpush3.xpose.msra.mxu0 %v9030_v18  ;;  %6299 = vmatpush3.xpose.msra.mxu1 %v9032_v19 }
 0x1a6   :  { %6266 = vmatprep.subr.mxu0 %v9034_v20  ;;  %6300 = vmatprep.subr.mxu1 %v9036_v21 }
 0x1a9   :  { %6267 = vmatpush3.xpose.msra.mxu0 %v9049_v23  ;;  %6301 = vmatpush3.xpose.msra.mxu1 %v9051_v24 }
 0x1aa   :  { %6268 = vmatprep.subr.mxu0 %v9053_v25  ;;  %6302 = vmatprep.subr.mxu1 %v9055_v26 }
 0x1ad   :  { %6269 = vmatpush3.xpose.msra.mxu0 %v9068_v28  ;;  %6303 = vmatpush3.xpose.msra.mxu1 %v9070_v29 }
 0x1ae   :  { %6270 = vmatprep.subr.mxu0 %v9072_v30  ;;  %6304 = vmatprep.subr.mxu1 %v9074_v31 }
 0x1b1   :  { %6271 = vmatpush3.xpose.msra.mxu0 %v9087_v33  ;;  %6305 = vmatpush3.xpose.msra.mxu1 %v9089_v34 }
 0x1b2   :  { %6272 = vmatprep.subr.mxu0 %v9091_v35  ;;  %6306 = vmatprep.subr.mxu1 %v9093_v36 }
 0x1b5   :  { %6273 = vmatpush3.xpose.msra.mxu0 %v9106_v38  ;;  %6307 = vmatpush3.xpose.msra.mxu1 %v9108_v39 }
 0x1b6   :  { %6274 = vmatprep.subr.mxu0 %v9110_v40  ;;  %6308 = vmatprep.subr.mxu1 %v9112_v41 }
 0x1b9   :  { %6275 = vmatpush3.xpose.msra.mxu0 %v9122_v42  ;;  %6309 = vmatpush3.xpose.msra.mxu1 %v9124_v43 }
 0x1ba   :  { %6276 = vmatprep.subr.mxu0 %v9126_v44  ;;  %6310 = vmatprep.subr.mxu1 %v9128_v45 }
 0x1bd   :  { %6277 = vmatpush3.xpose.msra.mxu0 %v9136_v47  ;;  %6311 = vmatpush3.xpose.msra.mxu1 %v9138_v48 }
 0x1be   :  { %6278 = vmatprep.subr.mxu0 %v9140_v49  ;;  %6312 = vmatprep.subr.mxu1 %v9142_v50 }
 0x1c1   :  { %6279 = vmatpush3.xpose.msra.mxu0 %v9148_v51  ;;  %6313 = vmatpush3.xpose.msra.mxu1 %v9150_v52 }
 0x1c2   :  { %6280 = vmatprep.subr.mxu0 %v12402_v32  ;;  %6314 = vmatprep.subr.mxu1 %v12403_v61 }
 0x1c5   :  { %6281 = vmatpush3.xpose.msra.mxu0 %v12404_v12  ;;  %6315 = vmatpush3.xpose.msra.mxu1 %v12405_v54 }
 0x1c6   :  { %6282 = vmatprep.subr.mxu0 %v12406_v27  ;;  %6316 = vmatprep.subr.mxu1 %v12407_v62  ;;  %v12427_v62 = vld [vmem:[#allocation40_spill] sm:$0xff] }
 0x1c9   :  { %6283 = vmatpush3.xpose.msra.mxu0 %v12408_v22  ;;  %6317 = vmatpush3.xpose.msra.mxu1 %v12409_v0  ;;  %v12426_v22 = vld [vmem:[#allocation42_spill] sm:$0xff] }
 0x1ca   :  { %6284 = vmatprep.subr.mxu0 %v12410_v1  ;;  %6318 = vmatprep.subr.mxu1 %v12411_v60 }
 0x1cd   :  { %6285 = vmatpush3.xpose.msra.mxu0 %v12412_v53  ;;  %6319 = vmatpush3.xpose.msra.mxu1 %v12413_v58  ;;  %v12423_v53 = vld [vmem:[#allocation14_spill] sm:$0xff] }
 0x1ce   :  { %6286 = vmatprep.subr.mxu0 %v12414_v7  ;;  %6320 = vmatprep.subr.mxu1 %v12415_v63  ;;  %v12424_v7 = vld [vmem:[#allocation39_spill] sm:$0xff] }
 0x1d1   :  { %6287 = vmatpush3.xpose.msra.mxu0 %v12416_v57  ;;  %6321 = vmatpush3.xpose.msra.mxu1 %v12417_v56  ;;  %v12425_v57 = vld [vmem:[#allocation41_spill] sm:$0xff] }
 0x1d2   :  { %6288 = vmatprep.subr.mxu0 %v12418_v2  ;;  %6322 = vmatprep.subr.mxu1 %v12419_v59 }
 0x1d5   :  { %6289 = vmatpush3.xpose.msra.mxu0 %v12420_v46  ;;  %6323 = vmatpush3.xpose.msra.mxu1 %v12421_v55 }
 0x1d6   :  { %6326 = vmatprep.subr.mxu0 %v12422_v17  ;;  %6360 = vmatprep.subr.mxu1 %v12423_v53 }
 0x258   :  { %v939_v58 = vpop.f32.mrf.mxu0  ;;  %v1010_v56 = vpop.f32.mrf.mxu1 }
 0x259   :  { %v1015_v60 = vadd.f32 %v939_v58, %v12424_v7  ;;  %v1017_v55 = vadd.f32 %v1010_v56, %v12427_v62 }
 0x25a   :  { %v941_v63 = vpop.f32.mrf.mxu0  ;;  %v1012_v59 = vpop.f32.mrf.mxu1 }
 0x25b   :  { %v5954_v1 = vmul.f32 -1.442695, %v1015_v60  ;;  %v1016_v0 = vadd.f32 %v941_v63, %v12425_v57  ;;  %v1018_v46 = vadd.f32 %v1012_v59, %v12426_v22 }
 0x25d   :  { %8021 = vpow2.f32 %v5954_v1  ;;  %v5955_v2 = vmul.f32 -1.442695, %v1016_v0  ;;  %v5956_v27 = vmul.f32 -1.442695, %v1018_v46 }
 0x25f   :  { %8023 = vpow2.f32 %v5955_v2 }
 0x260   :  { %8025 = vtanh.f32 %v1017_v55  ;;  %v12449_v55 = vld [vmem:[#allocation45_spill] sm:$0xff] }
 0x261   :  { %8027 = vpow2.f32 %v5956_v27 }
 0x26a   :  { %v8022_v17 = vpop.eup %8021 }
 0x26b   :  { %v1022_v54 = vadd.f32 1.0, %v8022_v17 }
 0x26c   :  { %v8024_v53 = vpop.eup %8023 }
 0x26d   :  { %8029 = vrcp.f32 %v1022_v54  ;;  %v1028_v58 = vadd.f32 1.0, %v8024_v53  ;;  %v8026_v60 = vpop.eup %8025 }
 0x26e   :  { %v8028_v7 = vpop.eup %8027 }
 0x26f   :  { %8031 = vrcp.f32 %v1028_v58  ;;  %v1035_v57 = vadd.f32 1.0, %v8028_v7  ;;  %v12450_v7 = vld [vmem:[#allocation46_spill] sm:$0xff] }
 0x271   :  { %8033 = vrcp.f32 %v1035_v57 }
 0x27a   :  { %v8030_v1 = vpop.eup %8029 }
 0x27b   :  { %v1039_v63 = vmul.f32 %v8030_v1, %v8026_v60 }
 0x27c   :  { %v8032_v0 = vpop.eup %8031 }
 0x27d   :  { %v1038_v2 = vmul.f32 %v8032_v0, %v9385_v37  ;;  %v12448_v37 = vld [vmem:[#allocation43_spill] sm:$0xff] }
 0x27e   :  { %v8034_v62 = vpop.eup %8033 }
 0x27f   :  { %v9463_v22 = vadd.f32 %v1039_v63, %v1038_v2  ;;  %v12451_v63 = vld [vmem:[#allocation44_spill] sm:$0xff] }
 0x281   :  { %8035 = vtanh.f32 %v9463_v22 }
 0x28e   :  { %v8036_v56 = vpop.eup %8035 }
 0x28f   :  { %v9466_v59 = vmul.f32 %v8036_v56, %v8034_v62 }
 0x291   :  { %12428 = vst [vmem:[#allocation15_spill] sm:$0xff] %v9466_v59  ;;  %6290 = vmatprep.mubr.f32.mxu0 %v9466_v59  ;;  %6324 = vmatprep.mubr.f32.mxu1 %v9466_v59 }
 0x292   :  { %6291 = vmatmul.mubr.f32.vlgmr.msra.gmra.mxu0 %v9466_v59  ;;  %6325 = vmatmul.mubr.f32.vlgmr.msra.gmra.mxu1 %v9466_v59  ;;  %v9608_v59 = vld [vmem:[#allocation7 + $0xd0] sm:$0xff] }
 0x293   :  { %6327 = vmatpush3.xpose.msra.mxu0 %v8973_v3  ;;  %6361 = vmatpush3.xpose.msra.mxu1 %v8975_v4  ;;  %v12429_v3 = vld [vmem:[#allocation18_spill] sm:$0xff]  ;;  %v12430_v4 = vld [vmem:[#allocation19_spill] sm:$0xff] }
 0x294   :  { %6328 = vmatprep.subr.mxu0 %v8977_v5  ;;  %6362 = vmatprep.subr.mxu1 %v8979_v6  ;;  %v12431_v5 = vld [vmem:[#allocation20_spill] sm:$0xff]  ;;  %v12432_v6 = vld [vmem:[#allocation21_spill] sm:$0xff] }
 0x297   :  { %6329 = vmatpush3.xpose.msra.mxu0 %v8992_v8  ;;  %6363 = vmatpush3.xpose.msra.mxu1 %v8994_v9  ;;  %v12433_v8 = vld [vmem:[#allocation22_spill] sm:$0xff]  ;;  %v12434_v9 = vld [vmem:[#allocation23_spill] sm:$0xff] }
 0x298   :  { %6330 = vmatprep.subr.mxu0 %v8996_v10  ;;  %6364 = vmatprep.subr.mxu1 %v8998_v11  ;;  %v12435_v10 = vld [vmem:[#allocation24_spill] sm:$0xff]  ;;  %v12436_v11 = vld [vmem:[#allocation25_spill] sm:$0xff] }
 0x29b   :  { %6331 = vmatpush3.xpose.msra.mxu0 %v9011_v13  ;;  %6365 = vmatpush3.xpose.msra.mxu1 %v9013_v14  ;;  %v12437_v13 = vld [vmem:[#allocation26_spill] sm:$0xff]  ;;  %v12438_v14 = vld [vmem:[#allocation27_spill] sm:$0xff] }
 0x29c   :  { %6332 = vmatprep.subr.mxu0 %v9015_v15  ;;  %6366 = vmatprep.subr.mxu1 %v9017_v16  ;;  %v12439_v15 = vld [vmem:[#allocation28_spill] sm:$0xff]  ;;  %v12440_v16 = vld [vmem:[#allocation29_spill] sm:$0xff] }
 0x29f   :  { %6333 = vmatpush3.xpose.msra.mxu0 %v9030_v18  ;;  %6367 = vmatpush3.xpose.msra.mxu1 %v9032_v19  ;;  %v12441_v18 = vld [vmem:[#allocation30_spill] sm:$0xff]  ;;  %v12442_v19 = vld [vmem:[#allocation31_spill] sm:$0xff] }
 0x2a0   :  { %6334 = vmatprep.subr.mxu0 %v9034_v20  ;;  %6368 = vmatprep.subr.mxu1 %v9036_v21  ;;  %v12443_v20 = vld [vmem:[#allocation32_spill] sm:$0xff]  ;;  %v12444_v21 = vld [vmem:[#allocation33_spill] sm:$0xff] }
 0x2a3   :  { %6335 = vmatpush3.xpose.msra.mxu0 %v9049_v23  ;;  %6369 = vmatpush3.xpose.msra.mxu1 %v9051_v24  ;;  %v12445_v23 = vld [vmem:[#allocation34_spill] sm:$0xff]  ;;  %v9534_v24 = vld [vmem:[#allocation7 + $0xf8] sm:$0xff] }
 0x2a4   :  { %6336 = vmatprep.subr.mxu0 %v9053_v25  ;;  %6370 = vmatprep.subr.mxu1 %v9055_v26  ;;  %12446 = vst [vmem:[#allocation16_spill] sm:$0xff] %v9534_v24  ;;  %v9537_v25 = vld [vmem:[#allocation7 + $0x1f8] sm:$0xff] }
 0x2a5   :  { %12447 = vst [vmem:[#allocation17_spill] sm:$0xff] %v9537_v25 }
 0x2a7   :  { %6337 = vmatpush3.xpose.msra.mxu0 %v9068_v28  ;;  %6371 = vmatpush3.xpose.msra.mxu1 %v9070_v29 }
 0x2a8   :  { %6338 = vmatprep.subr.mxu0 %v9072_v30  ;;  %6372 = vmatprep.subr.mxu1 %v9074_v31 }
 0x2ab   :  { %6339 = vmatpush3.xpose.msra.mxu0 %v9087_v33  ;;  %6373 = vmatpush3.xpose.msra.mxu1 %v9089_v34 }
 0x2ac   :  { %6340 = vmatprep.subr.mxu0 %v9091_v35  ;;  %6374 = vmatprep.subr.mxu1 %v9093_v36 }
 0x2af   :  { %6341 = vmatpush3.xpose.msra.mxu0 %v9106_v38  ;;  %6375 = vmatpush3.xpose.msra.mxu1 %v9108_v39 }
 0x2b0   :  { %6342 = vmatprep.subr.mxu0 %v9110_v40  ;;  %6376 = vmatprep.subr.mxu1 %v9112_v41 }
 0x2b3   :  { %6343 = vmatpush3.xpose.msra.mxu0 %v9122_v42  ;;  %6377 = vmatpush3.xpose.msra.mxu1 %v9124_v43 }
 0x2b4   :  { %6344 = vmatprep.subr.mxu0 %v9126_v44  ;;  %6378 = vmatprep.subr.mxu1 %v9128_v45 }
 0x2b7   :  { %6345 = vmatpush3.xpose.msra.mxu0 %v9136_v47  ;;  %6379 = vmatpush3.xpose.msra.mxu1 %v9138_v48 }
 0x2b8   :  { %6346 = vmatprep.subr.mxu0 %v9140_v49  ;;  %6380 = vmatprep.subr.mxu1 %v9142_v50 }
 0x2bb   :  { %6347 = vmatpush3.xpose.msra.mxu0 %v9148_v51  ;;  %6381 = vmatpush3.xpose.msra.mxu1 %v9150_v52 }
 0x2bc   :  { %6348 = vmatprep.subr.mxu0 %v12402_v32  ;;  %6382 = vmatprep.subr.mxu1 %v12403_v61 }
 0x2bf   :  { %6349 = vmatpush3.xpose.msra.mxu0 %v12404_v12  ;;  %6383 = vmatpush3.xpose.msra.mxu1 %v12429_v3 }
 0x2c0   :  { %6350 = vmatprep.subr.mxu0 %v12430_v4  ;;  %6384 = vmatprep.subr.mxu1 %v12431_v5 }
 0x2c3   :  { %6351 = vmatpush3.xpose.msra.mxu0 %v12432_v6  ;;  %6385 = vmatpush3.xpose.msra.mxu1 %v12433_v8 }
 0x2c4   :  { %6352 = vmatprep.subr.mxu0 %v12434_v9  ;;  %6386 = vmatprep.subr.mxu1 %v12435_v10 }
 0x2c7   :  { %6353 = vmatpush3.xpose.msra.mxu0 %v12436_v11  ;;  %6387 = vmatpush3.xpose.msra.mxu1 %v12437_v13 }
 0x2c8   :  { %6354 = vmatprep.subr.mxu0 %v12438_v14  ;;  %6388 = vmatprep.subr.mxu1 %v12439_v15 }
 0x2cb   :  { %6355 = vmatpush3.xpose.msra.mxu0 %v12440_v16  ;;  %6389 = vmatpush3.xpose.msra.mxu1 %v12441_v18 }
 0x2cc   :  { %6356 = vmatprep.subr.mxu0 %v12442_v19  ;;  %6390 = vmatprep.subr.mxu1 %v12443_v20 }
 0x2cf   :  { %6357 = vmatpush3.xpose.msra.mxu0 %v12444_v21  ;;  %6391 = vmatpush3.xpose.msra.mxu1 %v12445_v23 }
 0x2d0   :  { %6394 = vmatprep.subr.mxu0 %v9534_v24  ;;  %6428 = vmatprep.subr.mxu1 %v9537_v25 }
 0x352   :  { %v1118_v26 = vpop.f32.mrf.mxu0  ;;  %v1189_v53 = vpop.f32.mrf.mxu1 }
 0x353   :  { %v1194_v54 = vadd.f32 %v1118_v26, %v12448_v37  ;;  %v1196_v0 = vadd.f32 %v1189_v53, %v12451_v63  ;;  %v9554_v63 = vld [vmem:[#allocation7 + $0x78] sm:$0xff] }
 0x354   :  { %v1120_v27 = vpop.f32.mrf.mxu0  ;;  %v1191_v60 = vpop.f32.mrf.mxu1 }
 0x355   :  { %v5957_v46 = vmul.f32 -1.442695, %v1194_v54  ;;  %v1195_v17 = vadd.f32 %v1120_v27, %v12449_v55  ;;  %v1197_v1 = vadd.f32 %v1191_v60, %v12450_v7 }
 0x357   :  { %8037 = vpow2.f32 %v5957_v46  ;;  %v5958_v58 = vmul.f32 -1.442695, %v1195_v17  ;;  %v5959_v57 = vmul.f32 -1.442695, %v1197_v1 }
 0x359   :  { %8039 = vpow2.f32 %v5958_v58 }
 0x35a   :  { %8041 = vtanh.f32 %v1196_v0  ;;  %v9560_v0 = vld [vmem:[#allocation7 + $0xf0] sm:$0xff] }
 0x35b   :  { %8043 = vpow2.f32 %v5959_v57  ;;  %v9563_v57 = vld [vmem:[#allocation7 + $0x1f0] sm:$0xff] }
 0x364   :  { %v8038_v2 = vpop.eup %8037 }
 0x365   :  { %v1201_v62 = vadd.f32 1.0, %v8038_v2  ;;  %v9566_v2 = vld [vmem:[#allocation7 + $0x70] sm:$0xff] }
 0x366   :  { %v8040_v56 = vpop.eup %8039 }
 0x367   :  { %8045 = vrcp.f32 %v1201_v62  ;;  %v1207_v26 = vadd.f32 1.0, %v8040_v56  ;;  %v8042_v37 = vpop.eup %8041  ;;  %v9569_v62 = vld [vmem:[#allocation7 + $0x170] sm:$0xff]  ;;  %v9572_v56 = vld [vmem:[#allocation7 + $0xe8] sm:$0xff] }
 0x368   :  { %v8044_v54 = vpop.eup %8043 }
 0x369   :  { %8047 = vrcp.f32 %v1207_v26  ;;  %v1214_v17 = vadd.f32 1.0, %v8044_v54  ;;  %v9575_v26 = vld [vmem:[#allocation7 + $0x1e8] sm:$0xff] }
 0x36a   :  { %v9581_v54 = vld [vmem:[#allocation7 + $0x168] sm:$0xff] }
 0x36b   :  { %8049 = vrcp.f32 %v1214_v17  ;;  %v9593_v17 = vld [vmem:[#allocation7 + $0x160] sm:$0xff] }
 0x36c   :  { %12453 = vst [vmem:[#allocation14_spill] sm:$0xff] %v9593_v17 }
 0x374   :  { %v8046_v27 = vpop.eup %8045 }
 0x375   :  { %v1218_v46 = vmul.f32 %v8046_v27, %v8042_v37  ;;  %v9578_v37 = vld [vmem:[#allocation7 + $0x68] sm:$0xff]  ;;  %v9584_v27 = vld [vmem:[#allocation7 + $0xe0] sm:$0xff] }
 0x376   :  { %v8048_v55 = vpop.eup %8047 }
 0x377   :  { %v1217_v58 = vmul.f32 %v8048_v55, %v9463_v22  ;;  %v9557_v22 = vld [vmem:[#allocation7 + $0x178] sm:$0xff]  ;;  %v9590_v55 = vld [vmem:[#allocation7 + $0x60] sm:$0xff] }
 0x378   :  { %v8050_v53 = vpop.eup %8049 }
 0x379   :  { %v9545_v60 = vadd.f32 %v1218_v46, %v1217_v58  ;;  %v9587_v46 = vld [vmem:[#allocation7 + $0x1e0] sm:$0xff]  ;;  %v9596_v58 = vld [vmem:[#allocation7 + $0xd8] sm:$0xff] }
 0x37b   :  { %8051 = vtanh.f32 %v9545_v60 }
 0x388   :  { %v8052_v7 = vpop.eup %8051 }
 0x389   :  { %v9548_v1 = vmul.f32 %v8052_v7, %v8050_v53  ;;  %v9599_v53 = vld [vmem:[#allocation7 + $0x1d8] sm:$0xff] }
 0x38a   :  { %v9602_v7 = vld [vmem:[#allocation7 + $0x58] sm:$0xff] }
 0x38b   :  { %12452 = vst [vmem:[#allocation13_spill] sm:$0xff] %v9548_v1  ;;  %6358 = vmatprep.mubr.f32.mxu0 %v9548_v1  ;;  %6392 = vmatprep.mubr.f32.mxu1 %v9548_v1 }
 0x38c   :  { %6359 = vmatmul.mubr.f32.vlgmr.msra.gmra.mxu0 %v9548_v1  ;;  %6393 = vmatmul.mubr.f32.vlgmr.msra.gmra.mxu1 %v9548_v1  ;;  %v9605_v1 = vld [vmem:[#allocation7 + $0x158] sm:$0xff] }
 0x38d   :  { %6395 = vmatpush3.xpose.msra.mxu0 %v9554_v63  ;;  %6429 = vmatpush3.xpose.msra.mxu1 %v9557_v22 }
 0x38e   :  { %6396 = vmatprep.subr.mxu0 %v9560_v0  ;;  %6430 = vmatprep.subr.mxu1 %v9563_v57 }
 0x391   :  { %6397 = vmatpush3.xpose.msra.mxu0 %v9566_v2  ;;  %6431 = vmatpush3.xpose.msra.mxu1 %v9569_v62 }
 0x392   :  { %6398 = vmatprep.subr.mxu0 %v9572_v56  ;;  %6432 = vmatprep.subr.mxu1 %v9575_v26 }
 0x395   :  { %6399 = vmatpush3.xpose.msra.mxu0 %v9578_v37  ;;  %6433 = vmatpush3.xpose.msra.mxu1 %v9581_v54 }
 0x396   :  { %6400 = vmatprep.subr.mxu0 %v9584_v27  ;;  %6434 = vmatprep.subr.mxu1 %v9587_v46 }
 0x399   :  { %6401 = vmatpush3.xpose.msra.mxu0 %v9590_v55  ;;  %6435 = vmatpush3.xpose.msra.mxu1 %v9593_v17  ;;  %v9611_v17 = vld [vmem:[#allocation7 + $0x1d0] sm:$0xff] }
 0x39a   :  { %6402 = vmatprep.subr.mxu0 %v9596_v58  ;;  %6436 = vmatprep.subr.mxu1 %v9599_v53 }
 0x39d   :  { %6403 = vmatpush3.xpose.msra.mxu0 %v9602_v7  ;;  %6437 = vmatpush3.xpose.msra.mxu1 %v9605_v1 }
 0x39e   :  { %6404 = vmatprep.subr.mxu0 %v9608_v59  ;;  %6438 = vmatprep.subr.mxu1 %v9611_v17 }
 0x3a1   :  { %6405 = vmatpush3.xpose.msra.mxu0 %v9068_v28  ;;  %6439 = vmatpush3.xpose.msra.mxu1 %v9070_v29  ;;  %v12454_v29 = vld [vmem:[#allocation47_spill] sm:$0xff] }
 0x3a2   :  { %6406 = vmatprep.subr.mxu0 %v9072_v30  ;;  %6440 = vmatprep.subr.mxu1 %v9074_v31 }
 0x3a5   :  { %6407 = vmatpush3.xpose.msra.mxu0 %v9087_v33  ;;  %6441 = vmatpush3.xpose.msra.mxu1 %v9089_v34  ;;  %v12455_v34 = vld [vmem:[#allocation49_spill] sm:$0xff] }
 0x3a6   :  { %6408 = vmatprep.subr.mxu0 %v9091_v35  ;;  %6442 = vmatprep.subr.mxu1 %v9093_v36 }
 0x3a9   :  { %6409 = vmatpush3.xpose.msra.mxu0 %v9106_v38  ;;  %6443 = vmatpush3.xpose.msra.mxu1 %v9108_v39 }
 0x3aa   :  { %6410 = vmatprep.subr.mxu0 %v9110_v40  ;;  %6444 = vmatprep.subr.mxu1 %v9112_v41  ;;  %v12456_v40 = vld [vmem:[#allocation50_spill] sm:$0xff] }
 0x3ad   :  { %6411 = vmatpush3.xpose.msra.mxu0 %v9122_v42  ;;  %6445 = vmatpush3.xpose.msra.mxu1 %v9124_v43  ;;  %v12457_v42 = vld [vmem:[#allocation48_spill] sm:$0xff] }
 0x3ae   :  { %6412 = vmatprep.subr.mxu0 %v9126_v44  ;;  %6446 = vmatprep.subr.mxu1 %v9128_v45 }
 0x3b1   :  { %6413 = vmatpush3.xpose.msra.mxu0 %v9136_v47  ;;  %6447 = vmatpush3.xpose.msra.mxu1 %v9138_v48 }
 0x3b2   :  { %6414 = vmatprep.subr.mxu0 %v9140_v49  ;;  %6448 = vmatprep.subr.mxu1 %v9142_v50 }
 0x3b5   :  { %6415 = vmatpush3.xpose.msra.mxu0 %v9148_v51  ;;  %6449 = vmatpush3.xpose.msra.mxu1 %v9150_v52 }
 0x3b6   :  { %6416 = vmatprep.subr.mxu0 %v12402_v32  ;;  %6450 = vmatprep.subr.mxu1 %v12403_v61 }
 0x3b9   :  { %6417 = vmatpush3.xpose.msra.mxu0 %v12404_v12  ;;  %6451 = vmatpush3.xpose.msra.mxu1 %v12429_v3 }
 0x3ba   :  { %6418 = vmatprep.subr.mxu0 %v12430_v4  ;;  %6452 = vmatprep.subr.mxu1 %v12431_v5 }
 0x3bd   :  { %6419 = vmatpush3.xpose.msra.mxu0 %v12432_v6  ;;  %6453 = vmatpush3.xpose.msra.mxu1 %v12433_v8 }
 0x3be   :  { %6420 = vmatprep.subr.mxu0 %v12434_v9  ;;  %6454 = vmatprep.subr.mxu1 %v12435_v10  ;;  %v12459_v9 = vld [vmem:[#allocation14_spill] sm:$0xff] }
 0x3bf   :  { %v9692_v10 = vld [vmem:[#allocation7 + $0x50] sm:$0xff] }
 0x3c1   :  { %6421 = vmatpush3.xpose.msra.mxu0 %v12436_v11  ;;  %6455 = vmatpush3.xpose.msra.mxu1 %v12437_v13  ;;  %v9695_v11 = vld [vmem:[#allocation7 + $0x150] sm:$0xff]  ;;  %v9698_v13 = vld [vmem:[#allocation7 + $0xc8] sm:$0xff] }
 0x3c2   :  { %6422 = vmatprep.subr.mxu0 %v12438_v14  ;;  %6456 = vmatprep.subr.mxu1 %v12439_v15  ;;  %v9701_v14 = vld [vmem:[#allocation7 + $0x1c8] sm:$0xff] }
 0x3c3   :  { %v9704_v15 = vld [vmem:[#allocation7 + $0x48] sm:$0xff] }
 0x3c5   :  { %6423 = vmatpush3.xpose.msra.mxu0 %v12440_v16  ;;  %6457 = vmatpush3.xpose.msra.mxu1 %v12441_v18  ;;  %v9707_v16 = vld [vmem:[#allocation7 + $0x148] sm:$0xff]  ;;  %v9710_v18 = vld [vmem:[#allocation7 + $0xc0] sm:$0xff] }
 0x3c6   :  { %6424 = vmatprep.subr.mxu0 %v12442_v19  ;;  %6458 = vmatprep.subr.mxu1 %v12443_v20  ;;  %v9713_v19 = vld [vmem:[#allocation7 + $0x1c0] sm:$0xff] }
 0x3c7   :  { %v9716_v20 = vld [vmem:[#allocation7 + $0x40] sm:$0xff] }
 0x3c9   :  { %6425 = vmatpush3.xpose.msra.mxu0 %v12444_v21  ;;  %6459 = vmatpush3.xpose.msra.mxu1 %v12445_v23  ;;  %v9719_v21 = vld [vmem:[#allocation7 + $0x140] sm:$0xff]  ;;  %v9722_v23 = vld [vmem:[#allocation7 + $0xb8] sm:$0xff] }
 0x3ca   :  { %6462 = vmatprep.subr.mxu0 %v9534_v24  ;;  %6496 = vmatprep.subr.mxu1 %v9537_v25 }
 0x44c   :  { %v1297_v28 = vpop.f32.mrf.mxu0  ;;  %v1368_v36 = vpop.f32.mrf.mxu1 }
 0x44d   :  { %v1373_v30 = vadd.f32 %v1297_v28, %v12454_v29  ;;  %v1375_v43 = vadd.f32 %v1368_v36, %v12457_v42  ;;  %v9728_v28 = vld [vmem:[#allocation7 + $0x38] sm:$0xff]  ;;  %v9749_v36 = vld [vmem:[#allocation7 + $0x1a8] sm:$0xff]  ;;  %v9764_v42 = vld [vmem:[#allocation7 + $0x20] sm:$0xff] }
 0x44e   :  { %v1299_v31 = vpop.f32.mrf.mxu0  ;;  %v1370_v39 = vpop.f32.mrf.mxu1  ;;  %v9731_v29 = vld [vmem:[#allocation7 + $0x138] sm:$0xff] }
 0x44f   :  { %v5960_v33 = vmul.f32 -1.442695, %v1373_v30  ;;  %v1374_v35 = vadd.f32 %v1299_v31, %v12455_v34  ;;  %v1376_v41 = vadd.f32 %v1370_v39, %v12456_v40  ;;  %v9734_v30 = vld [vmem:[#allocation7 + $0xb0] sm:$0xff]  ;;  %v9755_v39 = vld [vmem:[#allocation7 + $0x128] sm:$0xff]  ;;  %v9758_v40 = vld [vmem:[#allocation7 + $0xa0] sm:$0xff] }
 0x450   :  { %v9737_v31 = vld [vmem:[#allocation7 + $0x1b0] sm:$0xff] }
 0x451   :  { %8053 = vpow2.f32 %v5960_v33  ;;  %v5961_v38 = vmul.f32 -1.442695, %v1374_v35  ;;  %v5962_v44 = vmul.f32 -1.442695, %v1376_v41  ;;  %v9740_v33 = vld [vmem:[#allocation7 + $0x30] sm:$0xff]  ;;  %v9746_v35 = vld [vmem:[#allocation7 + $0xa8] sm:$0xff] }
 0x452   :  { %v9743_v34 = vld [vmem:[#allocation7 + $0x130] sm:$0xff]  ;;  %v9761_v41 = vld [vmem:[#allocation7 + $0x1a0] sm:$0xff] }
 0x453   :  { %8055 = vpow2.f32 %v5961_v38  ;;  %v9752_v38 = vld [vmem:[#allocation7 + $0x28] sm:$0xff] }
 0x454   :  { %8057 = vtanh.f32 %v1375_v43  ;;  %v9767_v43 = vld [vmem:[#allocation7 + $0x120] sm:$0xff] }
 0x455   :  { %8059 = vpow2.f32 %v5962_v44  ;;  %12460 = vst [vmem:[#allocation41_spill] sm:$0xff] %v9767_v43  ;;  %v9770_v44 = vld [vmem:[#allocation7 + $0x98] sm:$0xff] }
 0x456   :  { %12461 = vst [vmem:[#allocation42_spill] sm:$0xff] %v9770_v44 }
 0x45e   :  { %v8054_v45 = vpop.eup %8053 }
 0x45f   :  { %v1380_v47 = vadd.f32 1.0, %v8054_v45  ;;  %v9773_v45 = vld [vmem:[#allocation7 + $0x198] sm:$0xff] }
 0x460   :  { %v8056_v48 = vpop.eup %8055  ;;  %12462 = vst [vmem:[#allocation40_spill] sm:$0xff] %v9773_v45 }
 0x461   :  { %8061 = vrcp.f32 %v1380_v47  ;;  %v1386_v49 = vadd.f32 1.0, %v8056_v48  ;;  %v8058_v50 = vpop.eup %8057  ;;  %v9776_v47 = vld [vmem:[#allocation7 + $0x18] sm:$0xff] }
 0x462   :  { %v8060_v51 = vpop.eup %8059  ;;  %12463 = vst [vmem:[#allocation18_spill] sm:$0xff] %v9776_v47  ;;  %v9779_v48 = vld [vmem:[#allocation7 + $0x118] sm:$0xff] }
 0x463   :  { %8063 = vrcp.f32 %v1386_v49  ;;  %v1393_v12 = vadd.f32 1.0, %v8060_v51  ;;  %12464 = vst [vmem:[#allocation19_spill] sm:$0xff] %v9779_v48  ;;  %v9782_v49 = vld [vmem:[#allocation7 + $0x90] sm:$0xff] }
 0x464   :  { %12465 = vst [vmem:[#allocation20_spill] sm:$0xff] %v9782_v49  ;;  %v9788_v51 = vld [vmem:[#allocation7 + $0x10] sm:$0xff] }
 0x465   :  { %8065 = vrcp.f32 %v1393_v12  ;;  %12467 = vst [vmem:[#allocation22_spill] sm:$0xff] %v9788_v51  ;;  %v9800_v12 = vld [vmem:[#allocation7 + $0x8] sm:$0xff] }
 0x466   :  { %12471 = vst [vmem:[#allocation26_spill] sm:$0xff] %v9800_v12 }
 0x46e   :  { %v8062_v52 = vpop.eup %8061 }
 0x46f   :  { %v1397_v32 = vmul.f32 %v8062_v52, %v8058_v50  ;;  %v9785_v50 = vld [vmem:[#allocation7 + $0x190] sm:$0xff] }
 0x470   :  { %v8064_v61 = vpop.eup %8063  ;;  %12466 = vst [vmem:[#allocation21_spill] sm:$0xff] %v9785_v50  ;;  %v9791_v52 = vld [vmem:[#allocation7 + $0x110] sm:$0xff] }
 0x471   :  { %v1396_v3 = vmul.f32 %v8064_v61, %v9545_v60  ;;  %v9725_v60 = vld [vmem:[#allocation7 + $0x1b8] sm:$0xff]  ;;  %12468 = vst [vmem:[#allocation23_spill] sm:$0xff] %v9791_v52  ;;  %v9797_v61 = vld [vmem:[#allocation7 + $0x188] sm:$0xff] }
 0x472   :  { %v8066_v5 = vpop.eup %8065  ;;  %12470 = vst [vmem:[#allocation25_spill] sm:$0xff] %v9797_v61 }
 0x473   :  { %v9663_v4 = vadd.f32 %v1397_v32, %v1396_v3  ;;  %v9794_v32 = vld [vmem:[#allocation7 + $0x88] sm:$0xff] }
 0x474   :  { %12469 = vst [vmem:[#allocation24_spill] sm:$0xff] %v9794_v32  ;;  %v9803_v3 = vld [vmem:[#allocation7 + $0x108] sm:$0xff] }
 0x475   :  { %8067 = vtanh.f32 %v9663_v4  ;;  %12472 = vst [vmem:[#allocation27_spill] sm:$0xff] %v9803_v3 }
 0x482   :  { %v8068_v6 = vpop.eup %8067 }
 0x483   :  { %v9666_v8 = vmul.f32 %v8068_v6, %v8066_v5  ;;  %v9806_v5 = vld [vmem:[#allocation7 + $0x80] sm:$0xff] }
 0x484   :  { %12473 = vst [vmem:[#allocation28_spill] sm:$0xff] %v9806_v5  ;;  %v9809_v6 = vld [vmem:[#allocation7 + $0x180] sm:$0xff] }
 0x485   :  { %12458 = vst [vmem:[#allocation39_spill] sm:$0xff] %v9666_v8  ;;  %6426 = vmatprep.mubr.f32.mxu0 %v9666_v8  ;;  %6460 = vmatprep.mubr.f32.mxu1 %v9666_v8  ;;  %12474 = vst [vmem:[#allocation29_spill] sm:$0xff] %v9809_v6 }
 0x486   :  { %6427 = vmatmul.mubr.f32.vlgmr.msra.gmra.mxu0 %v9666_v8  ;;  %6461 = vmatmul.mubr.f32.vlgmr.msra.gmra.mxu1 %v9666_v8  ;;  %v9812_v8 = vld [vmem:[#allocation7] sm:$0xff] }
 0x487   :  { %6463 = vmatpush3.xpose.msra.mxu0 %v9554_v63  ;;  %6497 = vmatpush3.xpose.msra.mxu1 %v9557_v22  ;;  %12475 = vst [vmem:[#allocation30_spill] sm:$0xff] %v9812_v8 }
 0x488   :  { %6464 = vmatprep.subr.mxu0 %v9560_v0  ;;  %6498 = vmatprep.subr.mxu1 %v9563_v57 }
 0x48b   :  { %6465 = vmatpush3.xpose.msra.mxu0 %v9566_v2  ;;  %6499 = vmatpush3.xpose.msra.mxu1 %v9569_v62 }
 0x48c   :  { %6466 = vmatprep.subr.mxu0 %v9572_v56  ;;  %6500 = vmatprep.subr.mxu1 %v9575_v26 }
 0x48f   :  { %6467 = vmatpush3.xpose.msra.mxu0 %v9578_v37  ;;  %6501 = vmatpush3.xpose.msra.mxu1 %v9581_v54 }
 0x490   :  { %6468 = vmatprep.subr.mxu0 %v9584_v27  ;;  %6502 = vmatprep.subr.mxu1 %v9587_v46 }
 0x493   :  { %6469 = vmatpush3.xpose.msra.mxu0 %v9590_v55  ;;  %6503 = vmatpush3.xpose.msra.mxu1 %v12459_v9 }
 0x494   :  { %6470 = vmatprep.subr.mxu0 %v9596_v58  ;;  %6504 = vmatprep.subr.mxu1 %v9599_v53 }
 0x497   :  { %6471 = vmatpush3.xpose.msra.mxu0 %v9602_v7  ;;  %6505 = vmatpush3.xpose.msra.mxu1 %v9605_v1 }
 0x498   :  { %6472 = vmatprep.subr.mxu0 %v9608_v59  ;;  %6506 = vmatprep.subr.mxu1 %v9611_v17 }
 0x49b   :  { %6473 = vmatpush3.xpose.msra.mxu0 %v9692_v10  ;;  %6507 = vmatpush3.xpose.msra.mxu1 %v9695_v11 }
 0x49c   :  { %6474 = vmatprep.subr.mxu0 %v9698_v13  ;;  %6508 = vmatprep.subr.mxu1 %v9701_v14 }
 0x49f   :  { %6475 = vmatpush3.xpose.msra.mxu0 %v9704_v15  ;;  %6509 = vmatpush3.xpose.msra.mxu1 %v9707_v16 }
 0x4a0   :  { %6476 = vmatprep.subr.mxu0 %v9710_v18  ;;  %6510 = vmatprep.subr.mxu1 %v9713_v19 }
 0x4a3   :  { %6477 = vmatpush3.xpose.msra.mxu0 %v9716_v20  ;;  %6511 = vmatpush3.xpose.msra.mxu1 %v9719_v21 }
 0x4a4   :  { %6478 = vmatprep.subr.mxu0 %v9722_v23  ;;  %6512 = vmatprep.subr.mxu1 %v9725_v60 }
 0x4a7   :  { %6479 = vmatpush3.xpose.msra.mxu0 %v9728_v28  ;;  %6513 = vmatpush3.xpose.msra.mxu1 %v9731_v29 }
 0x4a8   :  { %6480 = vmatprep.subr.mxu0 %v9734_v30  ;;  %6514 = vmatprep.subr.mxu1 %v9737_v31 }
 0x4ab   :  { %6481 = vmatpush3.xpose.msra.mxu0 %v9740_v33  ;;  %6515 = vmatpush3.xpose.msra.mxu1 %v9743_v34 }
 0x4ac   :  { %6482 = vmatprep.subr.mxu0 %v9746_v35  ;;  %6516 = vmatprep.subr.mxu1 %v9749_v36 }
 0x4af   :  { %6483 = vmatpush3.xpose.msra.mxu0 %v9752_v38  ;;  %6517 = vmatpush3.xpose.msra.mxu1 %v9755_v39 }
 0x4b0   :  { %6484 = vmatprep.subr.mxu0 %v9758_v40  ;;  %6518 = vmatprep.subr.mxu1 %v9761_v41 }
 0x4b3   :  { %6485 = vmatpush3.xpose.msra.mxu0 %v9764_v42  ;;  %6519 = vmatpush3.xpose.msra.mxu1 %v9767_v43 }
 0x4b4   :  { %6486 = vmatprep.subr.mxu0 %v9770_v44  ;;  %6520 = vmatprep.subr.mxu1 %v9773_v45  ;;  %v12480_v45 = vld [vmem:[#allocation52_spill] sm:$0xff] }
 0x4b7   :  { %6487 = vmatpush3.xpose.msra.mxu0 %v9776_v47  ;;  %6521 = vmatpush3.xpose.msra.mxu1 %v9779_v48  ;;  %v12479_v48 = vld [vmem:[#allocation54_spill] sm:$0xff] }
 0x4b8   :  { %6488 = vmatprep.subr.mxu0 %v9782_v49  ;;  %6522 = vmatprep.subr.mxu1 %v9785_v50 }
 0x4bb   :  { %6489 = vmatpush3.xpose.msra.mxu0 %v9788_v51  ;;  %6523 = vmatpush3.xpose.msra.mxu1 %v9791_v52  ;;  %v12478_v51 = vld [vmem:[#allocation53_spill] sm:$0xff] }
 0x4bc   :  { %6490 = vmatprep.subr.mxu0 %v9794_v32  ;;  %6524 = vmatprep.subr.mxu1 %v9797_v61  ;;  %v9815_v61 = vld [vmem:[#allocation7 + $0x100] sm:$0xff] }
 0x4bd   :  { %12476 = vst [vmem:[#allocation31_spill] sm:$0xff] %v9815_v61 }
 0x4bf   :  { %6491 = vmatpush3.xpose.msra.mxu0 %v9800_v12  ;;  %6525 = vmatpush3.xpose.msra.mxu1 %v9803_v3  ;;  %v12477_v12 = vld [vmem:[#allocation51_spill] sm:$0xff] }
 0x4c0   :  { %6492 = vmatprep.subr.mxu0 %v9806_v5  ;;  %6526 = vmatprep.subr.mxu1 %v9809_v6 }
 0x4c3   :  { %6493 = vmatpush3.xpose.msra.mxu0 %v9812_v8  ;;  %6527 = vmatpush3.xpose.msra.mxu1 %v9815_v61 }
 0x4c4   :  { %6530 = vmatprep.subr.mxu0 %v9534_v24  ;;  %6564 = vmatprep.subr.mxu1 %v9537_v25 }
 0x546   :  { %v1476_v3 = vpop.f32.mrf.mxu0  ;;  %v1547_v6 = vpop.f32.mrf.mxu1 }
 0x547   :  { %v1552_v32 = vadd.f32 %v1476_v3, %v12477_v12  ;;  %v1554_v61 = vadd.f32 %v1547_v6, %v12480_v45  ;;  %v12488_v6 = vld [vmem:[#allocation21_spill] sm:$0xff] }
 0x548   :  { %v1478_v5 = vpop.f32.mrf.mxu0  ;;  %v1549_v8 = vpop.f32.mrf.mxu1 }
 0x549   :  { %v5963_v52 = vmul.f32 -1.442695, %v1552_v32  ;;  %v1553_v50 = vadd.f32 %v1478_v5, %v12478_v51  ;;  %v1555_v47 = vadd.f32 %v1549_v8, %v12479_v48  ;;  %v12486_v48 = vld [vmem:[#allocation19_spill] sm:$0xff] }
 0x54b   :  { %8069 = vpow2.f32 %v5963_v52  ;;  %v5964_v49 = vmul.f32 -1.442695, %v1553_v50  ;;  %v5965_v44 = vmul.f32 -1.442695, %v1555_v47 }
 0x54d   :  { %8071 = vpow2.f32 %v5964_v49 }
 0x54e   :  { %8073 = vtanh.f32 %v1554_v61  ;;  %v12487_v61 = vld [vmem:[#allocation20_spill] sm:$0xff] }
 0x54f   :  { %8075 = vpow2.f32 %v5965_v44  ;;  %v12485_v44 = vld [vmem:[#allocation18_spill] sm:$0xff] }
 0x558   :  { %v8070_v24 = vpop.eup %8069 }
 0x559   :  { %v1559_v43 = vadd.f32 1.0, %v8070_v24 }
 0x55a   :  { %v8072_v25 = vpop.eup %8071 }
 0x55b   :  { %8077 = vrcp.f32 %v1559_v43  ;;  %v1565_v12 = vadd.f32 1.0, %v8072_v25  ;;  %v8074_v32 = vpop.eup %8073  ;;  %v12482_v25 = vld [vmem:[#allocation41_spill] sm:$0xff]  ;;  %v12484_v43 = vld [vmem:[#allocation40_spill] sm:$0xff] }
 0x55c   :  { %v8076_v51 = vpop.eup %8075 }
 0x55d   :  { %8079 = vrcp.f32 %v1565_v12  ;;  %v1572_v49 = vadd.f32 1.0, %v8076_v51  ;;  %v12489_v12 = vld [vmem:[#allocation22_spill] sm:$0xff]  ;;  %v12491_v51 = vld [vmem:[#allocation24_spill] sm:$0xff] }
 0x55f   :  { %8081 = vrcp.f32 %v1572_v49  ;;  %v12495_v49 = vld [vmem:[#allocation28_spill] sm:$0xff] }
 0x568   :  { %v8078_v52 = vpop.eup %8077 }
 0x569   :  { %v1576_v3 = vmul.f32 %v8078_v52, %v8074_v32  ;;  %v12490_v32 = vld [vmem:[#allocation23_spill] sm:$0xff]  ;;  %v12492_v52 = vld [vmem:[#allocation25_spill] sm:$0xff] }
 0x56a   :  { %v8080_v50 = vpop.eup %8079 }
 0x56b   :  { %v1575_v5 = vmul.f32 %v8080_v50, %v9663_v4  ;;  %v12483_v4 = vld [vmem:[#allocation42_spill] sm:$0xff]  ;;  %v12494_v50 = vld [vmem:[#allocation27_spill] sm:$0xff] }
 0x56c   :  { %v8082_v24 = vpop.eup %8081 }
 0x56d   :  { %v9825_v8 = vadd.f32 %v1576_v3, %v1575_v5  ;;  %v12493_v3 = vld [vmem:[#allocation26_spill] sm:$0xff]  ;;  %v12496_v5 = vld [vmem:[#allocation29_spill] sm:$0xff] }
 0x56f   :  { %8083 = vtanh.f32 %v9825_v8 }
 0x57c   :  { %v8084_v45 = vpop.eup %8083 }
 0x57d   :  { %v9828_v47 = vmul.f32 %v8084_v45, %v8082_v24  ;;  %v12497_v24 = vld [vmem:[#allocation30_spill] sm:$0xff]  ;;  %v12498_v45 = vld [vmem:[#allocation31_spill] sm:$0xff] }
 0x57f   :  { %12481 = vst [vmem:[#allocation32_spill] sm:$0xff] %v9828_v47  ;;  %6494 = vmatprep.mubr.f32.mxu0 %v9828_v47  ;;  %6528 = vmatprep.mubr.f32.mxu1 %v9828_v47 }
 0x580   :  { %6495 = vmatmul.mubr.f32.vlgmr.msra.gmra.mxu0 %v9828_v47  ;;  %6529 = vmatmul.mubr.f32.vlgmr.msra.gmra.mxu1 %v9828_v47  ;;  %v12499_v47 = vld [vmem:[#allocation16_spill] sm:$0xff] }
 0x581   :  { %6531 = vmatpush3.xpose.msra.mxu0 %v9554_v63  ;;  %6565 = vmatpush3.xpose.msra.mxu1 %v9557_v22 }
 0x582   :  { %6532 = vmatprep.subr.mxu0 %v9560_v0  ;;  %6566 = vmatprep.subr.mxu1 %v9563_v57 }
 0x585   :  { %6533 = vmatpush3.xpose.msra.mxu0 %v9566_v2  ;;  %6567 = vmatpush3.xpose.msra.mxu1 %v9569_v62 }
 0x586   :  { %6534 = vmatprep.subr.mxu0 %v9572_v56  ;;  %6568 = vmatprep.subr.mxu1 %v9575_v26 }
 0x589   :  { %6535 = vmatpush3.xpose.msra.mxu0 %v9578_v37  ;;  %6569 = vmatpush3.xpose.msra.mxu1 %v9581_v54 }
 0x58a   :  { %6536 = vmatprep.subr.mxu0 %v9584_v27  ;;  %6570 = vmatprep.subr.mxu1 %v9587_v46 }
 0x58d   :  { %6537 = vmatpush3.xpose.msra.mxu0 %v9590_v55  ;;  %6571 = vmatpush3.xpose.msra.mxu1 %v12459_v9 }
 0x58e   :  { %6538 = vmatprep.subr.mxu0 %v9596_v58  ;;  %6572 = vmatprep.subr.mxu1 %v9599_v53 }
 0x591   :  { %6539 = vmatpush3.xpose.msra.mxu0 %v9602_v7  ;;  %6573 = vmatpush3.xpose.msra.mxu1 %v9605_v1 }
 0x592   :  { %6540 = vmatprep.subr.mxu0 %v9608_v59  ;;  %6574 = vmatprep.subr.mxu1 %v9611_v17 }
 0x595   :  { %6541 = vmatpush3.xpose.msra.mxu0 %v9692_v10  ;;  %6575 = vmatpush3.xpose.msra.mxu1 %v9695_v11 }
 0x596   :  { %6542 = vmatprep.subr.mxu0 %v9698_v13  ;;  %6576 = vmatprep.subr.mxu1 %v9701_v14 }
 0x599   :  { %6543 = vmatpush3.xpose.msra.mxu0 %v9704_v15  ;;  %6577 = vmatpush3.xpose.msra.mxu1 %v9707_v16 }
 0x59a   :  { %6544 = vmatprep.subr.mxu0 %v9710_v18  ;;  %6578 = vmatprep.subr.mxu1 %v9713_v19 }
 0x59d   :  { %6545 = vmatpush3.xpose.msra.mxu0 %v9716_v20  ;;  %6579 = vmatpush3.xpose.msra.mxu1 %v9719_v21 }
 0x59e   :  { %6546 = vmatprep.subr.mxu0 %v9722_v23  ;;  %6580 = vmatprep.subr.mxu1 %v9725_v60 }
 0x5a1   :  { %6547 = vmatpush3.xpose.msra.mxu0 %v9728_v28  ;;  %6581 = vmatpush3.xpose.msra.mxu1 %v9731_v29 }
 0x5a2   :  { %6548 = vmatprep.subr.mxu0 %v9734_v30  ;;  %6582 = vmatprep.subr.mxu1 %v9737_v31 }
 0x5a5   :  { %6549 = vmatpush3.xpose.msra.mxu0 %v9740_v33  ;;  %6583 = vmatpush3.xpose.msra.mxu1 %v9743_v34 }
 0x5a6   :  { %6550 = vmatprep.subr.mxu0 %v9746_v35  ;;  %6584 = vmatprep.subr.mxu1 %v9749_v36 }
 0x5a9   :  { %6551 = vmatpush3.xpose.msra.mxu0 %v9752_v38  ;;  %6585 = vmatpush3.xpose.msra.mxu1 %v9755_v39 }
 0x5aa   :  { %6552 = vmatprep.subr.mxu0 %v9758_v40  ;;  %6586 = vmatprep.subr.mxu1 %v9761_v41 }
 0x5ad   :  { %6553 = vmatpush3.xpose.msra.mxu0 %v9764_v42  ;;  %6587 = vmatpush3.xpose.msra.mxu1 %v12482_v25 }
 0x5ae   :  { %6554 = vmatprep.subr.mxu0 %v12483_v4  ;;  %6588 = vmatprep.subr.mxu1 %v12484_v43  ;;  %v12504_v43 = vld [vmem:[#allocation56_spill] sm:$0xff] }
 0x5b1   :  { %6555 = vmatpush3.xpose.msra.mxu0 %v12485_v44  ;;  %6589 = vmatpush3.xpose.msra.mxu1 %v12486_v48  ;;  %v12503_v44 = vld [vmem:[#allocation58_spill] sm:$0xff] }
 0x5b2   :  { %6556 = vmatprep.subr.mxu0 %v12487_v61  ;;  %6590 = vmatprep.subr.mxu1 %v12488_v6 }
 0x5b5   :  { %6557 = vmatpush3.xpose.msra.mxu0 %v12489_v12  ;;  %6591 = vmatpush3.xpose.msra.mxu1 %v12490_v32  ;;  %v12500_v12 = vld [vmem:[#allocation17_spill] sm:$0xff] }
 0x5b6   :  { %6558 = vmatprep.subr.mxu0 %v12491_v51  ;;  %6592 = vmatprep.subr.mxu1 %v12492_v52  ;;  %v12501_v51 = vld [vmem:[#allocation55_spill] sm:$0xff] }
 0x5b9   :  { %6559 = vmatpush3.xpose.msra.mxu0 %v12493_v3  ;;  %6593 = vmatpush3.xpose.msra.mxu1 %v12494_v50  ;;  %v12502_v3 = vld [vmem:[#allocation57_spill] sm:$0xff] }
 0x5ba   :  { %6560 = vmatprep.subr.mxu0 %v12495_v49  ;;  %6594 = vmatprep.subr.mxu1 %v12496_v5 }
 0x5bd   :  { %6561 = vmatpush3.xpose.msra.mxu0 %v12497_v24  ;;  %6595 = vmatpush3.xpose.msra.mxu1 %v12498_v45 }
 0x5be   :  { %6598 = vmatprep.subr.mxu0 %v12499_v47  ;;  %6632 = vmatprep.subr.mxu1 %v12500_v12 }
 0x640   :  { %v1655_v32 = vpop.f32.mrf.mxu0  ;;  %v1726_v50 = vpop.f32.mrf.mxu1 }
 0x641   :  { %v1731_v6 = vadd.f32 %v1655_v32, %v12501_v51  ;;  %v1733_v45 = vadd.f32 %v1726_v50, %v12504_v43 }
 0x642   :  { %v1657_v52 = vpop.f32.mrf.mxu0  ;;  %v1728_v5 = vpop.f32.mrf.mxu1 }
 0x643   :  { %v5966_v61 = vmul.f32 -1.442695, %v1731_v6  ;;  %v1732_v48 = vadd.f32 %v1657_v52, %v12502_v3  ;;  %v1734_v24 = vadd.f32 %v1728_v5, %v12503_v44 }
 0x645   :  { %8085 = vpow2.f32 %v5966_v61  ;;  %v5967_v49 = vmul.f32 -1.442695, %v1732_v48  ;;  %v5968_v4 = vmul.f32 -1.442695, %v1734_v24 }
 0x647   :  { %8087 = vpow2.f32 %v5967_v49 }
 0x648   :  { %8089 = vtanh.f32 %v1733_v45  ;;  %v2142_v45 = vld [vmem:[#allocation4 + $0x78] sm:$0xff] }
 0x649   :  { %8091 = vpow2.f32 %v5968_v4 }
 0x652   :  { %v8086_v47 = vpop.eup %8085 }
 0x653   :  { %v1738_v25 = vadd.f32 1.0, %v8086_v47  ;;  %v2174_v47 = vld [vmem:[#allocation4 + $0x178] sm:$0xff] }
 0x654   :  { %v8088_v12 = vpop.eup %8087 }
 0x655   :  { %8093 = vrcp.f32 %v1738_v25  ;;  %v1744_v32 = vadd.f32 1.0, %v8088_v12  ;;  %v8090_v6 = vpop.eup %8089  ;;  %v2157_v12 = vld [vmem:[#allocation4 + $0xf0] sm:$0xff] }
 0x656   :  { %v8092_v51 = vpop.eup %8091 }
 0x657   :  { %8095 = vrcp.f32 %v1744_v32  ;;  %v1751_v3 = vadd.f32 1.0, %v8092_v51  ;;  %v2189_v32 = vld [vmem:[#allocation4 + $0x1f0] sm:$0xff] }
 0x658   :  { %v2141_v51 = vld [vmem:[#allocation4 + $0x70] sm:$0xff] }
 0x659   :  { %8097 = vrcp.f32 %v1751_v3  ;;  %v2140_v3 = vld [vmem:[#allocation4 + $0x68] sm:$0xff] }
 0x662   :  { %v8094_v61 = vpop.eup %8093 }
 0x663   :  { %v1755_v52 = vmul.f32 %v8094_v61, %v8090_v6  ;;  %v12526_v6 = vld [vmem:[#allocation67_spill] sm:$0xff]  ;;  %v2173_v61 = vld [vmem:[#allocation4 + $0x170] sm:$0xff] }
 0x664   :  { %v8096_v48 = vpop.eup %8095 }
 0x665   :  { %v1754_v49 = vmul.f32 %v8096_v48, %v9825_v8  ;;  %v2188_v48 = vld [vmem:[#allocation4 + $0x1e8] sm:$0xff] }
 0x666   :  { %v8098_v43 = vpop.eup %8097 }
 0x667   :  { %v9903_v44 = vadd.f32 %v1755_v52, %v1754_v49  ;;  %v2156_v52 = vld [vmem:[#allocation4 + $0xe8] sm:$0xff] }
 0x668   :  { %v2172_v49 = vld [vmem:[#allocation4 + $0x168] sm:$0xff] }
 0x669   :  { %8099 = vtanh.f32 %v9903_v44 }
 0x676   :  { %v8100_v50 = vpop.eup %8099 }
 0x677   :  { %v9906_v5 = vmul.f32 %v8100_v50, %v8098_v43  ;;  %v2187_v43 = vld [vmem:[#allocation4 + $0x1e0] sm:$0xff] }
 0x678   :  { %v2139_v50 = vld [vmem:[#allocation4 + $0x60] sm:$0xff] }
 0x679   :  { %6562 = vmatprep.mubr.f32.mxu0 %v9906_v5  ;;  %6596 = vmatprep.mubr.f32.mxu1 %v9906_v5 }
 0x67a   :  { %6563 = vmatmul.mubr.f32.vlgmr.msra.gmra.mxu0 %v9906_v5  ;;  %6597 = vmatmul.mubr.f32.vlgmr.msra.gmra.mxu1 %v9906_v5 }
 0x67b   :  { %6599 = vmatpush3.xpose.msra.mxu0 %v9554_v63  ;;  %6633 = vmatpush3.xpose.msra.mxu1 %v9557_v22  ;;  %v12507_v63 = vld [vmem:[#allocation40_spill] sm:$0xff]  ;;  %v12508_v22 = vld [vmem:[#allocation18_spill] sm:$0xff] }
 0x67c   :  { %6600 = vmatprep.subr.mxu0 %v9560_v0  ;;  %6634 = vmatprep.subr.mxu1 %v9563_v57  ;;  %v12509_v0 = vld [vmem:[#allocation19_spill] sm:$0xff]  ;;  %v12510_v57 = vld [vmem:[#allocation20_spill] sm:$0xff] }
 0x67f   :  { %6601 = vmatpush3.xpose.msra.mxu0 %v9566_v2  ;;  %6635 = vmatpush3.xpose.msra.mxu1 %v9569_v62  ;;  %v12511_v2 = vld [vmem:[#allocation21_spill] sm:$0xff]  ;;  %v12512_v62 = vld [vmem:[#allocation22_spill] sm:$0xff] }
 0x680   :  { %6602 = vmatprep.subr.mxu0 %v9572_v56  ;;  %6636 = vmatprep.subr.mxu1 %v9575_v26  ;;  %v12513_v56 = vld [vmem:[#allocation23_spill] sm:$0xff]  ;;  %v12514_v26 = vld [vmem:[#allocation24_spill] sm:$0xff] }
 0x683   :  { %6603 = vmatpush3.xpose.msra.mxu0 %v9578_v37  ;;  %6637 = vmatpush3.xpose.msra.mxu1 %v9581_v54  ;;  %v12515_v37 = vld [vmem:[#allocation25_spill] sm:$0xff]  ;;  %v12516_v54 = vld [vmem:[#allocation26_spill] sm:$0xff] }
 0x684   :  { %6604 = vmatprep.subr.mxu0 %v9584_v27  ;;  %6638 = vmatprep.subr.mxu1 %v9587_v46  ;;  %v12517_v27 = vld [vmem:[#allocation27_spill] sm:$0xff]  ;;  %v12518_v46 = vld [vmem:[#allocation28_spill] sm:$0xff] }
 0x687   :  { %6605 = vmatpush3.xpose.msra.mxu0 %v9590_v55  ;;  %6639 = vmatpush3.xpose.msra.mxu1 %v12459_v9  ;;  %v12519_v55 = vld [vmem:[#allocation29_spill] sm:$0xff] }
 0x688   :  { %6606 = vmatprep.subr.mxu0 %v9596_v58  ;;  %6640 = vmatprep.subr.mxu1 %v9599_v53  ;;  %v12521_v58 = vld [vmem:[#allocation31_spill] sm:$0xff] }
 0x689   :  { %v2158_v53 = vld [vmem:[#allocation4 + $0xf8] sm:$0xff] }
 0x68b   :  { %6607 = vmatpush3.xpose.msra.mxu0 %v9602_v7  ;;  %6641 = vmatpush3.xpose.msra.mxu1 %v9605_v1  ;;  %v12506_v1 = vld [vmem:[#allocation42_spill] sm:$0xff]  ;;  %v2190_v7 = vld [vmem:[#allocation4 + $0x1f8] sm:$0xff] }
 0x68c   :  { %6608 = vmatprep.subr.mxu0 %v9608_v59  ;;  %6642 = vmatprep.subr.mxu1 %v9611_v17  ;;  %v12505_v59 = vld [vmem:[#allocation41_spill] sm:$0xff]  ;;  %v12520_v17 = vld [vmem:[#allocation30_spill] sm:$0xff] }
 0x68f   :  { %6609 = vmatpush3.xpose.msra.mxu0 %v9692_v10  ;;  %6643 = vmatpush3.xpose.msra.mxu1 %v9695_v11  ;;  %v12522_v10 = vld [vmem:[#allocation59_spill] sm:$0xff] }
 0x690   :  { %6610 = vmatprep.subr.mxu0 %v9698_v13  ;;  %6644 = vmatprep.subr.mxu1 %v9701_v14 }
 0x693   :  { %6611 = vmatpush3.xpose.msra.mxu0 %v9704_v15  ;;  %6645 = vmatpush3.xpose.msra.mxu1 %v9707_v16  ;;  %v12523_v15 = vld [vmem:[#allocation61_spill] sm:$0xff] }
 0x694   :  { %6612 = vmatprep.subr.mxu0 %v9710_v18  ;;  %6646 = vmatprep.subr.mxu1 %v9713_v19 }
 0x697   :  { %6613 = vmatpush3.xpose.msra.mxu0 %v9716_v20  ;;  %6647 = vmatpush3.xpose.msra.mxu1 %v9719_v21  ;;  %v12524_v21 = vld [vmem:[#allocation62_spill] sm:$0xff] }
 0x698   :  { %6614 = vmatprep.subr.mxu0 %v9722_v23  ;;  %6648 = vmatprep.subr.mxu1 %v9725_v60  ;;  %v12525_v60 = vld [vmem:[#allocation60_spill] sm:$0xff] }
 0x69b   :  { %6615 = vmatpush3.xpose.msra.mxu0 %v9728_v28  ;;  %6649 = vmatpush3.xpose.msra.mxu1 %v9731_v29 }
 0x69c   :  { %6616 = vmatprep.subr.mxu0 %v9734_v30  ;;  %6650 = vmatprep.subr.mxu1 %v9737_v31 }
 0x69f   :  { %6617 = vmatpush3.xpose.msra.mxu0 %v9740_v33  ;;  %6651 = vmatpush3.xpose.msra.mxu1 %v9743_v34 }
 0x6a0   :  { %6618 = vmatprep.subr.mxu0 %v9746_v35  ;;  %6652 = vmatprep.subr.mxu1 %v9749_v36 }
 0x6a3   :  { %6619 = vmatpush3.xpose.msra.mxu0 %v9752_v38  ;;  %6653 = vmatpush3.xpose.msra.mxu1 %v9755_v39 }
 0x6a4   :  { %6620 = vmatprep.subr.mxu0 %v9758_v40  ;;  %6654 = vmatprep.subr.mxu1 %v9761_v41 }
 0x6a7   :  { %6621 = vmatpush3.xpose.msra.mxu0 %v9764_v42  ;;  %6655 = vmatpush3.xpose.msra.mxu1 %v12505_v59  ;;  %v2171_v59 = vld [vmem:[#allocation4 + $0x160] sm:$0xff] }
 0x6a8   :  { %6622 = vmatprep.subr.mxu0 %v12506_v1  ;;  %6656 = vmatprep.subr.mxu1 %v12507_v63  ;;  %v2154_v1 = vld [vmem:[#allocation4 + $0xd8] sm:$0xff] }
 0x6a9   :  { %v2186_v63 = vld [vmem:[#allocation4 + $0x1d8] sm:$0xff] }
 0x6ab   :  { %6623 = vmatpush3.xpose.msra.mxu0 %v12508_v22  ;;  %6657 = vmatpush3.xpose.msra.mxu1 %v12509_v0  ;;  %v2138_v22 = vld [vmem:[#allocation4 + $0x58] sm:$0xff] }
 0x6ac   :  { %6624 = vmatprep.subr.mxu0 %v12510_v57  ;;  %6658 = vmatprep.subr.mxu1 %v12511_v2  ;;  %v2170_v0 = vld [vmem:[#allocation4 + $0x158] sm:$0xff]  ;;  %v2153_v57 = vld [vmem:[#allocation4 + $0xd0] sm:$0xff] }
 0x6ad   :  { %v2185_v2 = vld [vmem:[#allocation4 + $0x1d0] sm:$0xff] }
 0x6af   :  { %6625 = vmatpush3.xpose.msra.mxu0 %v12512_v62  ;;  %6659 = vmatpush3.xpose.msra.mxu1 %v12513_v56  ;;  %v2137_v62 = vld [vmem:[#allocation4 + $0x50] sm:$0xff] }
 0x6b0   :  { %6626 = vmatprep.subr.mxu0 %v12514_v26  ;;  %6660 = vmatprep.subr.mxu1 %v12515_v37  ;;  %v2169_v56 = vld [vmem:[#allocation4 + $0x150] sm:$0xff]  ;;  %v2152_v26 = vld [vmem:[#allocation4 + $0xc8] sm:$0xff] }
 0x6b1   :  { %v2184_v37 = vld [vmem:[#allocation4 + $0x1c8] sm:$0xff] }
 0x6b3   :  { %6627 = vmatpush3.xpose.msra.mxu0 %v12516_v54  ;;  %6661 = vmatpush3.xpose.msra.mxu1 %v12517_v27  ;;  %v2136_v54 = vld [vmem:[#allocation4 + $0x48] sm:$0xff] }
 0x6b4   :  { %6628 = vmatprep.subr.mxu0 %v12518_v46  ;;  %6662 = vmatprep.subr.mxu1 %v12519_v55  ;;  %v2168_v27 = vld [vmem:[#allocation4 + $0x148] sm:$0xff]  ;;  %v2151_v46 = vld [vmem:[#allocation4 + $0xc0] sm:$0xff] }
 0x6b5   :  { %v2183_v55 = vld [vmem:[#allocation4 + $0x1c0] sm:$0xff] }
 0x6b7   :  { %6629 = vmatpush3.xpose.msra.mxu0 %v12520_v17  ;;  %6663 = vmatpush3.xpose.msra.mxu1 %v12521_v58  ;;  %v2135_v17 = vld [vmem:[#allocation4 + $0x40] sm:$0xff] }
 0x6b8   :  { %6666 = vmatprep.subr.mxu0 %v2158_v53  ;;  %6714 = vmatprep.subr.mxu1 %v2190_v7  ;;  %v2167_v58 = vld [vmem:[#allocation4 + $0x140] sm:$0xff]  ;;  %v2150_v53 = vld [vmem:[#allocation4 + $0xb8] sm:$0xff] }
 0x6b9   :  { %v2182_v7 = vld [vmem:[#allocation4 + $0x1b8] sm:$0xff] }
 0x73a   :  { %v1834_v9 = vpop.f32.mrf.mxu0  ;;  %v1905_v18 = vpop.f32.mrf.mxu1 }
 0x73b   :  { %v1910_v11 = vadd.f32 %v1834_v9, %v12522_v10  ;;  %v1912_v28 = vadd.f32 %v1905_v18, %v12525_v60  ;;  %v2134_v9 = vld [vmem:[#allocation4 + $0x38] sm:$0xff]  ;;  %v2180_v18 = vld [vmem:[#allocation4 + $0x1a8] sm:$0xff]  ;;  %v2131_v60 = vld [vmem:[#allocation4 + $0x20] sm:$0xff] }
 0x73c   :  { %v1836_v13 = vpop.f32.mrf.mxu0  ;;  %v1907_v20 = vpop.f32.mrf.mxu1  ;;  %v2166_v10 = vld [vmem:[#allocation4 + $0x138] sm:$0xff] }
 0x73d   :  { %v5969_v14 = vmul.f32 -1.442695, %v1910_v11  ;;  %v1911_v16 = vadd.f32 %v1836_v13, %v12523_v15  ;;  %v1913_v23 = vadd.f32 %v1907_v20, %v12524_v21  ;;  %v2149_v11 = vld [vmem:[#allocation4 + $0xb0] sm:$0xff]  ;;  %v2164_v20 = vld [vmem:[#allocation4 + $0x128] sm:$0xff]  ;;  %v2147_v21 = vld [vmem:[#allocation4 + $0xa0] sm:$0xff] }
 0x73e   :  { %v2181_v13 = vld [vmem:[#allocation4 + $0x1b0] sm:$0xff] }
 0x73f   :  { %8101 = vpow2.f32 %v5969_v14  ;;  %v5970_v19 = vmul.f32 -1.442695, %v1911_v16  ;;  %v5971_v29 = vmul.f32 -1.442695, %v1913_v23  ;;  %v2133_v14 = vld [vmem:[#allocation4 + $0x30] sm:$0xff]  ;;  %v2148_v16 = vld [vmem:[#allocation4 + $0xa8] sm:$0xff] }
 0x740   :  { %v2165_v15 = vld [vmem:[#allocation4 + $0x130] sm:$0xff]  ;;  %v2179_v23 = vld [vmem:[#allocation4 + $0x1a0] sm:$0xff] }
 0x741   :  { %8103 = vpow2.f32 %v5970_v19  ;;  %v2132_v19 = vld [vmem:[#allocation4 + $0x28] sm:$0xff] }
 0x742   :  { %8105 = vtanh.f32 %v1912_v28  ;;  %v2163_v28 = vld [vmem:[#allocation4 + $0x120] sm:$0xff] }
 0x743   :  { %8107 = vpow2.f32 %v5971_v29  ;;  %v2146_v29 = vld [vmem:[#allocation4 + $0x98] sm:$0xff] }
 0x74c   :  { %v8102_v30 = vpop.eup %8101 }
 0x74d   :  { %v1917_v31 = vadd.f32 1.0, %v8102_v30  ;;  %v2178_v30 = vld [vmem:[#allocation4 + $0x198] sm:$0xff] }
 0x74e   :  { %v8104_v33 = vpop.eup %8103 }
 0x74f   :  { %8109 = vrcp.f32 %v1917_v31  ;;  %v1923_v34 = vadd.f32 1.0, %v8104_v33  ;;  %v8106_v35 = vpop.eup %8105  ;;  %v2130_v31 = vld [vmem:[#allocation4 + $0x18] sm:$0xff] }
 0x750   :  { %v8108_v36 = vpop.eup %8107  ;;  %v2162_v33 = vld [vmem:[#allocation4 + $0x118] sm:$0xff] }
 0x751   :  { %8111 = vrcp.f32 %v1923_v34  ;;  %v1930_v41 = vadd.f32 1.0, %v8108_v36  ;;  %v2145_v34 = vld [vmem:[#allocation4 + $0x90] sm:$0xff] }
 0x752   :  { %v2129_v36 = vld [vmem:[#allocation4 + $0x10] sm:$0xff] }
 0x753   :  { %8113 = vrcp.f32 %v1930_v41  ;;  %v2128_v41 = vld [vmem:[#allocation4 + $0x8] sm:$0xff] }
 0x75c   :  { %v8110_v38 = vpop.eup %8109 }
 0x75d   :  { %v1934_v39 = vmul.f32 %v8110_v38, %v8106_v35  ;;  %v2177_v35 = vld [vmem:[#allocation4 + $0x190] sm:$0xff] }
 0x75e   :  { %v8112_v40 = vpop.eup %8111  ;;  %v2161_v38 = vld [vmem:[#allocation4 + $0x110] sm:$0xff] }
 0x75f   :  { %v1933_v42 = vmul.f32 %v8112_v40, %v9903_v44  ;;  %v2155_v44 = vld [vmem:[#allocation4 + $0xe0] sm:$0xff]  ;;  %v2176_v40 = vld [vmem:[#allocation4 + $0x188] sm:$0xff] }
 0x760   :  { %v8114_v25 = vpop.eup %8113 }
 0x761   :  { %v9979_v8 = vadd.f32 %v1934_v39, %v1933_v42  ;;  %v2144_v39 = vld [vmem:[#allocation4 + $0x88] sm:$0xff] }
 0x762   :  { %v2160_v42 = vld [vmem:[#allocation4 + $0x108] sm:$0xff] }
 0x763   :  { %8115 = vtanh.f32 %v9979_v8 }
 0x770   :  { %v8116_v4 = vpop.eup %8115 }
 0x771   :  { %v9982_v24 = vmul.f32 %v8116_v4, %v8114_v25  ;;  %v2143_v25 = vld [vmem:[#allocation4 + $0x80] sm:$0xff] }
 0x772   :  { %v2175_v4 = vld [vmem:[#allocation4 + $0x180] sm:$0xff] }
 0x773   :  { %6630 = vmatprep.mubr.f32.mxu0 %v9982_v24  ;;  %6664 = vmatprep.mubr.f32.mxu1 %v9982_v24 }
 0x774   :  { %6631 = vmatmul.mubr.f32.vlgmr.msra.gmra.mxu0 %v9982_v24  ;;  %6665 = vmatmul.mubr.f32.vlgmr.msra.gmra.mxu1 %v9982_v24 }
 0x775   :  { %6667 = vmatpush3.xpose.msra.mxu0 %v2142_v45  ;;  %6715 = vmatpush3.xpose.msra.mxu1 %v2174_v47  ;;  %v2127_v45 = vld [vmem:[#allocation4] sm:$0xff] }
 0x776   :  { %6698 = vmatprep.mubr.f32.mxu0 %v12526_v6  ;;  %6746 = vmatprep.mubr.f32.mxu1 %v12526_v6  ;;  %v2159_v47 = vld [vmem:[#allocation4 + $0x100] sm:$0xff] }
 0x777   :  { %6668 = vmatprep.subr.mxu0 %v2157_v12  ;;  %6716 = vmatprep.subr.mxu1 %v2189_v32  ;;  %v9990_v12 = vld [vmem:[#allocation7 + $0x2f8] sm:$0xff] }
 0x778   :  { %12527 = vst [vmem:[#allocation33_spill] sm:$0xff] %v9990_v12  ;;  %v9992_v32 = vld [vmem:[#allocation7 + $0x3f8] sm:$0xff] }
 0x779   :  { %6669 = vmatpush3.xpose.msra.mxu0 %v2141_v51  ;;  %6717 = vmatpush3.xpose.msra.mxu1 %v2173_v61  ;;  %12528 = vst [vmem:[#allocation34_spill] sm:$0xff] %v9992_v32  ;;  %v9996_v51 = vld [vmem:[#allocation7 + $0x278] sm:$0xff] }
 0x77a   :  { %6670 = vmatprep.subr.mxu0 %v2156_v52  ;;  %6718 = vmatprep.subr.mxu1 %v2188_v48  ;;  %v9998_v61 = vld [vmem:[#allocation7 + $0x378] sm:$0xff]  ;;  %v10006_v48 = vld [vmem:[#allocation7 + $0x2f0] sm:$0xff] }
 0x77b   :  { %v12529_v52 = vld [vmem:[#allocation15_spill] sm:$0xff] }
 0x77d   :  { %6671 = vmatpush3.xpose.msra.mxu0 %v2140_v3  ;;  %6719 = vmatpush3.xpose.msra.mxu1 %v2172_v49  ;;  %v10008_v3 = vld [vmem:[#allocation7 + $0x3f0] sm:$0xff] }
 0x77e   :  { %6672 = vmatprep.subr.mxu0 %v2155_v44  ;;  %6720 = vmatprep.subr.mxu1 %v2187_v43  ;;  %v10012_v49 = vld [vmem:[#allocation7 + $0x270] sm:$0xff]  ;;  %v10022_v43 = vld [vmem:[#allocation7 + $0x2e8] sm:$0xff] }
 0x77f   :  { %v10014_v44 = vld [vmem:[#allocation7 + $0x370] sm:$0xff] }
 0x781   :  { %6673 = vmatpush3.xpose.msra.mxu0 %v2139_v50  ;;  %6721 = vmatpush3.xpose.msra.mxu1 %v2171_v59  ;;  %v10024_v50 = vld [vmem:[#allocation7 + $0x3e8] sm:$0xff] }
 0x782   :  { %6674 = vmatprep.subr.mxu0 %v2154_v1  ;;  %6722 = vmatprep.subr.mxu1 %v2186_v63  ;;  %v10028_v59 = vld [vmem:[#allocation7 + $0x268] sm:$0xff]  ;;  %v12531_v63 = vld [vmem:[#allocation39_spill] sm:$0xff] }
 0x783   :  { %v10030_v1 = vld [vmem:[#allocation7 + $0x368] sm:$0xff] }
 0x785   :  { %6675 = vmatpush3.xpose.msra.mxu0 %v2138_v22  ;;  %6723 = vmatpush3.xpose.msra.mxu1 %v2170_v0  ;;  %v10038_v22 = vld [vmem:[#allocation7 + $0x2e0] sm:$0xff] }
 0x786   :  { %6676 = vmatprep.subr.mxu0 %v2153_v57  ;;  %6724 = vmatprep.subr.mxu1 %v2185_v2  ;;  %v10040_v0 = vld [vmem:[#allocation7 + $0x3e0] sm:$0xff] }
 0x787   :  { %v10044_v57 = vld [vmem:[#allocation7 + $0x260] sm:$0xff] }
 0x788   :  { %v10046_v2 = vld [vmem:[#allocation7 + $0x360] sm:$0xff] }
 0x789   :  { %6677 = vmatpush3.xpose.msra.mxu0 %v2137_v62  ;;  %6725 = vmatpush3.xpose.msra.mxu1 %v2169_v56  ;;  %v12532_v62 = vld [vmem:[#allocation32_spill] sm:$0xff]  ;;  %v10054_v56 = vld [vmem:[#allocation7 + $0x2d8] sm:$0xff] }
 0x78a   :  { %6678 = vmatprep.subr.mxu0 %v2152_v26  ;;  %6726 = vmatprep.subr.mxu1 %v2184_v37  ;;  %v10056_v26 = vld [vmem:[#allocation7 + $0x3d8] sm:$0xff] }
 0x78b   :  { %v10060_v37 = vld [vmem:[#allocation7 + $0x258] sm:$0xff] }
 0x78d   :  { %6679 = vmatpush3.xpose.msra.mxu0 %v2136_v54  ;;  %6727 = vmatpush3.xpose.msra.mxu1 %v2168_v27  ;;  %v10062_v54 = vld [vmem:[#allocation7 + $0x358] sm:$0xff]  ;;  %v10070_v27 = vld [vmem:[#allocation7 + $0x2d0] sm:$0xff] }
 0x78e   :  { %6680 = vmatprep.subr.mxu0 %v2151_v46  ;;  %6728 = vmatprep.subr.mxu1 %v2183_v55  ;;  %v10072_v46 = vld [vmem:[#allocation7 + $0x3d0] sm:$0xff] }
 0x78f   :  { %v10076_v55 = vld [vmem:[#allocation7 + $0x250] sm:$0xff] }
 0x791   :  { %6681 = vmatpush3.xpose.msra.mxu0 %v2135_v17  ;;  %6729 = vmatpush3.xpose.msra.mxu1 %v2167_v58  ;;  %v10078_v17 = vld [vmem:[#allocation7 + $0x350] sm:$0xff]  ;;  %v10086_v58 = vld [vmem:[#allocation7 + $0x2c8] sm:$0xff] }
 0x792   :  { %6682 = vmatprep.subr.mxu0 %v2150_v53  ;;  %6730 = vmatprep.subr.mxu1 %v2182_v7  ;;  %v10088_v53 = vld [vmem:[#allocation7 + $0x3c8] sm:$0xff] }
 0x793   :  { %v10092_v7 = vld [vmem:[#allocation7 + $0x248] sm:$0xff] }
 0x795   :  { %6683 = vmatpush3.xpose.msra.mxu0 %v2134_v9  ;;  %6731 = vmatpush3.xpose.msra.mxu1 %v2166_v10  ;;  %v10094_v9 = vld [vmem:[#allocation7 + $0x348] sm:$0xff]  ;;  %v10102_v10 = vld [vmem:[#allocation7 + $0x3c0] sm:$0xff] }
 0x796   :  { %6684 = vmatprep.subr.mxu0 %v2149_v11  ;;  %6732 = vmatprep.subr.mxu1 %v2181_v13  ;;  %v10106_v11 = vld [vmem:[#allocation7 + $0x240] sm:$0xff] }
 0x797   :  { %v10108_v13 = vld [vmem:[#allocation7 + $0x340] sm:$0xff] }
 0x799   :  { %6685 = vmatpush3.xpose.msra.mxu0 %v2133_v14  ;;  %6733 = vmatpush3.xpose.msra.mxu1 %v2165_v15  ;;  %v10114_v14 = vld [vmem:[#allocation7 + $0x3b8] sm:$0xff] }
 0x79a   :  { %6686 = vmatprep.subr.mxu0 %v2148_v16  ;;  %6734 = vmatprep.subr.mxu1 %v2180_v18  ;;  %v10118_v15 = vld [vmem:[#allocation7 + $0x238] sm:$0xff]  ;;  %v10124_v18 = vld [vmem:[#allocation7 + $0x2b0] sm:$0xff] }
 0x79b   :  { %v10120_v16 = vld [vmem:[#allocation7 + $0x338] sm:$0xff] }
 0x79d   :  { %6687 = vmatpush3.xpose.msra.mxu0 %v2132_v19  ;;  %6735 = vmatpush3.xpose.msra.mxu1 %v2164_v20  ;;  %v10126_v19 = vld [vmem:[#allocation7 + $0x3b0] sm:$0xff] }
 0x79e   :  { %6688 = vmatprep.subr.mxu0 %v2147_v21  ;;  %6736 = vmatprep.subr.mxu1 %v2179_v23  ;;  %v10130_v20 = vld [vmem:[#allocation7 + $0x230] sm:$0xff]  ;;  %v10136_v23 = vld [vmem:[#allocation7 + $0x2a8] sm:$0xff] }
 0x79f   :  { %v10132_v21 = vld [vmem:[#allocation7 + $0x330] sm:$0xff] }
 0x7a1   :  { %6689 = vmatpush3.xpose.msra.mxu0 %v2131_v60  ;;  %6737 = vmatpush3.xpose.msra.mxu1 %v2163_v28  ;;  %v10138_v60 = vld [vmem:[#allocation7 + $0x3a8] sm:$0xff] }
 0x7a2   :  { %6690 = vmatprep.subr.mxu0 %v2146_v29  ;;  %6738 = vmatprep.subr.mxu1 %v2178_v30  ;;  %v10142_v28 = vld [vmem:[#allocation7 + $0x228] sm:$0xff]  ;;  %v10146_v30 = vld [vmem:[#allocation7 + $0x2a0] sm:$0xff] }
 0x7a3   :  { %v10144_v29 = vld [vmem:[#allocation7 + $0x328] sm:$0xff]  ;;  %12534 = vst [vmem:[#allocation45_spill] sm:$0xff] %v10146_v30 }
 0x7a4   :  { %12533 = vst [vmem:[#allocation43_spill] sm:$0xff] %v10144_v29 }
 0x7a5   :  { %6691 = vmatpush3.xpose.msra.mxu0 %v2130_v31  ;;  %6739 = vmatpush3.xpose.msra.mxu1 %v2162_v33  ;;  %v10148_v31 = vld [vmem:[#allocation7 + $0x3a0] sm:$0xff] }
 0x7a6   :  { %6692 = vmatprep.subr.mxu0 %v2145_v34  ;;  %6740 = vmatprep.subr.mxu1 %v2177_v35  ;;  %12535 = vst [vmem:[#allocation46_spill] sm:$0xff] %v10148_v31  ;;  %v10154_v33 = vld [vmem:[#allocation7 + $0x220] sm:$0xff]  ;;  %v10158_v35 = vld [vmem:[#allocation7 + $0x298] sm:$0xff] }
 0x7a7   :  { %12536 = vst [vmem:[#allocation44_spill] sm:$0xff] %v10154_v33  ;;  %v10156_v34 = vld [vmem:[#allocation7 + $0x320] sm:$0xff]  ;;  %12538 = vst [vmem:[#allocation49_spill] sm:$0xff] %v10158_v35 }
 0x7a8   :  { %12537 = vst [vmem:[#allocation47_spill] sm:$0xff] %v10156_v34 }
 0x7a9   :  { %6693 = vmatpush3.xpose.msra.mxu0 %v2129_v36  ;;  %6741 = vmatpush3.xpose.msra.mxu1 %v2161_v38  ;;  %v10160_v36 = vld [vmem:[#allocation7 + $0x398] sm:$0xff] }
 0x7aa   :  { %6694 = vmatprep.subr.mxu0 %v2144_v39  ;;  %6742 = vmatprep.subr.mxu1 %v2176_v40  ;;  %12539 = vst [vmem:[#allocation50_spill] sm:$0xff] %v10160_v36  ;;  %v10166_v38 = vld [vmem:[#allocation7 + $0x218] sm:$0xff]  ;;  %v10170_v40 = vld [vmem:[#allocation7 + $0x290] sm:$0xff] }
 0x7ab   :  { %12540 = vst [vmem:[#allocation48_spill] sm:$0xff] %v10166_v38  ;;  %v10168_v39 = vld [vmem:[#allocation7 + $0x318] sm:$0xff]  ;;  %12542 = vst [vmem:[#allocation51_spill] sm:$0xff] %v10170_v40 }
 0x7ac   :  { %12541 = vst [vmem:[#allocation14_spill] sm:$0xff] %v10168_v39 }
 0x7ad   :  { %6695 = vmatpush3.xpose.msra.mxu0 %v2128_v41  ;;  %6743 = vmatpush3.xpose.msra.mxu1 %v2160_v42  ;;  %v10172_v41 = vld [vmem:[#allocation7 + $0x390] sm:$0xff] }
 0x7ae   :  { %6696 = vmatprep.subr.mxu0 %v2143_v25  ;;  %6744 = vmatprep.subr.mxu1 %v2175_v4  ;;  %12543 = vst [vmem:[#allocation53_spill] sm:$0xff] %v10172_v41  ;;  %v10178_v42 = vld [vmem:[#allocation7 + $0x210] sm:$0xff]  ;;  %v10182_v4 = vld [vmem:[#allocation7 + $0x288] sm:$0xff] }
 0x7af   :  { %12544 = vst [vmem:[#allocation54_spill] sm:$0xff] %v10178_v42  ;;  %v10180_v25 = vld [vmem:[#allocation7 + $0x310] sm:$0xff]  ;;  %12546 = vst [vmem:[#allocation16_spill] sm:$0xff] %v10182_v4 }
 0x7b0   :  { %12545 = vst [vmem:[#allocation52_spill] sm:$0xff] %v10180_v25 }
 0x7b1   :  { %6697 = vmatpush3.xpose.msra.mxu0 %v2127_v45  ;;  %6745 = vmatpush3.xpose.msra.mxu1 %v2159_v47  ;;  %v10184_v45 = vld [vmem:[#allocation7 + $0x388] sm:$0xff] }
 0x7b2   :  { %6762 = vmatprep.subr.mxu0 %v9990_v12  ;;  %6796 = vmatprep.subr.mxu1 %v9992_v32  ;;  %12547 = vst [vmem:[#allocation17_spill] sm:$0xff] %v10184_v45  ;;  %v10190_v47 = vld [vmem:[#allocation7 + $0x208] sm:$0xff] }
 0x7b3   :  { %12548 = vst [vmem:[#allocation55_spill] sm:$0xff] %v10190_v47 }
 0x7b4   :  { %6699 = vmatmul.mubr.f32.vlgmr.msra.gmra.mxu0 %v12526_v6  ;;  %6747 = vmatmul.mubr.f32.vlgmr.msra.gmra.mxu1 %v12526_v6  ;;  %v12530_v6 = vld [vmem:[#allocation13_spill] sm:$0xff] }
 0x7b5   :  { %6700 = vmatprep.mubr.f32.mxu0 %v12529_v52  ;;  %6748 = vmatprep.mubr.f32.mxu1 %v12529_v52 }
 0x7b6   :  { %6763 = vmatpush3.xpose.msra.mxu0 %v9996_v51  ;;  %6797 = vmatpush3.xpose.msra.mxu1 %v9998_v61 }
 0x7b7   :  { %6764 = vmatprep.subr.mxu0 %v10006_v48  ;;  %6798 = vmatprep.subr.mxu1 %v10008_v3 }
 0x7b8   :  { %6701 = vmatmul.mubr.f32.gmra.mxu0 %v12529_v52  ;;  %6749 = vmatmul.mubr.f32.gmra.mxu1 %v12529_v52  ;;  %v10192_v52 = vld [vmem:[#allocation7 + $0x308] sm:$0xff] }
 0x7b9   :  { %6702 = vmatprep.mubr.f32.mxu0 %v12530_v6  ;;  %6750 = vmatprep.mubr.f32.mxu1 %v12530_v6  ;;  %12549 = vst [vmem:[#allocation57_spill] sm:$0xff] %v10192_v52 }
 0x7ba   :  { %6765 = vmatpush3.xpose.msra.mxu0 %v10012_v49  ;;  %6799 = vmatpush3.xpose.msra.mxu1 %v10014_v44 }
 0x7bb   :  { %6766 = vmatprep.subr.mxu0 %v10022_v43  ;;  %6800 = vmatprep.subr.mxu1 %v10024_v50 }
 0x7bc   :  { %6703 = vmatmul.mubr.f32.gmra.mxu0 %v12530_v6  ;;  %6751 = vmatmul.mubr.f32.gmra.mxu1 %v12530_v6  ;;  %v10196_v6 = vld [vmem:[#allocation7 + $0x280] sm:$0xff] }
 0x7bd   :  { %6704 = vmatprep.mubr.f32.mxu0 %v12531_v63  ;;  %6752 = vmatprep.mubr.f32.mxu1 %v12531_v63  ;;  %12550 = vst [vmem:[#allocation58_spill] sm:$0xff] %v10196_v6 }
 0x7be   :  { %6767 = vmatpush3.xpose.msra.mxu0 %v10028_v59  ;;  %6801 = vmatpush3.xpose.msra.mxu1 %v10030_v1 }
 0x7bf   :  { %6768 = vmatprep.subr.mxu0 %v10038_v22  ;;  %6802 = vmatprep.subr.mxu1 %v10040_v0 }
 0x7c0   :  { %6705 = vmatmul.mubr.f32.gmra.mxu0 %v12531_v63  ;;  %6753 = vmatmul.mubr.f32.gmra.mxu1 %v12531_v63  ;;  %v10198_v63 = vld [vmem:[#allocation7 + $0x380] sm:$0xff] }
 0x7c1   :  { %6706 = vmatprep.mubr.f32.mxu0 %v12532_v62  ;;  %6754 = vmatprep.mubr.f32.mxu1 %v12532_v62  ;;  %12551 = vst [vmem:[#allocation56_spill] sm:$0xff] %v10198_v63 }
 0x7c2   :  { %6769 = vmatpush3.xpose.msra.mxu0 %v10044_v57  ;;  %6803 = vmatpush3.xpose.msra.mxu1 %v10046_v2 }
 0x7c3   :  { %6770 = vmatprep.subr.mxu0 %v10054_v56  ;;  %6804 = vmatprep.subr.mxu1 %v10056_v26 }
 0x7c4   :  { %6707 = vmatmul.mubr.f32.gmra.mxu0 %v12532_v62  ;;  %6755 = vmatmul.mubr.f32.gmra.mxu1 %v12532_v62  ;;  %v10202_v62 = vld [vmem:[#allocation7 + $0x200] sm:$0xff] }
 0x7c5   :  { %6708 = vmatprep.mubr.f32.mxu0 %v9906_v5  ;;  %6756 = vmatprep.mubr.f32.mxu1 %v9906_v5  ;;  %12552 = vst [vmem:[#allocation41_spill] sm:$0xff] %v10202_v62 }
 0x7c6   :  { %6771 = vmatpush3.xpose.msra.mxu0 %v10060_v37  ;;  %6805 = vmatpush3.xpose.msra.mxu1 %v10062_v54 }
 0x7c7   :  { %6772 = vmatprep.subr.mxu0 %v10070_v27  ;;  %6806 = vmatprep.subr.mxu1 %v10072_v46 }
 0x7c8   :  { %6709 = vmatmul.mubr.f32.gmra.mxu0 %v9906_v5  ;;  %6757 = vmatmul.mubr.f32.gmra.mxu1 %v9906_v5  ;;  %v10100_v5 = vld [vmem:[#allocation7 + $0x2c0] sm:$0xff] }
 0x7c9   :  { %6710 = vmatprep.mubr.f32.mxu0 %v9982_v24  ;;  %6758 = vmatprep.mubr.f32.mxu1 %v9982_v24 }
 0x7ca   :  { %6773 = vmatpush3.xpose.msra.mxu0 %v10076_v55  ;;  %6807 = vmatpush3.xpose.msra.mxu1 %v10078_v17 }
 0x7cb   :  { %6774 = vmatprep.subr.mxu0 %v10086_v58  ;;  %6808 = vmatprep.subr.mxu1 %v10088_v53 }
 0x7cc   :  { %6711 = vmatmul.mubr.f32.gmra.mxu0 %v9982_v24  ;;  %6759 = vmatmul.mubr.f32.gmra.mxu1 %v9982_v24  ;;  %v10112_v24 = vld [vmem:[#allocation7 + $0x2b8] sm:$0xff] }
 0x7ce   :  { %6775 = vmatpush3.xpose.msra.mxu0 %v10092_v7  ;;  %6809 = vmatpush3.xpose.msra.mxu1 %v10094_v9 }
 0x7cf   :  { %6776 = vmatprep.subr.mxu0 %v10100_v5  ;;  %6810 = vmatprep.subr.mxu1 %v10102_v10 }
 0x7d2   :  { %6777 = vmatpush3.xpose.msra.mxu0 %v10106_v11  ;;  %6811 = vmatpush3.xpose.msra.mxu1 %v10108_v13 }
 0x7d3   :  { %6778 = vmatprep.subr.mxu0 %v10112_v24  ;;  %6812 = vmatprep.subr.mxu1 %v10114_v14 }
 0x7d6   :  { %6779 = vmatpush3.xpose.msra.mxu0 %v10118_v15  ;;  %6813 = vmatpush3.xpose.msra.mxu1 %v10120_v16 }
 0x7d7   :  { %6780 = vmatprep.subr.mxu0 %v10124_v18  ;;  %6814 = vmatprep.subr.mxu1 %v10126_v19 }
 0x7da   :  { %6781 = vmatpush3.xpose.msra.mxu0 %v10130_v20  ;;  %6815 = vmatpush3.xpose.msra.mxu1 %v10132_v21 }
 0x7db   :  { %6782 = vmatprep.subr.mxu0 %v10136_v23  ;;  %6816 = vmatprep.subr.mxu1 %v10138_v60 }
 0x7de   :  { %6783 = vmatpush3.xpose.msra.mxu0 %v10142_v28  ;;  %6817 = vmatpush3.xpose.msra.mxu1 %v10144_v29 }
 0x7df   :  { %6784 = vmatprep.subr.mxu0 %v10146_v30  ;;  %6818 = vmatprep.subr.mxu1 %v10148_v31 }
 0x7e2   :  { %6785 = vmatpush3.xpose.msra.mxu0 %v10154_v33  ;;  %6819 = vmatpush3.xpose.msra.mxu1 %v10156_v34 }
 0x7e3   :  { %6786 = vmatprep.subr.mxu0 %v10158_v35  ;;  %6820 = vmatprep.subr.mxu1 %v10160_v36  ;;  %v12557_v36 = vld [vmem:[#allocation64_spill] sm:$0xff] }
 0x7e6   :  { %6787 = vmatpush3.xpose.msra.mxu0 %v10166_v38  ;;  %6821 = vmatpush3.xpose.msra.mxu1 %v10168_v39  ;;  %v12556_v38 = vld [vmem:[#allocation66_spill] sm:$0xff] }
 0x7e7   :  { %6788 = vmatprep.subr.mxu0 %v10170_v40  ;;  %6822 = vmatprep.subr.mxu1 %v10172_v41 }
 0x7ea   :  { %6789 = vmatpush3.xpose.msra.mxu0 %v10178_v42  ;;  %6823 = vmatpush3.xpose.msra.mxu1 %v10180_v25 }
 0x7eb   :  { %6790 = vmatprep.subr.mxu0 %v10182_v4  ;;  %6824 = vmatprep.subr.mxu1 %v10184_v45  ;;  %v10204_v4 = vld [vmem:[#allocation7 + $0x300] sm:$0xff] }
 0x7ec   :  { %12553 = vst [vmem:[#allocation42_spill] sm:$0xff] %v10204_v4 }
 0x7ee   :  { %6791 = vmatpush3.xpose.msra.mxu0 %v10190_v47  ;;  %6825 = vmatpush3.xpose.msra.mxu1 %v10192_v52  ;;  %v12554_v47 = vld [vmem:[#allocation63_spill] sm:$0xff] }
 0x7ef   :  { %6792 = vmatprep.subr.mxu0 %v10196_v6  ;;  %6826 = vmatprep.subr.mxu1 %v10198_v63  ;;  %v12555_v6 = vld [vmem:[#allocation65_spill] sm:$0xff] }
 0x7f2   :  { %6793 = vmatpush3.xpose.msra.mxu0 %v10202_v62  ;;  %6827 = vmatpush3.xpose.msra.mxu1 %v10204_v4 }
 0x7f3   :  { %6830 = vmatprep.subr.mxu0 %v9990_v12  ;;  %6864 = vmatprep.subr.mxu1 %v9992_v32 }
 0x834   :  { %v2013_v52 = vpop.f32.mrf.mxu0  ;;  %v2084_v63 = vpop.f32.mrf.mxu1 }
 0x835   :  { %v2089_v45 = vadd.f32 %v2013_v52, %v12554_v47  ;;  %v2091_v4 = vadd.f32 %v2084_v63, %v12557_v36  ;;  %v12563_v63 = vld [vmem:[#allocation14_spill] sm:$0xff] }
 0x836   :  { %v2015_v25 = vpop.f32.mrf.mxu0  ;;  %v2086_v39 = vpop.f32.mrf.mxu1 }
 0x837   :  { %v5972_v42 = vmul.f32 -1.442695, %v2089_v45  ;;  %v2090_v41 = vadd.f32 %v2015_v25, %v12555_v6  ;;  %v2092_v62 = vadd.f32 %v2086_v39, %v12556_v38 }
 0x839   :  { %8117 = vpow2.f32 %v5972_v42  ;;  %v5973_v40 = vmul.f32 -1.442695, %v2090_v41  ;;  %v5974_v35 = vmul.f32 -1.442695, %v2092_v62  ;;  %v12564_v62 = vld [vmem:[#allocation51_spill] sm:$0xff] }
 0x83b   :  { %8119 = vpow2.f32 %v5973_v40 }
 0x83c   :  { %8121 = vtanh.f32 %v2091_v4  ;;  %v12562_v4 = vld [vmem:[#allocation48_spill] sm:$0xff] }
 0x83d   :  { %8123 = vpow2.f32 %v5974_v35  ;;  %v12561_v35 = vld [vmem:[#allocation50_spill] sm:$0xff] }
 0x846   :  { %v8118_v12 = vpop.eup %8117 }
 0x847   :  { %v2096_v34 = vadd.f32 1.0, %v8118_v12 }
 0x848   :  { %v8120_v32 = vpop.eup %8119 }
 0x849   :  { %8125 = vrcp.f32 %v2096_v34  ;;  %v2102_v47 = vadd.f32 1.0, %v8120_v32  ;;  %v8122_v45 = vpop.eup %8121  ;;  %v12558_v32 = vmov 0.0   ;;  %v12560_v34 = vld [vmem:[#allocation49_spill] sm:$0xff] }
 0x84a   :  { %v8124_v25 = vpop.eup %8123 }
 0x84b   :  { %8127 = vrcp.f32 %v2102_v47  ;;  %v2109_v40 = vadd.f32 1.0, %v8124_v25  ;;  %v12565_v47 = vld [vmem:[#allocation53_spill] sm:$0xff]  ;;  %v12567_v25 = vld [vmem:[#allocation52_spill] sm:$0xff] }
 0x84d   :  { %8129 = vrcp.f32 %v2109_v40  ;;  %v12571_v40 = vld [vmem:[#allocation57_spill] sm:$0xff] }
 0x856   :  { %v8126_v42 = vpop.eup %8125 }
 0x857   :  { %v2113_v52 = vmul.f32 %v8126_v42, %v8122_v45  ;;  %v12566_v45 = vld [vmem:[#allocation54_spill] sm:$0xff]  ;;  %v12568_v42 = vld [vmem:[#allocation16_spill] sm:$0xff] }
 0x858   :  { %v8128_v41 = vpop.eup %8127 }
 0x859   :  { %v2112_v6 = vmul.f32 %v8128_v41, %v9979_v8  ;;  %v12559_v8 = vld [vmem:[#allocation47_spill] sm:$0xff] }
 0x85a   :  { %v8130_v36 = vpop.eup %8129  ;;  %v12570_v41 = vld [vmem:[#allocation55_spill] sm:$0xff] }
 0x85b   :  { %v2114_v38 = vadd.f32 %v2113_v52, %v2112_v6  ;;  %v12569_v52 = vld [vmem:[#allocation17_spill] sm:$0xff]  ;;  %v12572_v6 = vld [vmem:[#allocation58_spill] sm:$0xff] }
 0x85d   :  { %8131 = vtanh.f32 %v2114_v38  ;;  %v12573_v38 = vld [vmem:[#allocation56_spill] sm:$0xff] }
 0x86a   :  { %v8132_v39 = vpop.eup %8131 }
 0x86b   :  { %v2116_v12 = vmul.f32 %v8132_v39, %v8130_v36  ;;  %v12574_v36 = vld [vmem:[#allocation41_spill] sm:$0xff]  ;;  %v12575_v39 = vld [vmem:[#allocation42_spill] sm:$0xff] }
 0x86d   :  { %6712 = vmatprep.mubr.f32.mxu0 %v2116_v12  ;;  %6760 = vmatprep.mubr.f32.mxu1 %v2116_v12 }
 0x86e   :  { %6713 = vmatmul.mubr.f32.gmra.mxu0 %v2116_v12  ;;  %6761 = vmatmul.mubr.f32.gmra.mxu1 %v2116_v12  ;;  %v12576_v12 = vld [vmem:[#allocation33_spill] sm:$0xff] }
 0x86f   :  { %6794 = vmatprep.mubr.f32.mxu0 %v12558_v32  ;;  %6828 = vmatprep.mubr.f32.mxu1 %v12558_v32 }
 0x872   :  { %6795 = vmatmul.mubr.f32.vlgmr.msra.gmra.mxu0 %v12558_v32  ;;  %6829 = vmatmul.mubr.f32.vlgmr.msra.gmra.mxu1 %v12558_v32  ;;  %v12577_v32 = vld [vmem:[#allocation34_spill] sm:$0xff] }
 0x873   :  { %6831 = vmatpush3.xpose.msra.mxu0 %v9996_v51  ;;  %6865 = vmatpush3.xpose.msra.mxu1 %v9998_v61 }
 0x874   :  { %6832 = vmatprep.subr.mxu0 %v10006_v48  ;;  %6866 = vmatprep.subr.mxu1 %v10008_v3 }
 0x877   :  { %6833 = vmatpush3.xpose.msra.mxu0 %v10012_v49  ;;  %6867 = vmatpush3.xpose.msra.mxu1 %v10014_v44 }
 0x878   :  { %6834 = vmatprep.subr.mxu0 %v10022_v43  ;;  %6868 = vmatprep.subr.mxu1 %v10024_v50 }
 0x87b   :  { %6835 = vmatpush3.xpose.msra.mxu0 %v10028_v59  ;;  %6869 = vmatpush3.xpose.msra.mxu1 %v10030_v1 }
 0x87c   :  { %6836 = vmatprep.subr.mxu0 %v10038_v22  ;;  %6870 = vmatprep.subr.mxu1 %v10040_v0 }
 0x87f   :  { %6837 = vmatpush3.xpose.msra.mxu0 %v10044_v57  ;;  %6871 = vmatpush3.xpose.msra.mxu1 %v10046_v2 }
 0x880   :  { %6838 = vmatprep.subr.mxu0 %v10054_v56  ;;  %6872 = vmatprep.subr.mxu1 %v10056_v26 }
 0x883   :  { %6839 = vmatpush3.xpose.msra.mxu0 %v10060_v37  ;;  %6873 = vmatpush3.xpose.msra.mxu1 %v10062_v54 }
 0x884   :  { %6840 = vmatprep.subr.mxu0 %v10070_v27  ;;  %6874 = vmatprep.subr.mxu1 %v10072_v46 }
 0x887   :  { %6841 = vmatpush3.xpose.msra.mxu0 %v10076_v55  ;;  %6875 = vmatpush3.xpose.msra.mxu1 %v10078_v17 }
 0x888   :  { %6842 = vmatprep.subr.mxu0 %v10086_v58  ;;  %6876 = vmatprep.subr.mxu1 %v10088_v53 }
 0x88b   :  { %6843 = vmatpush3.xpose.msra.mxu0 %v10092_v7  ;;  %6877 = vmatpush3.xpose.msra.mxu1 %v10094_v9 }
 0x88c   :  { %6844 = vmatprep.subr.mxu0 %v10100_v5  ;;  %6878 = vmatprep.subr.mxu1 %v10102_v10 }
 0x88f   :  { %6845 = vmatpush3.xpose.msra.mxu0 %v10106_v11  ;;  %6879 = vmatpush3.xpose.msra.mxu1 %v10108_v13 }
 0x890   :  { %6846 = vmatprep.subr.mxu0 %v10112_v24  ;;  %6880 = vmatprep.subr.mxu1 %v10114_v14 }
 0x893   :  { %6847 = vmatpush3.xpose.msra.mxu0 %v10118_v15  ;;  %6881 = vmatpush3.xpose.msra.mxu1 %v10120_v16 }
 0x894   :  { %6848 = vmatprep.subr.mxu0 %v10124_v18  ;;  %6882 = vmatprep.subr.mxu1 %v10126_v19 }
 0x897   :  { %6849 = vmatpush3.xpose.msra.mxu0 %v10130_v20  ;;  %6883 = vmatpush3.xpose.msra.mxu1 %v10132_v21 }
 0x898   :  { %6850 = vmatprep.subr.mxu0 %v10136_v23  ;;  %6884 = vmatprep.subr.mxu1 %v10138_v60 }
 0x89b   :  { %6851 = vmatpush3.xpose.msra.mxu0 %v10142_v28  ;;  %6885 = vmatpush3.xpose.msra.mxu1 %v10144_v29 }
 0x89c   :  { %6852 = vmatprep.subr.mxu0 %v10146_v30  ;;  %6886 = vmatprep.subr.mxu1 %v10148_v31 }
 0x89f   :  { %6853 = vmatpush3.xpose.msra.mxu0 %v10154_v33  ;;  %6887 = vmatpush3.xpose.msra.mxu1 %v12559_v8 }
 0x8a0   :  { %6854 = vmatprep.subr.mxu0 %v12560_v34  ;;  %6888 = vmatprep.subr.mxu1 %v12561_v35 }
 0x8a3   :  { %6855 = vmatpush3.xpose.msra.mxu0 %v12562_v4  ;;  %6889 = vmatpush3.xpose.msra.mxu1 %v12563_v63 }
 0x8a4   :  { %6856 = vmatprep.subr.mxu0 %v12564_v62  ;;  %6890 = vmatprep.subr.mxu1 %v12565_v47 }
 0x8a7   :  { %6857 = vmatpush3.xpose.msra.mxu0 %v12566_v45  ;;  %6891 = vmatpush3.xpose.msra.mxu1 %v12567_v25  ;;  %v2345_v25 = vpop.f32.mrf.mxu0 }
 0x8a8   :  { %6858 = vmatprep.subr.mxu0 %v12568_v42  ;;  %6892 = vmatprep.subr.mxu1 %v12569_v52  ;;  %v2458_v42 = vpop.f32.mrf.mxu1 }
 0x8a9   :  { %v2347_v45 = vpop.f32.mrf.mxu0 }
 0x8aa   :  { %v2460_v52 = vpop.f32.mrf.mxu1 }
 0x8ab   :  { %6859 = vmatpush3.xpose.msra.mxu0 %v12570_v41  ;;  %6893 = vmatpush3.xpose.msra.mxu1 %v12571_v40  ;;  %v10283_v47 = vpop.f32.mrf.mxu0 }
 0x8ac   :  { %6860 = vmatprep.subr.mxu0 %v12572_v6  ;;  %6894 = vmatprep.subr.mxu1 %v12573_v38  ;;  %12578 = vst [vmem:[#allocation40_spill] sm:$0xff] %v10283_v47  ;;  %v10285_v41 = vpop.f32.mrf.mxu1 }
 0x8ad   :  { %12579 = vst [vmem:[#allocation18_spill] sm:$0xff] %v10285_v41  ;;  %v10287_v40 = vpop.f32.mrf.mxu0 }
 0x8ae   :  { %12580 = vst [vmem:[#allocation19_spill] sm:$0xff] %v10287_v40  ;;  %v10289_v6 = vpop.f32.mrf.mxu1 }
 0x8af   :  { %6861 = vmatpush3.xpose.msra.mxu0 %v12574_v36  ;;  %6895 = vmatpush3.xpose.msra.mxu1 %v12575_v39  ;;  %12581 = vst [vmem:[#allocation20_spill] sm:$0xff] %v10289_v6  ;;  %v10291_v38 = vpop.f32.mrf.mxu0 }
 0x8b0   :  { %6898 = vmatprep.subr.mxu0 %v12576_v12  ;;  %6932 = vmatprep.subr.mxu1 %v12577_v32  ;;  %12582 = vst [vmem:[#allocation21_spill] sm:$0xff] %v10291_v38  ;;  %v10293_v36 = vpop.f32.mrf.mxu1 }
 0x8b1   :  { %12583 = vst [vmem:[#allocation22_spill] sm:$0xff] %v10293_v36  ;;  %v10295_v39 = vpop.f32.mrf.mxu0 }
 0x8b2   :  { %12584 = vst [vmem:[#allocation23_spill] sm:$0xff] %v10295_v39  ;;  %v10297_v12 = vpop.f32.mrf.mxu1 }
 0x8b3   :  { %12585 = vst [vmem:[#allocation24_spill] sm:$0xff] %v10297_v12  ;;  %v10299_v32 = vpop.f32.mrf.mxu0 }
 0x8b4   :  { %12586 = vst [vmem:[#allocation25_spill] sm:$0xff] %v10299_v32  ;;  %v10301_v62 = vpop.f32.mrf.mxu1 }
 0x8b5   :  { %12587 = vst [vmem:[#allocation26_spill] sm:$0xff] %v10301_v62  ;;  %v10303_v63 = vpop.f32.mrf.mxu0 }
 0x8b6   :  { %12588 = vst [vmem:[#allocation27_spill] sm:$0xff] %v10303_v63  ;;  %v10305_v47 = vpop.f32.mrf.mxu1 }
 0x8b7   :  { %12589 = vst [vmem:[#allocation28_spill] sm:$0xff] %v10305_v47  ;;  %v10307_v41 = vpop.f32.mrf.mxu0 }
 0x8b8   :  { %12590 = vst [vmem:[#allocation29_spill] sm:$0xff] %v10307_v41  ;;  %v10309_v40 = vpop.f32.mrf.mxu1 }
 0x8b9   :  { %12591 = vst [vmem:[#allocation30_spill] sm:$0xff] %v10309_v40  ;;  %v10311_v6 = vpop.f32.mrf.mxu0  ;;  %v5975_v40 = vld [vmem:[%s12028_s4 + $0x4] sm:$0xf] }
 0x8ba   :  { %12592 = vst [vmem:[#allocation31_spill] sm:$0xff] %v10311_v6  ;;  %v10313_v38 = vpop.f32.mrf.mxu1  ;;  %v12601_v6 = vld [vmem:[#allocation35_spill] sm:$0xff] }
 0x8bb   :  { %12593 = vst [vmem:[#allocation59_spill] sm:$0xff] %v10313_v38  ;;  %v10315_v36 = vpop.f32.mrf.mxu0  ;;  %v10333_v38 = vrot.slane %v5975_v40, %v12601_v6 }
 0x8bc   :  { %12594 = vst [vmem:[#allocation61_spill] sm:$0xff] %v10315_v36  ;;  %v10317_v39 = vpop.f32.mrf.mxu1 }
 0x8bd   :  { %12595 = vst [vmem:[#allocation62_spill] sm:$0xff] %v10317_v39  ;;  %v10319_v12 = vpop.f32.mrf.mxu0  ;;  %12602 = vst [vmem:[#allocation32_spill] sm:$0xff] %v10333_v38 }
 0x8be   :  { %12596 = vst [vmem:[#allocation60_spill] sm:$0xff] %v10319_v12  ;;  %v10321_v32 = vpop.f32.mrf.mxu1  ;;  %v12605_v12 = vld [vmem:[#allocation37_spill] sm:$0xff] }
 0x8bf   :  { %12597 = vst [vmem:[#allocation67_spill] sm:$0xff] %v10321_v32  ;;  %v10323_v62 = vpop.f32.mrf.mxu0  ;;  %v10340_v47 = vrot.slane %v5975_v40, %v12605_v12  ;;  %v12609_v12 = vld [vmem:[#allocation38_spill] sm:$0xff] }
 0x8c0   :  { %12598 = vst [vmem:[#allocation15_spill] sm:$0xff] %v10323_v62  ;;  %v10325_v63 = vpop.f32.mrf.mxu1  ;;  %v10351_v31 = vrot.slane %v5975_v40, %v12609_v12 }
 0x8c1   :  { %12599 = vst [vmem:[#allocation13_spill] sm:$0xff] %v10325_v63  ;;  %v10330_v41 = vpop.f32.mrf.mxu0  ;;  %v2346_v63 = vadd.f32 %v2345_v25, %v10333_v38  ;;  %v2348_v35 = vadd.f32 %v2347_v45, %v10340_v47  ;;  %v12611_v25 = vld [vmem:[#allocation36_spill] sm:$0xff] }
 0x8c2   :  { %12600 = vst [vmem:[#allocation39_spill] sm:$0xff] %v10330_v41  ;;  %v10335_v36 = vpop.f32.mrf.mxu1  ;;  %12610 = vst [vmem:[#allocation69_spill] sm:$0xff] %v10351_v31  ;;  %v10355_v38 = vrot.slane %v5975_v40, %v12611_v25 }
 0x8c3   :  { %12603 = vst [vmem:[#allocation63_spill] sm:$0xff] %v10335_v36 }
 0x92e   :  { %v10337_v39 = vpop.f32.mrf.mxu0  ;;  %v10342_v32 = vpop.f32.mrf.mxu1 }
 0x92f   :  { %12604 = vst [vmem:[#allocation65_spill] sm:$0xff] %v10337_v39  ;;  %12606 = vst [vmem:[#allocation66_spill] sm:$0xff] %v10342_v32 }
 0x930   :  { %v10344_v62 = vpop.f32.mrf.mxu0  ;;  %v10348_v41 = vpop.f32.mrf.mxu1 }
 0x931   :  { %12607 = vst [vmem:[#allocation64_spill] sm:$0xff] %v10344_v62  ;;  %12608 = vst [vmem:[#allocation68_spill] sm:$0xff] %v10348_v41  ;;  %v2461_v62 = vadd.f32 %v2460_v52, %v10351_v31  ;;  %v2459_v41 = vadd.f32 %v2458_v42, %v10355_v38 }
 0x932   :  { %v2607_v4 = vpop.f32.mrf.mxu0  ;;  %v2678_v39 = vpop.f32.mrf.mxu1 }
 0x933   :  { %v2683_v6 = vadd.f32 %v2607_v4, %v2346_v63 }
 0x934   :  { %v2609_v34 = vpop.f32.mrf.mxu0  ;;  %v2680_v32 = vpop.f32.mrf.mxu1 }
 0x935   :  { %v5976_v8 = vmul.f32 -1.442695, %v2683_v6  ;;  %v2684_v36 = vadd.f32 %v2609_v34, %v2348_v35  ;;  %v2686_v45 = vadd.f32 %v2680_v32, %v2461_v62  ;;  %v2685_v6 = vadd.f32 %v2678_v39, %v2459_v41  ;;  %v12614_v39 = vld [vmem:[#allocation44_spill] sm:$0xff] }
 0x937   :  { %8133 = vpow2.f32 %v5976_v8  ;;  %v5977_v33 = vmul.f32 -1.442695, %v2684_v36  ;;  %v5978_v4 = vmul.f32 -1.442695, %v2686_v45  ;;  %v12617_v45 = vld [vmem:[#allocation50_spill] sm:$0xff] }
 0x939   :  { %8135 = vpow2.f32 %v5977_v33 }
 0x93a   :  { %8137 = vpow2.f32 %v5978_v4  ;;  %v12618_v4 = vld [vmem:[#allocation48_spill] sm:$0xff] }
 0x944   :  { %v8134_v63 = vpop.eup %8133 }
 0x945   :  { %v2690_v34 = vadd.f32 1.0, %v8134_v63  ;;  %v12619_v63 = vld [vmem:[#allocation14_spill] sm:$0xff] }
 0x946   :  { %v8136_v8 = vpop.eup %8135 }
 0x947   :  { %8139 = vrcp.f32 %v2690_v34  ;;  %v2696_v35 = vadd.f32 1.0, %v8136_v8  ;;  %v8138_v33 = vpop.eup %8137  ;;  %v12621_v34 = vld [vmem:[#allocation53_spill] sm:$0xff]  ;;  %v12622_v8 = vld [vmem:[#allocation54_spill] sm:$0xff] }
 0x948   :  { %8141 = vtanh.f32 %v2685_v6  ;;  %v2703_v31 = vadd.f32 1.0, %v8138_v33  ;;  %v12620_v6 = vld [vmem:[#allocation51_spill] sm:$0xff]  ;;  %v12624_v33 = vld [vmem:[#allocation16_spill] sm:$0xff] }
 0x949   :  { %8143 = vrcp.f32 %v2696_v35  ;;  %v12623_v35 = vld [vmem:[#allocation52_spill] sm:$0xff] }
 0x94a   :  { %8145 = vrcp.f32 %v2703_v31  ;;  %v12613_v31 = vld [vmem:[#allocation46_spill] sm:$0xff] }
 0x954   :  { %v8140_v36 = vpop.eup %8139 }
 0x955   :  { %v8142_v12 = vpop.eup %8141 }
 0x956   :  { %v8144_v52 = vpop.eup %8143  ;;  %v2707_v25 = vmul.f32 %v8142_v12, %v8140_v36  ;;  %v12615_v12 = vld [vmem:[#allocation47_spill] sm:$0xff]  ;;  %v12625_v36 = vld [vmem:[#allocation17_spill] sm:$0xff] }
 0x957   :  { %v2706_v40 = vmul.f32 0.0, %v8144_v52  ;;  %v8146_v62 = vpop.eup %8145  ;;  %v12626_v52 = vld [vmem:[#allocation55_spill] sm:$0xff] }
 0x959   :  { %v10358_v32 = vadd.f32 %v2707_v25, %v2706_v40  ;;  %v12616_v25 = vld [vmem:[#allocation49_spill] sm:$0xff] }
 0x95a   :  { %v12627_v40 = vld [vmem:[#allocation57_spill] sm:$0xff] }
 0x95b   :  { %8147 = vtanh.f32 %v10358_v32 }
 0x968   :  { %v8148_v42 = vpop.eup %8147 }
 0x969   :  { %v10361_v41 = vmul.f32 %v8148_v42, %v8146_v62  ;;  %v12628_v62 = vld [vmem:[#allocation58_spill] sm:$0xff]  ;;  %v12629_v42 = vld [vmem:[#allocation56_spill] sm:$0xff] }
 0x96b   :  { %12612 = vst [vmem:[#allocation70_spill] sm:$0xff] %v10361_v41  ;;  %6862 = vmatprep.mubr.f32.mxu0 %v10361_v41  ;;  %6896 = vmatprep.mubr.f32.mxu1 %v10361_v41 }
 0x96c   :  { %6863 = vmatmul.mubr.f32.vlgmr.msra.gmra.mxu0 %v10361_v41  ;;  %6897 = vmatmul.mubr.f32.vlgmr.msra.gmra.mxu1 %v10361_v41  ;;  %v12630_v41 = vld [vmem:[#allocation41_spill] sm:$0xff] }
 0x96d   :  { %6899 = vmatpush3.xpose.msra.mxu0 %v9996_v51  ;;  %6933 = vmatpush3.xpose.msra.mxu1 %v9998_v61 }
 0x96e   :  { %6900 = vmatprep.subr.mxu0 %v10006_v48  ;;  %6934 = vmatprep.subr.mxu1 %v10008_v3 }
 0x971   :  { %6901 = vmatpush3.xpose.msra.mxu0 %v10012_v49  ;;  %6935 = vmatpush3.xpose.msra.mxu1 %v10014_v44 }
 0x972   :  { %6902 = vmatprep.subr.mxu0 %v10022_v43  ;;  %6936 = vmatprep.subr.mxu1 %v10024_v50 }
 0x975   :  { %6903 = vmatpush3.xpose.msra.mxu0 %v10028_v59  ;;  %6937 = vmatpush3.xpose.msra.mxu1 %v10030_v1 }
 0x976   :  { %6904 = vmatprep.subr.mxu0 %v10038_v22  ;;  %6938 = vmatprep.subr.mxu1 %v10040_v0 }
 0x979   :  { %6905 = vmatpush3.xpose.msra.mxu0 %v10044_v57  ;;  %6939 = vmatpush3.xpose.msra.mxu1 %v10046_v2 }
 0x97a   :  { %6906 = vmatprep.subr.mxu0 %v10054_v56  ;;  %6940 = vmatprep.subr.mxu1 %v10056_v26 }
 0x97d   :  { %6907 = vmatpush3.xpose.msra.mxu0 %v10060_v37  ;;  %6941 = vmatpush3.xpose.msra.mxu1 %v10062_v54 }
 0x97e   :  { %6908 = vmatprep.subr.mxu0 %v10070_v27  ;;  %6942 = vmatprep.subr.mxu1 %v10072_v46 }
 0x981   :  { %6909 = vmatpush3.xpose.msra.mxu0 %v10076_v55  ;;  %6943 = vmatpush3.xpose.msra.mxu1 %v10078_v17 }
 0x982   :  { %6910 = vmatprep.subr.mxu0 %v10086_v58  ;;  %6944 = vmatprep.subr.mxu1 %v10088_v53 }
 0x985   :  { %6911 = vmatpush3.xpose.msra.mxu0 %v10092_v7  ;;  %6945 = vmatpush3.xpose.msra.mxu1 %v10094_v9 }
 0x986   :  { %6912 = vmatprep.subr.mxu0 %v10100_v5  ;;  %6946 = vmatprep.subr.mxu1 %v10102_v10 }
 0x989   :  { %6913 = vmatpush3.xpose.msra.mxu0 %v10106_v11  ;;  %6947 = vmatpush3.xpose.msra.mxu1 %v10108_v13 }
 0x98a   :  { %6914 = vmatprep.subr.mxu0 %v10112_v24  ;;  %6948 = vmatprep.subr.mxu1 %v10114_v14 }
 0x98d   :  { %6915 = vmatpush3.xpose.msra.mxu0 %v10118_v15  ;;  %6949 = vmatpush3.xpose.msra.mxu1 %v10120_v16 }
 0x98e   :  { %6916 = vmatprep.subr.mxu0 %v10124_v18  ;;  %6950 = vmatprep.subr.mxu1 %v10126_v19 }
 0x991   :  { %6917 = vmatpush3.xpose.msra.mxu0 %v10130_v20  ;;  %6951 = vmatpush3.xpose.msra.mxu1 %v10132_v21 }
 0x992   :  { %6918 = vmatprep.subr.mxu0 %v10136_v23  ;;  %6952 = vmatprep.subr.mxu1 %v10138_v60 }
 0x995   :  { %6919 = vmatpush3.xpose.msra.mxu0 %v10142_v28  ;;  %6953 = vmatpush3.xpose.msra.mxu1 %v10144_v29 }
 0x996   :  { %6920 = vmatprep.subr.mxu0 %v10146_v30  ;;  %6954 = vmatprep.subr.mxu1 %v12613_v31  ;;  %v12639_v31 = vld [vmem:[#allocation18_spill] sm:$0xff] }
 0x999   :  { %6921 = vmatpush3.xpose.msra.mxu0 %v12614_v39  ;;  %6955 = vmatpush3.xpose.msra.mxu1 %v12615_v12  ;;  %v12637_v12 = vld [vmem:[#allocation69_spill] sm:$0xff] }
 0x99a   :  { %6922 = vmatprep.subr.mxu0 %v12616_v25  ;;  %6956 = vmatprep.subr.mxu1 %v12617_v45 }
 0x99d   :  { %6923 = vmatpush3.xpose.msra.mxu0 %v12618_v4  ;;  %6957 = vmatpush3.xpose.msra.mxu1 %v12619_v63 }
 0x99e   :  { %6924 = vmatprep.subr.mxu0 %v12620_v6  ;;  %6958 = vmatprep.subr.mxu1 %v12621_v34  ;;  %v12631_v6 = vld [vmem:[#allocation42_spill] sm:$0xff]  ;;  %v12632_v34 = vld [vmem:[#allocation33_spill] sm:$0xff] }
 0x9a1   :  { %6925 = vmatpush3.xpose.msra.mxu0 %v12622_v8  ;;  %6959 = vmatpush3.xpose.msra.mxu1 %v12623_v35  ;;  %v12633_v8 = vld [vmem:[#allocation34_spill] sm:$0xff]  ;;  %v12634_v35 = vld [vmem:[#allocation32_spill] sm:$0xff] }
 0x9a2   :  { %6926 = vmatprep.subr.mxu0 %v12624_v33  ;;  %6960 = vmatprep.subr.mxu1 %v12625_v36  ;;  %v12635_v33 = vld [vmem:[#allocation40_spill] sm:$0xff] }
 0x9a3   :  { %v2352_v63 = vadd.f32 %v12635_v33, %v12634_v35  ;;  %v2465_v33 = vadd.f32 %v12639_v31, %v10355_v38 }
 0x9a5   :  { %6927 = vmatpush3.xpose.msra.mxu0 %v12626_v52  ;;  %6961 = vmatpush3.xpose.msra.mxu1 %v12627_v40  ;;  %v12636_v52 = vld [vmem:[#allocation19_spill] sm:$0xff] }
 0x9a6   :  { %6928 = vmatprep.subr.mxu0 %v12628_v62  ;;  %6962 = vmatprep.subr.mxu1 %v12629_v42  ;;  %v2354_v4 = vadd.f32 %v12636_v52, %v10340_v47 }
 0x9a9   :  { %6929 = vmatpush3.xpose.msra.mxu0 %v12630_v41  ;;  %6963 = vmatpush3.xpose.msra.mxu1 %v12631_v6 }
 0x9aa   :  { %6966 = vmatprep.subr.mxu0 %v12632_v34  ;;  %7000 = vmatprep.subr.mxu1 %v12633_v8  ;;  %v12638_v34 = vld [vmem:[#allocation20_spill] sm:$0xff] }
 0x9ab   :  { %v2467_v39 = vadd.f32 %v12638_v34, %v12637_v12 }
 0xa2c   :  { %v2782_v36 = vpop.f32.mrf.mxu0  ;;  %v2853_v42 = vpop.f32.mrf.mxu1 }
 0xa2d   :  { %v2858_v40 = vadd.f32 %v2782_v36, %v2352_v63  ;;  %v2860_v35 = vadd.f32 %v2853_v42, %v2465_v33  ;;  %v12663_v42 = vld [vmem:[#allocation34_spill] sm:$0xff]  ;;  %v12664_v33 = vld [vmem:[#allocation32_spill] sm:$0xff] }
 0xa2e   :  { %v2784_v45 = vpop.f32.mrf.mxu0  ;;  %v2855_v6 = vpop.f32.mrf.mxu1 }
 0xa2f   :  { %v5979_v62 = vmul.f32 -1.442695, %v2858_v40  ;;  %v2859_v25 = vadd.f32 %v2784_v45, %v2354_v4  ;;  %v2861_v8 = vadd.f32 %v2855_v6, %v2467_v39 }
 0xa31   :  { %8149 = vpow2.f32 %v5979_v62  ;;  %v5980_v41 = vmul.f32 -1.442695, %v2859_v25  ;;  %v5981_v30 = vmul.f32 -1.442695, %v2861_v8  ;;  %v12662_v62 = vld [vmem:[#allocation33_spill] sm:$0xff] }
 0xa33   :  { %8151 = vpow2.f32 %v5980_v41 }
 0xa34   :  { %8153 = vtanh.f32 %v2860_v35  ;;  %v12661_v35 = vld [vmem:[#allocation42_spill] sm:$0xff] }
 0xa35   :  { %8155 = vpow2.f32 %v5981_v30  ;;  %v12659_v30 = vld [vmem:[#allocation56_spill] sm:$0xff] }
 0xa3e   :  { %v8150_v29 = vpop.eup %8149 }
 0xa3f   :  { %v2865_v52 = vadd.f32 1.0, %v8150_v29 }
 0xa40   :  { %v8152_v63 = vpop.eup %8151 }
 0xa41   :  { %8157 = vrcp.f32 %v2865_v52  ;;  %v2871_v45 = vadd.f32 1.0, %v8152_v63  ;;  %v8154_v25 = vpop.eup %8153  ;;  %v12665_v52 = vld [vmem:[#allocation21_spill] sm:$0xff] }
 0xa42   :  { %v8156_v41 = vpop.eup %8155  ;;  %v2358_v63 = vadd.f32 %v12665_v52, %v12664_v33 }
 0xa43   :  { %8159 = vrcp.f32 %v2871_v45  ;;  %v2878_v34 = vadd.f32 1.0, %v8156_v41 }
 0xa45   :  { %8161 = vrcp.f32 %v2878_v34 }
 0xa4e   :  { %v8158_v4 = vpop.eup %8157 }
 0xa4f   :  { %v2882_v36 = vmul.f32 %v8158_v4, %v8154_v25  ;;  %v12666_v25 = vld [vmem:[#allocation23_spill] sm:$0xff] }
 0xa50   :  { %v8160_v40 = vpop.eup %8159  ;;  %v2360_v41 = vadd.f32 %v12666_v25, %v10340_v47 }
 0xa51   :  { %v2881_v39 = vmul.f32 %v8160_v40, %v10358_v32  ;;  %v12660_v32 = vld [vmem:[#allocation41_spill] sm:$0xff] }
 0xa52   :  { %v8162_v29 = vpop.eup %8161 }
 0xa53   :  { %v10440_v6 = vadd.f32 %v2882_v36, %v2881_v39 }
 0xa55   :  { %8163 = vtanh.f32 %v10440_v6 }
 0xa62   :  { %v8164_v31 = vpop.eup %8163 }
 0xa63   :  { %v10443_v8 = vmul.f32 %v8164_v31, %v8162_v29 }
 0xa65   :  { %12640 = vst [vmem:[#allocation40_spill] sm:$0xff] %v10443_v8  ;;  %6930 = vmatprep.mubr.f32.mxu0 %v10443_v8  ;;  %6964 = vmatprep.mubr.f32.mxu1 %v10443_v8 }
 0xa66   :  { %6931 = vmatmul.mubr.f32.vlgmr.msra.gmra.mxu0 %v10443_v8  ;;  %6965 = vmatmul.mubr.f32.vlgmr.msra.gmra.mxu1 %v10443_v8 }
 0xa67   :  { %6967 = vmatpush3.xpose.msra.mxu0 %v9996_v51  ;;  %7001 = vmatpush3.xpose.msra.mxu1 %v9998_v61  ;;  %v12641_v51 = vld [vmem:[#allocation43_spill] sm:$0xff]  ;;  %v12642_v61 = vld [vmem:[#allocation45_spill] sm:$0xff] }
 0xa68   :  { %6968 = vmatprep.subr.mxu0 %v10006_v48  ;;  %7002 = vmatprep.subr.mxu1 %v10008_v3  ;;  %v12643_v48 = vld [vmem:[#allocation46_spill] sm:$0xff]  ;;  %v12644_v3 = vld [vmem:[#allocation44_spill] sm:$0xff] }
 0xa6b   :  { %6969 = vmatpush3.xpose.msra.mxu0 %v10012_v49  ;;  %7003 = vmatpush3.xpose.msra.mxu1 %v10014_v44  ;;  %v12645_v49 = vld [vmem:[#allocation47_spill] sm:$0xff]  ;;  %v12646_v44 = vld [vmem:[#allocation49_spill] sm:$0xff] }
 0xa6c   :  { %6970 = vmatprep.subr.mxu0 %v10022_v43  ;;  %7004 = vmatprep.subr.mxu1 %v10024_v50  ;;  %v12647_v43 = vld [vmem:[#allocation50_spill] sm:$0xff]  ;;  %v12648_v50 = vld [vmem:[#allocation48_spill] sm:$0xff] }
 0xa6f   :  { %6971 = vmatpush3.xpose.msra.mxu0 %v10028_v59  ;;  %7005 = vmatpush3.xpose.msra.mxu1 %v10030_v1  ;;  %v12649_v59 = vld [vmem:[#allocation14_spill] sm:$0xff]  ;;  %v12650_v1 = vld [vmem:[#allocation51_spill] sm:$0xff] }
 0xa70   :  { %6972 = vmatprep.subr.mxu0 %v10038_v22  ;;  %7006 = vmatprep.subr.mxu1 %v10040_v0  ;;  %v12651_v22 = vld [vmem:[#allocation53_spill] sm:$0xff]  ;;  %v12652_v0 = vld [vmem:[#allocation54_spill] sm:$0xff] }
 0xa73   :  { %6973 = vmatpush3.xpose.msra.mxu0 %v10044_v57  ;;  %7007 = vmatpush3.xpose.msra.mxu1 %v10046_v2  ;;  %v12653_v57 = vld [vmem:[#allocation52_spill] sm:$0xff] }
 0xa74   :  { %6974 = vmatprep.subr.mxu0 %v10054_v56  ;;  %7008 = vmatprep.subr.mxu1 %v10056_v26  ;;  %v12654_v2 = vld [vmem:[#allocation16_spill] sm:$0xff]  ;;  %v12655_v56 = vld [vmem:[#allocation17_spill] sm:$0xff]  ;;  %v12656_v26 = vld [vmem:[#allocation55_spill] sm:$0xff] }
 0xa77   :  { %6975 = vmatpush3.xpose.msra.mxu0 %v10060_v37  ;;  %7009 = vmatpush3.xpose.msra.mxu1 %v10062_v54  ;;  %v12657_v37 = vld [vmem:[#allocation57_spill] sm:$0xff]  ;;  %v12658_v54 = vld [vmem:[#allocation58_spill] sm:$0xff] }
 0xa78   :  { %6976 = vmatprep.subr.mxu0 %v10070_v27  ;;  %7010 = vmatprep.subr.mxu1 %v10072_v46 }
 0xa7b   :  { %6977 = vmatpush3.xpose.msra.mxu0 %v10076_v55  ;;  %7011 = vmatpush3.xpose.msra.mxu1 %v10078_v17 }
 0xa7c   :  { %6978 = vmatprep.subr.mxu0 %v10086_v58  ;;  %7012 = vmatprep.subr.mxu1 %v10088_v53 }
 0xa7f   :  { %6979 = vmatpush3.xpose.msra.mxu0 %v10092_v7  ;;  %7013 = vmatpush3.xpose.msra.mxu1 %v10094_v9 }
 0xa80   :  { %6980 = vmatprep.subr.mxu0 %v10100_v5  ;;  %7014 = vmatprep.subr.mxu1 %v10102_v10 }
 0xa83   :  { %6981 = vmatpush3.xpose.msra.mxu0 %v10106_v11  ;;  %7015 = vmatpush3.xpose.msra.mxu1 %v10108_v13 }
 0xa84   :  { %6982 = vmatprep.subr.mxu0 %v10112_v24  ;;  %7016 = vmatprep.subr.mxu1 %v10114_v14 }
 0xa87   :  { %6983 = vmatpush3.xpose.msra.mxu0 %v10118_v15  ;;  %7017 = vmatpush3.xpose.msra.mxu1 %v10120_v16 }
 0xa88   :  { %6984 = vmatprep.subr.mxu0 %v10124_v18  ;;  %7018 = vmatprep.subr.mxu1 %v10126_v19 }
 0xa8b   :  { %6985 = vmatpush3.xpose.msra.mxu0 %v10130_v20  ;;  %7019 = vmatpush3.xpose.msra.mxu1 %v10132_v21 }
 0xa8c   :  { %6986 = vmatprep.subr.mxu0 %v10136_v23  ;;  %7020 = vmatprep.subr.mxu1 %v10138_v60 }
 0xa8f   :  { %6987 = vmatpush3.xpose.msra.mxu0 %v10142_v28  ;;  %7021 = vmatpush3.xpose.msra.mxu1 %v12641_v51 }
 0xa90   :  { %6988 = vmatprep.subr.mxu0 %v12642_v61  ;;  %7022 = vmatprep.subr.mxu1 %v12643_v48 }
 0xa93   :  { %6989 = vmatpush3.xpose.msra.mxu0 %v12644_v3  ;;  %7023 = vmatpush3.xpose.msra.mxu1 %v12645_v49 }
 0xa94   :  { %6990 = vmatprep.subr.mxu0 %v12646_v44  ;;  %7024 = vmatprep.subr.mxu1 %v12647_v43 }
 0xa97   :  { %6991 = vmatpush3.xpose.msra.mxu0 %v12648_v50  ;;  %7025 = vmatpush3.xpose.msra.mxu1 %v12649_v59 }
 0xa98   :  { %6992 = vmatprep.subr.mxu0 %v12650_v1  ;;  %7026 = vmatprep.subr.mxu1 %v12651_v22 }
 0xa9b   :  { %6993 = vmatpush3.xpose.msra.mxu0 %v12652_v0  ;;  %7027 = vmatpush3.xpose.msra.mxu1 %v12653_v57 }
 0xa9c   :  { %6994 = vmatprep.subr.mxu0 %v12654_v2  ;;  %7028 = vmatprep.subr.mxu1 %v12655_v56 }
 0xa9f   :  { %6995 = vmatpush3.xpose.msra.mxu0 %v12656_v26  ;;  %7029 = vmatpush3.xpose.msra.mxu1 %v12657_v37 }
 0xaa0   :  { %6996 = vmatprep.subr.mxu0 %v12658_v54  ;;  %7030 = vmatprep.subr.mxu1 %v12659_v30 }
 0xaa3   :  { %6997 = vmatpush3.xpose.msra.mxu0 %v12660_v32  ;;  %7031 = vmatpush3.xpose.msra.mxu1 %v12661_v35  ;;  %v12668_v35 = vld [vmem:[#allocation22_spill] sm:$0xff] }
 0xaa4   :  { %7034 = vmatprep.subr.mxu0 %v12662_v62  ;;  %7068 = vmatprep.subr.mxu1 %v12663_v42  ;;  %v12667_v62 = vld [vmem:[#allocation24_spill] sm:$0xff]  ;;  %v2471_v52 = vadd.f32 %v12668_v35, %v10355_v38 }
 0xaa5   :  { %v2473_v8 = vadd.f32 %v12667_v62, %v12637_v12  ;;  %v10540_v62 = vld [vmem:[#allocation7 + $0x3f0] sm:$0xff] }
 0xb26   :  { %v2957_v45 = vpop.f32.mrf.mxu0  ;;  %v3028_v39 = vpop.f32.mrf.mxu1 }
 0xb27   :  { %v3033_v4 = vadd.f32 %v2957_v45, %v2358_v63  ;;  %v3035_v33 = vadd.f32 %v3028_v39, %v2471_v52  ;;  %v10537_v39 = vld [vmem:[#allocation7 + $0x2f0] sm:$0xff] }
 0xb28   :  { %v2959_v36 = vpop.f32.mrf.mxu0  ;;  %v3030_v31 = vpop.f32.mrf.mxu1  ;;  %v10546_v52 = vld [vmem:[#allocation7 + $0x370] sm:$0xff] }
 0xb29   :  { %v5982_v40 = vmul.f32 -1.442695, %v3033_v4  ;;  %v3034_v34 = vadd.f32 %v2959_v36, %v2360_v41  ;;  %v3036_v42 = vadd.f32 %v3030_v31, %v2473_v8 }
 0xb2b   :  { %8165 = vpow2.f32 %v5982_v40  ;;  %v5983_v29 = vmul.f32 -1.442695, %v3034_v34  ;;  %v5984_v32 = vmul.f32 -1.442695, %v3036_v42  ;;  %v10543_v42 = vld [vmem:[#allocation7 + $0x270] sm:$0xff] }
 0xb2d   :  { %8167 = vpow2.f32 %v5983_v29 }
 0xb2e   :  { %8169 = vtanh.f32 %v3035_v33 }
 0xb2f   :  { %8171 = vpow2.f32 %v5984_v32  ;;  %v10531_v32 = vld [vmem:[#allocation7 + $0x278] sm:$0xff] }
 0xb38   :  { %v8166_v30 = vpop.eup %8165 }
 0xb39   :  { %v3040_v25 = vadd.f32 1.0, %v8166_v30 }
 0xb3a   :  { %v8168_v63 = vpop.eup %8167 }
 0xb3b   :  { %8173 = vrcp.f32 %v3040_v25  ;;  %v3046_v45 = vadd.f32 1.0, %v8168_v63  ;;  %v8170_v41 = vpop.eup %8169  ;;  %v10549_v25 = vld [vmem:[#allocation7 + $0x2e8] sm:$0xff] }
 0xb3c   :  { %v8172_v4 = vpop.eup %8171  ;;  %v10552_v63 = vld [vmem:[#allocation7 + $0x3e8] sm:$0xff] }
 0xb3d   :  { %8175 = vrcp.f32 %v3046_v45  ;;  %v3053_v29 = vadd.f32 1.0, %v8172_v4  ;;  %v10555_v45 = vld [vmem:[#allocation7 + $0x268] sm:$0xff]  ;;  %v10561_v4 = vld [vmem:[#allocation7 + $0x2e0] sm:$0xff] }
 0xb3f   :  { %8177 = vrcp.f32 %v3053_v29  ;;  %v10573_v29 = vld [vmem:[#allocation7 + $0x2d8] sm:$0xff] }
 0xb48   :  { %v8174_v36 = vpop.eup %8173 }
 0xb49   :  { %v3057_v40 = vmul.f32 %v8174_v36, %v8170_v41  ;;  %v10558_v41 = vld [vmem:[#allocation7 + $0x368] sm:$0xff]  ;;  %v10564_v36 = vld [vmem:[#allocation7 + $0x3e0] sm:$0xff] }
 0xb4a   :  { %v8176_v34 = vpop.eup %8175 }
 0xb4b   :  { %v3056_v8 = vmul.f32 %v8176_v34, %v10440_v6  ;;  %v10534_v6 = vld [vmem:[#allocation7 + $0x378] sm:$0xff]  ;;  %v10570_v34 = vld [vmem:[#allocation7 + $0x360] sm:$0xff] }
 0xb4c   :  { %v8178_v30 = vpop.eup %8177 }
 0xb4d   :  { %v10522_v31 = vadd.f32 %v3057_v40, %v3056_v8  ;;  %v10567_v40 = vld [vmem:[#allocation7 + $0x260] sm:$0xff]  ;;  %v10576_v8 = vld [vmem:[#allocation7 + $0x3d8] sm:$0xff] }
 0xb4f   :  { %8179 = vtanh.f32 %v10522_v31 }
 0xb5c   :  { %v8180_v35 = vpop.eup %8179 }
 0xb5d   :  { %v10525_v33 = vmul.f32 %v8180_v35, %v8178_v30  ;;  %v10579_v30 = vld [vmem:[#allocation7 + $0x258] sm:$0xff] }
 0xb5e   :  { %v10582_v35 = vld [vmem:[#allocation7 + $0x358] sm:$0xff] }
 0xb5f   :  { %12669 = vst [vmem:[#allocation19_spill] sm:$0xff] %v10525_v33  ;;  %6998 = vmatprep.mubr.f32.mxu0 %v10525_v33  ;;  %7032 = vmatprep.mubr.f32.mxu1 %v10525_v33 }
 0xb60   :  { %6999 = vmatmul.mubr.f32.vlgmr.msra.gmra.mxu0 %v10525_v33  ;;  %7033 = vmatmul.mubr.f32.vlgmr.msra.gmra.mxu1 %v10525_v33  ;;  %v10785_v33 = vld [vmem:[#allocation7 + $0x208] sm:$0xff] }
 0xb61   :  { %7035 = vmatpush3.xpose.msra.mxu0 %v10531_v32  ;;  %7069 = vmatpush3.xpose.msra.mxu1 %v10534_v6  ;;  %12696 = vst [vmem:[#allocation55_spill] sm:$0xff] %v10785_v33 }
 0xb62   :  { %7036 = vmatprep.subr.mxu0 %v10537_v39  ;;  %7070 = vmatprep.subr.mxu1 %v10540_v62 }
 0xb65   :  { %7037 = vmatpush3.xpose.msra.mxu0 %v10543_v42  ;;  %7071 = vmatpush3.xpose.msra.mxu1 %v10546_v52 }
 0xb66   :  { %7038 = vmatprep.subr.mxu0 %v10549_v25  ;;  %7072 = vmatprep.subr.mxu1 %v10552_v63 }
 0xb69   :  { %7039 = vmatpush3.xpose.msra.mxu0 %v10555_v45  ;;  %7073 = vmatpush3.xpose.msra.mxu1 %v10558_v41 }
 0xb6a   :  { %7040 = vmatprep.subr.mxu0 %v10561_v4  ;;  %7074 = vmatprep.subr.mxu1 %v10564_v36 }
 0xb6d   :  { %7041 = vmatpush3.xpose.msra.mxu0 %v10567_v40  ;;  %7075 = vmatpush3.xpose.msra.mxu1 %v10570_v34 }
 0xb6e   :  { %7042 = vmatprep.subr.mxu0 %v10573_v29  ;;  %7076 = vmatprep.subr.mxu1 %v10576_v8 }
 0xb71   :  { %7043 = vmatpush3.xpose.msra.mxu0 %v10579_v30  ;;  %7077 = vmatpush3.xpose.msra.mxu1 %v10582_v35 }
 0xb72   :  { %7044 = vmatprep.subr.mxu0 %v10070_v27  ;;  %7078 = vmatprep.subr.mxu1 %v10072_v46  ;;  %v12670_v27 = vld [vmem:[#allocation56_spill] sm:$0xff]  ;;  %v12671_v46 = vld [vmem:[#allocation41_spill] sm:$0xff] }
 0xb75   :  { %7045 = vmatpush3.xpose.msra.mxu0 %v10076_v55  ;;  %7079 = vmatpush3.xpose.msra.mxu1 %v10078_v17  ;;  %v12672_v55 = vld [vmem:[#allocation42_spill] sm:$0xff]  ;;  %v10629_v17 = vld [vmem:[#allocation7 + $0x2f8] sm:$0xff] }
 0xb76   :  { %7046 = vmatprep.subr.mxu0 %v10086_v58  ;;  %7080 = vmatprep.subr.mxu1 %v10088_v53  ;;  %12673 = vst [vmem:[#allocation69_spill] sm:$0xff] %v10629_v17  ;;  %v10632_v58 = vld [vmem:[#allocation7 + $0x3f8] sm:$0xff]  ;;  %v12675_v53 = vld [vmem:[#allocation32_spill] sm:$0xff] }
 0xb77   :  { %12674 = vst [vmem:[#allocation20_spill] sm:$0xff] %v10632_v58 }
 0xb79   :  { %7047 = vmatpush3.xpose.msra.mxu0 %v10092_v7  ;;  %7081 = vmatpush3.xpose.msra.mxu1 %v10094_v9  ;;  %v12676_v7 = vld [vmem:[#allocation25_spill] sm:$0xff] }
 0xb7a   :  { %7048 = vmatprep.subr.mxu0 %v10100_v5  ;;  %7082 = vmatprep.subr.mxu1 %v10102_v10  ;;  %v2364_v9 = vadd.f32 %v12676_v7, %v12675_v53  ;;  %v12677_v10 = vld [vmem:[#allocation27_spill] sm:$0xff]  ;;  %v10686_v7 = vld [vmem:[#allocation7 + $0x3c8] sm:$0xff] }
 0xb7d   :  { %7049 = vmatpush3.xpose.msra.mxu0 %v10106_v11  ;;  %7083 = vmatpush3.xpose.msra.mxu1 %v10108_v13  ;;  %v2366_v11 = vadd.f32 %v12677_v10, %v10340_v47  ;;  %v10695_v10 = vld [vmem:[#allocation7 + $0x2c0] sm:$0xff] }
 0xb7e   :  { %7050 = vmatprep.subr.mxu0 %v10112_v24  ;;  %7084 = vmatprep.subr.mxu1 %v10114_v14 }
 0xb81   :  { %7051 = vmatpush3.xpose.msra.mxu0 %v10118_v15  ;;  %7085 = vmatpush3.xpose.msra.mxu1 %v10120_v16 }
 0xb82   :  { %7052 = vmatprep.subr.mxu0 %v10124_v18  ;;  %7086 = vmatprep.subr.mxu1 %v10126_v19 }
 0xb85   :  { %7053 = vmatpush3.xpose.msra.mxu0 %v10130_v20  ;;  %7087 = vmatpush3.xpose.msra.mxu1 %v10132_v21  ;;  %v12678_v20 = vld [vmem:[#allocation28_spill] sm:$0xff] }
 0xb86   :  { %7054 = vmatprep.subr.mxu0 %v10136_v23  ;;  %7088 = vmatprep.subr.mxu1 %v10138_v60  ;;  %v2479_v21 = vadd.f32 %v12678_v20, %v12637_v12  ;;  %v12679_v60 = vld [vmem:[#allocation26_spill] sm:$0xff] }
 0xb87   :  { %v10722_v20 = vld [vmem:[#allocation7 + $0x3b0] sm:$0xff] }
 0xb89   :  { %7055 = vmatpush3.xpose.msra.mxu0 %v10142_v28  ;;  %7089 = vmatpush3.xpose.msra.mxu1 %v12641_v51  ;;  %v2477_v28 = vadd.f32 %v12679_v60, %v10355_v38  ;;  %v10731_v60 = vld [vmem:[#allocation7 + $0x2a8] sm:$0xff] }
 0xb8a   :  { %7056 = vmatprep.subr.mxu0 %v12642_v61  ;;  %7090 = vmatprep.subr.mxu1 %v12643_v48 }
 0xb8d   :  { %7057 = vmatpush3.xpose.msra.mxu0 %v12644_v3  ;;  %7091 = vmatpush3.xpose.msra.mxu1 %v12645_v49 }
 0xb8e   :  { %7058 = vmatprep.subr.mxu0 %v12646_v44  ;;  %7092 = vmatprep.subr.mxu1 %v12647_v43 }
 0xb91   :  { %7059 = vmatpush3.xpose.msra.mxu0 %v12648_v50  ;;  %7093 = vmatpush3.xpose.msra.mxu1 %v12649_v59 }
 0xb92   :  { %7060 = vmatprep.subr.mxu0 %v12650_v1  ;;  %7094 = vmatprep.subr.mxu1 %v12651_v22 }
 0xb95   :  { %7061 = vmatpush3.xpose.msra.mxu0 %v12652_v0  ;;  %7095 = vmatpush3.xpose.msra.mxu1 %v12653_v57 }
 0xb96   :  { %7062 = vmatprep.subr.mxu0 %v12654_v2  ;;  %7096 = vmatprep.subr.mxu1 %v12655_v56 }
 0xb99   :  { %7063 = vmatpush3.xpose.msra.mxu0 %v12656_v26  ;;  %7097 = vmatpush3.xpose.msra.mxu1 %v12657_v37 }
 0xb9a   :  { %7064 = vmatprep.subr.mxu0 %v12658_v54  ;;  %7098 = vmatprep.subr.mxu1 %v12670_v27  ;;  %v10671_v54 = vld [vmem:[#allocation7 + $0x2d0] sm:$0xff] }
 0xb9b   :  { %v10677_v27 = vld [vmem:[#allocation7 + $0x250] sm:$0xff] }
 0xb9d   :  { %7065 = vmatpush3.xpose.msra.mxu0 %v12671_v46  ;;  %7099 = vmatpush3.xpose.msra.mxu1 %v12672_v55  ;;  %v10680_v46 = vld [vmem:[#allocation7 + $0x350] sm:$0xff]  ;;  %v10683_v55 = vld [vmem:[#allocation7 + $0x2c8] sm:$0xff] }
 0xb9e   :  { %7102 = vmatprep.subr.mxu0 %v10629_v17  ;;  %7136 = vmatprep.subr.mxu1 %v10632_v58 }
 0xc20   :  { %v3132_v5 = vpop.f32.mrf.mxu0  ;;  %v3203_v16 = vpop.f32.mrf.mxu1 }
 0xc21   :  { %v3208_v13 = vadd.f32 %v3132_v5, %v2364_v9  ;;  %v3210_v51 = vadd.f32 %v3203_v16, %v2477_v28  ;;  %v10689_v9 = vld [vmem:[#allocation7 + $0x248] sm:$0xff]  ;;  %v10713_v16 = vld [vmem:[#allocation7 + $0x238] sm:$0xff] }
 0xc22   :  { %v3134_v24 = vpop.f32.mrf.mxu0  ;;  %v3205_v19 = vpop.f32.mrf.mxu1  ;;  %v10692_v5 = vld [vmem:[#allocation7 + $0x348] sm:$0xff] }
 0xc23   :  { %v5985_v14 = vmul.f32 -1.442695, %v3208_v13  ;;  %v3209_v15 = vadd.f32 %v3134_v24, %v2366_v11  ;;  %v3211_v23 = vadd.f32 %v3205_v19, %v2479_v21  ;;  %v10698_v11 = vld [vmem:[#allocation7 + $0x3c0] sm:$0xff]  ;;  %v10719_v19 = vld [vmem:[#allocation7 + $0x2b0] sm:$0xff]  ;;  %v10734_v28 = vld [vmem:[#allocation7 + $0x3a8] sm:$0xff] }
 0xc24   :  { %v10701_v13 = vld [vmem:[#allocation7 + $0x240] sm:$0xff]  ;;  %v10725_v21 = vld [vmem:[#allocation7 + $0x230] sm:$0xff] }
 0xc25   :  { %8181 = vpow2.f32 %v5985_v14  ;;  %v5986_v18 = vmul.f32 -1.442695, %v3209_v15  ;;  %v5987_v61 = vmul.f32 -1.442695, %v3211_v23  ;;  %v10704_v24 = vld [vmem:[#allocation7 + $0x340] sm:$0xff]  ;;  %v10707_v14 = vld [vmem:[#allocation7 + $0x2b8] sm:$0xff] }
 0xc26   :  { %v10710_v15 = vld [vmem:[#allocation7 + $0x3b8] sm:$0xff]  ;;  %v10728_v23 = vld [vmem:[#allocation7 + $0x330] sm:$0xff] }
 0xc27   :  { %8183 = vpow2.f32 %v5986_v18  ;;  %v10716_v18 = vld [vmem:[#allocation7 + $0x338] sm:$0xff] }
 0xc28   :  { %8185 = vtanh.f32 %v3210_v51  ;;  %v10737_v51 = vld [vmem:[#allocation7 + $0x228] sm:$0xff] }
 0xc29   :  { %8187 = vpow2.f32 %v5987_v61  ;;  %v10740_v61 = vld [vmem:[#allocation7 + $0x328] sm:$0xff] }
 0xc2a   :  { %12681 = vst [vmem:[#allocation43_spill] sm:$0xff] %v10740_v61 }
 0xc32   :  { %v8182_v48 = vpop.eup %8181 }
 0xc33   :  { %v3215_v3 = vadd.f32 1.0, %v8182_v48  ;;  %v10743_v48 = vld [vmem:[#allocation7 + $0x2a0] sm:$0xff] }
 0xc34   :  { %v8184_v49 = vpop.eup %8183  ;;  %12682 = vst [vmem:[#allocation45_spill] sm:$0xff] %v10743_v48 }
 0xc35   :  { %8189 = vrcp.f32 %v3215_v3  ;;  %v3221_v44 = vadd.f32 1.0, %v8184_v49  ;;  %v8186_v43 = vpop.eup %8185  ;;  %v10746_v3 = vld [vmem:[#allocation7 + $0x3a0] sm:$0xff] }
 0xc36   :  { %v8188_v50 = vpop.eup %8187  ;;  %12683 = vst [vmem:[#allocation46_spill] sm:$0xff] %v10746_v3  ;;  %v10749_v49 = vld [vmem:[#allocation7 + $0x220] sm:$0xff] }
 0xc37   :  { %8191 = vrcp.f32 %v3221_v44  ;;  %v3228_v0 = vadd.f32 1.0, %v8188_v50  ;;  %12684 = vst [vmem:[#allocation44_spill] sm:$0xff] %v10749_v49  ;;  %v10752_v44 = vld [vmem:[#allocation7 + $0x320] sm:$0xff]  ;;  %v10758_v50 = vld [vmem:[#allocation7 + $0x398] sm:$0xff] }
 0xc38   :  { %12685 = vst [vmem:[#allocation47_spill] sm:$0xff] %v10752_v44  ;;  %12687 = vst [vmem:[#allocation50_spill] sm:$0xff] %v10758_v50 }
 0xc39   :  { %8193 = vrcp.f32 %v3228_v0  ;;  %v10770_v0 = vld [vmem:[#allocation7 + $0x390] sm:$0xff] }
 0xc3a   :  { %12691 = vst [vmem:[#allocation53_spill] sm:$0xff] %v10770_v0 }
 0xc42   :  { %v8190_v59 = vpop.eup %8189 }
 0xc43   :  { %v3232_v1 = vmul.f32 %v8190_v59, %v8186_v43  ;;  %v10755_v43 = vld [vmem:[#allocation7 + $0x298] sm:$0xff] }
 0xc44   :  { %v8192_v22 = vpop.eup %8191  ;;  %12686 = vst [vmem:[#allocation49_spill] sm:$0xff] %v10755_v43  ;;  %v10761_v59 = vld [vmem:[#allocation7 + $0x218] sm:$0xff] }
 0xc45   :  { %v3231_v57 = vmul.f32 %v8192_v22, %v10522_v31  ;;  %v10674_v31 = vld [vmem:[#allocation7 + $0x3d0] sm:$0xff]  ;;  %12688 = vst [vmem:[#allocation48_spill] sm:$0xff] %v10761_v59 }
 0xc46   :  { %v8194_v56 = vpop.eup %8193  ;;  %v10767_v22 = vld [vmem:[#allocation7 + $0x290] sm:$0xff] }
 0xc47   :  { %v10644_v2 = vadd.f32 %v3232_v1, %v3231_v57  ;;  %v10764_v1 = vld [vmem:[#allocation7 + $0x318] sm:$0xff]  ;;  %12690 = vst [vmem:[#allocation51_spill] sm:$0xff] %v10767_v22  ;;  %v10773_v57 = vld [vmem:[#allocation7 + $0x210] sm:$0xff] }
 0xc48   :  { %12689 = vst [vmem:[#allocation14_spill] sm:$0xff] %v10764_v1  ;;  %12692 = vst [vmem:[#allocation54_spill] sm:$0xff] %v10773_v57 }
 0xc49   :  { %8195 = vtanh.f32 %v10644_v2 }
 0xc56   :  { %v8196_v26 = vpop.eup %8195 }
 0xc57   :  { %v10647_v37 = vmul.f32 %v8196_v26, %v8194_v56  ;;  %v10776_v56 = vld [vmem:[#allocation7 + $0x310] sm:$0xff]  ;;  %v10779_v26 = vld [vmem:[#allocation7 + $0x288] sm:$0xff] }
 0xc58   :  { %12693 = vst [vmem:[#allocation52_spill] sm:$0xff] %v10776_v56  ;;  %12694 = vst [vmem:[#allocation16_spill] sm:$0xff] %v10779_v26 }
 0xc59   :  { %12680 = vst [vmem:[#allocation18_spill] sm:$0xff] %v10647_v37  ;;  %7066 = vmatprep.mubr.f32.mxu0 %v10647_v37  ;;  %7100 = vmatprep.mubr.f32.mxu1 %v10647_v37 }
 0xc5a   :  { %7067 = vmatmul.mubr.f32.vlgmr.msra.gmra.mxu0 %v10647_v37  ;;  %7101 = vmatmul.mubr.f32.vlgmr.msra.gmra.mxu1 %v10647_v37  ;;  %v10782_v37 = vld [vmem:[#allocation7 + $0x388] sm:$0xff] }
 0xc5b   :  { %7103 = vmatpush3.xpose.msra.mxu0 %v10531_v32  ;;  %7137 = vmatpush3.xpose.msra.mxu1 %v10534_v6  ;;  %12695 = vst [vmem:[#allocation17_spill] sm:$0xff] %v10782_v37 }
 0xc5c   :  { %7104 = vmatprep.subr.mxu0 %v10537_v39  ;;  %7138 = vmatprep.subr.mxu1 %v10540_v62 }
 0xc5f   :  { %7105 = vmatpush3.xpose.msra.mxu0 %v10543_v42  ;;  %7139 = vmatpush3.xpose.msra.mxu1 %v10546_v52 }
 0xc60   :  { %7106 = vmatprep.subr.mxu0 %v10549_v25  ;;  %7140 = vmatprep.subr.mxu1 %v10552_v63 }
 0xc63   :  { %7107 = vmatpush3.xpose.msra.mxu0 %v10555_v45  ;;  %7141 = vmatpush3.xpose.msra.mxu1 %v10558_v41 }
 0xc64   :  { %7108 = vmatprep.subr.mxu0 %v10561_v4  ;;  %7142 = vmatprep.subr.mxu1 %v10564_v36 }
 0xc67   :  { %7109 = vmatpush3.xpose.msra.mxu0 %v10567_v40  ;;  %7143 = vmatpush3.xpose.msra.mxu1 %v10570_v34 }
 0xc68   :  { %7110 = vmatprep.subr.mxu0 %v10573_v29  ;;  %7144 = vmatprep.subr.mxu1 %v10576_v8 }
 0xc6b   :  { %7111 = vmatpush3.xpose.msra.mxu0 %v10579_v30  ;;  %7145 = vmatpush3.xpose.msra.mxu1 %v10582_v35 }
 0xc6c   :  { %7112 = vmatprep.subr.mxu0 %v10671_v54  ;;  %7146 = vmatprep.subr.mxu1 %v10674_v31 }
 0xc6f   :  { %7113 = vmatpush3.xpose.msra.mxu0 %v10677_v27  ;;  %7147 = vmatpush3.xpose.msra.mxu1 %v10680_v46 }
 0xc70   :  { %7114 = vmatprep.subr.mxu0 %v10683_v55  ;;  %7148 = vmatprep.subr.mxu1 %v10686_v7 }
 0xc73   :  { %7115 = vmatpush3.xpose.msra.mxu0 %v10689_v9  ;;  %7149 = vmatpush3.xpose.msra.mxu1 %v10692_v5 }
 0xc74   :  { %7116 = vmatprep.subr.mxu0 %v10695_v10  ;;  %7150 = vmatprep.subr.mxu1 %v10698_v11 }
 0xc77   :  { %7117 = vmatpush3.xpose.msra.mxu0 %v10701_v13  ;;  %7151 = vmatpush3.xpose.msra.mxu1 %v10704_v24 }
 0xc78   :  { %7118 = vmatprep.subr.mxu0 %v10707_v14  ;;  %7152 = vmatprep.subr.mxu1 %v10710_v15 }
 0xc7b   :  { %7119 = vmatpush3.xpose.msra.mxu0 %v10713_v16  ;;  %7153 = vmatpush3.xpose.msra.mxu1 %v10716_v18 }
 0xc7c   :  { %7120 = vmatprep.subr.mxu0 %v10719_v19  ;;  %7154 = vmatprep.subr.mxu1 %v10722_v20 }
 0xc7f   :  { %7121 = vmatpush3.xpose.msra.mxu0 %v10725_v21  ;;  %7155 = vmatpush3.xpose.msra.mxu1 %v10728_v23 }
 0xc80   :  { %7122 = vmatprep.subr.mxu0 %v10731_v60  ;;  %7156 = vmatprep.subr.mxu1 %v10734_v28 }
 0xc83   :  { %7123 = vmatpush3.xpose.msra.mxu0 %v10737_v51  ;;  %7157 = vmatpush3.xpose.msra.mxu1 %v10740_v61 }
 0xc84   :  { %7124 = vmatprep.subr.mxu0 %v10743_v48  ;;  %7158 = vmatprep.subr.mxu1 %v10746_v3  ;;  %v12705_v3 = vld [vmem:[#allocation30_spill] sm:$0xff] }
 0xc87   :  { %7125 = vmatpush3.xpose.msra.mxu0 %v10749_v49  ;;  %7159 = vmatpush3.xpose.msra.mxu1 %v10752_v44 }
 0xc88   :  { %7126 = vmatprep.subr.mxu0 %v10755_v43  ;;  %7160 = vmatprep.subr.mxu1 %v10758_v50 }
 0xc8b   :  { %7127 = vmatpush3.xpose.msra.mxu0 %v10761_v59  ;;  %7161 = vmatpush3.xpose.msra.mxu1 %v10764_v1 }
 0xc8c   :  { %7128 = vmatprep.subr.mxu0 %v10767_v22  ;;  %7162 = vmatprep.subr.mxu1 %v10770_v0  ;;  %v10788_v0 = vld [vmem:[#allocation7 + $0x308] sm:$0xff]  ;;  %v12703_v22 = vld [vmem:[#allocation31_spill] sm:$0xff] }
 0xc8d   :  { %12697 = vst [vmem:[#allocation57_spill] sm:$0xff] %v10788_v0  ;;  %v2372_v1 = vadd.f32 %v12703_v22, %v10340_v47 }
 0xc8f   :  { %7129 = vmatpush3.xpose.msra.mxu0 %v10773_v57  ;;  %7163 = vmatpush3.xpose.msra.mxu1 %v10776_v56  ;;  %v10791_v57 = vld [vmem:[#allocation7 + $0x280] sm:$0xff] }
 0xc90   :  { %7130 = vmatprep.subr.mxu0 %v10779_v26  ;;  %7164 = vmatprep.subr.mxu1 %v10782_v37  ;;  %12698 = vst [vmem:[#allocation58_spill] sm:$0xff] %v10791_v57  ;;  %v10794_v56 = vld [vmem:[#allocation7 + $0x380] sm:$0xff] }
 0xc91   :  { %12699 = vst [vmem:[#allocation33_spill] sm:$0xff] %v10794_v56  ;;  %v10797_v26 = vld [vmem:[#allocation7 + $0x200] sm:$0xff] }
 0xc92   :  { %12700 = vst [vmem:[#allocation34_spill] sm:$0xff] %v10797_v26  ;;  %v10800_v37 = vld [vmem:[#allocation7 + $0x300] sm:$0xff] }
 0xc93   :  { %7131 = vmatpush3.xpose.msra.mxu0 %v10785_v33  ;;  %7165 = vmatpush3.xpose.msra.mxu1 %v10788_v0  ;;  %12701 = vst [vmem:[#allocation21_spill] sm:$0xff] %v10800_v37  ;;  %v12702_v0 = vld [vmem:[#allocation29_spill] sm:$0xff] }
 0xc94   :  { %7132 = vmatprep.subr.mxu0 %v10791_v57  ;;  %7166 = vmatprep.subr.mxu1 %v10794_v56  ;;  %v2370_v33 = vadd.f32 %v12702_v0, %v12675_v53  ;;  %v2483_v0 = vadd.f32 %v12705_v3, %v10355_v38  ;;  %v12709_v3 = vld [vmem:[#allocation46_spill] sm:$0xff] }
 0xc97   :  { %7133 = vmatpush3.xpose.msra.mxu0 %v10797_v26  ;;  %7167 = vmatpush3.xpose.msra.mxu1 %v10800_v37 }
 0xc98   :  { %7170 = vmatprep.subr.mxu0 %v10629_v17  ;;  %7204 = vmatprep.subr.mxu1 %v10632_v58  ;;  %v12704_v17 = vld [vmem:[#allocation59_spill] sm:$0xff] }
 0xc99   :  { %v2485_v49 = vadd.f32 %v12704_v17, %v12637_v12 }
 0xd1a   :  { %v3307_v57 = vpop.f32.mrf.mxu0  ;;  %v3378_v26 = vpop.f32.mrf.mxu1 }
 0xd1b   :  { %v3383_v56 = vadd.f32 %v3307_v57, %v2370_v33  ;;  %v3385_v53 = vadd.f32 %v3378_v26, %v2483_v0  ;;  %v12711_v26 = vld [vmem:[#allocation47_spill] sm:$0xff]  ;;  %v12712_v0 = vld [vmem:[#allocation49_spill] sm:$0xff] }
 0xd1c   :  { %v3309_v59 = vpop.f32.mrf.mxu0  ;;  %v3380_v37 = vpop.f32.mrf.mxu1 }
 0xd1d   :  { %v5988_v50 = vmul.f32 -1.442695, %v3383_v56  ;;  %v3384_v43 = vadd.f32 %v3309_v59, %v2372_v1  ;;  %v3386_v58 = vadd.f32 %v3380_v37, %v2485_v49  ;;  %v12710_v56 = vld [vmem:[#allocation44_spill] sm:$0xff] }
 0xd1f   :  { %8197 = vpow2.f32 %v5988_v50  ;;  %v5989_v44 = vmul.f32 -1.442695, %v3384_v43  ;;  %v5990_v48 = vmul.f32 -1.442695, %v3386_v58 }
 0xd21   :  { %8199 = vpow2.f32 %v5989_v44 }
 0xd22   :  { %8201 = vtanh.f32 %v3385_v53 }
 0xd23   :  { %8203 = vpow2.f32 %v5990_v48  ;;  %v12708_v48 = vld [vmem:[#allocation45_spill] sm:$0xff] }
 0xd2c   :  { %v8198_v61 = vpop.eup %8197 }
 0xd2d   :  { %v3390_v22 = vadd.f32 1.0, %v8198_v61 }
 0xd2e   :  { %v8200_v33 = vpop.eup %8199 }
 0xd2f   :  { %8205 = vrcp.f32 %v3390_v22  ;;  %v3396_v50 = vadd.f32 1.0, %v8200_v33  ;;  %v8202_v43 = vpop.eup %8201  ;;  %v12713_v22 = vld [vmem:[#allocation50_spill] sm:$0xff]  ;;  %v12714_v33 = vld [vmem:[#allocation48_spill] sm:$0xff] }
 0xd30   :  { %v8204_v44 = vpop.eup %8203 }
 0xd31   :  { %8207 = vrcp.f32 %v3396_v50  ;;  %v3403_v17 = vadd.f32 1.0, %v8204_v44  ;;  %v12715_v50 = vld [vmem:[#allocation14_spill] sm:$0xff]  ;;  %v12717_v44 = vld [vmem:[#allocation53_spill] sm:$0xff] }
 0xd33   :  { %8209 = vrcp.f32 %v3403_v17  ;;  %v12721_v17 = vld [vmem:[#allocation17_spill] sm:$0xff] }
 0xd3c   :  { %v8206_v59 = vpop.eup %8205 }
 0xd3d   :  { %v3407_v1 = vmul.f32 %v8206_v59, %v8202_v43  ;;  %v12716_v43 = vld [vmem:[#allocation51_spill] sm:$0xff]  ;;  %v12718_v59 = vld [vmem:[#allocation54_spill] sm:$0xff] }
 0xd3e   :  { %v8208_v57 = vpop.eup %8207 }
 0xd3f   :  { %v3406_v37 = vmul.f32 %v8208_v57, %v10644_v2  ;;  %v12707_v2 = vld [vmem:[#allocation43_spill] sm:$0xff]  ;;  %v12720_v57 = vld [vmem:[#allocation16_spill] sm:$0xff] }
 0xd40   :  { %v8210_v58 = vpop.eup %8209 }
 0xd41   :  { %v10814_v49 = vadd.f32 %v3407_v1, %v3406_v37  ;;  %v12719_v1 = vld [vmem:[#allocation52_spill] sm:$0xff]  ;;  %v12722_v37 = vld [vmem:[#allocation55_spill] sm:$0xff] }
 0xd43   :  { %8211 = vtanh.f32 %v10814_v49 }
 0xd50   :  { %v8212_v53 = vpop.eup %8211 }
 0xd51   :  { %v10817_v61 = vmul.f32 %v8212_v53, %v8210_v58  ;;  %v12723_v58 = vld [vmem:[#allocation57_spill] sm:$0xff]  ;;  %v12724_v53 = vld [vmem:[#allocation58_spill] sm:$0xff] }
 0xd53   :  { %12706 = vst [vmem:[#allocation23_spill] sm:$0xff] %v10817_v61  ;;  %7134 = vmatprep.mubr.f32.mxu0 %v10817_v61  ;;  %7168 = vmatprep.mubr.f32.mxu1 %v10817_v61 }
 0xd54   :  { %7135 = vmatmul.mubr.f32.vlgmr.msra.gmra.mxu0 %v10817_v61  ;;  %7169 = vmatmul.mubr.f32.vlgmr.msra.gmra.mxu1 %v10817_v61  ;;  %v12725_v61 = vld [vmem:[#allocation33_spill] sm:$0xff] }
 0xd55   :  { %7171 = vmatpush3.xpose.msra.mxu0 %v10531_v32  ;;  %7205 = vmatpush3.xpose.msra.mxu1 %v10534_v6 }
 0xd56   :  { %7172 = vmatprep.subr.mxu0 %v10537_v39  ;;  %7206 = vmatprep.subr.mxu1 %v10540_v62 }
 0xd59   :  { %7173 = vmatpush3.xpose.msra.mxu0 %v10543_v42  ;;  %7207 = vmatpush3.xpose.msra.mxu1 %v10546_v52 }
 0xd5a   :  { %7174 = vmatprep.subr.mxu0 %v10549_v25  ;;  %7208 = vmatprep.subr.mxu1 %v10552_v63 }
 0xd5d   :  { %7175 = vmatpush3.xpose.msra.mxu0 %v10555_v45  ;;  %7209 = vmatpush3.xpose.msra.mxu1 %v10558_v41 }
 0xd5e   :  { %7176 = vmatprep.subr.mxu0 %v10561_v4  ;;  %7210 = vmatprep.subr.mxu1 %v10564_v36 }
 0xd61   :  { %7177 = vmatpush3.xpose.msra.mxu0 %v10567_v40  ;;  %7211 = vmatpush3.xpose.msra.mxu1 %v10570_v34 }
 0xd62   :  { %7178 = vmatprep.subr.mxu0 %v10573_v29  ;;  %7212 = vmatprep.subr.mxu1 %v10576_v8 }
 0xd65   :  { %7179 = vmatpush3.xpose.msra.mxu0 %v10579_v30  ;;  %7213 = vmatpush3.xpose.msra.mxu1 %v10582_v35 }
 0xd66   :  { %7180 = vmatprep.subr.mxu0 %v10671_v54  ;;  %7214 = vmatprep.subr.mxu1 %v10674_v31 }
 0xd69   :  { %7181 = vmatpush3.xpose.msra.mxu0 %v10677_v27  ;;  %7215 = vmatpush3.xpose.msra.mxu1 %v10680_v46 }
 0xd6a   :  { %7182 = vmatprep.subr.mxu0 %v10683_v55  ;;  %7216 = vmatprep.subr.mxu1 %v10686_v7 }
 0xd6d   :  { %7183 = vmatpush3.xpose.msra.mxu0 %v10689_v9  ;;  %7217 = vmatpush3.xpose.msra.mxu1 %v10692_v5 }
 0xd6e   :  { %7184 = vmatprep.subr.mxu0 %v10695_v10  ;;  %7218 = vmatprep.subr.mxu1 %v10698_v11 }
 0xd71   :  { %7185 = vmatpush3.xpose.msra.mxu0 %v10701_v13  ;;  %7219 = vmatpush3.xpose.msra.mxu1 %v10704_v24 }
 0xd72   :  { %7186 = vmatprep.subr.mxu0 %v10707_v14  ;;  %7220 = vmatprep.subr.mxu1 %v10710_v15 }
 0xd75   :  { %7187 = vmatpush3.xpose.msra.mxu0 %v10713_v16  ;;  %7221 = vmatpush3.xpose.msra.mxu1 %v10716_v18 }
 0xd76   :  { %7188 = vmatprep.subr.mxu0 %v10719_v19  ;;  %7222 = vmatprep.subr.mxu1 %v10722_v20 }
 0xd79   :  { %7189 = vmatpush3.xpose.msra.mxu0 %v10725_v21  ;;  %7223 = vmatpush3.xpose.msra.mxu1 %v10728_v23 }
 0xd7a   :  { %7190 = vmatprep.subr.mxu0 %v10731_v60  ;;  %7224 = vmatprep.subr.mxu1 %v10734_v28 }
 0xd7d   :  { %7191 = vmatpush3.xpose.msra.mxu0 %v10737_v51  ;;  %7225 = vmatpush3.xpose.msra.mxu1 %v12707_v2 }
 0xd7e   :  { %7192 = vmatprep.subr.mxu0 %v12708_v48  ;;  %7226 = vmatprep.subr.mxu1 %v12709_v3  ;;  %v12734_v3 = vld [vmem:[#allocation62_spill] sm:$0xff] }
 0xd81   :  { %7193 = vmatpush3.xpose.msra.mxu0 %v12710_v56  ;;  %7227 = vmatpush3.xpose.msra.mxu1 %v12711_v26 }
 0xd82   :  { %7194 = vmatprep.subr.mxu0 %v12712_v0  ;;  %7228 = vmatprep.subr.mxu1 %v12713_v22 }
 0xd85   :  { %7195 = vmatpush3.xpose.msra.mxu0 %v12714_v33  ;;  %7229 = vmatpush3.xpose.msra.mxu1 %v12715_v50  ;;  %v12726_v50 = vld [vmem:[#allocation34_spill] sm:$0xff] }
 0xd86   :  { %7196 = vmatprep.subr.mxu0 %v12716_v43  ;;  %7230 = vmatprep.subr.mxu1 %v12717_v44  ;;  %v12727_v43 = vld [vmem:[#allocation21_spill] sm:$0xff] }
 0xd87   :  { %v12728_v44 = vld [vmem:[#allocation69_spill] sm:$0xff] }
 0xd89   :  { %7197 = vmatpush3.xpose.msra.mxu0 %v12718_v59  ;;  %7231 = vmatpush3.xpose.msra.mxu1 %v12719_v1  ;;  %v12729_v59 = vld [vmem:[#allocation20_spill] sm:$0xff] }
 0xd8a   :  { %7198 = vmatprep.subr.mxu0 %v12720_v57  ;;  %7232 = vmatprep.subr.mxu1 %v12721_v17  ;;  %v12730_v1 = vld [vmem:[#allocation32_spill] sm:$0xff]  ;;  %v12731_v57 = vld [vmem:[#allocation61_spill] sm:$0xff] }
 0xd8b   :  { %v2376_v33 = vadd.f32 %v12731_v57, %v12730_v1  ;;  %v2489_v57 = vadd.f32 %v12734_v3, %v10355_v38 }
 0xd8d   :  { %7199 = vmatpush3.xpose.msra.mxu0 %v12722_v37  ;;  %7233 = vmatpush3.xpose.msra.mxu1 %v12723_v58  ;;  %v12732_v37 = vld [vmem:[#allocation60_spill] sm:$0xff] }
 0xd8e   :  { %7200 = vmatprep.subr.mxu0 %v12724_v53  ;;  %7234 = vmatprep.subr.mxu1 %v12725_v61  ;;  %v2378_v22 = vadd.f32 %v12732_v37, %v10340_v47 }
 0xd91   :  { %7201 = vmatpush3.xpose.msra.mxu0 %v12726_v50  ;;  %7235 = vmatpush3.xpose.msra.mxu1 %v12727_v43 }
 0xd92   :  { %7238 = vmatprep.subr.mxu0 %v12728_v44  ;;  %7272 = vmatprep.subr.mxu1 %v12729_v59  ;;  %v12733_v44 = vld [vmem:[#allocation67_spill] sm:$0xff] }
 0xd93   :  { %v2491_v56 = vadd.f32 %v12733_v44, %v12637_v12 }
 0xe14   :  { %v3482_v17 = vpop.f32.mrf.mxu0  ;;  %v3553_v61 = vpop.f32.mrf.mxu1 }
 0xe15   :  { %v3558_v58 = vadd.f32 %v3482_v17, %v2376_v33  ;;  %v3560_v1 = vadd.f32 %v3553_v61, %v2489_v57 }
 0xe16   :  { %v3484_v0 = vpop.f32.mrf.mxu0  ;;  %v3555_v43 = vpop.f32.mrf.mxu1 }
 0xe17   :  { %v5991_v53 = vmul.f32 -1.442695, %v3558_v58  ;;  %v3559_v26 = vadd.f32 %v3484_v0, %v2378_v22  ;;  %v3561_v59 = vadd.f32 %v3555_v43, %v2491_v56 }
 0xe19   :  { %8213 = vpow2.f32 %v5991_v53  ;;  %v5992_v50 = vmul.f32 -1.442695, %v3559_v26  ;;  %v5993_v48 = vmul.f32 -1.442695, %v3561_v59 }
 0xe1b   :  { %8215 = vpow2.f32 %v5992_v50 }
 0xe1c   :  { %8217 = vtanh.f32 %v3560_v1 }
 0xe1d   :  { %8219 = vpow2.f32 %v5993_v48 }
 0xe26   :  { %v8214_v2 = vpop.eup %8213 }
 0xe27   :  { %v3565_v37 = vadd.f32 1.0, %v8214_v2 }
 0xe28   :  { %v8216_v33 = vpop.eup %8215 }
 0xe29   :  { %8221 = vrcp.f32 %v3565_v37  ;;  %v3571_v0 = vadd.f32 1.0, %v8216_v33  ;;  %v8218_v26 = vpop.eup %8217 }
 0xe2a   :  { %v8220_v22 = vpop.eup %8219 }
 0xe2b   :  { %8223 = vrcp.f32 %v3571_v0  ;;  %v3578_v53 = vadd.f32 1.0, %v8220_v22 }
 0xe2d   :  { %8225 = vrcp.f32 %v3578_v53 }
 0xe36   :  { %v8222_v50 = vpop.eup %8221 }
 0xe37   :  { %v3582_v17 = vmul.f32 %v8222_v50, %v8218_v26 }
 0xe38   :  { %v8224_v58 = vpop.eup %8223 }
 0xe39   :  { %v3581_v56 = vmul.f32 %v8224_v58, %v10814_v49 }
 0xe3a   :  { %v8226_v61 = vpop.eup %8225 }
 0xe3b   :  { %v10896_v43 = vadd.f32 %v3582_v17, %v3581_v56 }
 0xe3d   :  { %8227 = vtanh.f32 %v10896_v43 }
 0xe4a   :  { %v8228_v2 = vpop.eup %8227 }
 0xe4b   :  { %v10899_v3 = vmul.f32 %v8228_v2, %v8226_v61  ;;  %v3961_v2 = vld [vmem:[#allocation4 + $0x278] sm:$0xff] }
 0xe4d   :  { %7202 = vmatprep.mubr.f32.mxu0 %v10899_v3  ;;  %7236 = vmatprep.mubr.f32.mxu1 %v10899_v3 }
 0xe4e   :  { %7203 = vmatmul.mubr.f32.vlgmr.msra.gmra.mxu0 %v10899_v3  ;;  %7237 = vmatmul.mubr.f32.vlgmr.msra.gmra.mxu1 %v10899_v3 }
 0xe4f   :  { %7239 = vmatpush3.xpose.msra.mxu0 %v10531_v32  ;;  %7273 = vmatpush3.xpose.msra.mxu1 %v10534_v6  ;;  %v12735_v32 = vld [vmem:[#allocation43_spill] sm:$0xff]  ;;  %v12736_v6 = vld [vmem:[#allocation45_spill] sm:$0xff] }
 0xe50   :  { %7240 = vmatprep.subr.mxu0 %v10537_v39  ;;  %7274 = vmatprep.subr.mxu1 %v10540_v62  ;;  %v12737_v39 = vld [vmem:[#allocation46_spill] sm:$0xff]  ;;  %v12738_v62 = vld [vmem:[#allocation44_spill] sm:$0xff] }
 0xe53   :  { %7241 = vmatpush3.xpose.msra.mxu0 %v10543_v42  ;;  %7275 = vmatpush3.xpose.msra.mxu1 %v10546_v52  ;;  %v12739_v42 = vld [vmem:[#allocation47_spill] sm:$0xff]  ;;  %v12740_v52 = vld [vmem:[#allocation49_spill] sm:$0xff] }
 0xe54   :  { %7242 = vmatprep.subr.mxu0 %v10549_v25  ;;  %7276 = vmatprep.subr.mxu1 %v10552_v63  ;;  %v12741_v25 = vld [vmem:[#allocation50_spill] sm:$0xff]  ;;  %v12742_v63 = vld [vmem:[#allocation48_spill] sm:$0xff] }
 0xe57   :  { %7243 = vmatpush3.xpose.msra.mxu0 %v10555_v45  ;;  %7277 = vmatpush3.xpose.msra.mxu1 %v10558_v41  ;;  %v12743_v45 = vld [vmem:[#allocation14_spill] sm:$0xff]  ;;  %v12744_v41 = vld [vmem:[#allocation51_spill] sm:$0xff] }
 0xe58   :  { %7244 = vmatprep.subr.mxu0 %v10561_v4  ;;  %7278 = vmatprep.subr.mxu1 %v10564_v36  ;;  %v12745_v4 = vld [vmem:[#allocation53_spill] sm:$0xff]  ;;  %v12746_v36 = vld [vmem:[#allocation54_spill] sm:$0xff] }
 0xe5b   :  { %7245 = vmatpush3.xpose.msra.mxu0 %v10567_v40  ;;  %7279 = vmatpush3.xpose.msra.mxu1 %v10570_v34  ;;  %v12747_v40 = vld [vmem:[#allocation52_spill] sm:$0xff] }
 0xe5c   :  { %7246 = vmatprep.subr.mxu0 %v10573_v29  ;;  %7280 = vmatprep.subr.mxu1 %v10576_v8  ;;  %v12748_v34 = vld [vmem:[#allocation16_spill] sm:$0xff]  ;;  %v12749_v29 = vld [vmem:[#allocation17_spill] sm:$0xff]  ;;  %v12750_v8 = vld [vmem:[#allocation55_spill] sm:$0xff] }
 0xe5f   :  { %7247 = vmatpush3.xpose.msra.mxu0 %v10579_v30  ;;  %7281 = vmatpush3.xpose.msra.mxu1 %v10582_v35  ;;  %v12751_v30 = vld [vmem:[#allocation57_spill] sm:$0xff]  ;;  %v12752_v35 = vld [vmem:[#allocation58_spill] sm:$0xff] }
 0xe60   :  { %7248 = vmatprep.subr.mxu0 %v10671_v54  ;;  %7282 = vmatprep.subr.mxu1 %v10674_v31  ;;  %v12753_v54 = vld [vmem:[#allocation33_spill] sm:$0xff]  ;;  %v12754_v31 = vld [vmem:[#allocation34_spill] sm:$0xff] }
 0xe63   :  { %7249 = vmatpush3.xpose.msra.mxu0 %v10677_v27  ;;  %7283 = vmatpush3.xpose.msra.mxu1 %v10680_v46  ;;  %v12755_v27 = vld [vmem:[#allocation21_spill] sm:$0xff]  ;;  %v3977_v46 = vld [vmem:[#allocation4 + $0x2f8] sm:$0xff] }
 0xe64   :  { %7250 = vmatprep.subr.mxu0 %v10683_v55  ;;  %7284 = vmatprep.subr.mxu1 %v10686_v7  ;;  %v4009_v55 = vld [vmem:[#allocation4 + $0x3f8] sm:$0xff]  ;;  %v12756_v7 = vld [vmem:[#allocation32_spill] sm:$0xff] }
 0xe67   :  { %7251 = vmatpush3.xpose.msra.mxu0 %v10689_v9  ;;  %7285 = vmatpush3.xpose.msra.mxu1 %v10692_v5  ;;  %v12757_v9 = vld [vmem:[#allocation15_spill] sm:$0xff] }
 0xe68   :  { %7252 = vmatprep.subr.mxu0 %v10695_v10  ;;  %7286 = vmatprep.subr.mxu1 %v10698_v11  ;;  %v2382_v5 = vadd.f32 %v12757_v9, %v12756_v7  ;;  %v12758_v11 = vld [vmem:[#allocation39_spill] sm:$0xff]  ;;  %v3955_v9 = vld [vmem:[#allocation4 + $0x248] sm:$0xff] }
 0xe6b   :  { %7253 = vmatpush3.xpose.msra.mxu0 %v10701_v13  ;;  %7287 = vmatpush3.xpose.msra.mxu1 %v10704_v24  ;;  %v2384_v13 = vadd.f32 %v12758_v11, %v10340_v47  ;;  %v4002_v11 = vld [vmem:[#allocation4 + $0x3c0] sm:$0xff] }
 0xe6c   :  { %7254 = vmatprep.subr.mxu0 %v10707_v14  ;;  %7288 = vmatprep.subr.mxu1 %v10710_v15 }
 0xe6f   :  { %7255 = vmatpush3.xpose.msra.mxu0 %v10713_v16  ;;  %7289 = vmatpush3.xpose.msra.mxu1 %v10716_v18 }
 0xe70   :  { %7256 = vmatprep.subr.mxu0 %v10719_v19  ;;  %7290 = vmatprep.subr.mxu1 %v10722_v20 }
 0xe73   :  { %7257 = vmatpush3.xpose.msra.mxu0 %v10725_v21  ;;  %7291 = vmatpush3.xpose.msra.mxu1 %v10728_v23  ;;  %v12759_v21 = vld [vmem:[#allocation63_spill] sm:$0xff] }
 0xe74   :  { %7258 = vmatprep.subr.mxu0 %v10731_v60  ;;  %7292 = vmatprep.subr.mxu1 %v10734_v28  ;;  %v2497_v23 = vadd.f32 %v12759_v21, %v12637_v12  ;;  %v12760_v28 = vld [vmem:[#allocation13_spill] sm:$0xff]  ;;  %v3952_v21 = vld [vmem:[#allocation4 + $0x230] sm:$0xff] }
 0xe77   :  { %7259 = vmatpush3.xpose.msra.mxu0 %v10737_v51  ;;  %7293 = vmatpush3.xpose.msra.mxu1 %v12735_v32  ;;  %v2495_v51 = vadd.f32 %v12760_v28, %v10355_v38  ;;  %v3993_v32 = vld [vmem:[#allocation4 + $0x378] sm:$0xff]  ;;  %v3999_v28 = vld [vmem:[#allocation4 + $0x3a8] sm:$0xff] }
 0xe78   :  { %7260 = vmatprep.subr.mxu0 %v12736_v6  ;;  %7294 = vmatprep.subr.mxu1 %v12737_v39  ;;  %v4008_v6 = vld [vmem:[#allocation4 + $0x3f0] sm:$0xff] }
 0xe79   :  { %v12761_v39 = vld [vmem:[#allocation70_spill] sm:$0xff] }
 0xe7b   :  { %7261 = vmatpush3.xpose.msra.mxu0 %v12738_v62  ;;  %7295 = vmatpush3.xpose.msra.mxu1 %v12739_v42  ;;  %v3960_v62 = vld [vmem:[#allocation4 + $0x270] sm:$0xff] }
 0xe7c   :  { %7262 = vmatprep.subr.mxu0 %v12740_v52  ;;  %7296 = vmatprep.subr.mxu1 %v12741_v25  ;;  %v3992_v42 = vld [vmem:[#allocation4 + $0x370] sm:$0xff]  ;;  %v3975_v52 = vld [vmem:[#allocation4 + $0x2e8] sm:$0xff] }
 0xe7d   :  { %v4007_v25 = vld [vmem:[#allocation4 + $0x3e8] sm:$0xff] }
 0xe7f   :  { %7263 = vmatpush3.xpose.msra.mxu0 %v12742_v63  ;;  %7297 = vmatpush3.xpose.msra.mxu1 %v12743_v45  ;;  %v3959_v63 = vld [vmem:[#allocation4 + $0x268] sm:$0xff] }
 0xe80   :  { %7264 = vmatprep.subr.mxu0 %v12744_v41  ;;  %7298 = vmatprep.subr.mxu1 %v12745_v4  ;;  %v3991_v45 = vld [vmem:[#allocation4 + $0x368] sm:$0xff]  ;;  %v3974_v41 = vld [vmem:[#allocation4 + $0x2e0] sm:$0xff] }
 0xe81   :  { %v4006_v4 = vld [vmem:[#allocation4 + $0x3e0] sm:$0xff] }
 0xe83   :  { %7265 = vmatpush3.xpose.msra.mxu0 %v12746_v36  ;;  %7299 = vmatpush3.xpose.msra.mxu1 %v12747_v40  ;;  %v3958_v36 = vld [vmem:[#allocation4 + $0x260] sm:$0xff] }
 0xe84   :  { %7266 = vmatprep.subr.mxu0 %v12748_v34  ;;  %7300 = vmatprep.subr.mxu1 %v12749_v29  ;;  %v3990_v40 = vld [vmem:[#allocation4 + $0x360] sm:$0xff]  ;;  %v3973_v34 = vld [vmem:[#allocation4 + $0x2d8] sm:$0xff] }
 0xe85   :  { %v4005_v29 = vld [vmem:[#allocation4 + $0x3d8] sm:$0xff] }
 0xe87   :  { %7267 = vmatpush3.xpose.msra.mxu0 %v12750_v8  ;;  %7301 = vmatpush3.xpose.msra.mxu1 %v12751_v30  ;;  %v3957_v8 = vld [vmem:[#allocation4 + $0x258] sm:$0xff] }
 0xe88   :  { %7268 = vmatprep.subr.mxu0 %v12752_v35  ;;  %7302 = vmatprep.subr.mxu1 %v12753_v54  ;;  %v3989_v30 = vld [vmem:[#allocation4 + $0x358] sm:$0xff]  ;;  %v3972_v35 = vld [vmem:[#allocation4 + $0x2d0] sm:$0xff] }
 0xe89   :  { %v4004_v54 = vld [vmem:[#allocation4 + $0x3d0] sm:$0xff] }
 0xe8b   :  { %7269 = vmatpush3.xpose.msra.mxu0 %v12754_v31  ;;  %7303 = vmatpush3.xpose.msra.mxu1 %v12755_v27  ;;  %v3956_v31 = vld [vmem:[#allocation4 + $0x250] sm:$0xff] }
 0xe8c   :  { %7306 = vmatprep.subr.mxu0 %v3977_v46  ;;  %7354 = vmatprep.subr.mxu1 %v4009_v55  ;;  %v3988_v27 = vld [vmem:[#allocation4 + $0x350] sm:$0xff]  ;;  %v3971_v46 = vld [vmem:[#allocation4 + $0x2c8] sm:$0xff] }
 0xe8d   :  { %v4003_v55 = vld [vmem:[#allocation4 + $0x3c8] sm:$0xff] }
 0xf0e   :  { %v3657_v10 = vpop.f32.mrf.mxu0  ;;  %v3728_v18 = vpop.f32.mrf.mxu1 }
 0xf0f   :  { %v3733_v24 = vadd.f32 %v3657_v10, %v2382_v5  ;;  %v3735_v49 = vadd.f32 %v3728_v18, %v2495_v51  ;;  %v3987_v5 = vld [vmem:[#allocation4 + $0x348] sm:$0xff]  ;;  %v3970_v10 = vld [vmem:[#allocation4 + $0x2c0] sm:$0xff]  ;;  %v3985_v18 = vld [vmem:[#allocation4 + $0x338] sm:$0xff] }
 0xf10   :  { %v3659_v14 = vpop.f32.mrf.mxu0  ;;  %v3730_v20 = vpop.f32.mrf.mxu1  ;;  %v3951_v51 = vld [vmem:[#allocation4 + $0x228] sm:$0xff] }
 0xf11   :  { %v5994_v15 = vmul.f32 -1.442695, %v3733_v24  ;;  %v3734_v16 = vadd.f32 %v3659_v14, %v2384_v13  ;;  %v3736_v60 = vadd.f32 %v3730_v20, %v2497_v23  ;;  %v3954_v13 = vld [vmem:[#allocation4 + $0x240] sm:$0xff]  ;;  %v3969_v14 = vld [vmem:[#allocation4 + $0x2b8] sm:$0xff]  ;;  %v4000_v20 = vld [vmem:[#allocation4 + $0x3b0] sm:$0xff] }
 0xf12   :  { %v3986_v24 = vld [vmem:[#allocation4 + $0x340] sm:$0xff]  ;;  %v3984_v23 = vld [vmem:[#allocation4 + $0x330] sm:$0xff] }
 0xf13   :  { %8229 = vpow2.f32 %v5994_v15  ;;  %v5995_v19 = vmul.f32 -1.442695, %v3734_v16  ;;  %v5996_v48 = vmul.f32 -1.442695, %v3736_v60  ;;  %v4001_v15 = vld [vmem:[#allocation4 + $0x3b8] sm:$0xff]  ;;  %v3967_v60 = vld [vmem:[#allocation4 + $0x2a8] sm:$0xff] }
 0xf14   :  { %v3953_v16 = vld [vmem:[#allocation4 + $0x238] sm:$0xff] }
 0xf15   :  { %8231 = vpow2.f32 %v5995_v19  ;;  %v3968_v19 = vld [vmem:[#allocation4 + $0x2b0] sm:$0xff] }
 0xf16   :  { %8233 = vtanh.f32 %v3735_v49  ;;  %v3983_v49 = vld [vmem:[#allocation4 + $0x328] sm:$0xff] }
 0xf17   :  { %8235 = vpow2.f32 %v5996_v48  ;;  %v3966_v48 = vld [vmem:[#allocation4 + $0x2a0] sm:$0xff] }
 0xf20   :  { %v8230_v1 = vpop.eup %8229 }
 0xf21   :  { %v3740_v44 = vadd.f32 1.0, %v8230_v1  ;;  %v3998_v1 = vld [vmem:[#allocation4 + $0x3a0] sm:$0xff] }
 0xf22   :  { %v8232_v59 = vpop.eup %8231 }
 0xf23   :  { %8237 = vrcp.f32 %v3740_v44  ;;  %v3746_v57 = vadd.f32 1.0, %v8232_v59  ;;  %v8234_v37 = vpop.eup %8233  ;;  %v3950_v44 = vld [vmem:[#allocation4 + $0x220] sm:$0xff] }
 0xf24   :  { %v8236_v33 = vpop.eup %8235  ;;  %v3982_v59 = vld [vmem:[#allocation4 + $0x320] sm:$0xff] }
 0xf25   :  { %8239 = vrcp.f32 %v3746_v57  ;;  %v3753_v50 = vadd.f32 1.0, %v8236_v33  ;;  %v3965_v57 = vld [vmem:[#allocation4 + $0x298] sm:$0xff] }
 0xf26   :  { %v3949_v33 = vld [vmem:[#allocation4 + $0x218] sm:$0xff] }
 0xf27   :  { %8241 = vrcp.f32 %v3753_v50  ;;  %v3948_v50 = vld [vmem:[#allocation4 + $0x210] sm:$0xff] }
 0xf30   :  { %v8238_v0 = vpop.eup %8237 }
 0xf31   :  { %v3757_v26 = vmul.f32 %v8238_v0, %v8234_v37  ;;  %v3997_v37 = vld [vmem:[#allocation4 + $0x398] sm:$0xff] }
 0xf32   :  { %v8240_v22 = vpop.eup %8239  ;;  %v3981_v0 = vld [vmem:[#allocation4 + $0x318] sm:$0xff] }
 0xf33   :  { %v3756_v17 = vmul.f32 %v8240_v22, %v10896_v43  ;;  %v3976_v43 = vld [vmem:[#allocation4 + $0x2f0] sm:$0xff] }
 0xf34   :  { %v8242_v53 = vpop.eup %8241  ;;  %v3996_v22 = vld [vmem:[#allocation4 + $0x390] sm:$0xff] }
 0xf35   :  { %v10976_v58 = vadd.f32 %v3757_v26, %v3756_v17  ;;  %v3964_v26 = vld [vmem:[#allocation4 + $0x290] sm:$0xff] }
 0xf36   :  { %v3980_v17 = vld [vmem:[#allocation4 + $0x310] sm:$0xff] }
 0xf37   :  { %8243 = vtanh.f32 %v10976_v58 }
 0xf44   :  { %v8244_v56 = vpop.eup %8243 }
 0xf45   :  { %v10979_v61 = vmul.f32 %v8244_v56, %v8242_v53  ;;  %v3963_v53 = vld [vmem:[#allocation4 + $0x288] sm:$0xff] }
 0xf46   :  { %v3995_v56 = vld [vmem:[#allocation4 + $0x388] sm:$0xff] }
 0xf47   :  { %7270 = vmatprep.mubr.f32.mxu0 %v10979_v61  ;;  %7304 = vmatprep.mubr.f32.mxu1 %v10979_v61 }
 0xf48   :  { %7271 = vmatmul.mubr.f32.vlgmr.msra.gmra.mxu0 %v10979_v61  ;;  %7305 = vmatmul.mubr.f32.vlgmr.msra.gmra.mxu1 %v10979_v61 }
 0xf49   :  { %7307 = vmatpush3.xpose.msra.mxu0 %v3961_v2  ;;  %7355 = vmatpush3.xpose.msra.mxu1 %v3993_v32  ;;  %v3947_v2 = vld [vmem:[#allocation4 + $0x208] sm:$0xff] }
 0xf4a   :  { %7338 = vmatprep.mubr.f32.mxu0 %v12761_v39  ;;  %7386 = vmatprep.mubr.f32.mxu1 %v12761_v39  ;;  %v3979_v32 = vld [vmem:[#allocation4 + $0x308] sm:$0xff] }
 0xf4b   :  { %7308 = vmatprep.subr.mxu0 %v3976_v43  ;;  %7356 = vmatprep.subr.mxu1 %v4008_v6  ;;  %v3962_v43 = vld [vmem:[#allocation4 + $0x280] sm:$0xff] }
 0xf4c   :  { %v3994_v6 = vld [vmem:[#allocation4 + $0x380] sm:$0xff] }
 0xf4d   :  { %7309 = vmatpush3.xpose.msra.mxu0 %v3960_v62  ;;  %7357 = vmatpush3.xpose.msra.mxu1 %v3992_v42  ;;  %v3946_v62 = vld [vmem:[#allocation4 + $0x200] sm:$0xff] }
 0xf4e   :  { %7310 = vmatprep.subr.mxu0 %v3975_v52  ;;  %7358 = vmatprep.subr.mxu1 %v4007_v25  ;;  %v3978_v42 = vld [vmem:[#allocation4 + $0x300] sm:$0xff]  ;;  %v10987_v52 = vld [vmem:[#allocation7 + $0x4f8] sm:$0xff] }
 0xf4f   :  { %12762 = vst [vmem:[#allocation24_spill] sm:$0xff] %v10987_v52  ;;  %v10989_v25 = vld [vmem:[#allocation7 + $0x5f8] sm:$0xff] }
 0xf50   :  { %12763 = vst [vmem:[#allocation22_spill] sm:$0xff] %v10989_v25 }
 0xf51   :  { %7311 = vmatpush3.xpose.msra.mxu0 %v3959_v63  ;;  %7359 = vmatpush3.xpose.msra.mxu1 %v3991_v45  ;;  %v10993_v63 = vld [vmem:[#allocation7 + $0x478] sm:$0xff] }
 0xf52   :  { %7312 = vmatprep.subr.mxu0 %v3974_v41  ;;  %7360 = vmatprep.subr.mxu1 %v4006_v4  ;;  %v10995_v45 = vld [vmem:[#allocation7 + $0x578] sm:$0xff]  ;;  %v12764_v41 = vld [vmem:[#allocation40_spill] sm:$0xff]  ;;  %v11003_v4 = vld [vmem:[#allocation7 + $0x4f0] sm:$0xff] }
 0xf55   :  { %7313 = vmatpush3.xpose.msra.mxu0 %v3958_v36  ;;  %7361 = vmatpush3.xpose.msra.mxu1 %v3990_v40  ;;  %v11005_v36 = vld [vmem:[#allocation7 + $0x5f0] sm:$0xff] }
 0xf56   :  { %7314 = vmatprep.subr.mxu0 %v3973_v34  ;;  %7362 = vmatprep.subr.mxu1 %v4005_v29  ;;  %v11009_v40 = vld [vmem:[#allocation7 + $0x470] sm:$0xff]  ;;  %v11019_v29 = vld [vmem:[#allocation7 + $0x4e8] sm:$0xff] }
 0xf57   :  { %v11011_v34 = vld [vmem:[#allocation7 + $0x570] sm:$0xff] }
 0xf59   :  { %7315 = vmatpush3.xpose.msra.mxu0 %v3957_v8  ;;  %7363 = vmatpush3.xpose.msra.mxu1 %v3989_v30  ;;  %v11021_v8 = vld [vmem:[#allocation7 + $0x5e8] sm:$0xff] }
 0xf5a   :  { %7316 = vmatprep.subr.mxu0 %v3972_v35  ;;  %7364 = vmatprep.subr.mxu1 %v4004_v54  ;;  %v11025_v30 = vld [vmem:[#allocation7 + $0x468] sm:$0xff]  ;;  %v12766_v54 = vld [vmem:[#allocation18_spill] sm:$0xff] }
 0xf5b   :  { %v11027_v35 = vld [vmem:[#allocation7 + $0x568] sm:$0xff] }
 0xf5d   :  { %7317 = vmatpush3.xpose.msra.mxu0 %v3956_v31  ;;  %7365 = vmatpush3.xpose.msra.mxu1 %v3988_v27  ;;  %v11035_v31 = vld [vmem:[#allocation7 + $0x4e0] sm:$0xff] }
 0xf5e   :  { %7318 = vmatprep.subr.mxu0 %v3971_v46  ;;  %7366 = vmatprep.subr.mxu1 %v4003_v55  ;;  %v11037_v27 = vld [vmem:[#allocation7 + $0x5e0] sm:$0xff] }
 0xf5f   :  { %v11041_v46 = vld [vmem:[#allocation7 + $0x460] sm:$0xff] }
 0xf60   :  { %v11043_v55 = vld [vmem:[#allocation7 + $0x560] sm:$0xff] }
 0xf61   :  { %7319 = vmatpush3.xpose.msra.mxu0 %v3955_v9  ;;  %7367 = vmatpush3.xpose.msra.mxu1 %v3987_v5  ;;  %v12767_v9 = vld [vmem:[#allocation23_spill] sm:$0xff] }
 0xf62   :  { %7320 = vmatprep.subr.mxu0 %v3970_v10  ;;  %7368 = vmatprep.subr.mxu1 %v4002_v11  ;;  %v11051_v5 = vld [vmem:[#allocation7 + $0x4d8] sm:$0xff] }
 0xf63   :  { %v11053_v10 = vld [vmem:[#allocation7 + $0x5d8] sm:$0xff] }
 0xf64   :  { %v11057_v11 = vld [vmem:[#allocation7 + $0x458] sm:$0xff] }
 0xf65   :  { %7321 = vmatpush3.xpose.msra.mxu0 %v3954_v13  ;;  %7369 = vmatpush3.xpose.msra.mxu1 %v3986_v24  ;;  %v11059_v13 = vld [vmem:[#allocation7 + $0x558] sm:$0xff]  ;;  %v11067_v24 = vld [vmem:[#allocation7 + $0x4d0] sm:$0xff] }
 0xf66   :  { %7322 = vmatprep.subr.mxu0 %v3969_v14  ;;  %7370 = vmatprep.subr.mxu1 %v4001_v15  ;;  %v11069_v14 = vld [vmem:[#allocation7 + $0x5d0] sm:$0xff] }
 0xf67   :  { %v11073_v15 = vld [vmem:[#allocation7 + $0x450] sm:$0xff] }
 0xf69   :  { %7323 = vmatpush3.xpose.msra.mxu0 %v3953_v16  ;;  %7371 = vmatpush3.xpose.msra.mxu1 %v3985_v18  ;;  %v11075_v16 = vld [vmem:[#allocation7 + $0x550] sm:$0xff]  ;;  %v11083_v18 = vld [vmem:[#allocation7 + $0x4c8] sm:$0xff] }
 0xf6a   :  { %7324 = vmatprep.subr.mxu0 %v3968_v19  ;;  %7372 = vmatprep.subr.mxu1 %v4000_v20  ;;  %v11085_v19 = vld [vmem:[#allocation7 + $0x5c8] sm:$0xff] }
 0xf6b   :  { %v11089_v20 = vld [vmem:[#allocation7 + $0x448] sm:$0xff] }
 0xf6d   :  { %7325 = vmatpush3.xpose.msra.mxu0 %v3952_v21  ;;  %7373 = vmatpush3.xpose.msra.mxu1 %v3984_v23  ;;  %v11091_v21 = vld [vmem:[#allocation7 + $0x548] sm:$0xff]  ;;  %v11099_v23 = vld [vmem:[#allocation7 + $0x5c0] sm:$0xff] }
 0xf6e   :  { %7326 = vmatprep.subr.mxu0 %v3967_v60  ;;  %7374 = vmatprep.subr.mxu1 %v3999_v28  ;;  %v11103_v60 = vld [vmem:[#allocation7 + $0x440] sm:$0xff] }
 0xf6f   :  { %v11105_v28 = vld [vmem:[#allocation7 + $0x540] sm:$0xff] }
 0xf71   :  { %7327 = vmatpush3.xpose.msra.mxu0 %v3951_v51  ;;  %7375 = vmatpush3.xpose.msra.mxu1 %v3983_v49  ;;  %v11111_v51 = vld [vmem:[#allocation7 + $0x5b8] sm:$0xff] }
 0xf72   :  { %7328 = vmatprep.subr.mxu0 %v3966_v48  ;;  %7376 = vmatprep.subr.mxu1 %v3998_v1  ;;  %v11115_v49 = vld [vmem:[#allocation7 + $0x438] sm:$0xff]  ;;  %v11121_v1 = vld [vmem:[#allocation7 + $0x4b0] sm:$0xff] }
 0xf73   :  { %v11117_v48 = vld [vmem:[#allocation7 + $0x538] sm:$0xff] }
 0xf75   :  { %7329 = vmatpush3.xpose.msra.mxu0 %v3950_v44  ;;  %7377 = vmatpush3.xpose.msra.mxu1 %v3982_v59  ;;  %v11123_v44 = vld [vmem:[#allocation7 + $0x5b0] sm:$0xff] }
 0xf76   :  { %7330 = vmatprep.subr.mxu0 %v3965_v57  ;;  %7378 = vmatprep.subr.mxu1 %v3997_v37  ;;  %v11127_v59 = vld [vmem:[#allocation7 + $0x430] sm:$0xff]  ;;  %v11133_v37 = vld [vmem:[#allocation7 + $0x4a8] sm:$0xff] }
 0xf77   :  { %v11129_v57 = vld [vmem:[#allocation7 + $0x530] sm:$0xff] }
 0xf79   :  { %7331 = vmatpush3.xpose.msra.mxu0 %v3949_v33  ;;  %7379 = vmatpush3.xpose.msra.mxu1 %v3981_v0  ;;  %v11135_v33 = vld [vmem:[#allocation7 + $0x5a8] sm:$0xff] }
 0xf7a   :  { %7332 = vmatprep.subr.mxu0 %v3964_v26  ;;  %7380 = vmatprep.subr.mxu1 %v3996_v22  ;;  %v11139_v0 = vld [vmem:[#allocation7 + $0x428] sm:$0xff]  ;;  %v11143_v22 = vld [vmem:[#allocation7 + $0x4a0] sm:$0xff] }
 0xf7b   :  { %v11141_v26 = vld [vmem:[#allocation7 + $0x528] sm:$0xff]  ;;  %12769 = vst [vmem:[#allocation41_spill] sm:$0xff] %v11143_v22 }
 0xf7c   :  { %12768 = vst [vmem:[#allocation56_spill] sm:$0xff] %v11141_v26 }
 0xf7d   :  { %7333 = vmatpush3.xpose.msra.mxu0 %v3948_v50  ;;  %7381 = vmatpush3.xpose.msra.mxu1 %v3980_v17  ;;  %v11145_v50 = vld [vmem:[#allocation7 + $0x5a0] sm:$0xff] }
 0xf7e   :  { %7334 = vmatprep.subr.mxu0 %v3963_v53  ;;  %7382 = vmatprep.subr.mxu1 %v3995_v56  ;;  %12770 = vst [vmem:[#allocation42_spill] sm:$0xff] %v11145_v50  ;;  %v11151_v17 = vld [vmem:[#allocation7 + $0x420] sm:$0xff]  ;;  %v11155_v56 = vld [vmem:[#allocation7 + $0x498] sm:$0xff] }
 0xf7f   :  { %12771 = vst [vmem:[#allocation25_spill] sm:$0xff] %v11151_v17  ;;  %v11153_v53 = vld [vmem:[#allocation7 + $0x520] sm:$0xff]  ;;  %12773 = vst [vmem:[#allocation28_spill] sm:$0xff] %v11155_v56 }
 0xf80   :  { %12772 = vst [vmem:[#allocation27_spill] sm:$0xff] %v11153_v53 }
 0xf81   :  { %7335 = vmatpush3.xpose.msra.mxu0 %v3947_v2  ;;  %7383 = vmatpush3.xpose.msra.mxu1 %v3979_v32  ;;  %v11157_v2 = vld [vmem:[#allocation7 + $0x598] sm:$0xff] }
 0xf82   :  { %7336 = vmatprep.subr.mxu0 %v3962_v43  ;;  %7384 = vmatprep.subr.mxu1 %v3994_v6  ;;  %12774 = vst [vmem:[#allocation26_spill] sm:$0xff] %v11157_v2  ;;  %v11163_v32 = vld [vmem:[#allocation7 + $0x418] sm:$0xff]  ;;  %v11167_v6 = vld [vmem:[#allocation7 + $0x490] sm:$0xff] }
 0xf83   :  { %12775 = vst [vmem:[#allocation29_spill] sm:$0xff] %v11163_v32  ;;  %v11165_v43 = vld [vmem:[#allocation7 + $0x518] sm:$0xff]  ;;  %12777 = vst [vmem:[#allocation59_spill] sm:$0xff] %v11167_v6 }
 0xf84   :  { %12776 = vst [vmem:[#allocation31_spill] sm:$0xff] %v11165_v43 }
 0xf85   :  { %7337 = vmatpush3.xpose.msra.mxu0 %v3946_v62  ;;  %7385 = vmatpush3.xpose.msra.mxu1 %v3978_v42  ;;  %v11169_v62 = vld [vmem:[#allocation7 + $0x590] sm:$0xff] }
 0xf86   :  { %7402 = vmatprep.subr.mxu0 %v10987_v52  ;;  %7436 = vmatprep.subr.mxu1 %v10989_v25  ;;  %12778 = vst [vmem:[#allocation30_spill] sm:$0xff] %v11169_v62  ;;  %v11175_v42 = vld [vmem:[#allocation7 + $0x410] sm:$0xff] }
 0xf87   :  { %12779 = vst [vmem:[#allocation69_spill] sm:$0xff] %v11175_v42 }
 0xf88   :  { %7339 = vmatmul.mubr.f32.vlgmr.msra.gmra.mxu0 %v12761_v39  ;;  %7387 = vmatmul.mubr.f32.vlgmr.msra.gmra.mxu1 %v12761_v39  ;;  %v12765_v39 = vld [vmem:[#allocation19_spill] sm:$0xff] }
 0xf89   :  { %7340 = vmatprep.mubr.f32.mxu0 %v12764_v41  ;;  %7388 = vmatprep.mubr.f32.mxu1 %v12764_v41 }
 0xf8a   :  { %7403 = vmatpush3.xpose.msra.mxu0 %v10993_v63  ;;  %7437 = vmatpush3.xpose.msra.mxu1 %v10995_v45 }
 0xf8b   :  { %7404 = vmatprep.subr.mxu0 %v11003_v4  ;;  %7438 = vmatprep.subr.mxu1 %v11005_v36 }
 0xf8c   :  { %7341 = vmatmul.mubr.f32.gmra.mxu0 %v12764_v41  ;;  %7389 = vmatmul.mubr.f32.gmra.mxu1 %v12764_v41  ;;  %v11177_v41 = vld [vmem:[#allocation7 + $0x510] sm:$0xff] }
 0xf8d   :  { %7342 = vmatprep.mubr.f32.mxu0 %v12765_v39  ;;  %7390 = vmatprep.mubr.f32.mxu1 %v12765_v39  ;;  %12780 = vst [vmem:[#allocation20_spill] sm:$0xff] %v11177_v41 }
 0xf8e   :  { %7405 = vmatpush3.xpose.msra.mxu0 %v11009_v40  ;;  %7439 = vmatpush3.xpose.msra.mxu1 %v11011_v34 }
 0xf8f   :  { %7406 = vmatprep.subr.mxu0 %v11019_v29  ;;  %7440 = vmatprep.subr.mxu1 %v11021_v8 }
 0xf90   :  { %7343 = vmatmul.mubr.f32.gmra.mxu0 %v12765_v39  ;;  %7391 = vmatmul.mubr.f32.gmra.mxu1 %v12765_v39  ;;  %v11179_v39 = vld [vmem:[#allocation7 + $0x488] sm:$0xff] }
 0xf91   :  { %7344 = vmatprep.mubr.f32.mxu0 %v12766_v54  ;;  %7392 = vmatprep.mubr.f32.mxu1 %v12766_v54  ;;  %12781 = vst [vmem:[#allocation61_spill] sm:$0xff] %v11179_v39 }
 0xf92   :  { %7407 = vmatpush3.xpose.msra.mxu0 %v11025_v30  ;;  %7441 = vmatpush3.xpose.msra.mxu1 %v11027_v35 }
 0xf93   :  { %7408 = vmatprep.subr.mxu0 %v11035_v31  ;;  %7442 = vmatprep.subr.mxu1 %v11037_v27 }
 0xf94   :  { %7345 = vmatmul.mubr.f32.gmra.mxu0 %v12766_v54  ;;  %7393 = vmatmul.mubr.f32.gmra.mxu1 %v12766_v54  ;;  %v11181_v54 = vld [vmem:[#allocation7 + $0x588] sm:$0xff] }
 0xf95   :  { %7346 = vmatprep.mubr.f32.mxu0 %v12767_v9  ;;  %7394 = vmatprep.mubr.f32.mxu1 %v12767_v9  ;;  %12782 = vst [vmem:[#allocation60_spill] sm:$0xff] %v11181_v54 }
 0xf96   :  { %7409 = vmatpush3.xpose.msra.mxu0 %v11041_v46  ;;  %7443 = vmatpush3.xpose.msra.mxu1 %v11043_v55 }
 0xf97   :  { %7410 = vmatprep.subr.mxu0 %v11051_v5  ;;  %7444 = vmatprep.subr.mxu1 %v11053_v10 }
 0xf98   :  { %7347 = vmatmul.mubr.f32.gmra.mxu0 %v12767_v9  ;;  %7395 = vmatmul.mubr.f32.gmra.mxu1 %v12767_v9  ;;  %v11187_v9 = vld [vmem:[#allocation7 + $0x408] sm:$0xff] }
 0xf99   :  { %7348 = vmatprep.mubr.f32.mxu0 %v10899_v3  ;;  %7396 = vmatprep.mubr.f32.mxu1 %v10899_v3  ;;  %12783 = vst [vmem:[#allocation67_spill] sm:$0xff] %v11187_v9 }
 0xf9a   :  { %7411 = vmatpush3.xpose.msra.mxu0 %v11057_v11  ;;  %7445 = vmatpush3.xpose.msra.mxu1 %v11059_v13 }
 0xf9b   :  { %7412 = vmatprep.subr.mxu0 %v11067_v24  ;;  %7446 = vmatprep.subr.mxu1 %v11069_v14 }
 0xf9c   :  { %7349 = vmatmul.mubr.f32.gmra.mxu0 %v10899_v3  ;;  %7397 = vmatmul.mubr.f32.gmra.mxu1 %v10899_v3  ;;  %v11097_v3 = vld [vmem:[#allocation7 + $0x4c0] sm:$0xff] }
 0xf9d   :  { %7350 = vmatprep.mubr.f32.mxu0 %v10979_v61  ;;  %7398 = vmatprep.mubr.f32.mxu1 %v10979_v61 }
 0xf9e   :  { %7413 = vmatpush3.xpose.msra.mxu0 %v11073_v15  ;;  %7447 = vmatpush3.xpose.msra.mxu1 %v11075_v16 }
 0xf9f   :  { %7414 = vmatprep.subr.mxu0 %v11083_v18  ;;  %7448 = vmatprep.subr.mxu1 %v11085_v19 }
 0xfa0   :  { %7351 = vmatmul.mubr.f32.gmra.mxu0 %v10979_v61  ;;  %7399 = vmatmul.mubr.f32.gmra.mxu1 %v10979_v61  ;;  %v11109_v61 = vld [vmem:[#allocation7 + $0x4b8] sm:$0xff] }
 0xfa2   :  { %7415 = vmatpush3.xpose.msra.mxu0 %v11089_v20  ;;  %7449 = vmatpush3.xpose.msra.mxu1 %v11091_v21 }
 0xfa3   :  { %7416 = vmatprep.subr.mxu0 %v11097_v3  ;;  %7450 = vmatprep.subr.mxu1 %v11099_v23 }
 0xfa6   :  { %7417 = vmatpush3.xpose.msra.mxu0 %v11103_v60  ;;  %7451 = vmatpush3.xpose.msra.mxu1 %v11105_v28 }
 0xfa7   :  { %7418 = vmatprep.subr.mxu0 %v11109_v61  ;;  %7452 = vmatprep.subr.mxu1 %v11111_v51 }
 0xfaa   :  { %7419 = vmatpush3.xpose.msra.mxu0 %v11115_v49  ;;  %7453 = vmatpush3.xpose.msra.mxu1 %v11117_v48 }
 0xfab   :  { %7420 = vmatprep.subr.mxu0 %v11121_v1  ;;  %7454 = vmatprep.subr.mxu1 %v11123_v44 }
 0xfae   :  { %7421 = vmatpush3.xpose.msra.mxu0 %v11127_v59  ;;  %7455 = vmatpush3.xpose.msra.mxu1 %v11129_v57 }
 0xfaf   :  { %7422 = vmatprep.subr.mxu0 %v11133_v37  ;;  %7456 = vmatprep.subr.mxu1 %v11135_v33 }
 0xfb2   :  { %7423 = vmatpush3.xpose.msra.mxu0 %v11139_v0  ;;  %7457 = vmatpush3.xpose.msra.mxu1 %v11141_v26 }
 0xfb3   :  { %7424 = vmatprep.subr.mxu0 %v11143_v22  ;;  %7458 = vmatprep.subr.mxu1 %v11145_v50  ;;  %v12792_v50 = vld [vmem:[#allocation66_spill] sm:$0xff] }
 0xfb6   :  { %7425 = vmatpush3.xpose.msra.mxu0 %v11151_v17  ;;  %7459 = vmatpush3.xpose.msra.mxu1 %v11153_v53 }
 0xfb7   :  { %7426 = vmatprep.subr.mxu0 %v11155_v56  ;;  %7460 = vmatprep.subr.mxu1 %v11157_v2 }
 0xfba   :  { %7427 = vmatpush3.xpose.msra.mxu0 %v11163_v32  ;;  %7461 = vmatpush3.xpose.msra.mxu1 %v11165_v43  ;;  %v11195_v43 = vld [vmem:[#allocation7 + $0x580] sm:$0xff] }
 0xfbb   :  { %7428 = vmatprep.subr.mxu0 %v11167_v6  ;;  %7462 = vmatprep.subr.mxu1 %v11169_v62  ;;  %v11189_v6 = vld [vmem:[#allocation7 + $0x508] sm:$0xff]  ;;  %v11193_v62 = vld [vmem:[#allocation7 + $0x480] sm:$0xff]  ;;  %12786 = vst [vmem:[#allocation45_spill] sm:$0xff] %v11195_v43 }
 0xfbc   :  { %12784 = vst [vmem:[#allocation62_spill] sm:$0xff] %v11189_v6  ;;  %12785 = vst [vmem:[#allocation43_spill] sm:$0xff] %v11193_v62 }
 0xfbe   :  { %7429 = vmatpush3.xpose.msra.mxu0 %v11175_v42  ;;  %7463 = vmatpush3.xpose.msra.mxu1 %v11177_v41  ;;  %v11199_v41 = vld [vmem:[#allocation7 + $0x400] sm:$0xff] }
 0xfbf   :  { %7430 = vmatprep.subr.mxu0 %v11179_v39  ;;  %7464 = vmatprep.subr.mxu1 %v11181_v54  ;;  %12787 = vst [vmem:[#allocation46_spill] sm:$0xff] %v11199_v41  ;;  %v11201_v39 = vld [vmem:[#allocation7 + $0x500] sm:$0xff] }
 0xfc0   :  { %12788 = vst [vmem:[#allocation44_spill] sm:$0xff] %v11201_v39 }
 0xfc2   :  { %7431 = vmatpush3.xpose.msra.mxu0 %v11187_v9  ;;  %7465 = vmatpush3.xpose.msra.mxu1 %v11189_v6  ;;  %v12789_v6 = vld [vmem:[#allocation65_spill] sm:$0xff] }
 0xfc3   :  { %7432 = vmatprep.subr.mxu0 %v11193_v62  ;;  %7466 = vmatprep.subr.mxu1 %v11195_v43  ;;  %v2388_v9 = vadd.f32 %v12789_v6, %v12756_v7  ;;  %v12790_v62 = vld [vmem:[#allocation64_spill] sm:$0xff]  ;;  %v2501_v7 = vadd.f32 %v12792_v50, %v10355_v38  ;;  %v12795_v50 = vld [vmem:[#allocation41_spill] sm:$0xff] }
 0xfc4   :  { %v2390_v42 = vadd.f32 %v12790_v62, %v10340_v47 }
 0xfc6   :  { %7433 = vmatpush3.xpose.msra.mxu0 %v11199_v41  ;;  %7467 = vmatpush3.xpose.msra.mxu1 %v11201_v39 }
 0xfc7   :  { %7470 = vmatprep.subr.mxu0 %v10987_v52  ;;  %7504 = vmatprep.subr.mxu1 %v10989_v25  ;;  %v12791_v52 = vld [vmem:[#allocation68_spill] sm:$0xff] }
 0xfc8   :  { %v2503_v17 = vadd.f32 %v12791_v52, %v12637_v12 }
0x1008   :  { %v3832_v54 = vpop.f32.mrf.mxu0  ;;  %v3903_v53 = vpop.f32.mrf.mxu1 }
0x1009   :  { %v3908_v43 = vadd.f32 %v3832_v54, %v2388_v9  ;;  %v3910_v6 = vadd.f32 %v3903_v53, %v2501_v7  ;;  %v12796_v53 = vld [vmem:[#allocation42_spill] sm:$0xff]  ;;  %v12798_v54 = vld [vmem:[#allocation27_spill] sm:$0xff]  ;;  %v12799_v9 = vld [vmem:[#allocation28_spill] sm:$0xff] }
0x100a   :  { %v3834_v32 = vpop.f32.mrf.mxu0  ;;  %v3905_v39 = vpop.f32.mrf.mxu1  ;;  %v12800_v7 = vld [vmem:[#allocation26_spill] sm:$0xff] }
0x100b   :  { %v5997_v2 = vmul.f32 -1.442695, %v3908_v43  ;;  %v3909_v56 = vadd.f32 %v3834_v32, %v2390_v42  ;;  %v3911_v25 = vadd.f32 %v3905_v39, %v2503_v17  ;;  %v12797_v39 = vld [vmem:[#allocation25_spill] sm:$0xff] }
0x100d   :  { %8245 = vpow2.f32 %v5997_v2  ;;  %v5998_v41 = vmul.f32 -1.442695, %v3909_v56  ;;  %v5999_v22 = vmul.f32 -1.442695, %v3911_v25 }
0x100f   :  { %8247 = vpow2.f32 %v5998_v41 }
0x1010   :  { %8249 = vtanh.f32 %v3910_v6  ;;  %v12801_v6 = vld [vmem:[#allocation29_spill] sm:$0xff] }
0x1011   :  { %8251 = vpow2.f32 %v5999_v22  ;;  %v12793_v22 = vmov 0.0  }
0x101a   :  { %v8246_v26 = vpop.eup %8245 }
0x101b   :  { %v3915_v47 = vadd.f32 1.0, %v8246_v26 }
0x101c   :  { %v8248_v62 = vpop.eup %8247 }
0x101d   :  { %8253 = vrcp.f32 %v3915_v47  ;;  %v3921_v2 = vadd.f32 1.0, %v8248_v62  ;;  %v8250_v56 = vpop.eup %8249  ;;  %v12802_v47 = vld [vmem:[#allocation31_spill] sm:$0xff] }
0x101e   :  { %v8252_v32 = vpop.eup %8251  ;;  %v12803_v62 = vld [vmem:[#allocation59_spill] sm:$0xff] }
0x101f   :  { %8255 = vrcp.f32 %v3921_v2  ;;  %v3928_v12 = vadd.f32 1.0, %v8252_v32  ;;  %v12804_v2 = vld [vmem:[#allocation30_spill] sm:$0xff]  ;;  %v12806_v32 = vld [vmem:[#allocation20_spill] sm:$0xff] }
0x1021   :  { %8257 = vrcp.f32 %v3928_v12  ;;  %v12810_v12 = vld [vmem:[#allocation62_spill] sm:$0xff] }
0x102a   :  { %v8254_v43 = vpop.eup %8253 }
0x102b   :  { %v3932_v42 = vmul.f32 %v8254_v43, %v8250_v56  ;;  %v12805_v56 = vld [vmem:[#allocation69_spill] sm:$0xff] }
0x102c   :  { %v8256_v41 = vpop.eup %8255  ;;  %v12807_v43 = vld [vmem:[#allocation61_spill] sm:$0xff] }
0x102d   :  { %v3931_v52 = vmul.f32 %v8256_v41, %v10976_v58  ;;  %v12794_v58 = vld [vmem:[#allocation56_spill] sm:$0xff]  ;;  %v12809_v41 = vld [vmem:[#allocation67_spill] sm:$0xff] }
0x102e   :  { %v8258_v38 = vpop.eup %8257 }
0x102f   :  { %v3933_v17 = vadd.f32 %v3932_v42, %v3931_v52  ;;  %v12808_v42 = vld [vmem:[#allocation60_spill] sm:$0xff]  ;;  %v12811_v52 = vld [vmem:[#allocation43_spill] sm:$0xff] }
0x1031   :  { %8259 = vtanh.f32 %v3933_v17  ;;  %v12812_v17 = vld [vmem:[#allocation45_spill] sm:$0xff] }
0x103e   :  { %v8260_v25 = vpop.eup %8259 }
0x103f   :  { %v3935_v26 = vmul.f32 %v8260_v25, %v8258_v38  ;;  %v12813_v38 = vld [vmem:[#allocation46_spill] sm:$0xff]  ;;  %v12814_v25 = vld [vmem:[#allocation44_spill] sm:$0xff] }
0x1041   :  { %7352 = vmatprep.mubr.f32.mxu0 %v3935_v26  ;;  %7400 = vmatprep.mubr.f32.mxu1 %v3935_v26 }
0x1042   :  { %7353 = vmatmul.mubr.f32.gmra.mxu0 %v3935_v26  ;;  %7401 = vmatmul.mubr.f32.gmra.mxu1 %v3935_v26  ;;  %v12815_v26 = vld [vmem:[#allocation24_spill] sm:$0xff] }
0x1043   :  { %7434 = vmatprep.mubr.f32.mxu0 %v12793_v22  ;;  %7468 = vmatprep.mubr.f32.mxu1 %v12793_v22 }
0x1046   :  { %7435 = vmatmul.mubr.f32.vlgmr.msra.gmra.mxu0 %v12793_v22  ;;  %7469 = vmatmul.mubr.f32.vlgmr.msra.gmra.mxu1 %v12793_v22  ;;  %v12816_v22 = vld [vmem:[#allocation22_spill] sm:$0xff] }
0x1047   :  { %7471 = vmatpush3.xpose.msra.mxu0 %v10993_v63  ;;  %7505 = vmatpush3.xpose.msra.mxu1 %v10995_v45 }
0x1048   :  { %7472 = vmatprep.subr.mxu0 %v11003_v4  ;;  %7506 = vmatprep.subr.mxu1 %v11005_v36 }
0x104b   :  { %7473 = vmatpush3.xpose.msra.mxu0 %v11009_v40  ;;  %7507 = vmatpush3.xpose.msra.mxu1 %v11011_v34 }
0x104c   :  { %7474 = vmatprep.subr.mxu0 %v11019_v29  ;;  %7508 = vmatprep.subr.mxu1 %v11021_v8 }
0x104f   :  { %7475 = vmatpush3.xpose.msra.mxu0 %v11025_v30  ;;  %7509 = vmatpush3.xpose.msra.mxu1 %v11027_v35 }
0x1050   :  { %7476 = vmatprep.subr.mxu0 %v11035_v31  ;;  %7510 = vmatprep.subr.mxu1 %v11037_v27 }
0x1053   :  { %7477 = vmatpush3.xpose.msra.mxu0 %v11041_v46  ;;  %7511 = vmatpush3.xpose.msra.mxu1 %v11043_v55 }
0x1054   :  { %7478 = vmatprep.subr.mxu0 %v11051_v5  ;;  %7512 = vmatprep.subr.mxu1 %v11053_v10 }
0x1057   :  { %7479 = vmatpush3.xpose.msra.mxu0 %v11057_v11  ;;  %7513 = vmatpush3.xpose.msra.mxu1 %v11059_v13 }
0x1058   :  { %7480 = vmatprep.subr.mxu0 %v11067_v24  ;;  %7514 = vmatprep.subr.mxu1 %v11069_v14 }
0x105b   :  { %7481 = vmatpush3.xpose.msra.mxu0 %v11073_v15  ;;  %7515 = vmatpush3.xpose.msra.mxu1 %v11075_v16 }
0x105c   :  { %7482 = vmatprep.subr.mxu0 %v11083_v18  ;;  %7516 = vmatprep.subr.mxu1 %v11085_v19 }
0x105f   :  { %7483 = vmatpush3.xpose.msra.mxu0 %v11089_v20  ;;  %7517 = vmatpush3.xpose.msra.mxu1 %v11091_v21 }
0x1060   :  { %7484 = vmatprep.subr.mxu0 %v11097_v3  ;;  %7518 = vmatprep.subr.mxu1 %v11099_v23 }
0x1063   :  { %7485 = vmatpush3.xpose.msra.mxu0 %v11103_v60  ;;  %7519 = vmatpush3.xpose.msra.mxu1 %v11105_v28 }
0x1064   :  { %7486 = vmatprep.subr.mxu0 %v11109_v61  ;;  %7520 = vmatprep.subr.mxu1 %v11111_v51 }
0x1067   :  { %7487 = vmatpush3.xpose.msra.mxu0 %v11115_v49  ;;  %7521 = vmatpush3.xpose.msra.mxu1 %v11117_v48 }
0x1068   :  { %7488 = vmatprep.subr.mxu0 %v11121_v1  ;;  %7522 = vmatprep.subr.mxu1 %v11123_v44 }
0x106b   :  { %7489 = vmatpush3.xpose.msra.mxu0 %v11127_v59  ;;  %7523 = vmatpush3.xpose.msra.mxu1 %v11129_v57 }
0x106c   :  { %7490 = vmatprep.subr.mxu0 %v11133_v37  ;;  %7524 = vmatprep.subr.mxu1 %v11135_v33 }
0x106f   :  { %7491 = vmatpush3.xpose.msra.mxu0 %v11139_v0  ;;  %7525 = vmatpush3.xpose.msra.mxu1 %v12794_v58 }
0x1070   :  { %7492 = vmatprep.subr.mxu0 %v12795_v50  ;;  %7526 = vmatprep.subr.mxu1 %v12796_v53 }
0x1073   :  { %7493 = vmatpush3.xpose.msra.mxu0 %v12797_v39  ;;  %7527 = vmatpush3.xpose.msra.mxu1 %v12798_v54 }
0x1074   :  { %7494 = vmatprep.subr.mxu0 %v12799_v9  ;;  %7528 = vmatprep.subr.mxu1 %v12800_v7 }
0x1077   :  { %7495 = vmatpush3.xpose.msra.mxu0 %v12801_v6  ;;  %7529 = vmatpush3.xpose.msra.mxu1 %v12802_v47 }
0x1078   :  { %7496 = vmatprep.subr.mxu0 %v12803_v62  ;;  %7530 = vmatprep.subr.mxu1 %v12804_v2 }
0x107b   :  { %7497 = vmatpush3.xpose.msra.mxu0 %v12805_v56  ;;  %7531 = vmatpush3.xpose.msra.mxu1 %v12806_v32  ;;  %v4164_v32 = vpop.f32.mrf.mxu0 }
0x107c   :  { %7498 = vmatprep.subr.mxu0 %v12807_v43  ;;  %7532 = vmatprep.subr.mxu1 %v12808_v42  ;;  %v4277_v43 = vpop.f32.mrf.mxu1 }
0x107d   :  { %v4166_v56 = vpop.f32.mrf.mxu0 }
0x107e   :  { %v4279_v42 = vpop.f32.mrf.mxu1 }
0x107f   :  { %7499 = vmatpush3.xpose.msra.mxu0 %v12809_v41  ;;  %7533 = vmatpush3.xpose.msra.mxu1 %v12810_v12  ;;  %v11284_v2 = vpop.f32.mrf.mxu0 }
0x1080   :  { %7500 = vmatprep.subr.mxu0 %v12811_v52  ;;  %7534 = vmatprep.subr.mxu1 %v12812_v17  ;;  %12817 = vst [vmem:[#allocation47_spill] sm:$0xff] %v11284_v2  ;;  %v11286_v41 = vpop.f32.mrf.mxu1 }
0x1081   :  { %12818 = vst [vmem:[#allocation49_spill] sm:$0xff] %v11286_v41  ;;  %v11288_v12 = vpop.f32.mrf.mxu0 }
0x1082   :  { %12819 = vst [vmem:[#allocation50_spill] sm:$0xff] %v11288_v12  ;;  %v11290_v52 = vpop.f32.mrf.mxu1 }
0x1083   :  { %7501 = vmatpush3.xpose.msra.mxu0 %v12813_v38  ;;  %7535 = vmatpush3.xpose.msra.mxu1 %v12814_v25  ;;  %12820 = vst [vmem:[#allocation48_spill] sm:$0xff] %v11290_v52  ;;  %v11292_v17 = vpop.f32.mrf.mxu0 }
0x1084   :  { %7538 = vmatprep.subr.mxu0 %v12815_v26  ;;  %7572 = vmatprep.subr.mxu1 %v12816_v22  ;;  %12821 = vst [vmem:[#allocation14_spill] sm:$0xff] %v11292_v17  ;;  %v11294_v38 = vpop.f32.mrf.mxu1 }
0x1085   :  { %12822 = vst [vmem:[#allocation51_spill] sm:$0xff] %v11294_v38  ;;  %v11296_v25 = vpop.f32.mrf.mxu0 }
0x1086   :  { %12823 = vst [vmem:[#allocation53_spill] sm:$0xff] %v11296_v25  ;;  %v11298_v26 = vpop.f32.mrf.mxu1 }
0x1087   :  { %12824 = vst [vmem:[#allocation54_spill] sm:$0xff] %v11298_v26  ;;  %v11300_v22 = vpop.f32.mrf.mxu0 }
0x1088   :  { %12825 = vst [vmem:[#allocation52_spill] sm:$0xff] %v11300_v22  ;;  %v11302_v62 = vpop.f32.mrf.mxu1 }
0x1089   :  { %12826 = vst [vmem:[#allocation16_spill] sm:$0xff] %v11302_v62  ;;  %v11304_v47 = vpop.f32.mrf.mxu0 }
0x108a   :  { %12827 = vst [vmem:[#allocation17_spill] sm:$0xff] %v11304_v47  ;;  %v11306_v2 = vpop.f32.mrf.mxu1 }
0x108b   :  { %12828 = vst [vmem:[#allocation55_spill] sm:$0xff] %v11306_v2  ;;  %v11308_v41 = vpop.f32.mrf.mxu0 }
0x108c   :  { %12829 = vst [vmem:[#allocation57_spill] sm:$0xff] %v11308_v41  ;;  %v11310_v12 = vpop.f32.mrf.mxu1 }
0x108d   :  { %12830 = vst [vmem:[#allocation58_spill] sm:$0xff] %v11310_v12  ;;  %v11312_v52 = vpop.f32.mrf.mxu0  ;;  %v6000_v12 = vld [vmem:[%s12028_s4 + $0x8] sm:$0xf] }
0x108e   :  { %12831 = vst [vmem:[#allocation33_spill] sm:$0xff] %v11312_v52  ;;  %v11314_v17 = vpop.f32.mrf.mxu1  ;;  %v12840_v52 = vld [vmem:[#allocation35_spill] sm:$0xff] }
0x108f   :  { %12832 = vst [vmem:[#allocation34_spill] sm:$0xff] %v11314_v17  ;;  %v11316_v38 = vpop.f32.mrf.mxu0  ;;  %v11334_v17 = vrot.slane %v6000_v12, %v12840_v52 }
0x1090   :  { %12833 = vst [vmem:[#allocation21_spill] sm:$0xff] %v11316_v38  ;;  %v11318_v25 = vpop.f32.mrf.mxu1 }
0x1091   :  { %12834 = vst [vmem:[#allocation32_spill] sm:$0xff] %v11318_v25  ;;  %v11320_v26 = vpop.f32.mrf.mxu0  ;;  %12841 = vst [vmem:[#allocation40_spill] sm:$0xff] %v11334_v17 }
0x1092   :  { %12835 = vst [vmem:[#allocation15_spill] sm:$0xff] %v11320_v26  ;;  %v11322_v22 = vpop.f32.mrf.mxu1  ;;  %v12844_v26 = vld [vmem:[#allocation37_spill] sm:$0xff] }
0x1093   :  { %12836 = vst [vmem:[#allocation39_spill] sm:$0xff] %v11322_v22  ;;  %v11324_v62 = vpop.f32.mrf.mxu0  ;;  %v11341_v2 = vrot.slane %v6000_v12, %v12844_v26  ;;  %v12848_v26 = vld [vmem:[#allocation38_spill] sm:$0xff] }
0x1094   :  { %12837 = vst [vmem:[#allocation63_spill] sm:$0xff] %v11324_v62  ;;  %v11326_v47 = vpop.f32.mrf.mxu1  ;;  %v11352_v53 = vrot.slane %v6000_v12, %v12848_v26 }
0x1095   :  { %12838 = vst [vmem:[#allocation13_spill] sm:$0xff] %v11326_v47  ;;  %v11331_v41 = vpop.f32.mrf.mxu0  ;;  %v4165_v47 = vadd.f32 %v4164_v32, %v11334_v17  ;;  %v4167_v7 = vadd.f32 %v4166_v56, %v11341_v2  ;;  %v12850_v32 = vld [vmem:[#allocation36_spill] sm:$0xff] }
0x1096   :  { %12839 = vst [vmem:[#allocation70_spill] sm:$0xff] %v11331_v41  ;;  %v11336_v38 = vpop.f32.mrf.mxu1  ;;  %12849 = vst [vmem:[#allocation68_spill] sm:$0xff] %v11352_v53  ;;  %v11356_v17 = vrot.slane %v6000_v12, %v12850_v32 }
0x1097   :  { %12842 = vst [vmem:[#allocation19_spill] sm:$0xff] %v11336_v38 }
0x1102   :  { %v11338_v25 = vpop.f32.mrf.mxu0  ;;  %v11343_v22 = vpop.f32.mrf.mxu1 }
0x1103   :  { %12843 = vst [vmem:[#allocation18_spill] sm:$0xff] %v11338_v25  ;;  %12845 = vst [vmem:[#allocation23_spill] sm:$0xff] %v11343_v22 }
0x1104   :  { %v11345_v62 = vpop.f32.mrf.mxu0  ;;  %v11349_v41 = vpop.f32.mrf.mxu1 }
0x1105   :  { %12846 = vst [vmem:[#allocation65_spill] sm:$0xff] %v11345_v62  ;;  %12847 = vst [vmem:[#allocation64_spill] sm:$0xff] %v11349_v41  ;;  %v4280_v62 = vadd.f32 %v4279_v42, %v11352_v53  ;;  %v4278_v41 = vadd.f32 %v4277_v43, %v11356_v17 }
0x1106   :  { %v4426_v6 = vpop.f32.mrf.mxu0  ;;  %v4497_v25 = vpop.f32.mrf.mxu1 }
0x1107   :  { %v4502_v52 = vadd.f32 %v4426_v6, %v4165_v47 }
0x1108   :  { %v4428_v9 = vpop.f32.mrf.mxu0  ;;  %v4499_v22 = vpop.f32.mrf.mxu1 }
0x1109   :  { %v6001_v54 = vmul.f32 -1.442695, %v4502_v52  ;;  %v4503_v38 = vadd.f32 %v4428_v9, %v4167_v7  ;;  %v4505_v56 = vadd.f32 %v4499_v22, %v4280_v62  ;;  %v4504_v52 = vadd.f32 %v4497_v25, %v4278_v41  ;;  %v12852_v25 = vld [vmem:[#allocation25_spill] sm:$0xff] }
0x110b   :  { %8261 = vpow2.f32 %v6001_v54  ;;  %v6002_v39 = vmul.f32 -1.442695, %v4503_v38  ;;  %v6003_v6 = vmul.f32 -1.442695, %v4505_v56  ;;  %v12853_v56 = vld [vmem:[#allocation27_spill] sm:$0xff] }
0x110d   :  { %8263 = vpow2.f32 %v6002_v39 }
0x110e   :  { %8265 = vpow2.f32 %v6003_v6  ;;  %v12854_v6 = vld [vmem:[#allocation28_spill] sm:$0xff] }
0x1118   :  { %v8262_v47 = vpop.eup %8261 }
0x1119   :  { %v4509_v9 = vadd.f32 1.0, %v8262_v47  ;;  %v12855_v47 = vld [vmem:[#allocation26_spill] sm:$0xff] }
0x111a   :  { %v8264_v54 = vpop.eup %8263 }
0x111b   :  { %8267 = vrcp.f32 %v4509_v9  ;;  %v4515_v7 = vadd.f32 1.0, %v8264_v54  ;;  %v8266_v39 = vpop.eup %8265  ;;  %v12857_v9 = vld [vmem:[#allocation31_spill] sm:$0xff] }
0x111c   :  { %8269 = vtanh.f32 %v4504_v52  ;;  %v4522_v53 = vadd.f32 1.0, %v8266_v39  ;;  %v12856_v52 = vld [vmem:[#allocation29_spill] sm:$0xff]  ;;  %v12858_v54 = vld [vmem:[#allocation59_spill] sm:$0xff] }
0x111d   :  { %8271 = vrcp.f32 %v4515_v7  ;;  %v12859_v7 = vld [vmem:[#allocation30_spill] sm:$0xff]  ;;  %v12860_v39 = vld [vmem:[#allocation69_spill] sm:$0xff] }
0x111e   :  { %8273 = vrcp.f32 %v4522_v53  ;;  %v12851_v53 = vld [vmem:[#allocation42_spill] sm:$0xff] }
0x1128   :  { %v8268_v38 = vpop.eup %8267 }
0x1129   :  { %v8270_v26 = vpop.eup %8269 }
0x112a   :  { %v8272_v42 = vpop.eup %8271  ;;  %v4526_v32 = vmul.f32 %v8270_v26, %v8268_v38  ;;  %v12861_v38 = vld [vmem:[#allocation20_spill] sm:$0xff]  ;;  %v12862_v26 = vld [vmem:[#allocation61_spill] sm:$0xff] }
0x112b   :  { %v4525_v12 = vmul.f32 0.0, %v8272_v42  ;;  %v8274_v62 = vpop.eup %8273  ;;  %v12863_v42 = vld [vmem:[#allocation60_spill] sm:$0xff] }
0x112d   :  { %v11359_v22 = vadd.f32 %v4526_v32, %v4525_v12  ;;  %v12864_v12 = vld [vmem:[#allocation67_spill] sm:$0xff]  ;;  %v12865_v32 = vld [vmem:[#allocation62_spill] sm:$0xff] }
0x112f   :  { %8275 = vtanh.f32 %v11359_v22 }
0x113c   :  { %v8276_v43 = vpop.eup %8275 }
0x113d   :  { %v4529_v41 = vmul.f32 %v8276_v43, %v8274_v62  ;;  %v12866_v62 = vld [vmem:[#allocation43_spill] sm:$0xff]  ;;  %v12867_v43 = vld [vmem:[#allocation45_spill] sm:$0xff] }
0x113f   :  { %7502 = vmatprep.mubr.f32.mxu0 %v4529_v41  ;;  %7536 = vmatprep.mubr.f32.mxu1 %v4529_v41 }
0x1140   :  { %7503 = vmatmul.mubr.f32.vlgmr.msra.gmra.mxu0 %v4529_v41  ;;  %7537 = vmatmul.mubr.f32.vlgmr.msra.gmra.mxu1 %v4529_v41  ;;  %v12868_v41 = vld [vmem:[#allocation46_spill] sm:$0xff] }
0x1141   :  { %7539 = vmatpush3.xpose.msra.mxu0 %v10993_v63  ;;  %7573 = vmatpush3.xpose.msra.mxu1 %v10995_v45 }
0x1142   :  { %7540 = vmatprep.subr.mxu0 %v11003_v4  ;;  %7574 = vmatprep.subr.mxu1 %v11005_v36 }
0x1145   :  { %7541 = vmatpush3.xpose.msra.mxu0 %v11009_v40  ;;  %7575 = vmatpush3.xpose.msra.mxu1 %v11011_v34 }
0x1146   :  { %7542 = vmatprep.subr.mxu0 %v11019_v29  ;;  %7576 = vmatprep.subr.mxu1 %v11021_v8 }
0x1149   :  { %7543 = vmatpush3.xpose.msra.mxu0 %v11025_v30  ;;  %7577 = vmatpush3.xpose.msra.mxu1 %v11027_v35 }
0x114a   :  { %7544 = vmatprep.subr.mxu0 %v11035_v31  ;;  %7578 = vmatprep.subr.mxu1 %v11037_v27 }
0x114d   :  { %7545 = vmatpush3.xpose.msra.mxu0 %v11041_v46  ;;  %7579 = vmatpush3.xpose.msra.mxu1 %v11043_v55 }
0x114e   :  { %7546 = vmatprep.subr.mxu0 %v11051_v5  ;;  %7580 = vmatprep.subr.mxu1 %v11053_v10 }
0x1151   :  { %7547 = vmatpush3.xpose.msra.mxu0 %v11057_v11  ;;  %7581 = vmatpush3.xpose.msra.mxu1 %v11059_v13 }
0x1152   :  { %7548 = vmatprep.subr.mxu0 %v11067_v24  ;;  %7582 = vmatprep.subr.mxu1 %v11069_v14 }
0x1155   :  { %7549 = vmatpush3.xpose.msra.mxu0 %v11073_v15  ;;  %7583 = vmatpush3.xpose.msra.mxu1 %v11075_v16 }
0x1156   :  { %7550 = vmatprep.subr.mxu0 %v11083_v18  ;;  %7584 = vmatprep.subr.mxu1 %v11085_v19 }
0x1159   :  { %7551 = vmatpush3.xpose.msra.mxu0 %v11089_v20  ;;  %7585 = vmatpush3.xpose.msra.mxu1 %v11091_v21 }
0x115a   :  { %7552 = vmatprep.subr.mxu0 %v11097_v3  ;;  %7586 = vmatprep.subr.mxu1 %v11099_v23 }
0x115d   :  { %7553 = vmatpush3.xpose.msra.mxu0 %v11103_v60  ;;  %7587 = vmatpush3.xpose.msra.mxu1 %v11105_v28 }
0x115e   :  { %7554 = vmatprep.subr.mxu0 %v11109_v61  ;;  %7588 = vmatprep.subr.mxu1 %v11111_v51 }
0x1161   :  { %7555 = vmatpush3.xpose.msra.mxu0 %v11115_v49  ;;  %7589 = vmatpush3.xpose.msra.mxu1 %v11117_v48 }
0x1162   :  { %7556 = vmatprep.subr.mxu0 %v11121_v1  ;;  %7590 = vmatprep.subr.mxu1 %v11123_v44 }
0x1165   :  { %7557 = vmatpush3.xpose.msra.mxu0 %v11127_v59  ;;  %7591 = vmatpush3.xpose.msra.mxu1 %v11129_v57 }
0x1166   :  { %7558 = vmatprep.subr.mxu0 %v11133_v37  ;;  %7592 = vmatprep.subr.mxu1 %v11135_v33 }
0x1169   :  { %7559 = vmatpush3.xpose.msra.mxu0 %v11139_v0  ;;  %7593 = vmatpush3.xpose.msra.mxu1 %v12794_v58 }
0x116a   :  { %7560 = vmatprep.subr.mxu0 %v12795_v50  ;;  %7594 = vmatprep.subr.mxu1 %v12851_v53  ;;  %v12877_v53 = vld [vmem:[#allocation49_spill] sm:$0xff] }
0x116d   :  { %7561 = vmatpush3.xpose.msra.mxu0 %v12852_v25  ;;  %7595 = vmatpush3.xpose.msra.mxu1 %v12853_v56  ;;  %v12875_v56 = vld [vmem:[#allocation68_spill] sm:$0xff] }
0x116e   :  { %7562 = vmatprep.subr.mxu0 %v12854_v6  ;;  %7596 = vmatprep.subr.mxu1 %v12855_v47 }
0x1171   :  { %7563 = vmatpush3.xpose.msra.mxu0 %v12856_v52  ;;  %7597 = vmatpush3.xpose.msra.mxu1 %v12857_v9 }
0x1172   :  { %7564 = vmatprep.subr.mxu0 %v12858_v54  ;;  %7598 = vmatprep.subr.mxu1 %v12859_v7  ;;  %v12869_v54 = vld [vmem:[#allocation44_spill] sm:$0xff] }
0x1173   :  { %v12870_v7 = vld [vmem:[#allocation24_spill] sm:$0xff] }
0x1175   :  { %7565 = vmatpush3.xpose.msra.mxu0 %v12860_v39  ;;  %7599 = vmatpush3.xpose.msra.mxu1 %v12861_v38  ;;  %v12871_v39 = vld [vmem:[#allocation22_spill] sm:$0xff]  ;;  %v12872_v38 = vld [vmem:[#allocation40_spill] sm:$0xff] }
0x1176   :  { %7566 = vmatprep.subr.mxu0 %v12862_v26  ;;  %7600 = vmatprep.subr.mxu1 %v12863_v42  ;;  %v12873_v26 = vld [vmem:[#allocation47_spill] sm:$0xff] }
0x1177   :  { %v4171_v9 = vadd.f32 %v12873_v26, %v12872_v38  ;;  %v4284_v26 = vadd.f32 %v12877_v53, %v11356_v17 }
0x1179   :  { %7567 = vmatpush3.xpose.msra.mxu0 %v12864_v12  ;;  %7601 = vmatpush3.xpose.msra.mxu1 %v12865_v32  ;;  %v12874_v12 = vld [vmem:[#allocation50_spill] sm:$0xff] }
0x117a   :  { %7568 = vmatprep.subr.mxu0 %v12866_v62  ;;  %7602 = vmatprep.subr.mxu1 %v12867_v43  ;;  %v4173_v52 = vadd.f32 %v12874_v12, %v11341_v2 }
0x117d   :  { %7569 = vmatpush3.xpose.msra.mxu0 %v12868_v41  ;;  %7603 = vmatpush3.xpose.msra.mxu1 %v12869_v54 }
0x117e   :  { %7606 = vmatprep.subr.mxu0 %v12870_v7  ;;  %7640 = vmatprep.subr.mxu1 %v12871_v39  ;;  %v12876_v7 = vld [vmem:[#allocation48_spill] sm:$0xff] }
0x117f   :  { %v4286_v25 = vadd.f32 %v12876_v7, %v12875_v56 }
0x1200   :  { %v4600_v42 = vpop.f32.mrf.mxu0  ;;  %v4671_v43 = vpop.f32.mrf.mxu1 }
0x1201   :  { %v4676_v32 = vadd.f32 %v4600_v42, %v4171_v9  ;;  %v4678_v38 = vadd.f32 %v4671_v43, %v4284_v26  ;;  %v12902_v43 = vld [vmem:[#allocation14_spill] sm:$0xff]  ;;  %v12903_v26 = vld [vmem:[#allocation53_spill] sm:$0xff] }
0x1202   :  { %v4602_v47 = vpop.f32.mrf.mxu0  ;;  %v4673_v54 = vpop.f32.mrf.mxu1 }
0x1203   :  { %v6004_v62 = vmul.f32 -1.442695, %v4676_v32  ;;  %v4677_v6 = vadd.f32 %v4602_v47, %v4173_v52  ;;  %v4679_v39 = vadd.f32 %v4673_v54, %v4286_v25 }
0x1205   :  { %8277 = vpow2.f32 %v6004_v62  ;;  %v6005_v41 = vmul.f32 -1.442695, %v4677_v6  ;;  %v6006_v50 = vmul.f32 -1.442695, %v4679_v39 }
0x1207   :  { %8279 = vpow2.f32 %v6005_v41 }
0x1208   :  { %8281 = vtanh.f32 %v4678_v38 }
0x1209   :  { %8283 = vpow2.f32 %v6006_v50  ;;  %v11503_v50 = vld [vmem:[#allocation7 + $0x5f8] sm:$0xff] }
0x120a   :  { %12900 = vst [vmem:[#allocation35_spill] sm:$0xff] %v11503_v50 }
0x1212   :  { %v8278_v58 = vpop.eup %8277 }
0x1213   :  { %v4683_v12 = vadd.f32 1.0, %v8278_v58 }
0x1214   :  { %v8280_v9 = vpop.eup %8279 }
0x1215   :  { %8285 = vrcp.f32 %v4683_v12  ;;  %v4689_v47 = vadd.f32 1.0, %v8280_v9  ;;  %v8282_v6 = vpop.eup %8281  ;;  %v4179_v12 = vadd.f32 %v12903_v26, %v11341_v2 }
0x1216   :  { %v8284_v52 = vpop.eup %8283 }
0x1217   :  { %8287 = vrcp.f32 %v4689_v47  ;;  %v4696_v41 = vadd.f32 1.0, %v8284_v52 }
0x1219   :  { %8289 = vrcp.f32 %v4696_v41  ;;  %v12904_v41 = vld [vmem:[#allocation54_spill] sm:$0xff] }
0x1222   :  { %v8286_v42 = vpop.eup %8285 }
0x1223   :  { %v4700_v32 = vmul.f32 %v8286_v42, %v8282_v6 }
0x1224   :  { %v8288_v62 = vpop.eup %8287 }
0x1225   :  { %v4699_v25 = vmul.f32 %v8288_v62, %v11359_v22  ;;  %v12901_v22 = vld [vmem:[#allocation40_spill] sm:$0xff] }
0x1226   :  { %v8290_v58 = vpop.eup %8289  ;;  %v4177_v7 = vadd.f32 %v12902_v43, %v12901_v22 }
0x1227   :  { %v11435_v54 = vadd.f32 %v4700_v32, %v4699_v25  ;;  %v4292_v25 = vadd.f32 %v12904_v41, %v12875_v56 }
0x1229   :  { %8291 = vtanh.f32 %v11435_v54 }
0x1236   :  { %v8292_v53 = vpop.eup %8291 }
0x1237   :  { %v4703_v38 = vmul.f32 %v8292_v53, %v8290_v58  ;;  %v12905_v53 = vld [vmem:[#allocation51_spill] sm:$0xff] }
0x1239   :  { %7570 = vmatprep.mubr.f32.mxu0 %v4703_v38  ;;  %7604 = vmatprep.mubr.f32.mxu1 %v4703_v38 }
0x123a   :  { %7571 = vmatmul.mubr.f32.vlgmr.msra.gmra.mxu0 %v4703_v38  ;;  %7605 = vmatmul.mubr.f32.vlgmr.msra.gmra.mxu1 %v4703_v38  ;;  %v4290_v38 = vadd.f32 %v12905_v53, %v11356_v17  ;;  %v11527_v53 = vld [vmem:[#allocation7 + $0x5f0] sm:$0xff] }
0x123b   :  { %7607 = vmatpush3.xpose.msra.mxu0 %v10993_v63  ;;  %7641 = vmatpush3.xpose.msra.mxu1 %v10995_v45  ;;  %v12878_v63 = vld [vmem:[#allocation56_spill] sm:$0xff]  ;;  %v12879_v45 = vld [vmem:[#allocation41_spill] sm:$0xff] }
0x123c   :  { %7608 = vmatprep.subr.mxu0 %v11003_v4  ;;  %7642 = vmatprep.subr.mxu1 %v11005_v36  ;;  %v12880_v4 = vld [vmem:[#allocation42_spill] sm:$0xff]  ;;  %v12881_v36 = vld [vmem:[#allocation25_spill] sm:$0xff] }
0x123f   :  { %7609 = vmatpush3.xpose.msra.mxu0 %v11009_v40  ;;  %7643 = vmatpush3.xpose.msra.mxu1 %v11011_v34  ;;  %v12882_v40 = vld [vmem:[#allocation27_spill] sm:$0xff]  ;;  %v12883_v34 = vld [vmem:[#allocation28_spill] sm:$0xff] }
0x1240   :  { %7610 = vmatprep.subr.mxu0 %v11019_v29  ;;  %7644 = vmatprep.subr.mxu1 %v11021_v8  ;;  %v12884_v29 = vld [vmem:[#allocation26_spill] sm:$0xff]  ;;  %v12885_v8 = vld [vmem:[#allocation29_spill] sm:$0xff] }
0x1243   :  { %7611 = vmatpush3.xpose.msra.mxu0 %v11025_v30  ;;  %7645 = vmatpush3.xpose.msra.mxu1 %v11027_v35  ;;  %v12886_v30 = vld [vmem:[#allocation31_spill] sm:$0xff] }
0x1244   :  { %7612 = vmatprep.subr.mxu0 %v11035_v31  ;;  %7646 = vmatprep.subr.mxu1 %v11037_v27  ;;  %v12887_v35 = vld [vmem:[#allocation59_spill] sm:$0xff]  ;;  %v12888_v31 = vld [vmem:[#allocation30_spill] sm:$0xff]  ;;  %v12889_v27 = vld [vmem:[#allocation69_spill] sm:$0xff] }
0x1247   :  { %7613 = vmatpush3.xpose.msra.mxu0 %v11041_v46  ;;  %7647 = vmatpush3.xpose.msra.mxu1 %v11043_v55  ;;  %v12890_v46 = vld [vmem:[#allocation20_spill] sm:$0xff]  ;;  %v12891_v55 = vld [vmem:[#allocation61_spill] sm:$0xff] }
0x1248   :  { %7614 = vmatprep.subr.mxu0 %v11051_v5  ;;  %7648 = vmatprep.subr.mxu1 %v11053_v10  ;;  %v12892_v5 = vld [vmem:[#allocation60_spill] sm:$0xff]  ;;  %v12893_v10 = vld [vmem:[#allocation67_spill] sm:$0xff] }
0x124b   :  { %7615 = vmatpush3.xpose.msra.mxu0 %v11057_v11  ;;  %7649 = vmatpush3.xpose.msra.mxu1 %v11059_v13  ;;  %v12894_v11 = vld [vmem:[#allocation62_spill] sm:$0xff]  ;;  %v12895_v13 = vld [vmem:[#allocation43_spill] sm:$0xff] }
0x124c   :  { %7616 = vmatprep.subr.mxu0 %v11067_v24  ;;  %7650 = vmatprep.subr.mxu1 %v11069_v14  ;;  %v12896_v24 = vld [vmem:[#allocation45_spill] sm:$0xff]  ;;  %v12897_v14 = vld [vmem:[#allocation46_spill] sm:$0xff] }
0x124f   :  { %7617 = vmatpush3.xpose.msra.mxu0 %v11073_v15  ;;  %7651 = vmatpush3.xpose.msra.mxu1 %v11075_v16  ;;  %v12898_v15 = vld [vmem:[#allocation44_spill] sm:$0xff]  ;;  %v11500_v16 = vld [vmem:[#allocation7 + $0x4f8] sm:$0xff] }
0x1250   :  { %7618 = vmatprep.subr.mxu0 %v11083_v18  ;;  %7652 = vmatprep.subr.mxu1 %v11085_v19  ;;  %12899 = vst [vmem:[#allocation66_spill] sm:$0xff] %v11500_v16 }
0x1253   :  { %7619 = vmatpush3.xpose.msra.mxu0 %v11089_v20  ;;  %7653 = vmatpush3.xpose.msra.mxu1 %v11091_v21 }
0x1254   :  { %7620 = vmatprep.subr.mxu0 %v11097_v3  ;;  %7654 = vmatprep.subr.mxu1 %v11099_v23 }
0x1257   :  { %7621 = vmatpush3.xpose.msra.mxu0 %v11103_v60  ;;  %7655 = vmatpush3.xpose.msra.mxu1 %v11105_v28 }
0x1258   :  { %7622 = vmatprep.subr.mxu0 %v11109_v61  ;;  %7656 = vmatprep.subr.mxu1 %v11111_v51 }
0x125b   :  { %7623 = vmatpush3.xpose.msra.mxu0 %v11115_v49  ;;  %7657 = vmatpush3.xpose.msra.mxu1 %v11117_v48 }
0x125c   :  { %7624 = vmatprep.subr.mxu0 %v11121_v1  ;;  %7658 = vmatprep.subr.mxu1 %v11123_v44 }
0x125f   :  { %7625 = vmatpush3.xpose.msra.mxu0 %v11127_v59  ;;  %7659 = vmatpush3.xpose.msra.mxu1 %v11129_v57 }
0x1260   :  { %7626 = vmatprep.subr.mxu0 %v11133_v37  ;;  %7660 = vmatprep.subr.mxu1 %v11135_v33 }
0x1263   :  { %7627 = vmatpush3.xpose.msra.mxu0 %v11139_v0  ;;  %7661 = vmatpush3.xpose.msra.mxu1 %v12878_v63 }
0x1264   :  { %7628 = vmatprep.subr.mxu0 %v12879_v45  ;;  %7662 = vmatprep.subr.mxu1 %v12880_v4 }
0x1267   :  { %7629 = vmatpush3.xpose.msra.mxu0 %v12881_v36  ;;  %7663 = vmatpush3.xpose.msra.mxu1 %v12882_v40 }
0x1268   :  { %7630 = vmatprep.subr.mxu0 %v12883_v34  ;;  %7664 = vmatprep.subr.mxu1 %v12884_v29 }
0x126b   :  { %7631 = vmatpush3.xpose.msra.mxu0 %v12885_v8  ;;  %7665 = vmatpush3.xpose.msra.mxu1 %v12886_v30 }
0x126c   :  { %7632 = vmatprep.subr.mxu0 %v12887_v35  ;;  %7666 = vmatprep.subr.mxu1 %v12888_v31 }
0x126f   :  { %7633 = vmatpush3.xpose.msra.mxu0 %v12889_v27  ;;  %7667 = vmatpush3.xpose.msra.mxu1 %v12890_v46 }
0x1270   :  { %7634 = vmatprep.subr.mxu0 %v12891_v55  ;;  %7668 = vmatprep.subr.mxu1 %v12892_v5 }
0x1273   :  { %7635 = vmatpush3.xpose.msra.mxu0 %v12893_v10  ;;  %7669 = vmatpush3.xpose.msra.mxu1 %v12894_v11 }
0x1274   :  { %7636 = vmatprep.subr.mxu0 %v12895_v13  ;;  %7670 = vmatprep.subr.mxu1 %v12896_v24 }
0x1277   :  { %7637 = vmatpush3.xpose.msra.mxu0 %v12897_v14  ;;  %7671 = vmatpush3.xpose.msra.mxu1 %v12898_v15 }
0x1278   :  { %7674 = vmatprep.subr.mxu0 %v11500_v16  ;;  %7708 = vmatprep.subr.mxu1 %v11503_v50 }
0x12fa   :  { %v4774_v39 = vpop.f32.mrf.mxu0  ;;  %v4845_v42 = vpop.f32.mrf.mxu1 }
0x12fb   :  { %v4850_v9 = vadd.f32 %v4774_v39, %v4177_v7  ;;  %v4852_v43 = vadd.f32 %v4845_v42, %v4290_v38  ;;  %v11530_v38 = vld [vmem:[#allocation7 + $0x470] sm:$0xff] }
0x12fc   :  { %v4776_v47 = vpop.f32.mrf.mxu0  ;;  %v4847_v62 = vpop.f32.mrf.mxu1 }
0x12fd   :  { %v6007_v6 = vmul.f32 -1.442695, %v4850_v9  ;;  %v4851_v52 = vadd.f32 %v4776_v47, %v4179_v12  ;;  %v4853_v58 = vadd.f32 %v4847_v62, %v4292_v25 }
0x12ff   :  { %8293 = vpow2.f32 %v6007_v6  ;;  %v6008_v32 = vmul.f32 -1.442695, %v4851_v52  ;;  %v6009_v22 = vmul.f32 -1.442695, %v4853_v58  ;;  %v11521_v58 = vld [vmem:[#allocation7 + $0x578] sm:$0xff] }
0x1301   :  { %8295 = vpow2.f32 %v6008_v32 }
0x1302   :  { %8297 = vtanh.f32 %v4852_v43  ;;  %v11533_v43 = vld [vmem:[#allocation7 + $0x570] sm:$0xff] }
0x1303   :  { %8299 = vpow2.f32 %v6009_v22  ;;  %v11518_v22 = vld [vmem:[#allocation7 + $0x478] sm:$0xff] }
0x130c   :  { %v8294_v50 = vpop.eup %8293 }
0x130d   :  { %v4857_v26 = vadd.f32 1.0, %v8294_v50 }
0x130e   :  { %v8296_v7 = vpop.eup %8295 }
0x130f   :  { %8301 = vrcp.f32 %v4857_v26  ;;  %v4863_v39 = vadd.f32 1.0, %v8296_v7  ;;  %v8298_v12 = vpop.eup %8297  ;;  %v11536_v26 = vld [vmem:[#allocation7 + $0x4e8] sm:$0xff] }
0x1310   :  { %v8300_v9 = vpop.eup %8299  ;;  %v11539_v7 = vld [vmem:[#allocation7 + $0x5e8] sm:$0xff] }
0x1311   :  { %8303 = vrcp.f32 %v4863_v39  ;;  %v4870_v32 = vadd.f32 1.0, %v8300_v9  ;;  %v11542_v39 = vld [vmem:[#allocation7 + $0x468] sm:$0xff]  ;;  %v11548_v9 = vld [vmem:[#allocation7 + $0x4e0] sm:$0xff] }
0x1313   :  { %8305 = vrcp.f32 %v4870_v32  ;;  %v11560_v32 = vld [vmem:[#allocation7 + $0x4d8] sm:$0xff] }
0x1314   :  { %12907 = vst [vmem:[#allocation38_spill] sm:$0xff] %v11560_v32 }
0x131c   :  { %v8302_v47 = vpop.eup %8301 }
0x131d   :  { %v4874_v6 = vmul.f32 %v8302_v47, %v8298_v12  ;;  %v11545_v12 = vld [vmem:[#allocation7 + $0x568] sm:$0xff]  ;;  %v11551_v47 = vld [vmem:[#allocation7 + $0x5e0] sm:$0xff] }
0x131e   :  { %v8304_v52 = vpop.eup %8303 }
0x131f   :  { %v4873_v62 = vmul.f32 %v8304_v52, %v11435_v54  ;;  %v11524_v54 = vld [vmem:[#allocation7 + $0x4f0] sm:$0xff]  ;;  %v11557_v52 = vld [vmem:[#allocation7 + $0x560] sm:$0xff] }
0x1320   :  { %v8306_v50 = vpop.eup %8305  ;;  %12906 = vst [vmem:[#allocation37_spill] sm:$0xff] %v11557_v52 }
0x1321   :  { %v11515_v41 = vadd.f32 %v4874_v6, %v4873_v62  ;;  %v11554_v6 = vld [vmem:[#allocation7 + $0x460] sm:$0xff]  ;;  %v11563_v62 = vld [vmem:[#allocation7 + $0x5d8] sm:$0xff] }
0x1322   :  { %12908 = vst [vmem:[#allocation36_spill] sm:$0xff] %v11563_v62 }
0x1323   :  { %8307 = vtanh.f32 %v11515_v41 }
0x1330   :  { %v8308_v42 = vpop.eup %8307 }
0x1331   :  { %v4877_v25 = vmul.f32 %v8308_v42, %v8306_v50  ;;  %v11566_v50 = vld [vmem:[#allocation7 + $0x458] sm:$0xff] }
0x1332   :  { %v11569_v42 = vld [vmem:[#allocation7 + $0x558] sm:$0xff] }
0x1333   :  { %7638 = vmatprep.mubr.f32.mxu0 %v4877_v25  ;;  %7672 = vmatprep.mubr.f32.mxu1 %v4877_v25 }
0x1334   :  { %7639 = vmatmul.mubr.f32.vlgmr.msra.gmra.mxu0 %v4877_v25  ;;  %7673 = vmatmul.mubr.f32.vlgmr.msra.gmra.mxu1 %v4877_v25  ;;  %v11572_v25 = vld [vmem:[#allocation7 + $0x4d0] sm:$0xff] }
0x1335   :  { %7675 = vmatpush3.xpose.msra.mxu0 %v11518_v22  ;;  %7709 = vmatpush3.xpose.msra.mxu1 %v11521_v58 }
0x1336   :  { %7676 = vmatprep.subr.mxu0 %v11524_v54  ;;  %7710 = vmatprep.subr.mxu1 %v11527_v53 }
0x1339   :  { %7677 = vmatpush3.xpose.msra.mxu0 %v11530_v38  ;;  %7711 = vmatpush3.xpose.msra.mxu1 %v11533_v43 }
0x133a   :  { %7678 = vmatprep.subr.mxu0 %v11536_v26  ;;  %7712 = vmatprep.subr.mxu1 %v11539_v7 }
0x133d   :  { %7679 = vmatpush3.xpose.msra.mxu0 %v11542_v39  ;;  %7713 = vmatpush3.xpose.msra.mxu1 %v11545_v12 }
0x133e   :  { %7680 = vmatprep.subr.mxu0 %v11548_v9  ;;  %7714 = vmatprep.subr.mxu1 %v11551_v47 }
0x1341   :  { %7681 = vmatpush3.xpose.msra.mxu0 %v11554_v6  ;;  %7715 = vmatpush3.xpose.msra.mxu1 %v11557_v52  ;;  %v11575_v52 = vld [vmem:[#allocation7 + $0x5d0] sm:$0xff] }
0x1342   :  { %7682 = vmatprep.subr.mxu0 %v11560_v32  ;;  %7716 = vmatprep.subr.mxu1 %v11563_v62  ;;  %v11578_v32 = vld [vmem:[#allocation7 + $0x450] sm:$0xff] }
0x1343   :  { %v11581_v62 = vld [vmem:[#allocation7 + $0x550] sm:$0xff] }
0x1345   :  { %7683 = vmatpush3.xpose.msra.mxu0 %v11566_v50  ;;  %7717 = vmatpush3.xpose.msra.mxu1 %v11569_v42 }
0x1346   :  { %7684 = vmatprep.subr.mxu0 %v11572_v25  ;;  %7718 = vmatprep.subr.mxu1 %v11575_v52 }
0x1349   :  { %7685 = vmatpush3.xpose.msra.mxu0 %v11578_v32  ;;  %7719 = vmatpush3.xpose.msra.mxu1 %v11581_v62 }
0x134a   :  { %7686 = vmatprep.subr.mxu0 %v11083_v18  ;;  %7720 = vmatprep.subr.mxu1 %v11085_v19  ;;  %v12909_v18 = vld [vmem:[#allocation35_spill] sm:$0xff]  ;;  %v12910_v19 = vld [vmem:[#allocation40_spill] sm:$0xff] }
0x134d   :  { %7687 = vmatpush3.xpose.msra.mxu0 %v11089_v20  ;;  %7721 = vmatpush3.xpose.msra.mxu1 %v11091_v21  ;;  %v12911_v20 = vld [vmem:[#allocation52_spill] sm:$0xff] }
0x134e   :  { %7688 = vmatprep.subr.mxu0 %v11097_v3  ;;  %7722 = vmatprep.subr.mxu1 %v11099_v23  ;;  %v4183_v21 = vadd.f32 %v12911_v20, %v12910_v19  ;;  %v12912_v23 = vld [vmem:[#allocation17_spill] sm:$0xff] }
0x134f   :  { %v11666_v20 = vld [vmem:[#allocation7 + $0x448] sm:$0xff] }
0x1351   :  { %7689 = vmatpush3.xpose.msra.mxu0 %v11103_v60  ;;  %7723 = vmatpush3.xpose.msra.mxu1 %v11105_v28  ;;  %v4185_v60 = vadd.f32 %v12912_v23, %v11341_v2  ;;  %v11675_v23 = vld [vmem:[#allocation7 + $0x5c0] sm:$0xff] }
0x1352   :  { %7690 = vmatprep.subr.mxu0 %v11109_v61  ;;  %7724 = vmatprep.subr.mxu1 %v11111_v51 }
0x1355   :  { %7691 = vmatpush3.xpose.msra.mxu0 %v11115_v49  ;;  %7725 = vmatpush3.xpose.msra.mxu1 %v11117_v48 }
0x1356   :  { %7692 = vmatprep.subr.mxu0 %v11121_v1  ;;  %7726 = vmatprep.subr.mxu1 %v11123_v44 }
0x1359   :  { %7693 = vmatpush3.xpose.msra.mxu0 %v11127_v59  ;;  %7727 = vmatpush3.xpose.msra.mxu1 %v11129_v57  ;;  %v12913_v59 = vld [vmem:[#allocation55_spill] sm:$0xff] }
0x135a   :  { %7694 = vmatprep.subr.mxu0 %v11133_v37  ;;  %7728 = vmatprep.subr.mxu1 %v11135_v33  ;;  %v4298_v57 = vadd.f32 %v12913_v59, %v12875_v56  ;;  %v12914_v33 = vld [vmem:[#allocation16_spill] sm:$0xff]  ;;  %v11702_v59 = vld [vmem:[#allocation7 + $0x430] sm:$0xff] }
0x135d   :  { %7695 = vmatpush3.xpose.msra.mxu0 %v11139_v0  ;;  %7729 = vmatpush3.xpose.msra.mxu1 %v12878_v63  ;;  %v4296_v0 = vadd.f32 %v12914_v33, %v11356_v17  ;;  %v11711_v33 = vld [vmem:[#allocation7 + $0x5a8] sm:$0xff] }
0x135e   :  { %7696 = vmatprep.subr.mxu0 %v12879_v45  ;;  %7730 = vmatprep.subr.mxu1 %v12880_v4 }
0x1361   :  { %7697 = vmatpush3.xpose.msra.mxu0 %v12881_v36  ;;  %7731 = vmatpush3.xpose.msra.mxu1 %v12882_v40 }
0x1362   :  { %7698 = vmatprep.subr.mxu0 %v12883_v34  ;;  %7732 = vmatprep.subr.mxu1 %v12884_v29 }
0x1365   :  { %7699 = vmatpush3.xpose.msra.mxu0 %v12885_v8  ;;  %7733 = vmatpush3.xpose.msra.mxu1 %v12886_v30 }
0x1366   :  { %7700 = vmatprep.subr.mxu0 %v12887_v35  ;;  %7734 = vmatprep.subr.mxu1 %v12888_v31 }
0x1369   :  { %7701 = vmatpush3.xpose.msra.mxu0 %v12889_v27  ;;  %7735 = vmatpush3.xpose.msra.mxu1 %v12890_v46 }
0x136a   :  { %7702 = vmatprep.subr.mxu0 %v12891_v55  ;;  %7736 = vmatprep.subr.mxu1 %v12892_v5 }
0x136d   :  { %7703 = vmatpush3.xpose.msra.mxu0 %v12893_v10  ;;  %7737 = vmatpush3.xpose.msra.mxu1 %v12894_v11 }
0x136e   :  { %7704 = vmatprep.subr.mxu0 %v12895_v13  ;;  %7738 = vmatprep.subr.mxu1 %v12896_v24  ;;  %v12915_v13 = vld [vmem:[#allocation37_spill] sm:$0xff]  ;;  %v12916_v24 = vld [vmem:[#allocation38_spill] sm:$0xff] }
0x1371   :  { %7705 = vmatpush3.xpose.msra.mxu0 %v12897_v14  ;;  %7739 = vmatpush3.xpose.msra.mxu1 %v12898_v15  ;;  %v12917_v14 = vld [vmem:[#allocation36_spill] sm:$0xff]  ;;  %v11660_v15 = vld [vmem:[#allocation7 + $0x4c8] sm:$0xff] }
0x1372   :  { %7742 = vmatprep.subr.mxu0 %v11500_v16  ;;  %7776 = vmatprep.subr.mxu1 %v12909_v18 }
0x13f4   :  { %v4948_v3 = vpop.f32.mrf.mxu0  ;;  %v5019_v48 = vpop.f32.mrf.mxu1 }
0x13f5   :  { %v5024_v28 = vadd.f32 %v4948_v3, %v4183_v21  ;;  %v5026_v63 = vadd.f32 %v5019_v48, %v4296_v0  ;;  %v11669_v21 = vld [vmem:[#allocation7 + $0x548] sm:$0xff]  ;;  %v11672_v3 = vld [vmem:[#allocation7 + $0x4c0] sm:$0xff]  ;;  %v11693_v48 = vld [vmem:[#allocation7 + $0x538] sm:$0xff] }
0x13f6   :  { %v4950_v61 = vpop.f32.mrf.mxu0  ;;  %v5021_v44 = vpop.f32.mrf.mxu1  ;;  %v11714_v0 = vld [vmem:[#allocation7 + $0x428] sm:$0xff] }
0x13f7   :  { %v6010_v51 = vmul.f32 -1.442695, %v5024_v28  ;;  %v5025_v49 = vadd.f32 %v4950_v61, %v4185_v60  ;;  %v5027_v37 = vadd.f32 %v5021_v44, %v4298_v57  ;;  %v11678_v60 = vld [vmem:[#allocation7 + $0x440] sm:$0xff]  ;;  %v11684_v61 = vld [vmem:[#allocation7 + $0x4b8] sm:$0xff]  ;;  %v11699_v44 = vld [vmem:[#allocation7 + $0x5b0] sm:$0xff] }
0x13f8   :  { %v11681_v28 = vld [vmem:[#allocation7 + $0x540] sm:$0xff]  ;;  %v11705_v57 = vld [vmem:[#allocation7 + $0x530] sm:$0xff] }
0x13f9   :  { %8309 = vpow2.f32 %v6010_v51  ;;  %v6011_v1 = vmul.f32 -1.442695, %v5025_v49  ;;  %v6012_v45 = vmul.f32 -1.442695, %v5027_v37  ;;  %v11687_v51 = vld [vmem:[#allocation7 + $0x5b8] sm:$0xff]  ;;  %v11708_v37 = vld [vmem:[#allocation7 + $0x4a8] sm:$0xff] }
0x13fa   :  { %v11690_v49 = vld [vmem:[#allocation7 + $0x438] sm:$0xff] }
0x13fb   :  { %8311 = vpow2.f32 %v6011_v1  ;;  %v11696_v1 = vld [vmem:[#allocation7 + $0x4b0] sm:$0xff] }
0x13fc   :  { %8313 = vtanh.f32 %v5026_v63  ;;  %v11717_v63 = vld [vmem:[#allocation7 + $0x528] sm:$0xff] }
0x13fd   :  { %8315 = vpow2.f32 %v6012_v45  ;;  %12918 = vst [vmem:[#allocation24_spill] sm:$0xff] %v11717_v63  ;;  %v11720_v45 = vld [vmem:[#allocation7 + $0x4a0] sm:$0xff] }
0x13fe   :  { %12919 = vst [vmem:[#allocation22_spill] sm:$0xff] %v11720_v45 }
0x1406   :  { %v8310_v4 = vpop.eup %8309 }
0x1407   :  { %v5031_v36 = vadd.f32 1.0, %v8310_v4  ;;  %v11723_v4 = vld [vmem:[#allocation7 + $0x5a0] sm:$0xff] }
0x1408   :  { %v8312_v40 = vpop.eup %8311  ;;  %12920 = vst [vmem:[#allocation47_spill] sm:$0xff] %v11723_v4 }
0x1409   :  { %8317 = vrcp.f32 %v5031_v36  ;;  %v5037_v34 = vadd.f32 1.0, %v8312_v40  ;;  %v8314_v29 = vpop.eup %8313  ;;  %v11726_v36 = vld [vmem:[#allocation7 + $0x420] sm:$0xff] }
0x140a   :  { %v8316_v8 = vpop.eup %8315  ;;  %12921 = vst [vmem:[#allocation50_spill] sm:$0xff] %v11726_v36  ;;  %v11729_v40 = vld [vmem:[#allocation7 + $0x520] sm:$0xff] }
0x140b   :  { %8319 = vrcp.f32 %v5037_v34  ;;  %v5044_v27 = vadd.f32 1.0, %v8316_v8  ;;  %12922 = vst [vmem:[#allocation68_spill] sm:$0xff] %v11729_v40  ;;  %v11732_v34 = vld [vmem:[#allocation7 + $0x498] sm:$0xff] }
0x140c   :  { %12923 = vst [vmem:[#allocation48_spill] sm:$0xff] %v11732_v34  ;;  %v11738_v8 = vld [vmem:[#allocation7 + $0x418] sm:$0xff] }
0x140d   :  { %8321 = vrcp.f32 %v5044_v27  ;;  %12925 = vst [vmem:[#allocation56_spill] sm:$0xff] %v11738_v8  ;;  %v11750_v27 = vld [vmem:[#allocation7 + $0x410] sm:$0xff] }
0x140e   :  { %12929 = vst [vmem:[#allocation27_spill] sm:$0xff] %v11750_v27 }
0x1416   :  { %v8318_v30 = vpop.eup %8317 }
0x1417   :  { %v5048_v35 = vmul.f32 %v8318_v30, %v8314_v29  ;;  %v11735_v29 = vld [vmem:[#allocation7 + $0x598] sm:$0xff] }
0x1418   :  { %v8320_v31 = vpop.eup %8319  ;;  %12924 = vst [vmem:[#allocation49_spill] sm:$0xff] %v11735_v29  ;;  %v11741_v30 = vld [vmem:[#allocation7 + $0x518] sm:$0xff] }
0x1419   :  { %v5047_v46 = vmul.f32 %v8320_v31, %v11515_v41  ;;  %v11663_v41 = vld [vmem:[#allocation7 + $0x5c8] sm:$0xff]  ;;  %12926 = vst [vmem:[#allocation41_spill] sm:$0xff] %v11741_v30  ;;  %v11747_v31 = vld [vmem:[#allocation7 + $0x590] sm:$0xff] }
0x141a   :  { %v8322_v5 = vpop.eup %8321  ;;  %12928 = vst [vmem:[#allocation25_spill] sm:$0xff] %v11747_v31 }
0x141b   :  { %v11635_v55 = vadd.f32 %v5048_v35, %v5047_v46  ;;  %v11744_v35 = vld [vmem:[#allocation7 + $0x490] sm:$0xff] }
0x141c   :  { %12927 = vst [vmem:[#allocation42_spill] sm:$0xff] %v11744_v35  ;;  %v11753_v46 = vld [vmem:[#allocation7 + $0x510] sm:$0xff] }
0x141d   :  { %8323 = vtanh.f32 %v11635_v55  ;;  %12930 = vst [vmem:[#allocation28_spill] sm:$0xff] %v11753_v46 }
0x142a   :  { %v8324_v10 = vpop.eup %8323 }
0x142b   :  { %v5051_v11 = vmul.f32 %v8324_v10, %v8322_v5  ;;  %v11756_v5 = vld [vmem:[#allocation7 + $0x488] sm:$0xff] }
0x142c   :  { %12931 = vst [vmem:[#allocation26_spill] sm:$0xff] %v11756_v5  ;;  %v11759_v10 = vld [vmem:[#allocation7 + $0x588] sm:$0xff] }
0x142d   :  { %7706 = vmatprep.mubr.f32.mxu0 %v5051_v11  ;;  %7740 = vmatprep.mubr.f32.mxu1 %v5051_v11  ;;  %12932 = vst [vmem:[#allocation29_spill] sm:$0xff] %v11759_v10 }
0x142e   :  { %7707 = vmatmul.mubr.f32.vlgmr.msra.gmra.mxu0 %v5051_v11  ;;  %7741 = vmatmul.mubr.f32.vlgmr.msra.gmra.mxu1 %v5051_v11  ;;  %v11762_v11 = vld [vmem:[#allocation7 + $0x408] sm:$0xff] }
0x142f   :  { %7743 = vmatpush3.xpose.msra.mxu0 %v11518_v22  ;;  %7777 = vmatpush3.xpose.msra.mxu1 %v11521_v58  ;;  %12933 = vst [vmem:[#allocation31_spill] sm:$0xff] %v11762_v11 }
0x1430   :  { %7744 = vmatprep.subr.mxu0 %v11524_v54  ;;  %7778 = vmatprep.subr.mxu1 %v11527_v53 }
0x1433   :  { %7745 = vmatpush3.xpose.msra.mxu0 %v11530_v38  ;;  %7779 = vmatpush3.xpose.msra.mxu1 %v11533_v43 }
0x1434   :  { %7746 = vmatprep.subr.mxu0 %v11536_v26  ;;  %7780 = vmatprep.subr.mxu1 %v11539_v7 }
0x1437   :  { %7747 = vmatpush3.xpose.msra.mxu0 %v11542_v39  ;;  %7781 = vmatpush3.xpose.msra.mxu1 %v11545_v12 }
0x1438   :  { %7748 = vmatprep.subr.mxu0 %v11548_v9  ;;  %7782 = vmatprep.subr.mxu1 %v11551_v47 }
0x143b   :  { %7749 = vmatpush3.xpose.msra.mxu0 %v11554_v6  ;;  %7783 = vmatpush3.xpose.msra.mxu1 %v12915_v13 }
0x143c   :  { %7750 = vmatprep.subr.mxu0 %v12916_v24  ;;  %7784 = vmatprep.subr.mxu1 %v12917_v14 }
0x143f   :  { %7751 = vmatpush3.xpose.msra.mxu0 %v11566_v50  ;;  %7785 = vmatpush3.xpose.msra.mxu1 %v11569_v42 }
0x1440   :  { %7752 = vmatprep.subr.mxu0 %v11572_v25  ;;  %7786 = vmatprep.subr.mxu1 %v11575_v52 }
0x1443   :  { %7753 = vmatpush3.xpose.msra.mxu0 %v11578_v32  ;;  %7787 = vmatpush3.xpose.msra.mxu1 %v11581_v62 }
0x1444   :  { %7754 = vmatprep.subr.mxu0 %v11660_v15  ;;  %7788 = vmatprep.subr.mxu1 %v11663_v41 }
0x1447   :  { %7755 = vmatpush3.xpose.msra.mxu0 %v11666_v20  ;;  %7789 = vmatpush3.xpose.msra.mxu1 %v11669_v21 }
0x1448   :  { %7756 = vmatprep.subr.mxu0 %v11672_v3  ;;  %7790 = vmatprep.subr.mxu1 %v11675_v23 }
0x144b   :  { %7757 = vmatpush3.xpose.msra.mxu0 %v11678_v60  ;;  %7791 = vmatpush3.xpose.msra.mxu1 %v11681_v28 }
0x144c   :  { %7758 = vmatprep.subr.mxu0 %v11684_v61  ;;  %7792 = vmatprep.subr.mxu1 %v11687_v51 }
0x144f   :  { %7759 = vmatpush3.xpose.msra.mxu0 %v11690_v49  ;;  %7793 = vmatpush3.xpose.msra.mxu1 %v11693_v48 }
0x1450   :  { %7760 = vmatprep.subr.mxu0 %v11696_v1  ;;  %7794 = vmatprep.subr.mxu1 %v11699_v44 }
0x1453   :  { %7761 = vmatpush3.xpose.msra.mxu0 %v11702_v59  ;;  %7795 = vmatpush3.xpose.msra.mxu1 %v11705_v57 }
0x1454   :  { %7762 = vmatprep.subr.mxu0 %v11708_v37  ;;  %7796 = vmatprep.subr.mxu1 %v11711_v33 }
0x1457   :  { %7763 = vmatpush3.xpose.msra.mxu0 %v11714_v0  ;;  %7797 = vmatpush3.xpose.msra.mxu1 %v11717_v63 }
0x1458   :  { %7764 = vmatprep.subr.mxu0 %v11720_v45  ;;  %7798 = vmatprep.subr.mxu1 %v11723_v4  ;;  %v12942_v4 = vld [vmem:[#allocation58_spill] sm:$0xff] }
0x145b   :  { %7765 = vmatpush3.xpose.msra.mxu0 %v11726_v36  ;;  %7799 = vmatpush3.xpose.msra.mxu1 %v11729_v40 }
0x145c   :  { %7766 = vmatprep.subr.mxu0 %v11732_v34  ;;  %7800 = vmatprep.subr.mxu1 %v11735_v29 }
0x145f   :  { %7767 = vmatpush3.xpose.msra.mxu0 %v11738_v8  ;;  %7801 = vmatpush3.xpose.msra.mxu1 %v11741_v30 }
0x1460   :  { %7768 = vmatprep.subr.mxu0 %v11744_v35  ;;  %7802 = vmatprep.subr.mxu1 %v11747_v31  ;;  %v11765_v31 = vld [vmem:[#allocation7 + $0x508] sm:$0xff] }
0x1461   :  { %12934 = vst [vmem:[#allocation59_spill] sm:$0xff] %v11765_v31  ;;  %v12940_v35 = vld [vmem:[#allocation33_spill] sm:$0xff] }
0x1462   :  { %v4191_v30 = vadd.f32 %v12940_v35, %v11341_v2 }
0x1463   :  { %7769 = vmatpush3.xpose.msra.mxu0 %v11750_v27  ;;  %7803 = vmatpush3.xpose.msra.mxu1 %v11753_v46  ;;  %v11768_v27 = vld [vmem:[#allocation7 + $0x480] sm:$0xff] }
0x1464   :  { %7770 = vmatprep.subr.mxu0 %v11756_v5  ;;  %7804 = vmatprep.subr.mxu1 %v11759_v10  ;;  %12935 = vst [vmem:[#allocation30_spill] sm:$0xff] %v11768_v27  ;;  %v11771_v46 = vld [vmem:[#allocation7 + $0x580] sm:$0xff] }
0x1465   :  { %12936 = vst [vmem:[#allocation69_spill] sm:$0xff] %v11771_v46  ;;  %v11774_v5 = vld [vmem:[#allocation7 + $0x400] sm:$0xff] }
0x1466   :  { %12937 = vst [vmem:[#allocation20_spill] sm:$0xff] %v11774_v5  ;;  %v11777_v10 = vld [vmem:[#allocation7 + $0x500] sm:$0xff] }
0x1467   :  { %7771 = vmatpush3.xpose.msra.mxu0 %v11762_v11  ;;  %7805 = vmatpush3.xpose.msra.mxu1 %v11765_v31  ;;  %12938 = vst [vmem:[#allocation61_spill] sm:$0xff] %v11777_v10  ;;  %v12939_v31 = vld [vmem:[#allocation57_spill] sm:$0xff] }
0x1468   :  { %7772 = vmatprep.subr.mxu0 %v11768_v27  ;;  %7806 = vmatprep.subr.mxu1 %v11771_v46  ;;  %v4189_v11 = vadd.f32 %v12939_v31, %v12910_v19  ;;  %v4302_v31 = vadd.f32 %v12942_v4, %v11356_v17  ;;  %v12945_v4 = vld [vmem:[#allocation47_spill] sm:$0xff] }
0x146b   :  { %7773 = vmatpush3.xpose.msra.mxu0 %v11774_v5  ;;  %7807 = vmatpush3.xpose.msra.mxu1 %v11777_v10 }
0x146c   :  { %7810 = vmatprep.subr.mxu0 %v11500_v16  ;;  %7844 = vmatprep.subr.mxu1 %v12909_v18  ;;  %v12941_v16 = vld [vmem:[#allocation34_spill] sm:$0xff] }
0x146d   :  { %v4304_v36 = vadd.f32 %v12941_v16, %v12875_v56 }
0x14ee   :  { %v5122_v27 = vpop.f32.mrf.mxu0  ;;  %v5193_v5 = vpop.f32.mrf.mxu1 }
0x14ef   :  { %v5198_v46 = vadd.f32 %v5122_v27, %v4189_v11  ;;  %v5200_v19 = vadd.f32 %v5193_v5, %v4302_v31  ;;  %v12946_v5 = vld [vmem:[#allocation50_spill] sm:$0xff]  ;;  %v12947_v11 = vld [vmem:[#allocation68_spill] sm:$0xff] }
0x14f0   :  { %v5124_v8 = vpop.f32.mrf.mxu0  ;;  %v5195_v10 = vpop.f32.mrf.mxu1  ;;  %v12948_v31 = vld [vmem:[#allocation48_spill] sm:$0xff] }
0x14f1   :  { %v6013_v29 = vmul.f32 -1.442695, %v5198_v46  ;;  %v5199_v34 = vadd.f32 %v5124_v8, %v4191_v30  ;;  %v5201_v18 = vadd.f32 %v5195_v10, %v4304_v36 }
0x14f3   :  { %8325 = vpow2.f32 %v6013_v29  ;;  %v6014_v40 = vmul.f32 -1.442695, %v5199_v34  ;;  %v6015_v45 = vmul.f32 -1.442695, %v5201_v18 }
0x14f5   :  { %8327 = vpow2.f32 %v6014_v40 }
0x14f6   :  { %8329 = vtanh.f32 %v5200_v19 }
0x14f7   :  { %8331 = vpow2.f32 %v6015_v45  ;;  %v12944_v45 = vld [vmem:[#allocation22_spill] sm:$0xff] }
0x1500   :  { %v8326_v63 = vpop.eup %8325 }
0x1501   :  { %v5205_v35 = vadd.f32 1.0, %v8326_v63 }
0x1502   :  { %v8328_v27 = vpop.eup %8327 }
0x1503   :  { %8333 = vrcp.f32 %v5205_v35  ;;  %v5211_v29 = vadd.f32 1.0, %v8328_v27  ;;  %v8330_v34 = vpop.eup %8329  ;;  %v12949_v35 = vld [vmem:[#allocation49_spill] sm:$0xff]  ;;  %v12950_v27 = vld [vmem:[#allocation56_spill] sm:$0xff] }
0x1504   :  { %v8332_v40 = vpop.eup %8331 }
0x1505   :  { %8335 = vrcp.f32 %v5211_v29  ;;  %v5218_v16 = vadd.f32 1.0, %v8332_v40  ;;  %v12951_v29 = vld [vmem:[#allocation41_spill] sm:$0xff] }
0x1506   :  { %v12953_v40 = vld [vmem:[#allocation25_spill] sm:$0xff] }
0x1507   :  { %8337 = vrcp.f32 %v5218_v16  ;;  %v12957_v16 = vld [vmem:[#allocation29_spill] sm:$0xff] }
0x1510   :  { %v8334_v8 = vpop.eup %8333 }
0x1511   :  { %v5222_v30 = vmul.f32 %v8334_v8, %v8330_v34  ;;  %v12952_v34 = vld [vmem:[#allocation42_spill] sm:$0xff]  ;;  %v12954_v8 = vld [vmem:[#allocation27_spill] sm:$0xff] }
0x1512   :  { %v8336_v46 = vpop.eup %8335 }
0x1513   :  { %v5221_v36 = vmul.f32 %v8336_v46, %v11635_v55  ;;  %v12943_v55 = vld [vmem:[#allocation24_spill] sm:$0xff]  ;;  %v12956_v46 = vld [vmem:[#allocation26_spill] sm:$0xff] }
0x1514   :  { %v8338_v18 = vpop.eup %8337 }
0x1515   :  { %v11791_v10 = vadd.f32 %v5222_v30, %v5221_v36  ;;  %v12955_v30 = vld [vmem:[#allocation28_spill] sm:$0xff]  ;;  %v12958_v36 = vld [vmem:[#allocation31_spill] sm:$0xff] }
0x1517   :  { %8339 = vtanh.f32 %v11791_v10 }
0x1524   :  { %v8340_v19 = vpop.eup %8339 }
0x1525   :  { %v5225_v63 = vmul.f32 %v8340_v19, %v8338_v18  ;;  %v12959_v18 = vld [vmem:[#allocation59_spill] sm:$0xff]  ;;  %v12960_v19 = vld [vmem:[#allocation30_spill] sm:$0xff] }
0x1527   :  { %7774 = vmatprep.mubr.f32.mxu0 %v5225_v63  ;;  %7808 = vmatprep.mubr.f32.mxu1 %v5225_v63 }
0x1528   :  { %7775 = vmatmul.mubr.f32.vlgmr.msra.gmra.mxu0 %v5225_v63  ;;  %7809 = vmatmul.mubr.f32.vlgmr.msra.gmra.mxu1 %v5225_v63  ;;  %v12961_v63 = vld [vmem:[#allocation69_spill] sm:$0xff] }
0x1529   :  { %7811 = vmatpush3.xpose.msra.mxu0 %v11518_v22  ;;  %7845 = vmatpush3.xpose.msra.mxu1 %v11521_v58 }
0x152a   :  { %7812 = vmatprep.subr.mxu0 %v11524_v54  ;;  %7846 = vmatprep.subr.mxu1 %v11527_v53 }
0x152d   :  { %7813 = vmatpush3.xpose.msra.mxu0 %v11530_v38  ;;  %7847 = vmatpush3.xpose.msra.mxu1 %v11533_v43 }
0x152e   :  { %7814 = vmatprep.subr.mxu0 %v11536_v26  ;;  %7848 = vmatprep.subr.mxu1 %v11539_v7 }
0x1531   :  { %7815 = vmatpush3.xpose.msra.mxu0 %v11542_v39  ;;  %7849 = vmatpush3.xpose.msra.mxu1 %v11545_v12 }
0x1532   :  { %7816 = vmatprep.subr.mxu0 %v11548_v9  ;;  %7850 = vmatprep.subr.mxu1 %v11551_v47 }
0x1535   :  { %7817 = vmatpush3.xpose.msra.mxu0 %v11554_v6  ;;  %7851 = vmatpush3.xpose.msra.mxu1 %v12915_v13 }
0x1536   :  { %7818 = vmatprep.subr.mxu0 %v12916_v24  ;;  %7852 = vmatprep.subr.mxu1 %v12917_v14 }
0x1539   :  { %7819 = vmatpush3.xpose.msra.mxu0 %v11566_v50  ;;  %7853 = vmatpush3.xpose.msra.mxu1 %v11569_v42 }
0x153a   :  { %7820 = vmatprep.subr.mxu0 %v11572_v25  ;;  %7854 = vmatprep.subr.mxu1 %v11575_v52 }
0x153d   :  { %7821 = vmatpush3.xpose.msra.mxu0 %v11578_v32  ;;  %7855 = vmatpush3.xpose.msra.mxu1 %v11581_v62 }
0x153e   :  { %7822 = vmatprep.subr.mxu0 %v11660_v15  ;;  %7856 = vmatprep.subr.mxu1 %v11663_v41 }
0x1541   :  { %7823 = vmatpush3.xpose.msra.mxu0 %v11666_v20  ;;  %7857 = vmatpush3.xpose.msra.mxu1 %v11669_v21 }
0x1542   :  { %7824 = vmatprep.subr.mxu0 %v11672_v3  ;;  %7858 = vmatprep.subr.mxu1 %v11675_v23 }
0x1545   :  { %7825 = vmatpush3.xpose.msra.mxu0 %v11678_v60  ;;  %7859 = vmatpush3.xpose.msra.mxu1 %v11681_v28 }
0x1546   :  { %7826 = vmatprep.subr.mxu0 %v11684_v61  ;;  %7860 = vmatprep.subr.mxu1 %v11687_v51 }
0x1549   :  { %7827 = vmatpush3.xpose.msra.mxu0 %v11690_v49  ;;  %7861 = vmatpush3.xpose.msra.mxu1 %v11693_v48 }
0x154a   :  { %7828 = vmatprep.subr.mxu0 %v11696_v1  ;;  %7862 = vmatprep.subr.mxu1 %v11699_v44 }
0x154d   :  { %7829 = vmatpush3.xpose.msra.mxu0 %v11702_v59  ;;  %7863 = vmatpush3.xpose.msra.mxu1 %v11705_v57 }
0x154e   :  { %7830 = vmatprep.subr.mxu0 %v11708_v37  ;;  %7864 = vmatprep.subr.mxu1 %v11711_v33 }
0x1551   :  { %7831 = vmatpush3.xpose.msra.mxu0 %v11714_v0  ;;  %7865 = vmatpush3.xpose.msra.mxu1 %v12943_v55 }
0x1552   :  { %7832 = vmatprep.subr.mxu0 %v12944_v45  ;;  %7866 = vmatprep.subr.mxu1 %v12945_v4  ;;  %v12970_v4 = vld [vmem:[#allocation32_spill] sm:$0xff] }
0x1555   :  { %7833 = vmatpush3.xpose.msra.mxu0 %v12946_v5  ;;  %7867 = vmatpush3.xpose.msra.mxu1 %v12947_v11 }
0x1556   :  { %7834 = vmatprep.subr.mxu0 %v12948_v31  ;;  %7868 = vmatprep.subr.mxu1 %v12949_v35 }
0x1559   :  { %7835 = vmatpush3.xpose.msra.mxu0 %v12950_v27  ;;  %7869 = vmatpush3.xpose.msra.mxu1 %v12951_v29  ;;  %v12962_v29 = vld [vmem:[#allocation20_spill] sm:$0xff] }
0x155a   :  { %7836 = vmatprep.subr.mxu0 %v12952_v34  ;;  %7870 = vmatprep.subr.mxu1 %v12953_v40  ;;  %v12963_v34 = vld [vmem:[#allocation61_spill] sm:$0xff]  ;;  %v12964_v40 = vld [vmem:[#allocation66_spill] sm:$0xff] }
0x155d   :  { %7837 = vmatpush3.xpose.msra.mxu0 %v12954_v8  ;;  %7871 = vmatpush3.xpose.msra.mxu1 %v12955_v30  ;;  %v12965_v8 = vld [vmem:[#allocation35_spill] sm:$0xff]  ;;  %v12966_v30 = vld [vmem:[#allocation40_spill] sm:$0xff] }
0x155e   :  { %7838 = vmatprep.subr.mxu0 %v12956_v46  ;;  %7872 = vmatprep.subr.mxu1 %v12957_v16  ;;  %v12967_v46 = vld [vmem:[#allocation21_spill] sm:$0xff] }
0x155f   :  { %v4195_v27 = vadd.f32 %v12967_v46, %v12966_v30  ;;  %v4308_v46 = vadd.f32 %v12970_v4, %v11356_v17 }
0x1561   :  { %7839 = vmatpush3.xpose.msra.mxu0 %v12958_v36  ;;  %7873 = vmatpush3.xpose.msra.mxu1 %v12959_v18  ;;  %v12968_v36 = vld [vmem:[#allocation15_spill] sm:$0xff] }
0x1562   :  { %7840 = vmatprep.subr.mxu0 %v12960_v19  ;;  %7874 = vmatprep.subr.mxu1 %v12961_v63  ;;  %v4197_v35 = vadd.f32 %v12968_v36, %v11341_v2 }
0x1565   :  { %7841 = vmatpush3.xpose.msra.mxu0 %v12962_v29  ;;  %7875 = vmatpush3.xpose.msra.mxu1 %v12963_v34 }
0x1566   :  { %7878 = vmatprep.subr.mxu0 %v12964_v40  ;;  %7912 = vmatprep.subr.mxu1 %v12965_v8  ;;  %v12969_v40 = vld [vmem:[#allocation39_spill] sm:$0xff] }
0x1567   :  { %v4310_v5 = vadd.f32 %v12969_v40, %v12875_v56 }
0x15e8   :  { %v5296_v16 = vpop.f32.mrf.mxu0  ;;  %v5367_v63 = vpop.f32.mrf.mxu1 }
0x15e9   :  { %v5372_v18 = vadd.f32 %v5296_v16, %v4195_v27  ;;  %v5374_v30 = vadd.f32 %v5367_v63, %v4308_v46 }
0x15ea   :  { %v5298_v31 = vpop.f32.mrf.mxu0  ;;  %v5369_v34 = vpop.f32.mrf.mxu1 }
0x15eb   :  { %v6016_v19 = vmul.f32 -1.442695, %v5372_v18  ;;  %v5373_v11 = vadd.f32 %v5298_v31, %v4197_v35  ;;  %v5375_v8 = vadd.f32 %v5369_v34, %v4310_v5 }
0x15ed   :  { %8341 = vpow2.f32 %v6016_v19  ;;  %v6017_v29 = vmul.f32 -1.442695, %v5373_v11  ;;  %v6018_v45 = vmul.f32 -1.442695, %v5375_v8 }
0x15ef   :  { %8343 = vpow2.f32 %v6017_v29 }
0x15f0   :  { %8345 = vtanh.f32 %v5374_v30 }
0x15f1   :  { %8347 = vpow2.f32 %v6018_v45 }
0x15fa   :  { %v8342_v55 = vpop.eup %8341 }
0x15fb   :  { %v5379_v36 = vadd.f32 1.0, %v8342_v55 }
0x15fc   :  { %v8344_v27 = vpop.eup %8343 }
0x15fd   :  { %8349 = vrcp.f32 %v5379_v36  ;;  %v5385_v31 = vadd.f32 1.0, %v8344_v27  ;;  %v8346_v11 = vpop.eup %8345 }
0x15fe   :  { %v8348_v35 = vpop.eup %8347 }
0x15ff   :  { %8351 = vrcp.f32 %v5385_v31  ;;  %v5392_v19 = vadd.f32 1.0, %v8348_v35 }
0x1601   :  { %8353 = vrcp.f32 %v5392_v19 }
0x160a   :  { %v8350_v29 = vpop.eup %8349 }
0x160b   :  { %v5396_v16 = vmul.f32 %v8350_v29, %v8346_v11 }
0x160c   :  { %v8352_v18 = vpop.eup %8351 }
0x160d   :  { %v5395_v5 = vmul.f32 %v8352_v18, %v11791_v10 }
0x160e   :  { %v8354_v55 = vpop.eup %8353 }
0x160f   :  { %v11867_v34 = vadd.f32 %v5396_v16, %v5395_v5 }
0x1611   :  { %8355 = vtanh.f32 %v11867_v34 }
0x161e   :  { %v8356_v4 = vpop.eup %8355 }
0x161f   :  { %v5399_v30 = vmul.f32 %v8356_v4, %v8354_v55  ;;  %v5763_v55 = vld [vmem:[%s12029_s5 + $0x78] sm:$0xff]  ;;  %v5761_v4 = vld [vmem:[%s12029_s5 + $0x68] sm:$0xff] }
0x1621   :  { %7842 = vmatprep.mubr.f32.mxu0 %v5399_v30  ;;  %7876 = vmatprep.mubr.f32.mxu1 %v5399_v30 }
0x1622   :  { %7843 = vmatmul.mubr.f32.vlgmr.msra.gmra.mxu0 %v5399_v30  ;;  %7877 = vmatmul.mubr.f32.vlgmr.msra.gmra.mxu1 %v5399_v30  ;;  %v5760_v30 = vld [vmem:[%s12029_s5 + $0x60] sm:$0xff] }
0x1623   :  { %7879 = vmatpush3.xpose.msra.mxu0 %v11518_v22  ;;  %7913 = vmatpush3.xpose.msra.mxu1 %v11521_v58  ;;  %v12971_v22 = vld [vmem:[#allocation24_spill] sm:$0xff]  ;;  %v12972_v58 = vld [vmem:[#allocation22_spill] sm:$0xff] }
0x1624   :  { %7880 = vmatprep.subr.mxu0 %v11524_v54  ;;  %7914 = vmatprep.subr.mxu1 %v11527_v53  ;;  %v12973_v54 = vld [vmem:[#allocation47_spill] sm:$0xff]  ;;  %v12974_v53 = vld [vmem:[#allocation50_spill] sm:$0xff] }
0x1627   :  { %7881 = vmatpush3.xpose.msra.mxu0 %v11530_v38  ;;  %7915 = vmatpush3.xpose.msra.mxu1 %v11533_v43  ;;  %v12975_v38 = vld [vmem:[#allocation68_spill] sm:$0xff] }
0x1628   :  { %7882 = vmatprep.subr.mxu0 %v11536_v26  ;;  %7916 = vmatprep.subr.mxu1 %v11539_v7  ;;  %v12976_v43 = vld [vmem:[#allocation48_spill] sm:$0xff]  ;;  %v12977_v26 = vld [vmem:[#allocation49_spill] sm:$0xff] }
0x1629   :  { %v12978_v7 = vld [vmem:[#allocation56_spill] sm:$0xff] }
0x162b   :  { %7883 = vmatpush3.xpose.msra.mxu0 %v11542_v39  ;;  %7917 = vmatpush3.xpose.msra.mxu1 %v11545_v12  ;;  %v12979_v39 = vld [vmem:[#allocation41_spill] sm:$0xff]  ;;  %v12980_v12 = vld [vmem:[#allocation42_spill] sm:$0xff] }
0x162c   :  { %7884 = vmatprep.subr.mxu0 %v11548_v9  ;;  %7918 = vmatprep.subr.mxu1 %v11551_v47  ;;  %v12981_v9 = vld [vmem:[#allocation25_spill] sm:$0xff]  ;;  %v12982_v47 = vld [vmem:[#allocation27_spill] sm:$0xff] }
0x162f   :  { %7885 = vmatpush3.xpose.msra.mxu0 %v11554_v6  ;;  %7919 = vmatpush3.xpose.msra.mxu1 %v12915_v13  ;;  %v12983_v6 = vld [vmem:[#allocation28_spill] sm:$0xff] }
0x1630   :  { %7886 = vmatprep.subr.mxu0 %v12916_v24  ;;  %7920 = vmatprep.subr.mxu1 %v12917_v14  ;;  %v12990_v13 = vld [vmem:[#allocation20_spill] sm:$0xff]  ;;  %v12991_v24 = vld [vmem:[#allocation61_spill] sm:$0xff]  ;;  %v12992_v14 = vmov 0.0  }
0x1633   :  { %7887 = vmatpush3.xpose.msra.mxu0 %v11566_v50  ;;  %7921 = vmatpush3.xpose.msra.mxu1 %v11569_v42  ;;  %v12987_v50 = vld [vmem:[#allocation59_spill] sm:$0xff]  ;;  %v12988_v42 = vld [vmem:[#allocation30_spill] sm:$0xff] }
0x1634   :  { %7888 = vmatprep.subr.mxu0 %v11572_v25  ;;  %7922 = vmatprep.subr.mxu1 %v11575_v52  ;;  %v12984_v52 = vld [vmem:[#allocation26_spill] sm:$0xff]  ;;  %v12989_v25 = vld [vmem:[#allocation69_spill] sm:$0xff] }
0x1637   :  { %7889 = vmatpush3.xpose.msra.mxu0 %v11578_v32  ;;  %7923 = vmatpush3.xpose.msra.mxu1 %v11581_v62  ;;  %v12985_v32 = vld [vmem:[#allocation29_spill] sm:$0xff]  ;;  %v12986_v62 = vld [vmem:[#allocation31_spill] sm:$0xff] }
0x1638   :  { %7890 = vmatprep.subr.mxu0 %v11660_v15  ;;  %7924 = vmatprep.subr.mxu1 %v11663_v41  ;;  %v12993_v15 = vld [vmem:[#allocation40_spill] sm:$0xff]  ;;  %v12994_v41 = vld [vmem:[#allocation63_spill] sm:$0xff] }
0x163b   :  { %7891 = vmatpush3.xpose.msra.mxu0 %v11666_v20  ;;  %7925 = vmatpush3.xpose.msra.mxu1 %v11669_v21  ;;  %v4201_v20 = vadd.f32 %v12994_v41, %v12993_v15 }
0x163c   :  { %7892 = vmatprep.subr.mxu0 %v11672_v3  ;;  %7926 = vmatprep.subr.mxu1 %v11675_v23  ;;  %v12995_v3 = vld [vmem:[#allocation70_spill] sm:$0xff] }
0x163d   :  { %v4203_v23 = vadd.f32 %v12995_v3, %v11341_v2 }
0x163f   :  { %7893 = vmatpush3.xpose.msra.mxu0 %v11678_v60  ;;  %7927 = vmatpush3.xpose.msra.mxu1 %v11681_v28 }
0x1640   :  { %7894 = vmatprep.subr.mxu0 %v11684_v61  ;;  %7928 = vmatprep.subr.mxu1 %v11687_v51 }
0x1643   :  { %7895 = vmatpush3.xpose.msra.mxu0 %v11690_v49  ;;  %7929 = vmatpush3.xpose.msra.mxu1 %v11693_v48 }
0x1644   :  { %7896 = vmatprep.subr.mxu0 %v11696_v1  ;;  %7930 = vmatprep.subr.mxu1 %v11699_v44  ;;  %v12996_v44 = vld [vmem:[#allocation19_spill] sm:$0xff] }
0x1647   :  { %7897 = vmatpush3.xpose.msra.mxu0 %v11702_v59  ;;  %7931 = vmatpush3.xpose.msra.mxu1 %v11705_v57  ;;  %v4316_v59 = vadd.f32 %v12996_v44, %v12875_v56 }
0x1648   :  { %7898 = vmatprep.subr.mxu0 %v11708_v37  ;;  %7932 = vmatprep.subr.mxu1 %v11711_v33  ;;  %v12997_v37 = vld [vmem:[#allocation13_spill] sm:$0xff] }
0x1649   :  { %v4314_v33 = vadd.f32 %v12997_v37, %v11356_v17 }
0x164b   :  { %7899 = vmatpush3.xpose.msra.mxu0 %v11714_v0  ;;  %7933 = vmatpush3.xpose.msra.mxu1 %v12971_v22  ;;  %v5759_v22 = vld [vmem:[%s12029_s5 + $0x58] sm:$0xff] }
0x164c   :  { %7900 = vmatprep.subr.mxu0 %v12972_v58  ;;  %7934 = vmatprep.subr.mxu1 %v12973_v54  ;;  %v5758_v58 = vld [vmem:[%s12029_s5 + $0x50] sm:$0xff]  ;;  %v5757_v54 = vld [vmem:[%s12029_s5 + $0x48] sm:$0xff] }
0x164f   :  { %7901 = vmatpush3.xpose.msra.mxu0 %v12974_v53  ;;  %7935 = vmatpush3.xpose.msra.mxu1 %v12975_v38  ;;  %v5756_v53 = vld [vmem:[%s12029_s5 + $0x40] sm:$0xff]  ;;  %v5755_v38 = vld [vmem:[%s12029_s5 + $0x38] sm:$0xff] }
0x1650   :  { %7902 = vmatprep.subr.mxu0 %v12976_v43  ;;  %7936 = vmatprep.subr.mxu1 %v12977_v26  ;;  %v5754_v43 = vld [vmem:[%s12029_s5 + $0x30] sm:$0xff]  ;;  %v5753_v26 = vld [vmem:[%s12029_s5 + $0x28] sm:$0xff] }
0x1653   :  { %7903 = vmatpush3.xpose.msra.mxu0 %v12978_v7  ;;  %7937 = vmatpush3.xpose.msra.mxu1 %v12979_v39  ;;  %v5752_v7 = vld [vmem:[%s12029_s5 + $0x20] sm:$0xff]  ;;  %v5751_v39 = vld [vmem:[%s12029_s5 + $0x18] sm:$0xff] }
0x1654   :  { %7904 = vmatprep.subr.mxu0 %v12980_v12  ;;  %7938 = vmatprep.subr.mxu1 %v12981_v9  ;;  %v5750_v12 = vld [vmem:[%s12029_s5 + $0x10] sm:$0xff]  ;;  %v5749_v9 = vld [vmem:[%s12029_s5 + $0x8] sm:$0xff] }
0x1657   :  { %7905 = vmatpush3.xpose.msra.mxu0 %v12982_v47  ;;  %7939 = vmatpush3.xpose.msra.mxu1 %v12983_v6  ;;  %v5748_v47 = vld [vmem:[%s12029_s5] sm:$0xff]  ;;  %v12998_v6 = vld [vmem:[#allocation18_spill] sm:$0xff] }
0x1658   :  { %7906 = vmatprep.subr.mxu0 %v12984_v52  ;;  %7940 = vmatprep.subr.mxu1 %v12985_v32  ;;  %v4207_v52 = vadd.f32 %v12998_v6, %v12993_v15 }
0x165b   :  { %7907 = vmatpush3.xpose.msra.mxu0 %v12986_v62  ;;  %7941 = vmatpush3.xpose.msra.mxu1 %v12987_v50  ;;  %v12999_v62 = vld [vmem:[#allocation65_spill] sm:$0xff] }
0x165c   :  { %7908 = vmatprep.subr.mxu0 %v12988_v42  ;;  %7942 = vmatprep.subr.mxu1 %v12989_v25  ;;  %v4209_v50 = vadd.f32 %v12999_v62, %v11341_v2 }
0x165f   :  { %7909 = vmatpush3.xpose.msra.mxu0 %v12990_v13  ;;  %7943 = vmatpush3.xpose.msra.mxu1 %v12991_v24 }
0x1660   :  { %7963 = vmatprep.subr.mxu0 %v12992_v14 }
0x16e2   :  { %v5470_v21 = vpop.f32.mrf.mxu0  ;;  %v5541_v49 = vpop.f32.mrf.mxu1 }
0x16e3   :  { %v5546_v60 = vadd.f32 %v5470_v21, %v4201_v20  ;;  %v5548_v0 = vadd.f32 %v5541_v49, %v4314_v33  ;;  %v13000_v21 = vld [vmem:[#allocation64_spill] sm:$0xff] }
0x16e4   :  { %v5472_v28 = vpop.f32.mrf.mxu0  ;;  %v5543_v1 = vpop.f32.mrf.mxu1  ;;  %v4322_v3 = vadd.f32 %v13000_v21, %v12875_v56 }
0x16e5   :  { %v6019_v61 = vmul.f32 -1.442695, %v5546_v60  ;;  %v5547_v51 = vadd.f32 %v5472_v28, %v4203_v23  ;;  %v5549_v57 = vadd.f32 %v5543_v1, %v4316_v59  ;;  %v13001_v60 = vld [vmem:[#allocation23_spill] sm:$0xff] }
0x16e6   :  { %v4320_v15 = vadd.f32 %v13001_v60, %v11356_v17 }
0x16e7   :  { %8357 = vpow2.f32 %v6019_v61  ;;  %v6020_v48 = vmul.f32 -1.442695, %v5547_v51  ;;  %v6021_v10 = vmul.f32 -1.442695, %v5549_v57 }
0x16e9   :  { %8359 = vpow2.f32 %v6020_v48 }
0x16ea   :  { %8361 = vtanh.f32 %v5548_v0 }
0x16eb   :  { %8363 = vpow2.f32 %v6021_v10 }
0x16f4   :  { %v8358_v45 = vpop.eup %8357 }
0x16f5   :  { %v5553_v63 = vadd.f32 1.0, %v8358_v45 }
0x16f6   :  { %v8360_v40 = vpop.eup %8359 }
0x16f7   :  { %8365 = vrcp.f32 %v5553_v63  ;;  %v5559_v8 = vadd.f32 1.0, %v8360_v40  ;;  %v8362_v46 = vpop.eup %8361  ;;  %v6025_v63 = vld [vmem:[%s12030_s6] ss:$0 sm:$0xff] }
0x16f8   :  { %v8364_v36 = vpop.eup %8363 }
0x16f9   :  { %8367 = vrcp.f32 %v5559_v8  ;;  %v5566_v35 = vadd.f32 1.0, %v8364_v36 }
0x16fb   :  { %8369 = vrcp.f32 %v5566_v35 }
0x1704   :  { %v8366_v27 = vpop.eup %8365 }
0x1705   :  { %v5570_v31 = vmul.f32 %v8366_v27, %v8362_v46 }
0x1706   :  { %v8368_v11 = vpop.eup %8367 }
0x1707   :  { %v5569_v29 = vmul.f32 %v8368_v11, %v11867_v34  ;;  %v5762_v34 = vld [vmem:[%s12029_s5 + $0x70] sm:$0xff] }
0x1708   :  { %v8370_v18 = vpop.eup %8369 }
0x1709   :  { %v11942_v16 = vadd.f32 %v5570_v31, %v5569_v29 }
0x170b   :  { %8371 = vtanh.f32 %v11942_v16 }
0x1718   :  { %v8372_v19 = vpop.eup %8371 }
0x1719   :  { %v5573_v5 = vmul.f32 %v8372_v19, %v8370_v18 }
0x171b   :  { %7910 = vmatprep.mubr.f32.mxu0 %v5573_v5  ;;  %7944 = vmatprep.mubr.f32.mxu1 %v5573_v5 }
0x171c   :  { %7911 = vmatmul.mubr.f32.vlgmr.msra.gmra.mxu0 %v5573_v5  ;;  %7945 = vmatmul.mubr.f32.vlgmr.msra.gmra.mxu1 %v5573_v5 }
0x171d   :  { %7964 = vmatpush3.xpose.msra.mxu0 %v5763_v55  ;;  %7995 = vmatprep.mubr.msk.f32.mxu0 %vm8654_vm1, %v12992_v14 }
0x171e   :  { %7965 = vmatprep.subr.mxu0 %v12992_v14 }
0x1721   :  { %7966 = vmatpush3.xpose.msra.mxu0 %v5762_v34 }
0x1722   :  { %7967 = vmatprep.subr.mxu0 %v12992_v14 }
0x1725   :  { %7968 = vmatpush3.xpose.msra.mxu0 %v5761_v4 }
0x1726   :  { %7969 = vmatprep.subr.mxu0 %v12992_v14 }
0x1729   :  { %7970 = vmatpush3.xpose.msra.mxu0 %v5760_v30 }
0x172a   :  { %7971 = vmatprep.subr.mxu0 %v12992_v14 }
0x172d   :  { %7972 = vmatpush3.xpose.msra.mxu0 %v5759_v22 }
0x172e   :  { %7973 = vmatprep.subr.mxu0 %v12992_v14 }
0x1731   :  { %7974 = vmatpush3.xpose.msra.mxu0 %v5758_v58 }
0x1732   :  { %7975 = vmatprep.subr.mxu0 %v12992_v14 }
0x1735   :  { %7976 = vmatpush3.xpose.msra.mxu0 %v5757_v54 }
0x1736   :  { %7977 = vmatprep.subr.mxu0 %v12992_v14 }
0x1739   :  { %7978 = vmatpush3.xpose.msra.mxu0 %v5756_v53 }
0x173a   :  { %7979 = vmatprep.subr.mxu0 %v12992_v14 }
0x173d   :  { %7980 = vmatpush3.xpose.msra.mxu0 %v5755_v38 }
0x173e   :  { %7981 = vmatprep.subr.mxu0 %v12992_v14 }
0x1741   :  { %7982 = vmatpush3.xpose.msra.mxu0 %v5754_v43 }
0x1742   :  { %7983 = vmatprep.subr.mxu0 %v12992_v14 }
0x1745   :  { %7984 = vmatpush3.xpose.msra.mxu0 %v5753_v26 }
0x1746   :  { %7985 = vmatprep.subr.mxu0 %v12992_v14 }
0x1749   :  { %7986 = vmatpush3.xpose.msra.mxu0 %v5752_v7 }
0x174a   :  { %7987 = vmatprep.subr.mxu0 %v12992_v14 }
0x174d   :  { %7988 = vmatpush3.xpose.msra.mxu0 %v5751_v39 }
0x174e   :  { %7989 = vmatprep.subr.mxu0 %v12992_v14 }
0x1751   :  { %7990 = vmatpush3.xpose.msra.mxu0 %v5750_v12 }
0x1752   :  { %7991 = vmatprep.subr.mxu0 %v12992_v14 }
0x1755   :  { %7992 = vmatpush3.xpose.msra.mxu0 %v5749_v9 }
0x1756   :  { %7993 = vmatprep.subr.mxu0 %v12992_v14 }
0x1759   :  { %7994 = vmatpush3.xpose.msra.mxu0 %v5748_v47 }
0x17dc   :  { %v5644_v32 = vpop.f32.mrf.mxu0  ;;  %v5715_v41 = vpop.f32.mrf.mxu1 }
0x17dd   :  { %v5720_v42 = vadd.f32 %v5644_v32, %v4207_v52  ;;  %v5722_v28 = vadd.f32 %v5715_v41, %v4320_v15 }
0x17de   :  { %v5646_v25 = vpop.f32.mrf.mxu0  ;;  %v5717_v14 = vpop.f32.mrf.mxu1 }
0x17df   :  { %v6022_v13 = vmul.f32 -1.442695, %v5720_v42  ;;  %v5721_v24 = vadd.f32 %v5646_v25, %v4209_v50  ;;  %v5723_v23 = vadd.f32 %v5717_v14, %v4322_v3 }
0x17e1   :  { %8373 = vpow2.f32 %v6022_v13  ;;  %v6023_v20 = vmul.f32 -1.442695, %v5721_v24  ;;  %v6024_v61 = vmul.f32 -1.442695, %v5723_v23 }
0x17e3   :  { %8375 = vpow2.f32 %v6023_v20 }
0x17e4   :  { %8377 = vtanh.f32 %v5722_v28 }
0x17e5   :  { %8379 = vpow2.f32 %v6024_v61 }
0x17ee   :  { %v8374_v51 = vpop.eup %8373 }
0x17ef   :  { %v5727_v2 = vadd.f32 1.0, %v8374_v51 }
0x17f0   :  { %v8376_v49 = vpop.eup %8375 }
0x17f1   :  { %8381 = vrcp.f32 %v5727_v2  ;;  %v5733_v48 = vadd.f32 1.0, %v8376_v49  ;;  %v8378_v1 = vpop.eup %8377 }
0x17f2   :  { %v8380_v44 = vpop.eup %8379 }
0x17f3   :  { %8383 = vrcp.f32 %v5733_v48  ;;  %v5740_v56 = vadd.f32 1.0, %v8380_v44 }
0x17f5   :  { %8385 = vrcp.f32 %v5740_v56 }
0x17fe   :  { %v8382_v59 = vpop.eup %8381 }
0x17ff   :  { %v5744_v57 = vmul.f32 %v8382_v59, %v8378_v1 }
0x1800   :  { %v8384_v37 = vpop.eup %8383 }
0x1801   :  { %v5743_v33 = vmul.f32 %v8384_v37, %v11942_v16 }
0x1802   :  { %v8386_v17 = vpop.eup %8385 }
0x1803   :  { %v5745_v0 = vadd.f32 %v5744_v57, %v5743_v33 }
0x1805   :  { %8387 = vtanh.f32 %v5745_v0 }
0x1812   :  { %v8388_v10 = vpop.eup %8387 }
0x1813   :  { %v5747_v45 = vmul.f32 %v8388_v10, %v8386_v17 }
0x1815   :  { %7996 = vmatmul.mubr.f32.vlgmr.msra.gmra.mxu0 %v5747_v45 }
0x18d5   :  { %v5837_v40 = vpop.f32.mrf.mxu0 }
0x18d6   :  { %v5838_v8 = vadd.f32 %v6025_v63, %v5837_v40 }
0x18d7   :  { %v7997_v46 = vpop.f32.mrf.mxu0 }
0x18d8   :  { %v5841_v36 = vmul.f32 %v5838_v8, %v5838_v8 }
0x18da   :  { %5842 = vadd.xlane.f32.xlu0 %v5841_v36 }
0x1963   :  { %v5843_v27 = vpop.xlane.xlu0 %5842 }
0x1964   :  { %v5844_v31 = vadd.f32 1e-12, %v5843_v27 }
0x1966   :  { %8389 = vrsqrt.f32 %v5844_v31 }
0x1973   :  { %v8390_v11 = vpop.eup %8389 }
0x1974   :  { %v5846_v35 = vmul.f32 %v8390_v11, %v5838_v8 }
0x1976   :  { %5847 = vst [vmem:[#allocation9] sm:$0xff] %v5846_v35 }
0x1977   :  { %8634 = shalt.err (!%p8631_p0)
}
0x1978   :  { %5857 = dma.vmem_to_hbm [thread:$0]  %s5855_s15, 128, %s12031_s7, [#allocation6]  }
0x1979   :  { %8647 = dma.done.wait [#allocation6], 128  }
0x197a   :  { %8648 = vsyncadd [#allocation6], 4294967168 }
0x197b   :  { %5861 = vsyncpa [#allocation5], 1 }
0x197c   :  { %5862 = vsyncpa [#allocation8], 1 }
0x197d   :  { %5863 = vsyncpa [#allocation6], 1 }

</bundles_post_ra>
